<compile_context>
chip_gen: v7x
topology: tpu7x:2x2x1
jax: 0.10.0
libtpu: 0.0.40
codegen_flags: <defaults>
</compile_context>

<pallas_src>
import functools

import jax
import jax.numpy as jnp
from jax.experimental import pallas as pl
from jax.experimental.pallas import tpu as pltpu


# ------------- fused 3x3 conv + bias + ReLU (+ 2x2 max-pool), HWNC ----------


def _conv3x3_hwnc_kernel(x_ref, w_ref, b_ref, o_ref, *, n_out_cols, pool):
    # x_ref: (H, W, TB, Cin) bf16   ; w_ref: (3, 3, Cin, Cout) bf16
    # b_ref: (1, Cout) f32          ; o_ref: (1, n_out_cols, TB, Cout)
    p = pl.program_id(1)                     # output row handled by this step
    tb = x_ref.shape[2]
    cin = x_ref.shape[3]
    cout = w_ref.shape[3]
    stride = 2 if pool else 1
    n_conv_rows = 2 if pool else 1           # conv rows feeding one output row
    ncols = stride * n_out_cols              # unpooled conv columns needed

    accs = []
    for dr in range(n_conv_rows):            # static unroll (<= 2)
        acc = None
        for i in range(3):
            row = stride * p + dr + i        # dynamic leading-dim index
            for j in range(3):               # 9 taps -> 9 big-M matmuls
                xs = x_ref[row, pl.ds(j, ncols)]         # (ncols, TB, Cin)
                xs = xs.reshape(ncols * tb, cin)         # leading-dim merge
                c = jnp.dot(xs, w_ref[i, j],
                            preferred_element_type=jnp.float32)
                acc = c if acc is None else acc + c
        accs.append(acc)                      # (ncols*TB, Cout) f32

    if pool:
        # 2x2 max pool on the f32 accumulators (floor mode: extra conv row/col
        # was never computed, matching PyTorch MaxPool2d).
        m = jnp.maximum(accs[0], accs[1]).reshape(n_out_cols, 2, tb, cout)
        m = jnp.maximum(m[:, 0], m[:, 1])     # (n_out_cols, TB, Cout)
    else:
        m = accs[0].reshape(n_out_cols, tb, cout)

    bias = b_ref[...]                          # (1, Cout) f32, single epilogue add
    o_ref[0] = jnp.maximum(m + bias, 0.0).astype(o_ref.dtype)


def conv3x3_hwnc(x_hwnc, w_hwio, b, *, pool, tb, out_dtype=jnp.bfloat16):
    """VALID 3x3 conv + bias + ReLU (+ fused floor-mode 2x2 max-pool), HWNC."""
    H, W, Bp, Cin = x_hwnc.shape
    KH, KW, Cin2, Cout = w_hwio.shape
    assert (KH, KW) == (3, 3) and Cin == Cin2 and Bp % tb == 0
    ch, cw = H - 2, W - 2                      # conv output spatial size
    oh, ow = (ch // 2, cw // 2) if pool else (ch, cw)
    nb = Bp // tb
    kernel = functools.partial(_conv3x3_hwnc_kernel, n_out_cols=ow, pool=pool)
    flops = 2 * oh * ow * (4 if pool else 1) * 9 * Bp * Cin * Cout
    return pl.pallas_call(
        kernel,
        out_shape=jax.ShapeDtypeStruct((oh, ow, Bp, Cout), out_dtype),
        grid=(nb, oh),
        in_specs=[
            # Full spatial block, constant across the row axis -> stays VMEM
            # resident; only re-DMAed when the batch tile changes.
            pl.BlockSpec((H, W, tb, Cin), lambda b_, p_: (0, 0, b_, 0)),
            pl.BlockSpec((KH, KW, Cin, Cout), lambda b_, p_: (0, 0, 0, 0)),
            pl.BlockSpec((1, Cout), lambda b_, p_: (0, 0)),
        ],
        out_specs=pl.BlockSpec((1, ow, tb, Cout), lambda b_, p_: (p_, 0, b_, 0)),
        compiler_params=pltpu.CompilerParams(
            dimension_semantics=("parallel", "parallel"),
            vmem_limit_bytes=32 * 1024 * 1024,   # safe on v5e/v6e/v7x
        ),
        cost_estimate=pl.CostEstimate(
            flops=flops,
            transcendentals=0,
            bytes_accessed=int(2 * H * W * Bp * Cin
                               + 2 * KH * KW * Cin * Cout
                               + jnp.dtype(out_dtype).itemsize * oh * ow * Bp * Cout),
        ),
    )(x_hwnc.astype(jnp.bfloat16),
      w_hwio.astype(jnp.bfloat16),
      b.astype(jnp.float32).reshape(1, Cout))


# -------------------------- FC over HWNC activations ------------------------


def _fc_hwnc_kernel(x_ref, w_ref, b_ref, o_ref, *, h, w):
    acc = None
    for i in range(h):
        for j in range(w):
            c = jnp.dot(x_ref[i, j].astype(jnp.bfloat16), w_ref[i, j],
                        preferred_element_type=jnp.float32)
            acc = c if acc is None else acc + c
    o_ref[...] = (acc + b_ref[...]).astype(o_ref.dtype)


def fc_hwnc(x_hwnc, w_hwcn, b, *, tb):
    # TODO(synk): could be fused into conv3's epilogue (low priority per review).
    H, W, Bp, C = x_hwnc.shape
    H2, W2, C2, N = w_hwcn.shape
    assert (H, W, C) == (H2, W2, C2) and Bp % tb == 0
    nb = Bp // tb
    kernel = functools.partial(_fc_hwnc_kernel, h=H, w=W)
    return pl.pallas_call(
        kernel,
        out_shape=jax.ShapeDtypeStruct((Bp, N), jnp.float32),
        grid=(nb,),
        in_specs=[
            pl.BlockSpec((H, W, tb, C), lambda b_: (0, 0, b_, 0)),
            pl.BlockSpec((H, W, C, N), lambda b_: (0, 0, 0, 0)),
            pl.BlockSpec((1, N), lambda b_: (0, 0)),
        ],
        out_specs=pl.BlockSpec((tb, N), lambda b_: (b_, 0)),
        compiler_params=pltpu.CompilerParams(
            dimension_semantics=("parallel",),
            vmem_limit_bytes=32 * 1024 * 1024,
        ),
    )(x_hwnc, w_hwcn.astype(jnp.bfloat16),
      b.astype(jnp.float32).reshape(1, N))


# --------------------------------- Model ------------------------------------


def init_params(key, num_classes=10):
    ks = jax.random.split(key, 8)

    def conv_init(kw_, kb_, kh, kwid, cin, cout):
        bound = 1.0 / jnp.sqrt(cin * kh * kwid)
        w = jax.random.uniform(kw_, (kh, kwid, cin, cout), jnp.float32, -bound, bound)
        b = jax.random.uniform(kb_, (cout,), jnp.float32, -bound, bound)
        return w, b

    w1, b1 = conv_init(ks[0], ks[1], 3, 3, 3, 128)
    w2, b2 = conv_init(ks[2], ks[3], 3, 3, 128, 128)
    w3, b3 = conv_init(ks[4], ks[5], 3, 3, 128, 128)
    fan_in = 128 * 4 * 4
    bound = 1.0 / jnp.sqrt(fan_in)
    # wfc rows follow PyTorch's NCHW flatten order (C, H, W).
    wfc = jax.random.uniform(ks[6], (fan_in, num_classes), jnp.float32, -bound, bound)
    bfc = jax.random.uniform(ks[7], (num_classes,), jnp.float32, -bound, bound)
    return dict(w1=w1, b1=b1, w2=w2, b2=b2, w3=w3, b3=b3, wfc=wfc, bfc=bfc)


def _batch_cfg(B):
    """Pad batch to a multiple of 16; cap the per-kernel batch tile at 128
    (v7x has only 64 MiB VMEM; TB=128 keeps the conv2 resident block small)."""
    if B <= 128:
        bp = max(16, ((B + 15) // 16) * 16)
        return bp, bp
    tb = 128
    return ((B + tb - 1) // tb) * tb, tb


@jax.jit
def cnncifar_forward(x_nchw, params):
    B = x_nchw.shape[0]
    num_classes = params["bfc"].shape[0]
    Bp, TB = _batch_cfg(B)

    # NCHW -> HWNC (batch on sublanes, channels on lanes), bf16 for the MXU.
    x = jnp.transpose(x_nchw, (2, 3, 0, 1)).astype(jnp.bfloat16)   # (32,32,B,3)
    if Bp != B:
        x = jnp.pad(x, ((0, 0), (0, 0), (0, Bp - B), (0, 0)))

    # conv1 + ReLU + pool fused (no im2col, no standalone pool launch).
    y1 = conv3x3_hwnc(x, params["w1"], params["b1"], pool=True, tb=TB,
                      out_dtype=jnp.bfloat16)                       # (15,15,Bp,128)
    # conv2 + ReLU + pool fused.
    y2 = conv3x3_hwnc(y1, params["w2"], params["b2"], pool=True, tb=TB,
                      out_dtype=jnp.bfloat16)                       # (6,6,Bp,128)
    # conv3 + ReLU (f32 output: it is the returned feature).
    y3 = conv3x3_hwnc(y2, params["w3"], params["b3"], pool=False, tb=TB,
                      out_dtype=jnp.float32)                        # (4,4,Bp,128)

    # FC: fold the PyTorch (C,H,W)-flatten permutation into the weight and pad
    # the output dim to a lane-dense multiple of 128.
    h3, w3_, _, C3 = y3.shape
    wfc = params["wfc"].reshape(C3, h3, w3_, num_classes).transpose(1, 2, 0, 3)
    Npad = pl.cdiv(num_classes, 128) * 128
    wfc_p = jnp.pad(wfc, ((0, 0), (0, 0), (0, 0), (0, Npad - num_classes)))
    bfc_p = jnp.pad(params["bfc"], (0, Npad - num_classes))
    logits = fc_hwnc(y3, wfc_p, bfc_p, tb=TB)[:B, :num_classes]

    # feature in PyTorch flatten order (C, H, W).
    feature = jnp.transpose(y3, (2, 3, 0, 1)).reshape(Bp, -1)[:B]
    return logits, feature


# ---------------------- Plain JAX reference (bf16-matched) -------------------


@jax.jit
def _reference_forward(x_nchw, params):
    bf = jnp.bfloat16

    def conv(x, w_hwio, b):
        w_oihw = jnp.transpose(w_hwio, (3, 2, 0, 1)).astype(bf)
        dn = jax.lax.conv_dimension_numbers(x.shape, w_oihw.shape,
                                            ("NCHW", "OIHW", "NCHW"))
        y = jax.lax.conv_general_dilated(
            x.astype(bf), w_oihw, (1, 1), "VALID", dimension_numbers=dn,
            preferred_element_type=jnp.float32)
        return jax.nn.relu(y + b[None, :, None, None])

    def pool(x):
        return jax.lax.reduce_window(
            x, -jnp.inf, jax.lax.max, (1, 1, 2, 2), (1, 1, 2, 2), "VALID")

    x1 = pool(conv(x_nchw, params["w1"], params["b1"]))
    x2 = pool(conv(x1, params["w2"], params["b2"]))
    x3 = conv(x2, params["w3"], params["b3"])
    feat = x3.reshape(x3.shape[0], -1)
    logits = jnp.dot(feat.astype(bf), params["wfc"].astype(bf),
                     preferred_element_type=jnp.float32) + params["bfc"]
    return logits, feat


# ---------------------------------- Main ------------------------------------


if __name__ == "__main__":
    key = jax.random.PRNGKey(0)
    k_x, k_p = jax.random.split(key)
    # CIFAR-shaped input: the FC layer requires 32x32 spatial input.
    x = jax.random.normal(k_x, (2, 3, 32, 32), dtype=jnp.float32)
    params = init_params(k_p, num_classes=10)

    logits, feature = cnncifar_forward(x, params)
    jax.block_until_ready((logits, feature))

    ref_logits, ref_feat = _reference_forward(x, params)
    assert logits.shape == (2, 10) and feature.shape == (2, 128 * 4 * 4)
    assert jnp.allclose(logits, ref_logits, atol=2e-2, rtol=2e-2), (
        float(jnp.max(jnp.abs(logits - ref_logits))))
    assert jnp.allclose(feature, ref_feat, atol=2e-2, rtol=2e-2), (
        float(jnp.max(jnp.abs(feature - ref_feat))))

    print("KERNEL_OK")
</pallas_src>

<mosaic_0001>
module attributes {stable_mosaic.version = 11 : i64} {
  func.func @_conv3x3_hwnc_kernel(%arg0: i32, %arg1: i32, %arg2: memref<32x32x16x3xbf16, #tpu.memory_space<vmem>>, %arg3: memref<3x3x3x128xbf16, #tpu.memory_space<vmem>>, %arg4: memref<1x128xf32, #tpu.memory_space<vmem>>, %arg5: memref<1x15x16x128xbf16, #tpu.memory_space<vmem>>) attributes {dimension_semantics = [#tpu.dimension_semantics<parallel>, #tpu.dimension_semantics<parallel>], iteration_bounds = array<i64: 1, 15>, scalar_prefetch = 0 : i64, scratch_operands = 0 : i64, tpu.core_type = #tpu.core_type<tc>, window_params = [{transform_indices = @transform_0, window_bounds = array<i64: 32, 32, 16, 3>}, {pipeline_mode = #tpu.pipeline_mode<synchronous>, transform_indices = @transform_1, window_bounds = array<i64: 3, 3, 3, 128>}, {pipeline_mode = #tpu.pipeline_mode<synchronous>, transform_indices = @transform_2, window_bounds = array<i64: 1, 128>}, {transform_indices = @transform_3, window_bounds = array<i64: 1, 15, 16, 128>}]} {
    %c2_i32 = arith.constant 2 : i32
    %0 = arith.muli %c2_i32, %arg1 : i32
    %c0_i32 = arith.constant 0 : i32
    %1 = arith.addi %0, %c0_i32 : i32
    %c0_i32_0 = arith.constant 0 : i32
    %2 = arith.addi %1, %c0_i32_0 : i32
    %3 = arith.index_cast %2 : i32 to index
    %c0 = arith.constant 0 : index
    %c0_1 = arith.constant 0 : index
    %c0_2 = arith.constant 0 : index
    %4 = vector.load %arg2[%3, %c0, %c0_1, %c0_2] : memref<32x32x16x3xbf16, #tpu.memory_space<vmem>>, vector<1x30x16x3xbf16>
    %5 = vector.shape_cast %4 : vector<1x30x16x3xbf16> to vector<30x16x3xbf16>
    %6 = vector.shape_cast %5 : vector<30x16x3xbf16> to vector<480x3xbf16>
    %c0_3 = arith.constant 0 : index
    %c0_4 = arith.constant 0 : index
    %c0_5 = arith.constant 0 : index
    %c0_6 = arith.constant 0 : index
    %7 = vector.load %arg3[%c0_3, %c0_4, %c0_5, %c0_6] : memref<3x3x3x128xbf16, #tpu.memory_space<vmem>>, vector<1x1x3x128xbf16>
    %8 = vector.shape_cast %7 : vector<1x1x3x128xbf16> to vector<3x128xbf16>
    %cst = arith.constant dense<0.000000e+00> : vector<480x128xf32>
    %9 = tpu.matmul %6, %8, %cst {dimension_numbers = #tpu.dot_dimension_numbers<[1], [0], [0], [1], [0, 0, 1, 1], [], []>} : vector<480x3xbf16>, vector<3x128xbf16>, vector<480x128xf32> -> vector<480x128xf32>
    %10 = arith.index_cast %2 : i32 to index
    %c1 = arith.constant 1 : index
    %c0_7 = arith.constant 0 : index
    %c0_8 = arith.constant 0 : index
    %11 = vector.load %arg2[%10, %c1, %c0_7, %c0_8] : memref<32x32x16x3xbf16, #tpu.memory_space<vmem>>, vector<1x30x16x3xbf16>
    %12 = vector.shape_cast %11 : vector<1x30x16x3xbf16> to vector<30x16x3xbf16>
    %13 = vector.shape_cast %12 : vector<30x16x3xbf16> to vector<480x3xbf16>
    %c0_9 = arith.constant 0 : index
    %c1_10 = arith.constant 1 : index
    %c0_11 = arith.constant 0 : index
    %c0_12 = arith.constant 0 : index
    %14 = vector.load %arg3[%c0_9, %c1_10, %c0_11, %c0_12] : memref<3x3x3x128xbf16, #tpu.memory_space<vmem>>, vector<1x1x3x128xbf16>
    %15 = vector.shape_cast %14 : vector<1x1x3x128xbf16> to vector<3x128xbf16>
    %cst_13 = arith.constant dense<0.000000e+00> : vector<480x128xf32>
    %16 = tpu.matmul %13, %15, %cst_13 {dimension_numbers = #tpu.dot_dimension_numbers<[1], [0], [0], [1], [0, 0, 1, 1], [], []>} : vector<480x3xbf16>, vector<3x128xbf16>, vector<480x128xf32> -> vector<480x128xf32>
    %17 = arith.addf %9, %16 : vector<480x128xf32>
    %18 = arith.index_cast %2 : i32 to index
    %c2 = arith.constant 2 : index
    %c0_14 = arith.constant 0 : index
    %c0_15 = arith.constant 0 : index
    %19 = vector.load %arg2[%18, %c2, %c0_14, %c0_15] : memref<32x32x16x3xbf16, #tpu.memory_space<vmem>>, vector<1x30x16x3xbf16>
    %20 = vector.shape_cast %19 : vector<1x30x16x3xbf16> to vector<30x16x3xbf16>
    %21 = vector.shape_cast %20 : vector<30x16x3xbf16> to vector<480x3xbf16>
    %c0_16 = arith.constant 0 : index
    %c2_17 = arith.constant 2 : index
    %c0_18 = arith.constant 0 : index
    %c0_19 = arith.constant 0 : index
    %22 = vector.load %arg3[%c0_16, %c2_17, %c0_18, %c0_19] : memref<3x3x3x128xbf16, #tpu.memory_space<vmem>>, vector<1x1x3x128xbf16>
    %23 = vector.shape_cast %22 : vector<1x1x3x128xbf16> to vector<3x128xbf16>
    %cst_20 = arith.constant dense<0.000000e+00> : vector<480x128xf32>
    %24 = tpu.matmul %21, %23, %cst_20 {dimension_numbers = #tpu.dot_dimension_numbers<[1], [0], [0], [1], [0, 0, 1, 1], [], []>} : vector<480x3xbf16>, vector<3x128xbf16>, vector<480x128xf32> -> vector<480x128xf32>
    %25 = arith.addf %17, %24 : vector<480x128xf32>
    %c2_i32_21 = arith.constant 2 : i32
    %26 = arith.muli %c2_i32_21, %arg1 : i32
    %c0_i32_22 = arith.constant 0 : i32
    %27 = arith.addi %26, %c0_i32_22 : i32
    %c1_i32 = arith.constant 1 : i32
    %28 = arith.addi %27, %c1_i32 : i32
    %29 = arith.index_cast %28 : i32 to index
    %c0_23 = arith.constant 0 : index
    %c0_24 = arith.constant 0 : index
    %c0_25 = arith.constant 0 : index
    %30 = vector.load %arg2[%29, %c0_23, %c0_24, %c0_25] : memref<32x32x16x3xbf16, #tpu.memory_space<vmem>>, vector<1x30x16x3xbf16>
    %31 = vector.shape_cast %30 : vector<1x30x16x3xbf16> to vector<30x16x3xbf16>
    %32 = vector.shape_cast %31 : vector<30x16x3xbf16> to vector<480x3xbf16>
    %c1_26 = arith.constant 1 : index
    %c0_27 = arith.constant 0 : index
    %c0_28 = arith.constant 0 : index
    %c0_29 = arith.constant 0 : index
    %33 = vector.load %arg3[%c1_26, %c0_27, %c0_28, %c0_29] : memref<3x3x3x128xbf16, #tpu.memory_space<vmem>>, vector<1x1x3x128xbf16>
    %34 = vector.shape_cast %33 : vector<1x1x3x128xbf16> to vector<3x128xbf16>
    %cst_30 = arith.constant dense<0.000000e+00> : vector<480x128xf32>
    %35 = tpu.matmul %32, %34, %cst_30 {dimension_numbers = #tpu.dot_dimension_numbers<[1], [0], [0], [1], [0, 0, 1, 1], [], []>} : vector<480x3xbf16>, vector<3x128xbf16>, vector<480x128xf32> -> vector<480x128xf32>
    %36 = arith.addf %25, %35 : vector<480x128xf32>
    %37 = arith.index_cast %28 : i32 to index
    %c1_31 = arith.constant 1 : index
    %c0_32 = arith.constant 0 : index
    %c0_33 = arith.constant 0 : index
    %38 = vector.load %arg2[%37, %c1_31, %c0_32, %c0_33] : memref<32x32x16x3xbf16, #tpu.memory_space<vmem>>, vector<1x30x16x3xbf16>
    %39 = vector.shape_cast %38 : vector<1x30x16x3xbf16> to vector<30x16x3xbf16>
    %40 = vector.shape_cast %39 : vector<30x16x3xbf16> to vector<480x3xbf16>
    %c1_34 = arith.constant 1 : index
    %c1_35 = arith.constant 1 : index
    %c0_36 = arith.constant 0 : index
    %c0_37 = arith.constant 0 : index
    %41 = vector.load %arg3[%c1_34, %c1_35, %c0_36, %c0_37] : memref<3x3x3x128xbf16, #tpu.memory_space<vmem>>, vector<1x1x3x128xbf16>
    %42 = vector.shape_cast %41 : vector<1x1x3x128xbf16> to vector<3x128xbf16>
    %cst_38 = arith.constant dense<0.000000e+00> : vector<480x128xf32>
    %43 = tpu.matmul %40, %42, %cst_38 {dimension_numbers = #tpu.dot_dimension_numbers<[1], [0], [0], [1], [0, 0, 1, 1], [], []>} : vector<480x3xbf16>, vector<3x128xbf16>, vector<480x128xf32> -> vector<480x128xf32>
    %44 = arith.addf %36, %43 : vector<480x128xf32>
    %45 = arith.index_cast %28 : i32 to index
    %c2_39 = arith.constant 2 : index
    %c0_40 = arith.constant 0 : index
    %c0_41 = arith.constant 0 : index
    %46 = vector.load %arg2[%45, %c2_39, %c0_40, %c0_41] : memref<32x32x16x3xbf16, #tpu.memory_space<vmem>>, vector<1x30x16x3xbf16>
    %47 = vector.shape_cast %46 : vector<1x30x16x3xbf16> to vector<30x16x3xbf16>
    %48 = vector.shape_cast %47 : vector<30x16x3xbf16> to vector<480x3xbf16>
    %c1_42 = arith.constant 1 : index
    %c2_43 = arith.constant 2 : index
    %c0_44 = arith.constant 0 : index
    %c0_45 = arith.constant 0 : index
    %49 = vector.load %arg3[%c1_42, %c2_43, %c0_44, %c0_45] : memref<3x3x3x128xbf16, #tpu.memory_space<vmem>>, vector<1x1x3x128xbf16>
    %50 = vector.shape_cast %49 : vector<1x1x3x128xbf16> to vector<3x128xbf16>
    %cst_46 = arith.constant dense<0.000000e+00> : vector<480x128xf32>
    %51 = tpu.matmul %48, %50, %cst_46 {dimension_numbers = #tpu.dot_dimension_numbers<[1], [0], [0], [1], [0, 0, 1, 1], [], []>} : vector<480x3xbf16>, vector<3x128xbf16>, vector<480x128xf32> -> vector<480x128xf32>
    %52 = arith.addf %44, %51 : vector<480x128xf32>
    %c2_i32_47 = arith.constant 2 : i32
    %53 = arith.muli %c2_i32_47, %arg1 : i32
    %c0_i32_48 = arith.constant 0 : i32
    %54 = arith.addi %53, %c0_i32_48 : i32
    %c2_i32_49 = arith.constant 2 : i32
    %55 = arith.addi %54, %c2_i32_49 : i32
    %56 = arith.index_cast %55 : i32 to index
    %c0_50 = arith.constant 0 : index
    %c0_51 = arith.constant 0 : index
    %c0_52 = arith.constant 0 : index
    %57 = vector.load %arg2[%56, %c0_50, %c0_51, %c0_52] : memref<32x32x16x3xbf16, #tpu.memory_space<vmem>>, vector<1x30x16x3xbf16>
    %58 = vector.shape_cast %57 : vector<1x30x16x3xbf16> to vector<30x16x3xbf16>
    %59 = vector.shape_cast %58 : vector<30x16x3xbf16> to vector<480x3xbf16>
    %c2_53 = arith.constant 2 : index
    %c0_54 = arith.constant 0 : index
    %c0_55 = arith.constant 0 : index
    %c0_56 = arith.constant 0 : index
    %60 = vector.load %arg3[%c2_53, %c0_54, %c0_55, %c0_56] : memref<3x3x3x128xbf16, #tpu.memory_space<vmem>>, vector<1x1x3x128xbf16>
    %61 = vector.shape_cast %60 : vector<1x1x3x128xbf16> to vector<3x128xbf16>
    %cst_57 = arith.constant dense<0.000000e+00> : vector<480x128xf32>
    %62 = tpu.matmul %59, %61, %cst_57 {dimension_numbers = #tpu.dot_dimension_numbers<[1], [0], [0], [1], [0, 0, 1, 1], [], []>} : vector<480x3xbf16>, vector<3x128xbf16>, vector<480x128xf32> -> vector<480x128xf32>
    %63 = arith.addf %52, %62 : vector<480x128xf32>
    %64 = arith.index_cast %55 : i32 to index
    %c1_58 = arith.constant 1 : index
    %c0_59 = arith.constant 0 : index
    %c0_60 = arith.constant 0 : index
    %65 = vector.load %arg2[%64, %c1_58, %c0_59, %c0_60] : memref<32x32x16x3xbf16, #tpu.memory_space<vmem>>, vector<1x30x16x3xbf16>
    %66 = vector.shape_cast %65 : vector<1x30x16x3xbf16> to vector<30x16x3xbf16>
    %67 = vector.shape_cast %66 : vector<30x16x3xbf16> to vector<480x3xbf16>
    %c2_61 = arith.constant 2 : index
    %c1_62 = arith.constant 1 : index
    %c0_63 = arith.constant 0 : index
    %c0_64 = arith.constant 0 : index
    %68 = vector.load %arg3[%c2_61, %c1_62, %c0_63, %c0_64] : memref<3x3x3x128xbf16, #tpu.memory_space<vmem>>, vector<1x1x3x128xbf16>
    %69 = vector.shape_cast %68 : vector<1x1x3x128xbf16> to vector<3x128xbf16>
    %cst_65 = arith.constant dense<0.000000e+00> : vector<480x128xf32>
    %70 = tpu.matmul %67, %69, %cst_65 {dimension_numbers = #tpu.dot_dimension_numbers<[1], [0], [0], [1], [0, 0, 1, 1], [], []>} : vector<480x3xbf16>, vector<3x128xbf16>, vector<480x128xf32> -> vector<480x128xf32>
    %71 = arith.addf %63, %70 : vector<480x128xf32>
    %72 = arith.index_cast %55 : i32 to index
    %c2_66 = arith.constant 2 : index
    %c0_67 = arith.constant 0 : index
    %c0_68 = arith.constant 0 : index
    %73 = vector.load %arg2[%72, %c2_66, %c0_67, %c0_68] : memref<32x32x16x3xbf16, #tpu.memory_space<vmem>>, vector<1x30x16x3xbf16>
    %74 = vector.shape_cast %73 : vector<1x30x16x3xbf16> to vector<30x16x3xbf16>
    %75 = vector.shape_cast %74 : vector<30x16x3xbf16> to vector<480x3xbf16>
    %c2_69 = arith.constant 2 : index
    %c2_70 = arith.constant 2 : index
    %c0_71 = arith.constant 0 : index
    %c0_72 = arith.constant 0 : index
    %76 = vector.load %arg3[%c2_69, %c2_70, %c0_71, %c0_72] : memref<3x3x3x128xbf16, #tpu.memory_space<vmem>>, vector<1x1x3x128xbf16>
    %77 = vector.shape_cast %76 : vector<1x1x3x128xbf16> to vector<3x128xbf16>
    %cst_73 = arith.constant dense<0.000000e+00> : vector<480x128xf32>
    %78 = tpu.matmul %75, %77, %cst_73 {dimension_numbers = #tpu.dot_dimension_numbers<[1], [0], [0], [1], [0, 0, 1, 1], [], []>} : vector<480x3xbf16>, vector<3x128xbf16>, vector<480x128xf32> -> vector<480x128xf32>
    %79 = arith.addf %71, %78 : vector<480x128xf32>
    %c2_i32_74 = arith.constant 2 : i32
    %80 = arith.muli %c2_i32_74, %arg1 : i32
    %c1_i32_75 = arith.constant 1 : i32
    %81 = arith.addi %80, %c1_i32_75 : i32
    %c0_i32_76 = arith.constant 0 : i32
    %82 = arith.addi %81, %c0_i32_76 : i32
    %83 = arith.index_cast %82 : i32 to index
    %c0_77 = arith.constant 0 : index
    %c0_78 = arith.constant 0 : index
    %c0_79 = arith.constant 0 : index
    %84 = vector.load %arg2[%83, %c0_77, %c0_78, %c0_79] : memref<32x32x16x3xbf16, #tpu.memory_space<vmem>>, vector<1x30x16x3xbf16>
    %85 = vector.shape_cast %84 : vector<1x30x16x3xbf16> to vector<30x16x3xbf16>
    %86 = vector.shape_cast %85 : vector<30x16x3xbf16> to vector<480x3xbf16>
    %c0_80 = arith.constant 0 : index
    %c0_81 = arith.constant 0 : index
    %c0_82 = arith.constant 0 : index
    %c0_83 = arith.constant 0 : index
    %87 = vector.load %arg3[%c0_80, %c0_81, %c0_82, %c0_83] : memref<3x3x3x128xbf16, #tpu.memory_space<vmem>>, vector<1x1x3x128xbf16>
    %88 = vector.shape_cast %87 : vector<1x1x3x128xbf16> to vector<3x128xbf16>
    %cst_84 = arith.constant dense<0.000000e+00> : vector<480x128xf32>
    %89 = tpu.matmul %86, %88, %cst_84 {dimension_numbers = #tpu.dot_dimension_numbers<[1], [0], [0], [1], [0, 0, 1, 1], [], []>} : vector<480x3xbf16>, vector<3x128xbf16>, vector<480x128xf32> -> vector<480x128xf32>
    %90 = arith.index_cast %82 : i32 to index
    %c1_85 = arith.constant 1 : index
    %c0_86 = arith.constant 0 : index
    %c0_87 = arith.constant 0 : index
    %91 = vector.load %arg2[%90, %c1_85, %c0_86, %c0_87] : memref<32x32x16x3xbf16, #tpu.memory_space<vmem>>, vector<1x30x16x3xbf16>
    %92 = vector.shape_cast %91 : vector<1x30x16x3xbf16> to vector<30x16x3xbf16>
    %93 = vector.shape_cast %92 : vector<30x16x3xbf16> to vector<480x3xbf16>
    %c0_88 = arith.constant 0 : index
    %c1_89 = arith.constant 1 : index
    %c0_90 = arith.constant 0 : index
    %c0_91 = arith.constant 0 : index
    %94 = vector.load %arg3[%c0_88, %c1_89, %c0_90, %c0_91] : memref<3x3x3x128xbf16, #tpu.memory_space<vmem>>, vector<1x1x3x128xbf16>
    %95 = vector.shape_cast %94 : vector<1x1x3x128xbf16> to vector<3x128xbf16>
    %cst_92 = arith.constant dense<0.000000e+00> : vector<480x128xf32>
    %96 = tpu.matmul %93, %95, %cst_92 {dimension_numbers = #tpu.dot_dimension_numbers<[1], [0], [0], [1], [0, 0, 1, 1], [], []>} : vector<480x3xbf16>, vector<3x128xbf16>, vector<480x128xf32> -> vector<480x128xf32>
    %97 = arith.addf %89, %96 : vector<480x128xf32>
    %98 = arith.index_cast %82 : i32 to index
    %c2_93 = arith.constant 2 : index
    %c0_94 = arith.constant 0 : index
    %c0_95 = arith.constant 0 : index
    %99 = vector.load %arg2[%98, %c2_93, %c0_94, %c0_95] : memref<32x32x16x3xbf16, #tpu.memory_space<vmem>>, vector<1x30x16x3xbf16>
    %100 = vector.shape_cast %99 : vector<1x30x16x3xbf16> to vector<30x16x3xbf16>
    %101 = vector.shape_cast %100 : vector<30x16x3xbf16> to vector<480x3xbf16>
    %c0_96 = arith.constant 0 : index
    %c2_97 = arith.constant 2 : index
    %c0_98 = arith.constant 0 : index
    %c0_99 = arith.constant 0 : index
    %102 = vector.load %arg3[%c0_96, %c2_97, %c0_98, %c0_99] : memref<3x3x3x128xbf16, #tpu.memory_space<vmem>>, vector<1x1x3x128xbf16>
    %103 = vector.shape_cast %102 : vector<1x1x3x128xbf16> to vector<3x128xbf16>
    %cst_100 = arith.constant dense<0.000000e+00> : vector<480x128xf32>
    %104 = tpu.matmul %101, %103, %cst_100 {dimension_numbers = #tpu.dot_dimension_numbers<[1], [0], [0], [1], [0, 0, 1, 1], [], []>} : vector<480x3xbf16>, vector<3x128xbf16>, vector<480x128xf32> -> vector<480x128xf32>
    %105 = arith.addf %97, %104 : vector<480x128xf32>
    %c2_i32_101 = arith.constant 2 : i32
    %106 = arith.muli %c2_i32_101, %arg1 : i32
    %c1_i32_102 = arith.constant 1 : i32
    %107 = arith.addi %106, %c1_i32_102 : i32
    %c1_i32_103 = arith.constant 1 : i32
    %108 = arith.addi %107, %c1_i32_103 : i32
    %109 = arith.index_cast %108 : i32 to index
    %c0_104 = arith.constant 0 : index
    %c0_105 = arith.constant 0 : index
    %c0_106 = arith.constant 0 : index
    %110 = vector.load %arg2[%109, %c0_104, %c0_105, %c0_106] : memref<32x32x16x3xbf16, #tpu.memory_space<vmem>>, vector<1x30x16x3xbf16>
    %111 = vector.shape_cast %110 : vector<1x30x16x3xbf16> to vector<30x16x3xbf16>
    %112 = vector.shape_cast %111 : vector<30x16x3xbf16> to vector<480x3xbf16>
    %c1_107 = arith.constant 1 : index
    %c0_108 = arith.constant 0 : index
    %c0_109 = arith.constant 0 : index
    %c0_110 = arith.constant 0 : index
    %113 = vector.load %arg3[%c1_107, %c0_108, %c0_109, %c0_110] : memref<3x3x3x128xbf16, #tpu.memory_space<vmem>>, vector<1x1x3x128xbf16>
    %114 = vector.shape_cast %113 : vector<1x1x3x128xbf16> to vector<3x128xbf16>
    %cst_111 = arith.constant dense<0.000000e+00> : vector<480x128xf32>
    %115 = tpu.matmul %112, %114, %cst_111 {dimension_numbers = #tpu.dot_dimension_numbers<[1], [0], [0], [1], [0, 0, 1, 1], [], []>} : vector<480x3xbf16>, vector<3x128xbf16>, vector<480x128xf32> -> vector<480x128xf32>
    %116 = arith.addf %105, %115 : vector<480x128xf32>
    %117 = arith.index_cast %108 : i32 to index
    %c1_112 = arith.constant 1 : index
    %c0_113 = arith.constant 0 : index
    %c0_114 = arith.constant 0 : index
    %118 = vector.load %arg2[%117, %c1_112, %c0_113, %c0_114] : memref<32x32x16x3xbf16, #tpu.memory_space<vmem>>, vector<1x30x16x3xbf16>
    %119 = vector.shape_cast %118 : vector<1x30x16x3xbf16> to vector<30x16x3xbf16>
    %120 = vector.shape_cast %119 : vector<30x16x3xbf16> to vector<480x3xbf16>
    %c1_115 = arith.constant 1 : index
    %c1_116 = arith.constant 1 : index
    %c0_117 = arith.constant 0 : index
    %c0_118 = arith.constant 0 : index
    %121 = vector.load %arg3[%c1_115, %c1_116, %c0_117, %c0_118] : memref<3x3x3x128xbf16, #tpu.memory_space<vmem>>, vector<1x1x3x128xbf16>
    %122 = vector.shape_cast %121 : vector<1x1x3x128xbf16> to vector<3x128xbf16>
    %cst_119 = arith.constant dense<0.000000e+00> : vector<480x128xf32>
    %123 = tpu.matmul %120, %122, %cst_119 {dimension_numbers = #tpu.dot_dimension_numbers<[1], [0], [0], [1], [0, 0, 1, 1], [], []>} : vector<480x3xbf16>, vector<3x128xbf16>, vector<480x128xf32> -> vector<480x128xf32>
    %124 = arith.addf %116, %123 : vector<480x128xf32>
    %125 = arith.index_cast %108 : i32 to index
    %c2_120 = arith.constant 2 : index
    %c0_121 = arith.constant 0 : index
    %c0_122 = arith.constant 0 : index
    %126 = vector.load %arg2[%125, %c2_120, %c0_121, %c0_122] : memref<32x32x16x3xbf16, #tpu.memory_space<vmem>>, vector<1x30x16x3xbf16>
    %127 = vector.shape_cast %126 : vector<1x30x16x3xbf16> to vector<30x16x3xbf16>
    %128 = vector.shape_cast %127 : vector<30x16x3xbf16> to vector<480x3xbf16>
    %c1_123 = arith.constant 1 : index
    %c2_124 = arith.constant 2 : index
    %c0_125 = arith.constant 0 : index
    %c0_126 = arith.constant 0 : index
    %129 = vector.load %arg3[%c1_123, %c2_124, %c0_125, %c0_126] : memref<3x3x3x128xbf16, #tpu.memory_space<vmem>>, vector<1x1x3x128xbf16>
    %130 = vector.shape_cast %129 : vector<1x1x3x128xbf16> to vector<3x128xbf16>
    %cst_127 = arith.constant dense<0.000000e+00> : vector<480x128xf32>
    %131 = tpu.matmul %128, %130, %cst_127 {dimension_numbers = #tpu.dot_dimension_numbers<[1], [0], [0], [1], [0, 0, 1, 1], [], []>} : vector<480x3xbf16>, vector<3x128xbf16>, vector<480x128xf32> -> vector<480x128xf32>
    %132 = arith.addf %124, %131 : vector<480x128xf32>
    %c2_i32_128 = arith.constant 2 : i32
    %133 = arith.muli %c2_i32_128, %arg1 : i32
    %c1_i32_129 = arith.constant 1 : i32
    %134 = arith.addi %133, %c1_i32_129 : i32
    %c2_i32_130 = arith.constant 2 : i32
    %135 = arith.addi %134, %c2_i32_130 : i32
    %136 = arith.index_cast %135 : i32 to index
    %c0_131 = arith.constant 0 : index
    %c0_132 = arith.constant 0 : index
    %c0_133 = arith.constant 0 : index
    %137 = vector.load %arg2[%136, %c0_131, %c0_132, %c0_133] : memref<32x32x16x3xbf16, #tpu.memory_space<vmem>>, vector<1x30x16x3xbf16>
    %138 = vector.shape_cast %137 : vector<1x30x16x3xbf16> to vector<30x16x3xbf16>
    %139 = vector.shape_cast %138 : vector<30x16x3xbf16> to vector<480x3xbf16>
    %c2_134 = arith.constant 2 : index
    %c0_135 = arith.constant 0 : index
    %c0_136 = arith.constant 0 : index
    %c0_137 = arith.constant 0 : index
    %140 = vector.load %arg3[%c2_134, %c0_135, %c0_136, %c0_137] : memref<3x3x3x128xbf16, #tpu.memory_space<vmem>>, vector<1x1x3x128xbf16>
    %141 = vector.shape_cast %140 : vector<1x1x3x128xbf16> to vector<3x128xbf16>
    %cst_138 = arith.constant dense<0.000000e+00> : vector<480x128xf32>
    %142 = tpu.matmul %139, %141, %cst_138 {dimension_numbers = #tpu.dot_dimension_numbers<[1], [0], [0], [1], [0, 0, 1, 1], [], []>} : vector<480x3xbf16>, vector<3x128xbf16>, vector<480x128xf32> -> vector<480x128xf32>
    %143 = arith.addf %132, %142 : vector<480x128xf32>
    %144 = arith.index_cast %135 : i32 to index
    %c1_139 = arith.constant 1 : index
    %c0_140 = arith.constant 0 : index
    %c0_141 = arith.constant 0 : index
    %145 = vector.load %arg2[%144, %c1_139, %c0_140, %c0_141] : memref<32x32x16x3xbf16, #tpu.memory_space<vmem>>, vector<1x30x16x3xbf16>
    %146 = vector.shape_cast %145 : vector<1x30x16x3xbf16> to vector<30x16x3xbf16>
    %147 = vector.shape_cast %146 : vector<30x16x3xbf16> to vector<480x3xbf16>
    %c2_142 = arith.constant 2 : index
    %c1_143 = arith.constant 1 : index
    %c0_144 = arith.constant 0 : index
    %c0_145 = arith.constant 0 : index
    %148 = vector.load %arg3[%c2_142, %c1_143, %c0_144, %c0_145] : memref<3x3x3x128xbf16, #tpu.memory_space<vmem>>, vector<1x1x3x128xbf16>
    %149 = vector.shape_cast %148 : vector<1x1x3x128xbf16> to vector<3x128xbf16>
    %cst_146 = arith.constant dense<0.000000e+00> : vector<480x128xf32>
    %150 = tpu.matmul %147, %149, %cst_146 {dimension_numbers = #tpu.dot_dimension_numbers<[1], [0], [0], [1], [0, 0, 1, 1], [], []>} : vector<480x3xbf16>, vector<3x128xbf16>, vector<480x128xf32> -> vector<480x128xf32>
    %151 = arith.addf %143, %150 : vector<480x128xf32>
    %152 = arith.index_cast %135 : i32 to index
    %c2_147 = arith.constant 2 : index
    %c0_148 = arith.constant 0 : index
    %c0_149 = arith.constant 0 : index
    %153 = vector.load %arg2[%152, %c2_147, %c0_148, %c0_149] : memref<32x32x16x3xbf16, #tpu.memory_space<vmem>>, vector<1x30x16x3xbf16>
    %154 = vector.shape_cast %153 : vector<1x30x16x3xbf16> to vector<30x16x3xbf16>
    %155 = vector.shape_cast %154 : vector<30x16x3xbf16> to vector<480x3xbf16>
    %c2_150 = arith.constant 2 : index
    %c2_151 = arith.constant 2 : index
    %c0_152 = arith.constant 0 : index
    %c0_153 = arith.constant 0 : index
    %156 = vector.load %arg3[%c2_150, %c2_151, %c0_152, %c0_153] : memref<3x3x3x128xbf16, #tpu.memory_space<vmem>>, vector<1x1x3x128xbf16>
    %157 = vector.shape_cast %156 : vector<1x1x3x128xbf16> to vector<3x128xbf16>
    %cst_154 = arith.constant dense<0.000000e+00> : vector<480x128xf32>
    %158 = tpu.matmul %155, %157, %cst_154 {dimension_numbers = #tpu.dot_dimension_numbers<[1], [0], [0], [1], [0, 0, 1, 1], [], []>} : vector<480x3xbf16>, vector<3x128xbf16>, vector<480x128xf32> -> vector<480x128xf32>
    %159 = arith.addf %151, %158 : vector<480x128xf32>
    %160 = arith.maximumf %79, %159 : vector<480x128xf32>
    %161 = vector.shape_cast %160 : vector<480x128xf32> to vector<15x2x16x128xf32>
    %162 = vector.extract_strided_slice %161 {offsets = [0, 0, 0, 0], sizes = [15, 1, 16, 128], strides = [1, 1, 1, 1]} : vector<15x2x16x128xf32> to vector<15x1x16x128xf32>
    %163 = vector.shape_cast %162 : vector<15x1x16x128xf32> to vector<15x16x128xf32>
    %164 = vector.extract_strided_slice %161 {offsets = [0, 1, 0, 0], sizes = [15, 1, 16, 128], strides = [1, 1, 1, 1]} : vector<15x2x16x128xf32> to vector<15x1x16x128xf32>
    %165 = vector.shape_cast %164 : vector<15x1x16x128xf32> to vector<15x16x128xf32>
    %166 = arith.maximumf %163, %165 : vector<15x16x128xf32>
    %c0_155 = arith.constant 0 : index
    %c0_156 = arith.constant 0 : index
    %167 = vector.load %arg4[%c0_155, %c0_156] : memref<1x128xf32, #tpu.memory_space<vmem>>, vector<1x128xf32>
    %168 = vector.shape_cast %167 : vector<1x128xf32> to vector<1x1x128xf32>
    %169 = vector.broadcast %168 : vector<1x1x128xf32> to vector<15x16x128xf32>
    %170 = arith.addf %166, %169 : vector<15x16x128xf32>
    %cst_157 = arith.constant 0.000000e+00 : f32
    %171 = vector.broadcast %cst_157 : f32 to vector<15x16x128xf32>
    %172 = arith.maximumf %170, %171 : vector<15x16x128xf32>
    %173 = arith.truncf %172 : vector<15x16x128xf32> to vector<15x16x128xbf16>
    %c0_158 = arith.constant 0 : index
    %c0_159 = arith.constant 0 : index
    %c0_160 = arith.constant 0 : index
    %c0_161 = arith.constant 0 : index
    %174 = vector.load %arg5[%c0_158, %c0_159, %c0_160, %c0_161] : memref<1x15x16x128xbf16, #tpu.memory_space<vmem>>, vector<1x15x16x128xbf16>
    %175 = vector.shape_cast %174 : vector<1x15x16x128xbf16> to vector<15x16x128xbf16>
    %176 = vector.shape_cast %173 : vector<15x16x128xbf16> to vector<1x15x16x128xbf16>
    tpu.vector_store %arg5[%c0_158, %c0_159, %c0_160, %c0_161], %176 {strides = array<i32>} : memref<1x15x16x128xbf16, #tpu.memory_space<vmem>>, vector<1x15x16x128xbf16>,
    return
  }
  func.func @transform_0(%arg0: i32, %arg1: i32) -> (i32, i32, i32, i32) {
    %c0_i32 = arith.constant 0 : i32
    %c0_i32_0 = arith.constant 0 : i32
    %c0_i32_1 = arith.constant 0 : i32
    %c0_i32_2 = arith.constant 0 : i32
    return %c0_i32, %c0_i32_0, %arg0, %c0_i32_1 : i32, i32, i32, i32
  }
  func.func @transform_1(%arg0: i32, %arg1: i32) -> (i32, i32, i32, i32) {
    %c0_i32 = arith.constant 0 : i32
    %c0_i32_0 = arith.constant 0 : i32
    %c0_i32_1 = arith.constant 0 : i32
    %c0_i32_2 = arith.constant 0 : i32
    %c0_i32_3 = arith.constant 0 : i32
    return %c0_i32, %c0_i32_0, %c0_i32_1, %c0_i32_2 : i32, i32, i32, i32
  }
  func.func @transform_2(%arg0: i32, %arg1: i32) -> (i32, i32) {
    %c0_i32 = arith.constant 0 : i32
    %c0_i32_0 = arith.constant 0 : i32
    %c0_i32_1 = arith.constant 0 : i32
    return %c0_i32, %c0_i32_0 : i32, i32
  }
  func.func @transform_3(%arg0: i32, %arg1: i32) -> (i32, i32, i32, i32) {
    %c0_i32 = arith.constant 0 : i32
    %c0_i32_0 = arith.constant 0 : i32
    %c0_i32_1 = arith.constant 0 : i32
    return %arg1, %c0_i32, %arg0, %c0_i32_0 : i32, i32, i32, i32
  }
}

module attributes {stable_mosaic.version = 11 : i64} {
  func.func @_conv3x3_hwnc_kernel(%arg0: i32, %arg1: i32, %arg2: memref<15x15x16x128xbf16, #tpu.memory_space<vmem>>, %arg3: memref<3x3x128x128xbf16, #tpu.memory_space<vmem>>, %arg4: memref<1x128xf32, #tpu.memory_space<vmem>>, %arg5: memref<1x6x16x128xbf16, #tpu.memory_space<vmem>>) attributes {dimension_semantics = [#tpu.dimension_semantics<parallel>, #tpu.dimension_semantics<parallel>], iteration_bounds = array<i64: 1, 6>, scalar_prefetch = 0 : i64, scratch_operands = 0 : i64, tpu.core_type = #tpu.core_type<tc>, window_params = [{transform_indices = @transform_0, window_bounds = array<i64: 15, 15, 16, 128>}, {pipeline_mode = #tpu.pipeline_mode<synchronous>, transform_indices = @transform_1, window_bounds = array<i64: 3, 3, 128, 128>}, {pipeline_mode = #tpu.pipeline_mode<synchronous>, transform_indices = @transform_2, window_bounds = array<i64: 1, 128>}, {transform_indices = @transform_3, window_bounds = array<i64: 1, 6, 16, 128>}]} {
    %c2_i32 = arith.constant 2 : i32
    %0 = arith.muli %c2_i32, %arg1 : i32
    %c0_i32 = arith.constant 0 : i32
    %1 = arith.addi %0, %c0_i32 : i32
    %c0_i32_0 = arith.constant 0 : i32
    %2 = arith.addi %1, %c0_i32_0 : i32
    %3 = arith.index_cast %2 : i32 to index
    %c0 = arith.constant 0 : index
    %c0_1 = arith.constant 0 : index
    %c0_2 = arith.constant 0 : index
    %4 = vector.load %arg2[%3, %c0, %c0_1, %c0_2] : memref<15x15x16x128xbf16, #tpu.memory_space<vmem>>, vector<1x12x16x128xbf16>
    %5 = vector.shape_cast %4 : vector<1x12x16x128xbf16> to vector<12x16x128xbf16>
    %6 = vector.shape_cast %5 : vector<12x16x128xbf16> to vector<192x128xbf16>
    %c0_3 = arith.constant 0 : index
    %c0_4 = arith.constant 0 : index
    %c0_5 = arith.constant 0 : index
    %c0_6 = arith.constant 0 : index
    %7 = vector.load %arg3[%c0_3, %c0_4, %c0_5, %c0_6] : memref<3x3x128x128xbf16, #tpu.memory_space<vmem>>, vector<1x1x128x128xbf16>
    %8 = vector.shape_cast %7 : vector<1x1x128x128xbf16> to vector<128x128xbf16>
    %cst = arith.constant dense<0.000000e+00> : vector<192x128xf32>
    %9 = tpu.matmul %6, %8, %cst {dimension_numbers = #tpu.dot_dimension_numbers<[1], [0], [0], [1], [0, 0, 1, 1], [], []>} : vector<192x128xbf16>, vector<128x128xbf16>, vector<192x128xf32> -> vector<192x128xf32>
    %10 = arith.index_cast %2 : i32 to index
    %c1 = arith.constant 1 : index
    %c0_7 = arith.constant 0 : index
    %c0_8 = arith.constant 0 : index
    %11 = vector.load %arg2[%10, %c1, %c0_7, %c0_8] : memref<15x15x16x128xbf16, #tpu.memory_space<vmem>>, vector<1x12x16x128xbf16>
    %12 = vector.shape_cast %11 : vector<1x12x16x128xbf16> to vector<12x16x128xbf16>
    %13 = vector.shape_cast %12 : vector<12x16x128xbf16> to vector<192x128xbf16>
    %c0_9 = arith.constant 0 : index
    %c1_10 = arith.constant 1 : index
    %c0_11 = arith.constant 0 : index
    %c0_12 = arith.constant 0 : index
    %14 = vector.load %arg3[%c0_9, %c1_10, %c0_11, %c0_12] : memref<3x3x128x128xbf16, #tpu.memory_space<vmem>>, vector<1x1x128x128xbf16>
    %15 = vector.shape_cast %14 : vector<1x1x128x128xbf16> to vector<128x128xbf16>
    %cst_13 = arith.constant dense<0.000000e+00> : vector<192x128xf32>
    %16 = tpu.matmul %13, %15, %cst_13 {dimension_numbers = #tpu.dot_dimension_numbers<[1], [0], [0], [1], [0, 0, 1, 1], [], []>} : vector<192x128xbf16>, vector<128x128xbf16>, vector<192x128xf32> -> vector<192x128xf32>
    %17 = arith.addf %9, %16 : vector<192x128xf32>
    %18 = arith.index_cast %2 : i32 to index
    %c2 = arith.constant 2 : index
    %c0_14 = arith.constant 0 : index
    %c0_15 = arith.constant 0 : index
    %19 = vector.load %arg2[%18, %c2, %c0_14, %c0_15] : memref<15x15x16x128xbf16, #tpu.memory_space<vmem>>, vector<1x12x16x128xbf16>
    %20 = vector.shape_cast %19 : vector<1x12x16x128xbf16> to vector<12x16x128xbf16>
    %21 = vector.shape_cast %20 : vector<12x16x128xbf16> to vector<192x128xbf16>
    %c0_16 = arith.constant 0 : index
    %c2_17 = arith.constant 2 : index
    %c0_18 = arith.constant 0 : index
    %c0_19 = arith.constant 0 : index
    %22 = vector.load %arg3[%c0_16, %c2_17, %c0_18, %c0_19] : memref<3x3x128x128xbf16, #tpu.memory_space<vmem>>, vector<1x1x128x128xbf16>
    %23 = vector.shape_cast %22 : vector<1x1x128x128xbf16> to vector<128x128xbf16>
    %cst_20 = arith.constant dense<0.000000e+00> : vector<192x128xf32>
    %24 = tpu.matmul %21, %23, %cst_20 {dimension_numbers = #tpu.dot_dimension_numbers<[1], [0], [0], [1], [0, 0, 1, 1], [], []>} : vector<192x128xbf16>, vector<128x128xbf16>, vector<192x128xf32> -> vector<192x128xf32>
    %25 = arith.addf %17, %24 : vector<192x128xf32>
    %c2_i32_21 = arith.constant 2 : i32
    %26 = arith.muli %c2_i32_21, %arg1 : i32
    %c0_i32_22 = arith.constant 0 : i32
    %27 = arith.addi %26, %c0_i32_22 : i32
    %c1_i32 = arith.constant 1 : i32
    %28 = arith.addi %27, %c1_i32 : i32
    %29 = arith.index_cast %28 : i32 to index
    %c0_23 = arith.constant 0 : index
    %c0_24 = arith.constant 0 : index
    %c0_25 = arith.constant 0 : index
    %30 = vector.load %arg2[%29, %c0_23, %c0_24, %c0_25] : memref<15x15x16x128xbf16, #tpu.memory_space<vmem>>, vector<1x12x16x128xbf16>
    %31 = vector.shape_cast %30 : vector<1x12x16x128xbf16> to vector<12x16x128xbf16>
    %32 = vector.shape_cast %31 : vector<12x16x128xbf16> to vector<192x128xbf16>
    %c1_26 = arith.constant 1 : index
    %c0_27 = arith.constant 0 : index
    %c0_28 = arith.constant 0 : index
    %c0_29 = arith.constant 0 : index
    %33 = vector.load %arg3[%c1_26, %c0_27, %c0_28, %c0_29] : memref<3x3x128x128xbf16, #tpu.memory_space<vmem>>, vector<1x1x128x128xbf16>
    %34 = vector.shape_cast %33 : vector<1x1x128x128xbf16> to vector<128x128xbf16>
    %cst_30 = arith.constant dense<0.000000e+00> : vector<192x128xf32>
    %35 = tpu.matmul %32, %34, %cst_30 {dimension_numbers = #tpu.dot_dimension_numbers<[1], [0], [0], [1], [0, 0, 1, 1], [], []>} : vector<192x128xbf16>, vector<128x128xbf16>, vector<192x128xf32> -> vector<192x128xf32>
    %36 = arith.addf %25, %35 : vector<192x128xf32>
    %37 = arith.index_cast %28 : i32 to index
    %c1_31 = arith.constant 1 : index
    %c0_32 = arith.constant 0 : index
    %c0_33 = arith.constant 0 : index
    %38 = vector.load %arg2[%37, %c1_31, %c0_32, %c0_33] : memref<15x15x16x128xbf16, #tpu.memory_space<vmem>>, vector<1x12x16x128xbf16>
    %39 = vector.shape_cast %38 : vector<1x12x16x128xbf16> to vector<12x16x128xbf16>
    %40 = vector.shape_cast %39 : vector<12x16x128xbf16> to vector<192x128xbf16>
    %c1_34 = arith.constant 1 : index
    %c1_35 = arith.constant 1 : index
    %c0_36 = arith.constant 0 : index
    %c0_37 = arith.constant 0 : index
    %41 = vector.load %arg3[%c1_34, %c1_35, %c0_36, %c0_37] : memref<3x3x128x128xbf16, #tpu.memory_space<vmem>>, vector<1x1x128x128xbf16>
    %42 = vector.shape_cast %41 : vector<1x1x128x128xbf16> to vector<128x128xbf16>
    %cst_38 = arith.constant dense<0.000000e+00> : vector<192x128xf32>
    %43 = tpu.matmul %40, %42, %cst_38 {dimension_numbers = #tpu.dot_dimension_numbers<[1], [0], [0], [1], [0, 0, 1, 1], [], []>} : vector<192x128xbf16>, vector<128x128xbf16>, vector<192x128xf32> -> vector<192x128xf32>
    %44 = arith.addf %36, %43 : vector<192x128xf32>
    %45 = arith.index_cast %28 : i32 to index
    %c2_39 = arith.constant 2 : index
    %c0_40 = arith.constant 0 : index
    %c0_41 = arith.constant 0 : index
    %46 = vector.load %arg2[%45, %c2_39, %c0_40, %c0_41] : memref<15x15x16x128xbf16, #tpu.memory_space<vmem>>, vector<1x12x16x128xbf16>
    %47 = vector.shape_cast %46 : vector<1x12x16x128xbf16> to vector<12x16x128xbf16>
    %48 = vector.shape_cast %47 : vector<12x16x128xbf16> to vector<192x128xbf16>
    %c1_42 = arith.constant 1 : index
    %c2_43 = arith.constant 2 : index
    %c0_44 = arith.constant 0 : index
    %c0_45 = arith.constant 0 : index
    %49 = vector.load %arg3[%c1_42, %c2_43, %c0_44, %c0_45] : memref<3x3x128x128xbf16, #tpu.memory_space<vmem>>, vector<1x1x128x128xbf16>
    %50 = vector.shape_cast %49 : vector<1x1x128x128xbf16> to vector<128x128xbf16>
    %cst_46 = arith.constant dense<0.000000e+00> : vector<192x128xf32>
    %51 = tpu.matmul %48, %50, %cst_46 {dimension_numbers = #tpu.dot_dimension_numbers<[1], [0], [0], [1], [0, 0, 1, 1], [], []>} : vector<192x128xbf16>, vector<128x128xbf16>, vector<192x128xf32> -> vector<192x128xf32>
    %52 = arith.addf %44, %51 : vector<192x128xf32>
    %c2_i32_47 = arith.constant 2 : i32
    %53 = arith.muli %c2_i32_47, %arg1 : i32
    %c0_i32_48 = arith.constant 0 : i32
    %54 = arith.addi %53, %c0_i32_48 : i32
    %c2_i32_49 = arith.constant 2 : i32
    %55 = arith.addi %54, %c2_i32_49 : i32
    %56 = arith.index_cast %55 : i32 to index
    %c0_50 = arith.constant 0 : index
    %c0_51 = arith.constant 0 : index
    %c0_52 = arith.constant 0 : index
    %57 = vector.load %arg2[%56, %c0_50, %c0_51, %c0_52] : memref<15x15x16x128xbf16, #tpu.memory_space<vmem>>, vector<1x12x16x128xbf16>
    %58 = vector.shape_cast %57 : vector<1x12x16x128xbf16> to vector<12x16x128xbf16>
    %59 = vector.shape_cast %58 : vector<12x16x128xbf16> to vector<192x128xbf16>
    %c2_53 = arith.constant 2 : index
    %c0_54 = arith.constant 0 : index
    %c0_55 = arith.constant 0 : index
    %c0_56 = arith.constant 0 : index
    %60 = vector.load %arg3[%c2_53, %c0_54, %c0_55, %c0_56] : memref<3x3x128x128xbf16, #tpu.memory_space<vmem>>, vector<1x1x128x128xbf16>
    %61 = vector.shape_cast %60 : vector<1x1x128x128xbf16> to vector<128x128xbf16>
    %cst_57 = arith.constant dense<0.000000e+00> : vector<192x128xf32>
    %62 = tpu.matmul %59, %61, %cst_57 {dimension_numbers = #tpu.dot_dimension_numbers<[1], [0], [0], [1], [0, 0, 1, 1], [], []>} : vector<192x128xbf16>, vector<128x128xbf16>, vector<192x128xf32> -> vector<192x128xf32>
    %63 = arith.addf %52, %62 : vector<192x128xf32>
    %64 = arith.index_cast %55 : i32 to index
    %c1_58 = arith.constant 1 : index
    %c0_59 = arith.constant 0 : index
    %c0_60 = arith.constant 0 : index
    %65 = vector.load %arg2[%64, %c1_58, %c0_59, %c0_60] : memref<15x15x16x128xbf16, #tpu.memory_space<vmem>>, vector<1x12x16x128xbf16>
    %66 = vector.shape_cast %65 : vector<1x12x16x128xbf16> to vector<12x16x128xbf16>
    %67 = vector.shape_cast %66 : vector<12x16x128xbf16> to vector<192x128xbf16>
    %c2_61 = arith.constant 2 : index
    %c1_62 = arith.constant 1 : index
    %c0_63 = arith.constant 0 : index
    %c0_64 = arith.constant 0 : index
    %68 = vector.load %arg3[%c2_61, %c1_62, %c0_63, %c0_64] : memref<3x3x128x128xbf16, #tpu.memory_space<vmem>>, vector<1x1x128x128xbf16>
    %69 = vector.shape_cast %68 : vector<1x1x128x128xbf16> to vector<128x128xbf16>
    %cst_65 = arith.constant dense<0.000000e+00> : vector<192x128xf32>
    %70 = tpu.matmul %67, %69, %cst_65 {dimension_numbers = #tpu.dot_dimension_numbers<[1], [0], [0], [1], [0, 0, 1, 1], [], []>} : vector<192x128xbf16>, vector<128x128xbf16>, vector<192x128xf32> -> vector<192x128xf32>
    %71 = arith.addf %63, %70 : vector<192x128xf32>
    %72 = arith.index_cast %55 : i32 to index
    %c2_66 = arith.constant 2 : index
    %c0_67 = arith.constant 0 : index
    %c0_68 = arith.constant 0 : index
    %73 = vector.load %arg2[%72, %c2_66, %c0_67, %c0_68] : memref<15x15x16x128xbf16, #tpu.memory_space<vmem>>, vector<1x12x16x128xbf16>
    %74 = vector.shape_cast %73 : vector<1x12x16x128xbf16> to vector<12x16x128xbf16>
    %75 = vector.shape_cast %74 : vector<12x16x128xbf16> to vector<192x128xbf16>
    %c2_69 = arith.constant 2 : index
    %c2_70 = arith.constant 2 : index
    %c0_71 = arith.constant 0 : index
    %c0_72 = arith.constant 0 : index
    %76 = vector.load %arg3[%c2_69, %c2_70, %c0_71, %c0_72] : memref<3x3x128x128xbf16, #tpu.memory_space<vmem>>, vector<1x1x128x128xbf16>
    %77 = vector.shape_cast %76 : vector<1x1x128x128xbf16> to vector<128x128xbf16>
    %cst_73 = arith.constant dense<0.000000e+00> : vector<192x128xf32>
    %78 = tpu.matmul %75, %77, %cst_73 {dimension_numbers = #tpu.dot_dimension_numbers<[1], [0], [0], [1], [0, 0, 1, 1], [], []>} : vector<192x128xbf16>, vector<128x128xbf16>, vector<192x128xf32> -> vector<192x128xf32>
    %79 = arith.addf %71, %78 : vector<192x128xf32>
    %c2_i32_74 = arith.constant 2 : i32
    %80 = arith.muli %c2_i32_74, %arg1 : i32
    %c1_i32_75 = arith.constant 1 : i32
    %81 = arith.addi %80, %c1_i32_75 : i32
    %c0_i32_76 = arith.constant 0 : i32
    %82 = arith.addi %81, %c0_i32_76 : i32
    %83 = arith.index_cast %82 : i32 to index
    %c0_77 = arith.constant 0 : index
    %c0_78 = arith.constant 0 : index
    %c0_79 = arith.constant 0 : index
    %84 = vector.load %arg2[%83, %c0_77, %c0_78, %c0_79] : memref<15x15x16x128xbf16, #tpu.memory_space<vmem>>, vector<1x12x16x128xbf16>
    %85 = vector.shape_cast %84 : vector<1x12x16x128xbf16> to vector<12x16x128xbf16>
    %86 = vector.shape_cast %85 : vector<12x16x128xbf16> to vector<192x128xbf16>
    %c0_80 = arith.constant 0 : index
    %c0_81 = arith.constant 0 : index
    %c0_82 = arith.constant 0 : index
    %c0_83 = arith.constant 0 : index
    %87 = vector.load %arg3[%c0_80, %c0_81, %c0_82, %c0_83] : memref<3x3x128x128xbf16, #tpu.memory_space<vmem>>, vector<1x1x128x128xbf16>
    %88 = vector.shape_cast %87 : vector<1x1x128x128xbf16> to vector<128x128xbf16>
    %cst_84 = arith.constant dense<0.000000e+00> : vector<192x128xf32>
    %89 = tpu.matmul %86, %88, %cst_84 {dimension_numbers = #tpu.dot_dimension_numbers<[1], [0], [0], [1], [0, 0, 1, 1], [], []>} : vector<192x128xbf16>, vector<128x128xbf16>, vector<192x128xf32> -> vector<192x128xf32>
    %90 = arith.index_cast %82 : i32 to index
    %c1_85 = arith.constant 1 : index
    %c0_86 = arith.constant 0 : index
    %c0_87 = arith.constant 0 : index
    %91 = vector.load %arg2[%90, %c1_85, %c0_86, %c0_87] : memref<15x15x16x128xbf16, #tpu.memory_space<vmem>>, vector<1x12x16x128xbf16>
    %92 = vector.shape_cast %91 : vector<1x12x16x128xbf16> to vector<12x16x128xbf16>
    %93 = vector.shape_cast %92 : vector<12x16x128xbf16> to vector<192x128xbf16>
    %c0_88 = arith.constant 0 : index
    %c1_89 = arith.constant 1 : index
    %c0_90 = arith.constant 0 : index
    %c0_91 = arith.constant 0 : index
    %94 = vector.load %arg3[%c0_88, %c1_89, %c0_90, %c0_91] : memref<3x3x128x128xbf16, #tpu.memory_space<vmem>>, vector<1x1x128x128xbf16>
    %95 = vector.shape_cast %94 : vector<1x1x128x128xbf16> to vector<128x128xbf16>
    %cst_92 = arith.constant dense<0.000000e+00> : vector<192x128xf32>
    %96 = tpu.matmul %93, %95, %cst_92 {dimension_numbers = #tpu.dot_dimension_numbers<[1], [0], [0], [1], [0, 0, 1, 1], [], []>} : vector<192x128xbf16>, vector<128x128xbf16>, vector<192x128xf32> -> vector<192x128xf32>
    %97 = arith.addf %89, %96 : vector<192x128xf32>
    %98 = arith.index_cast %82 : i32 to index
    %c2_93 = arith.constant 2 : index
    %c0_94 = arith.constant 0 : index
    %c0_95 = arith.constant 0 : index
    %99 = vector.load %arg2[%98, %c2_93, %c0_94, %c0_95] : memref<15x15x16x128xbf16, #tpu.memory_space<vmem>>, vector<1x12x16x128xbf16>
    %100 = vector.shape_cast %99 : vector<1x12x16x128xbf16> to vector<12x16x128xbf16>
    %101 = vector.shape_cast %100 : vector<12x16x128xbf16> to vector<192x128xbf16>
    %c0_96 = arith.constant 0 : index
    %c2_97 = arith.constant 2 : index
    %c0_98 = arith.constant 0 : index
    %c0_99 = arith.constant 0 : index
    %102 = vector.load %arg3[%c0_96, %c2_97, %c0_98, %c0_99] : memref<3x3x128x128xbf16, #tpu.memory_space<vmem>>, vector<1x1x128x128xbf16>
    %103 = vector.shape_cast %102 : vector<1x1x128x128xbf16> to vector<128x128xbf16>
    %cst_100 = arith.constant dense<0.000000e+00> : vector<192x128xf32>
    %104 = tpu.matmul %101, %103, %cst_100 {dimension_numbers = #tpu.dot_dimension_numbers<[1], [0], [0], [1], [0, 0, 1, 1], [], []>} : vector<192x128xbf16>, vector<128x128xbf16>, vector<192x128xf32> -> vector<192x128xf32>
    %105 = arith.addf %97, %104 : vector<192x128xf32>
    %c2_i32_101 = arith.constant 2 : i32
    %106 = arith.muli %c2_i32_101, %arg1 : i32
    %c1_i32_102 = arith.constant 1 : i32
    %107 = arith.addi %106, %c1_i32_102 : i32
    %c1_i32_103 = arith.constant 1 : i32
    %108 = arith.addi %107, %c1_i32_103 : i32
    %109 = arith.index_cast %108 : i32 to index
    %c0_104 = arith.constant 0 : index
    %c0_105 = arith.constant 0 : index
    %c0_106 = arith.constant 0 : index
    %110 = vector.load %arg2[%109, %c0_104, %c0_105, %c0_106] : memref<15x15x16x128xbf16, #tpu.memory_space<vmem>>, vector<1x12x16x128xbf16>
    %111 = vector.shape_cast %110 : vector<1x12x16x128xbf16> to vector<12x16x128xbf16>
    %112 = vector.shape_cast %111 : vector<12x16x128xbf16> to vector<192x128xbf16>
    %c1_107 = arith.constant 1 : index
    %c0_108 = arith.constant 0 : index
    %c0_109 = arith.constant 0 : index
    %c0_110 = arith.constant 0 : index
    %113 = vector.load %arg3[%c1_107, %c0_108, %c0_109, %c0_110] : memref<3x3x128x128xbf16, #tpu.memory_space<vmem>>, vector<1x1x128x128xbf16>
    %114 = vector.shape_cast %113 : vector<1x1x128x128xbf16> to vector<128x128xbf16>
    %cst_111 = arith.constant dense<0.000000e+00> : vector<192x128xf32>
    %115 = tpu.matmul %112, %114, %cst_111 {dimension_numbers = #tpu.dot_dimension_numbers<[1], [0], [0], [1], [0, 0, 1, 1], [], []>} : vector<192x128xbf16>, vector<128x128xbf16>, vector<192x128xf32> -> vector<192x128xf32>
    %116 = arith.addf %105, %115 : vector<192x128xf32>
    %117 = arith.index_cast %108 : i32 to index
    %c1_112 = arith.constant 1 : index
    %c0_113 = arith.constant 0 : index
    %c0_114 = arith.constant 0 : index
    %118 = vector.load %arg2[%117, %c1_112, %c0_113, %c0_114] : memref<15x15x16x128xbf16, #tpu.memory_space<vmem>>, vector<1x12x16x128xbf16>
    %119 = vector.shape_cast %118 : vector<1x12x16x128xbf16> to vector<12x16x128xbf16>
    %120 = vector.shape_cast %119 : vector<12x16x128xbf16> to vector<192x128xbf16>
    %c1_115 = arith.constant 1 : index
    %c1_116 = arith.constant 1 : index
    %c0_117 = arith.constant 0 : index
    %c0_118 = arith.constant 0 : index
    %121 = vector.load %arg3[%c1_115, %c1_116, %c0_117, %c0_118] : memref<3x3x128x128xbf16, #tpu.memory_space<vmem>>, vector<1x1x128x128xbf16>
    %122 = vector.shape_cast %121 : vector<1x1x128x128xbf16> to vector<128x128xbf16>
    %cst_119 = arith.constant dense<0.000000e+00> : vector<192x128xf32>
    %123 = tpu.matmul %120, %122, %cst_119 {dimension_numbers = #tpu.dot_dimension_numbers<[1], [0], [0], [1], [0, 0, 1, 1], [], []>} : vector<192x128xbf16>, vector<128x128xbf16>, vector<192x128xf32> -> vector<192x128xf32>
    %124 = arith.addf %116, %123 : vector<192x128xf32>
    %125 = arith.index_cast %108 : i32 to index
    %c2_120 = arith.constant 2 : index
    %c0_121 = arith.constant 0 : index
    %c0_122 = arith.constant 0 : index
    %126 = vector.load %arg2[%125, %c2_120, %c0_121, %c0_122] : memref<15x15x16x128xbf16, #tpu.memory_space<vmem>>, vector<1x12x16x128xbf16>
    %127 = vector.shape_cast %126 : vector<1x12x16x128xbf16> to vector<12x16x128xbf16>
    %128 = vector.shape_cast %127 : vector<12x16x128xbf16> to vector<192x128xbf16>
    %c1_123 = arith.constant 1 : index
    %c2_124 = arith.constant 2 : index
    %c0_125 = arith.constant 0 : index
    %c0_126 = arith.constant 0 : index
    %129 = vector.load %arg3[%c1_123, %c2_124, %c0_125, %c0_126] : memref<3x3x128x128xbf16, #tpu.memory_space<vmem>>, vector<1x1x128x128xbf16>
    %130 = vector.shape_cast %129 : vector<1x1x128x128xbf16> to vector<128x128xbf16>
    %cst_127 = arith.constant dense<0.000000e+00> : vector<192x128xf32>
    %131 = tpu.matmul %128, %130, %cst_127 {dimension_numbers = #tpu.dot_dimension_numbers<[1], [0], [0], [1], [0, 0, 1, 1], [], []>} : vector<192x128xbf16>, vector<128x128xbf16>, vector<192x128xf32> -> vector<192x128xf32>
    %132 = arith.addf %124, %131 : vector<192x128xf32>
    %c2_i32_128 = arith.constant 2 : i32
    %133 = arith.muli %c2_i32_128, %arg1 : i32
    %c1_i32_129 = arith.constant 1 : i32
    %134 = arith.addi %133, %c1_i32_129 : i32
    %c2_i32_130 = arith.constant 2 : i32
    %135 = arith.addi %134, %c2_i32_130 : i32
    %136 = arith.index_cast %135 : i32 to index
    %c0_131 = arith.constant 0 : index
    %c0_132 = arith.constant 0 : index
    %c0_133 = arith.constant 0 : index
    %137 = vector.load %arg2[%136, %c0_131, %c0_132, %c0_133] : memref<15x15x16x128xbf16, #tpu.memory_space<vmem>>, vector<1x12x16x128xbf16>
    %138 = vector.shape_cast %137 : vector<1x12x16x128xbf16> to vector<12x16x128xbf16>
    %139 = vector.shape_cast %138 : vector<12x16x128xbf16> to vector<192x128xbf16>
    %c2_134 = arith.constant 2 : index
    %c0_135 = arith.constant 0 : index
    %c0_136 = arith.constant 0 : index
    %c0_137 = arith.constant 0 : index
    %140 = vector.load %arg3[%c2_134, %c0_135, %c0_136, %c0_137] : memref<3x3x128x128xbf16, #tpu.memory_space<vmem>>, vector<1x1x128x128xbf16>
    %141 = vector.shape_cast %140 : vector<1x1x128x128xbf16> to vector<128x128xbf16>
    %cst_138 = arith.constant dense<0.000000e+00> : vector<192x128xf32>
    %142 = tpu.matmul %139, %141, %cst_138 {dimension_numbers = #tpu.dot_dimension_numbers<[1], [0], [0], [1], [0, 0, 1, 1], [], []>} : vector<192x128xbf16>, vector<128x128xbf16>, vector<192x128xf32> -> vector<192x128xf32>
    %143 = arith.addf %132, %142 : vector<192x128xf32>
    %144 = arith.index_cast %135 : i32 to index
    %c1_139 = arith.constant 1 : index
    %c0_140 = arith.constant 0 : index
    %c0_141 = arith.constant 0 : index
    %145 = vector.load %arg2[%144, %c1_139, %c0_140, %c0_141] : memref<15x15x16x128xbf16, #tpu.memory_space<vmem>>, vector<1x12x16x128xbf16>
    %146 = vector.shape_cast %145 : vector<1x12x16x128xbf16> to vector<12x16x128xbf16>
    %147 = vector.shape_cast %146 : vector<12x16x128xbf16> to vector<192x128xbf16>
    %c2_142 = arith.constant 2 : index
    %c1_143 = arith.constant 1 : index
    %c0_144 = arith.constant 0 : index
    %c0_145 = arith.constant 0 : index
    %148 = vector.load %arg3[%c2_142, %c1_143, %c0_144, %c0_145] : memref<3x3x128x128xbf16, #tpu.memory_space<vmem>>, vector<1x1x128x128xbf16>
    %149 = vector.shape_cast %148 : vector<1x1x128x128xbf16> to vector<128x128xbf16>
    %cst_146 = arith.constant dense<0.000000e+00> : vector<192x128xf32>
    %150 = tpu.matmul %147, %149, %cst_146 {dimension_numbers = #tpu.dot_dimension_numbers<[1], [0], [0], [1], [0, 0, 1, 1], [], []>} : vector<192x128xbf16>, vector<128x128xbf16>, vector<192x128xf32> -> vector<192x128xf32>
    %151 = arith.addf %143, %150 : vector<192x128xf32>
    %152 = arith.index_cast %135 : i32 to index
    %c2_147 = arith.constant 2 : index
    %c0_148 = arith.constant 0 : index
    %c0_149 = arith.constant 0 : index
    %153 = vector.load %arg2[%152, %c2_147, %c0_148, %c0_149] : memref<15x15x16x128xbf16, #tpu.memory_space<vmem>>, vector<1x12x16x128xbf16>
    %154 = vector.shape_cast %153 : vector<1x12x16x128xbf16> to vector<12x16x128xbf16>
    %155 = vector.shape_cast %154 : vector<12x16x128xbf16> to vector<192x128xbf16>
    %c2_150 = arith.constant 2 : index
    %c2_151 = arith.constant 2 : index
    %c0_152 = arith.constant 0 : index
    %c0_153 = arith.constant 0 : index
    %156 = vector.load %arg3[%c2_150, %c2_151, %c0_152, %c0_153] : memref<3x3x128x128xbf16, #tpu.memory_space<vmem>>, vector<1x1x128x128xbf16>
    %157 = vector.shape_cast %156 : vector<1x1x128x128xbf16> to vector<128x128xbf16>
    %cst_154 = arith.constant dense<0.000000e+00> : vector<192x128xf32>
    %158 = tpu.matmul %155, %157, %cst_154 {dimension_numbers = #tpu.dot_dimension_numbers<[1], [0], [0], [1], [0, 0, 1, 1], [], []>} : vector<192x128xbf16>, vector<128x128xbf16>, vector<192x128xf32> -> vector<192x128xf32>
    %159 = arith.addf %151, %158 : vector<192x128xf32>
    %160 = arith.maximumf %79, %159 : vector<192x128xf32>
    %161 = vector.shape_cast %160 : vector<192x128xf32> to vector<6x2x16x128xf32>
    %162 = vector.extract_strided_slice %161 {offsets = [0, 0, 0, 0], sizes = [6, 1, 16, 128], strides = [1, 1, 1, 1]} : vector<6x2x16x128xf32> to vector<6x1x16x128xf32>
    %163 = vector.shape_cast %162 : vector<6x1x16x128xf32> to vector<6x16x128xf32>
    %164 = vector.extract_strided_slice %161 {offsets = [0, 1, 0, 0], sizes = [6, 1, 16, 128], strides = [1, 1, 1, 1]} : vector<6x2x16x128xf32> to vector<6x1x16x128xf32>
    %165 = vector.shape_cast %164 : vector<6x1x16x128xf32> to vector<6x16x128xf32>
    %166 = arith.maximumf %163, %165 : vector<6x16x128xf32>
    %c0_155 = arith.constant 0 : index
    %c0_156 = arith.constant 0 : index
    %167 = vector.load %arg4[%c0_155, %c0_156] : memref<1x128xf32, #tpu.memory_space<vmem>>, vector<1x128xf32>
    %168 = vector.shape_cast %167 : vector<1x128xf32> to vector<1x1x128xf32>
    %169 = vector.broadcast %168 : vector<1x1x128xf32> to vector<6x16x128xf32>
    %170 = arith.addf %166, %169 : vector<6x16x128xf32>
    %cst_157 = arith.constant 0.000000e+00 : f32
    %171 = vector.broadcast %cst_157 : f32 to vector<6x16x128xf32>
    %172 = arith.maximumf %170, %171 : vector<6x16x128xf32>
    %173 = arith.truncf %172 : vector<6x16x128xf32> to vector<6x16x128xbf16>
    %c0_158 = arith.constant 0 : index
    %c0_159 = arith.constant 0 : index
    %c0_160 = arith.constant 0 : index
    %c0_161 = arith.constant 0 : index
    %174 = vector.load %arg5[%c0_158, %c0_159, %c0_160, %c0_161] : memref<1x6x16x128xbf16, #tpu.memory_space<vmem>>, vector<1x6x16x128xbf16>
    %175 = vector.shape_cast %174 : vector<1x6x16x128xbf16> to vector<6x16x128xbf16>
    %176 = vector.shape_cast %173 : vector<6x16x128xbf16> to vector<1x6x16x128xbf16>
    tpu.vector_store %arg5[%c0_158, %c0_159, %c0_160, %c0_161], %176 {strides = array<i32>} : memref<1x6x16x128xbf16, #tpu.memory_space<vmem>>, vector<1x6x16x128xbf16>,
    return
  }
  func.func @transform_0(%arg0: i32, %arg1: i32) -> (i32, i32, i32, i32) {
    %c0_i32 = arith.constant 0 : i32
    %c0_i32_0 = arith.constant 0 : i32
    %c0_i32_1 = arith.constant 0 : i32
    %c0_i32_2 = arith.constant 0 : i32
    return %c0_i32, %c0_i32_0, %arg0, %c0_i32_1 : i32, i32, i32, i32
  }
  func.func @transform_1(%arg0: i32, %arg1: i32) -> (i32, i32, i32, i32) {
    %c0_i32 = arith.constant 0 : i32
    %c0_i32_0 = arith.constant 0 : i32
    %c0_i32_1 = arith.constant 0 : i32
    %c0_i32_2 = arith.constant 0 : i32
    %c0_i32_3 = arith.constant 0 : i32
    return %c0_i32, %c0_i32_0, %c0_i32_1, %c0_i32_2 : i32, i32, i32, i32
  }
  func.func @transform_2(%arg0: i32, %arg1: i32) -> (i32, i32) {
    %c0_i32 = arith.constant 0 : i32
    %c0_i32_0 = arith.constant 0 : i32
    %c0_i32_1 = arith.constant 0 : i32
    return %c0_i32, %c0_i32_0 : i32, i32
  }
  func.func @transform_3(%arg0: i32, %arg1: i32) -> (i32, i32, i32, i32) {
    %c0_i32 = arith.constant 0 : i32
    %c0_i32_0 = arith.constant 0 : i32
    %c0_i32_1 = arith.constant 0 : i32
    return %arg1, %c0_i32, %arg0, %c0_i32_0 : i32, i32, i32, i32
  }
}

module attributes {stable_mosaic.version = 11 : i64} {
  func.func @_conv3x3_hwnc_kernel(%arg0: i32, %arg1: i32, %arg2: memref<6x6x16x128xbf16, #tpu.memory_space<vmem>>, %arg3: memref<3x3x128x128xbf16, #tpu.memory_space<vmem>>, %arg4: memref<1x128xf32, #tpu.memory_space<vmem>>, %arg5: memref<1x4x16x128xf32, #tpu.memory_space<vmem>>) attributes {dimension_semantics = [#tpu.dimension_semantics<parallel>, #tpu.dimension_semantics<parallel>], iteration_bounds = array<i64: 1, 4>, scalar_prefetch = 0 : i64, scratch_operands = 0 : i64, tpu.core_type = #tpu.core_type<tc>, window_params = [{transform_indices = @transform_0, window_bounds = array<i64: 6, 6, 16, 128>}, {pipeline_mode = #tpu.pipeline_mode<synchronous>, transform_indices = @transform_1, window_bounds = array<i64: 3, 3, 128, 128>}, {pipeline_mode = #tpu.pipeline_mode<synchronous>, transform_indices = @transform_2, window_bounds = array<i64: 1, 128>}, {transform_indices = @transform_3, window_bounds = array<i64: 1, 4, 16, 128>}]} {
    %c1_i32 = arith.constant 1 : i32
    %0 = arith.muli %c1_i32, %arg1 : i32
    %c0_i32 = arith.constant 0 : i32
    %1 = arith.addi %0, %c0_i32 : i32
    %c0_i32_0 = arith.constant 0 : i32
    %2 = arith.addi %1, %c0_i32_0 : i32
    %3 = arith.index_cast %2 : i32 to index
    %c0 = arith.constant 0 : index
    %c0_1 = arith.constant 0 : index
    %c0_2 = arith.constant 0 : index
    %4 = vector.load %arg2[%3, %c0, %c0_1, %c0_2] : memref<6x6x16x128xbf16, #tpu.memory_space<vmem>>, vector<1x4x16x128xbf16>
    %5 = vector.shape_cast %4 : vector<1x4x16x128xbf16> to vector<4x16x128xbf16>
    %6 = vector.shape_cast %5 : vector<4x16x128xbf16> to vector<64x128xbf16>
    %c0_3 = arith.constant 0 : index
    %c0_4 = arith.constant 0 : index
    %c0_5 = arith.constant 0 : index
    %c0_6 = arith.constant 0 : index
    %7 = vector.load %arg3[%c0_3, %c0_4, %c0_5, %c0_6] : memref<3x3x128x128xbf16, #tpu.memory_space<vmem>>, vector<1x1x128x128xbf16>
    %8 = vector.shape_cast %7 : vector<1x1x128x128xbf16> to vector<128x128xbf16>
    %cst = arith.constant dense<0.000000e+00> : vector<64x128xf32>
    %9 = tpu.matmul %6, %8, %cst {dimension_numbers = #tpu.dot_dimension_numbers<[1], [0], [0], [1], [0, 0, 1, 1], [], []>} : vector<64x128xbf16>, vector<128x128xbf16>, vector<64x128xf32> -> vector<64x128xf32>
    %10 = arith.index_cast %2 : i32 to index
    %c1 = arith.constant 1 : index
    %c0_7 = arith.constant 0 : index
    %c0_8 = arith.constant 0 : index
    %11 = vector.load %arg2[%10, %c1, %c0_7, %c0_8] : memref<6x6x16x128xbf16, #tpu.memory_space<vmem>>, vector<1x4x16x128xbf16>
    %12 = vector.shape_cast %11 : vector<1x4x16x128xbf16> to vector<4x16x128xbf16>
    %13 = vector.shape_cast %12 : vector<4x16x128xbf16> to vector<64x128xbf16>
    %c0_9 = arith.constant 0 : index
    %c1_10 = arith.constant 1 : index
    %c0_11 = arith.constant 0 : index
    %c0_12 = arith.constant 0 : index
    %14 = vector.load %arg3[%c0_9, %c1_10, %c0_11, %c0_12] : memref<3x3x128x128xbf16, #tpu.memory_space<vmem>>, vector<1x1x128x128xbf16>
    %15 = vector.shape_cast %14 : vector<1x1x128x128xbf16> to vector<128x128xbf16>
    %cst_13 = arith.constant dense<0.000000e+00> : vector<64x128xf32>
    %16 = tpu.matmul %13, %15, %cst_13 {dimension_numbers = #tpu.dot_dimension_numbers<[1], [0], [0], [1], [0, 0, 1, 1], [], []>} : vector<64x128xbf16>, vector<128x128xbf16>, vector<64x128xf32> -> vector<64x128xf32>
    %17 = arith.addf %9, %16 : vector<64x128xf32>
    %18 = arith.index_cast %2 : i32 to index
    %c2 = arith.constant 2 : index
    %c0_14 = arith.constant 0 : index
    %c0_15 = arith.constant 0 : index
    %19 = vector.load %arg2[%18, %c2, %c0_14, %c0_15] : memref<6x6x16x128xbf16, #tpu.memory_space<vmem>>, vector<1x4x16x128xbf16>
    %20 = vector.shape_cast %19 : vector<1x4x16x128xbf16> to vector<4x16x128xbf16>
    %21 = vector.shape_cast %20 : vector<4x16x128xbf16> to vector<64x128xbf16>
    %c0_16 = arith.constant 0 : index
    %c2_17 = arith.constant 2 : index
    %c0_18 = arith.constant 0 : index
    %c0_19 = arith.constant 0 : index
    %22 = vector.load %arg3[%c0_16, %c2_17, %c0_18, %c0_19] : memref<3x3x128x128xbf16, #tpu.memory_space<vmem>>, vector<1x1x128x128xbf16>
    %23 = vector.shape_cast %22 : vector<1x1x128x128xbf16> to vector<128x128xbf16>
    %cst_20 = arith.constant dense<0.000000e+00> : vector<64x128xf32>
    %24 = tpu.matmul %21, %23, %cst_20 {dimension_numbers = #tpu.dot_dimension_numbers<[1], [0], [0], [1], [0, 0, 1, 1], [], []>} : vector<64x128xbf16>, vector<128x128xbf16>, vector<64x128xf32> -> vector<64x128xf32>
    %25 = arith.addf %17, %24 : vector<64x128xf32>
    %c1_i32_21 = arith.constant 1 : i32
    %26 = arith.muli %c1_i32_21, %arg1 : i32
    %c0_i32_22 = arith.constant 0 : i32
    %27 = arith.addi %26, %c0_i32_22 : i32
    %c1_i32_23 = arith.constant 1 : i32
    %28 = arith.addi %27, %c1_i32_23 : i32
    %29 = arith.index_cast %28 : i32 to index
    %c0_24 = arith.constant 0 : index
    %c0_25 = arith.constant 0 : index
    %c0_26 = arith.constant 0 : index
    %30 = vector.load %arg2[%29, %c0_24, %c0_25, %c0_26] : memref<6x6x16x128xbf16, #tpu.memory_space<vmem>>, vector<1x4x16x128xbf16>
    %31 = vector.shape_cast %30 : vector<1x4x16x128xbf16> to vector<4x16x128xbf16>
    %32 = vector.shape_cast %31 : vector<4x16x128xbf16> to vector<64x128xbf16>
    %c1_27 = arith.constant 1 : index
    %c0_28 = arith.constant 0 : index
    %c0_29 = arith.constant 0 : index
    %c0_30 = arith.constant 0 : index
    %33 = vector.load %arg3[%c1_27, %c0_28, %c0_29, %c0_30] : memref<3x3x128x128xbf16, #tpu.memory_space<vmem>>, vector<1x1x128x128xbf16>
    %34 = vector.shape_cast %33 : vector<1x1x128x128xbf16> to vector<128x128xbf16>
    %cst_31 = arith.constant dense<0.000000e+00> : vector<64x128xf32>
    %35 = tpu.matmul %32, %34, %cst_31 {dimension_numbers = #tpu.dot_dimension_numbers<[1], [0], [0], [1], [0, 0, 1, 1], [], []>} : vector<64x128xbf16>, vector<128x128xbf16>, vector<64x128xf32> -> vector<64x128xf32>
    %36 = arith.addf %25, %35 : vector<64x128xf32>
    %37 = arith.index_cast %28 : i32 to index
    %c1_32 = arith.constant 1 : index
    %c0_33 = arith.constant 0 : index
    %c0_34 = arith.constant 0 : index
    %38 = vector.load %arg2[%37, %c1_32, %c0_33, %c0_34] : memref<6x6x16x128xbf16, #tpu.memory_space<vmem>>, vector<1x4x16x128xbf16>
    %39 = vector.shape_cast %38 : vector<1x4x16x128xbf16> to vector<4x16x128xbf16>
    %40 = vector.shape_cast %39 : vector<4x16x128xbf16> to vector<64x128xbf16>
    %c1_35 = arith.constant 1 : index
    %c1_36 = arith.constant 1 : index
    %c0_37 = arith.constant 0 : index
    %c0_38 = arith.constant 0 : index
    %41 = vector.load %arg3[%c1_35, %c1_36, %c0_37, %c0_38] : memref<3x3x128x128xbf16, #tpu.memory_space<vmem>>, vector<1x1x128x128xbf16>
    %42 = vector.shape_cast %41 : vector<1x1x128x128xbf16> to vector<128x128xbf16>
    %cst_39 = arith.constant dense<0.000000e+00> : vector<64x128xf32>
    %43 = tpu.matmul %40, %42, %cst_39 {dimension_numbers = #tpu.dot_dimension_numbers<[1], [0], [0], [1], [0, 0, 1, 1], [], []>} : vector<64x128xbf16>, vector<128x128xbf16>, vector<64x128xf32> -> vector<64x128xf32>
    %44 = arith.addf %36, %43 : vector<64x128xf32>
    %45 = arith.index_cast %28 : i32 to index
    %c2_40 = arith.constant 2 : index
    %c0_41 = arith.constant 0 : index
    %c0_42 = arith.constant 0 : index
    %46 = vector.load %arg2[%45, %c2_40, %c0_41, %c0_42] : memref<6x6x16x128xbf16, #tpu.memory_space<vmem>>, vector<1x4x16x128xbf16>
    %47 = vector.shape_cast %46 : vector<1x4x16x128xbf16> to vector<4x16x128xbf16>
    %48 = vector.shape_cast %47 : vector<4x16x128xbf16> to vector<64x128xbf16>
    %c1_43 = arith.constant 1 : index
    %c2_44 = arith.constant 2 : index
    %c0_45 = arith.constant 0 : index
    %c0_46 = arith.constant 0 : index
    %49 = vector.load %arg3[%c1_43, %c2_44, %c0_45, %c0_46] : memref<3x3x128x128xbf16, #tpu.memory_space<vmem>>, vector<1x1x128x128xbf16>
    %50 = vector.shape_cast %49 : vector<1x1x128x128xbf16> to vector<128x128xbf16>
    %cst_47 = arith.constant dense<0.000000e+00> : vector<64x128xf32>
    %51 = tpu.matmul %48, %50, %cst_47 {dimension_numbers = #tpu.dot_dimension_numbers<[1], [0], [0], [1], [0, 0, 1, 1], [], []>} : vector<64x128xbf16>, vector<128x128xbf16>, vector<64x128xf32> -> vector<64x128xf32>
    %52 = arith.addf %44, %51 : vector<64x128xf32>
    %c1_i32_48 = arith.constant 1 : i32
    %53 = arith.muli %c1_i32_48, %arg1 : i32
    %c0_i32_49 = arith.constant 0 : i32
    %54 = arith.addi %53, %c0_i32_49 : i32
    %c2_i32 = arith.constant 2 : i32
    %55 = arith.addi %54, %c2_i32 : i32
    %56 = arith.index_cast %55 : i32 to index
    %c0_50 = arith.constant 0 : index
    %c0_51 = arith.constant 0 : index
    %c0_52 = arith.constant 0 : index
    %57 = vector.load %arg2[%56, %c0_50, %c0_51, %c0_52] : memref<6x6x16x128xbf16, #tpu.memory_space<vmem>>, vector<1x4x16x128xbf16>
    %58 = vector.shape_cast %57 : vector<1x4x16x128xbf16> to vector<4x16x128xbf16>
    %59 = vector.shape_cast %58 : vector<4x16x128xbf16> to vector<64x128xbf16>
    %c2_53 = arith.constant 2 : index
    %c0_54 = arith.constant 0 : index
    %c0_55 = arith.constant 0 : index
    %c0_56 = arith.constant 0 : index
    %60 = vector.load %arg3[%c2_53, %c0_54, %c0_55, %c0_56] : memref<3x3x128x128xbf16, #tpu.memory_space<vmem>>, vector<1x1x128x128xbf16>
    %61 = vector.shape_cast %60 : vector<1x1x128x128xbf16> to vector<128x128xbf16>
    %cst_57 = arith.constant dense<0.000000e+00> : vector<64x128xf32>
    %62 = tpu.matmul %59, %61, %cst_57 {dimension_numbers = #tpu.dot_dimension_numbers<[1], [0], [0], [1], [0, 0, 1, 1], [], []>} : vector<64x128xbf16>, vector<128x128xbf16>, vector<64x128xf32> -> vector<64x128xf32>
    %63 = arith.addf %52, %62 : vector<64x128xf32>
    %64 = arith.index_cast %55 : i32 to index
    %c1_58 = arith.constant 1 : index
    %c0_59 = arith.constant 0 : index
    %c0_60 = arith.constant 0 : index
    %65 = vector.load %arg2[%64, %c1_58, %c0_59, %c0_60] : memref<6x6x16x128xbf16, #tpu.memory_space<vmem>>, vector<1x4x16x128xbf16>
    %66 = vector.shape_cast %65 : vector<1x4x16x128xbf16> to vector<4x16x128xbf16>
    %67 = vector.shape_cast %66 : vector<4x16x128xbf16> to vector<64x128xbf16>
    %c2_61 = arith.constant 2 : index
    %c1_62 = arith.constant 1 : index
    %c0_63 = arith.constant 0 : index
    %c0_64 = arith.constant 0 : index
    %68 = vector.load %arg3[%c2_61, %c1_62, %c0_63, %c0_64] : memref<3x3x128x128xbf16, #tpu.memory_space<vmem>>, vector<1x1x128x128xbf16>
    %69 = vector.shape_cast %68 : vector<1x1x128x128xbf16> to vector<128x128xbf16>
    %cst_65 = arith.constant dense<0.000000e+00> : vector<64x128xf32>
    %70 = tpu.matmul %67, %69, %cst_65 {dimension_numbers = #tpu.dot_dimension_numbers<[1], [0], [0], [1], [0, 0, 1, 1], [], []>} : vector<64x128xbf16>, vector<128x128xbf16>, vector<64x128xf32> -> vector<64x128xf32>
    %71 = arith.addf %63, %70 : vector<64x128xf32>
    %72 = arith.index_cast %55 : i32 to index
    %c2_66 = arith.constant 2 : index
    %c0_67 = arith.constant 0 : index
    %c0_68 = arith.constant 0 : index
    %73 = vector.load %arg2[%72, %c2_66, %c0_67, %c0_68] : memref<6x6x16x128xbf16, #tpu.memory_space<vmem>>, vector<1x4x16x128xbf16>
    %74 = vector.shape_cast %73 : vector<1x4x16x128xbf16> to vector<4x16x128xbf16>
    %75 = vector.shape_cast %74 : vector<4x16x128xbf16> to vector<64x128xbf16>
    %c2_69 = arith.constant 2 : index
    %c2_70 = arith.constant 2 : index
    %c0_71 = arith.constant 0 : index
    %c0_72 = arith.constant 0 : index
    %76 = vector.load %arg3[%c2_69, %c2_70, %c0_71, %c0_72] : memref<3x3x128x128xbf16, #tpu.memory_space<vmem>>, vector<1x1x128x128xbf16>
    %77 = vector.shape_cast %76 : vector<1x1x128x128xbf16> to vector<128x128xbf16>
    %cst_73 = arith.constant dense<0.000000e+00> : vector<64x128xf32>
    %78 = tpu.matmul %75, %77, %cst_73 {dimension_numbers = #tpu.dot_dimension_numbers<[1], [0], [0], [1], [0, 0, 1, 1], [], []>} : vector<64x128xbf16>, vector<128x128xbf16>, vector<64x128xf32> -> vector<64x128xf32>
    %79 = arith.addf %71, %78 : vector<64x128xf32>
    %80 = vector.shape_cast %79 : vector<64x128xf32> to vector<4x16x128xf32>
    %c0_74 = arith.constant 0 : index
    %c0_75 = arith.constant 0 : index
    %81 = vector.load %arg4[%c0_74, %c0_75] : memref<1x128xf32, #tpu.memory_space<vmem>>, vector<1x128xf32>
    %82 = vector.shape_cast %81 : vector<1x128xf32> to vector<1x1x128xf32>
    %83 = vector.broadcast %82 : vector<1x1x128xf32> to vector<4x16x128xf32>
    %84 = arith.addf %80, %83 : vector<4x16x128xf32>
    %cst_76 = arith.constant 0.000000e+00 : f32
    %85 = vector.broadcast %cst_76 : f32 to vector<4x16x128xf32>
    %86 = arith.maximumf %84, %85 : vector<4x16x128xf32>
    %c0_77 = arith.constant 0 : index
    %c0_78 = arith.constant 0 : index
    %c0_79 = arith.constant 0 : index
    %c0_80 = arith.constant 0 : index
    %87 = vector.load %arg5[%c0_77, %c0_78, %c0_79, %c0_80] : memref<1x4x16x128xf32, #tpu.memory_space<vmem>>, vector<1x4x16x128xf32>
    %88 = vector.shape_cast %87 : vector<1x4x16x128xf32> to vector<4x16x128xf32>
    %89 = vector.shape_cast %86 : vector<4x16x128xf32> to vector<1x4x16x128xf32>
    tpu.vector_store %arg5[%c0_77, %c0_78, %c0_79, %c0_80], %89 {strides = array<i32>} : memref<1x4x16x128xf32, #tpu.memory_space<vmem>>, vector<1x4x16x128xf32>,
    return
  }
  func.func @transform_0(%arg0: i32, %arg1: i32) -> (i32, i32, i32, i32) {
    %c0_i32 = arith.constant 0 : i32
    %c0_i32_0 = arith.constant 0 : i32
    %c0_i32_1 = arith.constant 0 : i32
    %c0_i32_2 = arith.constant 0 : i32
    return %c0_i32, %c0_i32_0, %arg0, %c0_i32_1 : i32, i32, i32, i32
  }
  func.func @transform_1(%arg0: i32, %arg1: i32) -> (i32, i32, i32, i32) {
    %c0_i32 = arith.constant 0 : i32
    %c0_i32_0 = arith.constant 0 : i32
    %c0_i32_1 = arith.constant 0 : i32
    %c0_i32_2 = arith.constant 0 : i32
    %c0_i32_3 = arith.constant 0 : i32
    return %c0_i32, %c0_i32_0, %c0_i32_1, %c0_i32_2 : i32, i32, i32, i32
  }
  func.func @transform_2(%arg0: i32, %arg1: i32) -> (i32, i32) {
    %c0_i32 = arith.constant 0 : i32
    %c0_i32_0 = arith.constant 0 : i32
    %c0_i32_1 = arith.constant 0 : i32
    return %c0_i32, %c0_i32_0 : i32, i32
  }
  func.func @transform_3(%arg0: i32, %arg1: i32) -> (i32, i32, i32, i32) {
    %c0_i32 = arith.constant 0 : i32
    %c0_i32_0 = arith.constant 0 : i32
    %c0_i32_1 = arith.constant 0 : i32
    return %arg1, %c0_i32, %arg0, %c0_i32_0 : i32, i32, i32, i32
  }
}

module attributes {stable_mosaic.version = 11 : i64} {
  func.func @_fc_hwnc_kernel(%arg0: i32, %arg1: memref<4x4x16x128xf32, #tpu.memory_space<vmem>>, %arg2: memref<4x4x128x128xbf16, #tpu.memory_space<vmem>>, %arg3: memref<1x128xf32, #tpu.memory_space<vmem>>, %arg4: memref<16x128xf32, #tpu.memory_space<vmem>>) attributes {dimension_semantics = [#tpu.dimension_semantics<parallel>], iteration_bounds = array<i64: 1>, scalar_prefetch = 0 : i64, scratch_operands = 0 : i64, tpu.core_type = #tpu.core_type<tc>, window_params = [{transform_indices = @transform_0, window_bounds = array<i64: 4, 4, 16, 128>}, {pipeline_mode = #tpu.pipeline_mode<synchronous>, transform_indices = @transform_1, window_bounds = array<i64: 4, 4, 128, 128>}, {pipeline_mode = #tpu.pipeline_mode<synchronous>, transform_indices = @transform_2, window_bounds = array<i64: 1, 128>}, {transform_indices = @transform_3, window_bounds = array<i64: 16, 128>}]} {
    %c0 = arith.constant 0 : index
    %c0_0 = arith.constant 0 : index
    %c0_1 = arith.constant 0 : index
    %c0_2 = arith.constant 0 : index
    %0 = vector.load %arg1[%c0, %c0_0, %c0_1, %c0_2] : memref<4x4x16x128xf32, #tpu.memory_space<vmem>>, vector<1x1x16x128xf32>
    %1 = vector.shape_cast %0 : vector<1x1x16x128xf32> to vector<16x128xf32>
    %2 = arith.truncf %1 : vector<16x128xf32> to vector<16x128xbf16>
    %c0_3 = arith.constant 0 : index
    %c0_4 = arith.constant 0 : index
    %c0_5 = arith.constant 0 : index
    %c0_6 = arith.constant 0 : index
    %3 = vector.load %arg2[%c0_3, %c0_4, %c0_5, %c0_6] : memref<4x4x128x128xbf16, #tpu.memory_space<vmem>>, vector<1x1x128x128xbf16>
    %4 = vector.shape_cast %3 : vector<1x1x128x128xbf16> to vector<128x128xbf16>
    %cst = arith.constant dense<0.000000e+00> : vector<16x128xf32>
    %5 = tpu.matmul %2, %4, %cst {dimension_numbers = #tpu.dot_dimension_numbers<[1], [0], [0], [1], [0, 0, 1, 1], [], []>} : vector<16x128xbf16>, vector<128x128xbf16>, vector<16x128xf32> -> vector<16x128xf32>
    %c0_7 = arith.constant 0 : index
    %c1 = arith.constant 1 : index
    %c0_8 = arith.constant 0 : index
    %c0_9 = arith.constant 0 : index
    %6 = vector.load %arg1[%c0_7, %c1, %c0_8, %c0_9] : memref<4x4x16x128xf32, #tpu.memory_space<vmem>>, vector<1x1x16x128xf32>
    %7 = vector.shape_cast %6 : vector<1x1x16x128xf32> to vector<16x128xf32>
    %8 = arith.truncf %7 : vector<16x128xf32> to vector<16x128xbf16>
    %c0_10 = arith.constant 0 : index
    %c1_11 = arith.constant 1 : index
    %c0_12 = arith.constant 0 : index
    %c0_13 = arith.constant 0 : index
    %9 = vector.load %arg2[%c0_10, %c1_11, %c0_12, %c0_13] : memref<4x4x128x128xbf16, #tpu.memory_space<vmem>>, vector<1x1x128x128xbf16>
    %10 = vector.shape_cast %9 : vector<1x1x128x128xbf16> to vector<128x128xbf16>
    %cst_14 = arith.constant dense<0.000000e+00> : vector<16x128xf32>
    %11 = tpu.matmul %8, %10, %cst_14 {dimension_numbers = #tpu.dot_dimension_numbers<[1], [0], [0], [1], [0, 0, 1, 1], [], []>} : vector<16x128xbf16>, vector<128x128xbf16>, vector<16x128xf32> -> vector<16x128xf32>
    %12 = arith.addf %5, %11 : vector<16x128xf32>
    %c0_15 = arith.constant 0 : index
    %c2 = arith.constant 2 : index
    %c0_16 = arith.constant 0 : index
    %c0_17 = arith.constant 0 : index
    %13 = vector.load %arg1[%c0_15, %c2, %c0_16, %c0_17] : memref<4x4x16x128xf32, #tpu.memory_space<vmem>>, vector<1x1x16x128xf32>
    %14 = vector.shape_cast %13 : vector<1x1x16x128xf32> to vector<16x128xf32>
    %15 = arith.truncf %14 : vector<16x128xf32> to vector<16x128xbf16>
    %c0_18 = arith.constant 0 : index
    %c2_19 = arith.constant 2 : index
    %c0_20 = arith.constant 0 : index
    %c0_21 = arith.constant 0 : index
    %16 = vector.load %arg2[%c0_18, %c2_19, %c0_20, %c0_21] : memref<4x4x128x128xbf16, #tpu.memory_space<vmem>>, vector<1x1x128x128xbf16>
    %17 = vector.shape_cast %16 : vector<1x1x128x128xbf16> to vector<128x128xbf16>
    %cst_22 = arith.constant dense<0.000000e+00> : vector<16x128xf32>
    %18 = tpu.matmul %15, %17, %cst_22 {dimension_numbers = #tpu.dot_dimension_numbers<[1], [0], [0], [1], [0, 0, 1, 1], [], []>} : vector<16x128xbf16>, vector<128x128xbf16>, vector<16x128xf32> -> vector<16x128xf32>
    %19 = arith.addf %12, %18 : vector<16x128xf32>
    %c0_23 = arith.constant 0 : index
    %c3 = arith.constant 3 : index
    %c0_24 = arith.constant 0 : index
    %c0_25 = arith.constant 0 : index
    %20 = vector.load %arg1[%c0_23, %c3, %c0_24, %c0_25] : memref<4x4x16x128xf32, #tpu.memory_space<vmem>>, vector<1x1x16x128xf32>
    %21 = vector.shape_cast %20 : vector<1x1x16x128xf32> to vector<16x128xf32>
    %22 = arith.truncf %21 : vector<16x128xf32> to vector<16x128xbf16>
    %c0_26 = arith.constant 0 : index
    %c3_27 = arith.constant 3 : index
    %c0_28 = arith.constant 0 : index
    %c0_29 = arith.constant 0 : index
    %23 = vector.load %arg2[%c0_26, %c3_27, %c0_28, %c0_29] : memref<4x4x128x128xbf16, #tpu.memory_space<vmem>>, vector<1x1x128x128xbf16>
    %24 = vector.shape_cast %23 : vector<1x1x128x128xbf16> to vector<128x128xbf16>
    %cst_30 = arith.constant dense<0.000000e+00> : vector<16x128xf32>
    %25 = tpu.matmul %22, %24, %cst_30 {dimension_numbers = #tpu.dot_dimension_numbers<[1], [0], [0], [1], [0, 0, 1, 1], [], []>} : vector<16x128xbf16>, vector<128x128xbf16>, vector<16x128xf32> -> vector<16x128xf32>
    %26 = arith.addf %19, %25 : vector<16x128xf32>
    %c1_31 = arith.constant 1 : index
    %c0_32 = arith.constant 0 : index
    %c0_33 = arith.constant 0 : index
    %c0_34 = arith.constant 0 : index
    %27 = vector.load %arg1[%c1_31, %c0_32, %c0_33, %c0_34] : memref<4x4x16x128xf32, #tpu.memory_space<vmem>>, vector<1x1x16x128xf32>
    %28 = vector.shape_cast %27 : vector<1x1x16x128xf32> to vector<16x128xf32>
    %29 = arith.truncf %28 : vector<16x128xf32> to vector<16x128xbf16>
    %c1_35 = arith.constant 1 : index
    %c0_36 = arith.constant 0 : index
    %c0_37 = arith.constant 0 : index
    %c0_38 = arith.constant 0 : index
    %30 = vector.load %arg2[%c1_35, %c0_36, %c0_37, %c0_38] : memref<4x4x128x128xbf16, #tpu.memory_space<vmem>>, vector<1x1x128x128xbf16>
    %31 = vector.shape_cast %30 : vector<1x1x128x128xbf16> to vector<128x128xbf16>
    %cst_39 = arith.constant dense<0.000000e+00> : vector<16x128xf32>
    %32 = tpu.matmul %29, %31, %cst_39 {dimension_numbers = #tpu.dot_dimension_numbers<[1], [0], [0], [1], [0, 0, 1, 1], [], []>} : vector<16x128xbf16>, vector<128x128xbf16>, vector<16x128xf32> -> vector<16x128xf32>
    %33 = arith.addf %26, %32 : vector<16x128xf32>
    %c1_40 = arith.constant 1 : index
    %c1_41 = arith.constant 1 : index
    %c0_42 = arith.constant 0 : index
    %c0_43 = arith.constant 0 : index
    %34 = vector.load %arg1[%c1_40, %c1_41, %c0_42, %c0_43] : memref<4x4x16x128xf32, #tpu.memory_space<vmem>>, vector<1x1x16x128xf32>
    %35 = vector.shape_cast %34 : vector<1x1x16x128xf32> to vector<16x128xf32>
    %36 = arith.truncf %35 : vector<16x128xf32> to vector<16x128xbf16>
    %c1_44 = arith.constant 1 : index
    %c1_45 = arith.constant 1 : index
    %c0_46 = arith.constant 0 : index
    %c0_47 = arith.constant 0 : index
    %37 = vector.load %arg2[%c1_44, %c1_45, %c0_46, %c0_47] : memref<4x4x128x128xbf16, #tpu.memory_space<vmem>>, vector<1x1x128x128xbf16>
    %38 = vector.shape_cast %37 : vector<1x1x128x128xbf16> to vector<128x128xbf16>
    %cst_48 = arith.constant dense<0.000000e+00> : vector<16x128xf32>
    %39 = tpu.matmul %36, %38, %cst_48 {dimension_numbers = #tpu.dot_dimension_numbers<[1], [0], [0], [1], [0, 0, 1, 1], [], []>} : vector<16x128xbf16>, vector<128x128xbf16>, vector<16x128xf32> -> vector<16x128xf32>
    %40 = arith.addf %33, %39 : vector<16x128xf32>
    %c1_49 = arith.constant 1 : index
    %c2_50 = arith.constant 2 : index
    %c0_51 = arith.constant 0 : index
    %c0_52 = arith.constant 0 : index
    %41 = vector.load %arg1[%c1_49, %c2_50, %c0_51, %c0_52] : memref<4x4x16x128xf32, #tpu.memory_space<vmem>>, vector<1x1x16x128xf32>
    %42 = vector.shape_cast %41 : vector<1x1x16x128xf32> to vector<16x128xf32>
    %43 = arith.truncf %42 : vector<16x128xf32> to vector<16x128xbf16>
    %c1_53 = arith.constant 1 : index
    %c2_54 = arith.constant 2 : index
    %c0_55 = arith.constant 0 : index
    %c0_56 = arith.constant 0 : index
    %44 = vector.load %arg2[%c1_53, %c2_54, %c0_55, %c0_56] : memref<4x4x128x128xbf16, #tpu.memory_space<vmem>>, vector<1x1x128x128xbf16>
    %45 = vector.shape_cast %44 : vector<1x1x128x128xbf16> to vector<128x128xbf16>
    %cst_57 = arith.constant dense<0.000000e+00> : vector<16x128xf32>
    %46 = tpu.matmul %43, %45, %cst_57 {dimension_numbers = #tpu.dot_dimension_numbers<[1], [0], [0], [1], [0, 0, 1, 1], [], []>} : vector<16x128xbf16>, vector<128x128xbf16>, vector<16x128xf32> -> vector<16x128xf32>
    %47 = arith.addf %40, %46 : vector<16x128xf32>
    %c1_58 = arith.constant 1 : index
    %c3_59 = arith.constant 3 : index
    %c0_60 = arith.constant 0 : index
    %c0_61 = arith.constant 0 : index
    %48 = vector.load %arg1[%c1_58, %c3_59, %c0_60, %c0_61] : memref<4x4x16x128xf32, #tpu.memory_space<vmem>>, vector<1x1x16x128xf32>
    %49 = vector.shape_cast %48 : vector<1x1x16x128xf32> to vector<16x128xf32>
    %50 = arith.truncf %49 : vector<16x128xf32> to vector<16x128xbf16>
    %c1_62 = arith.constant 1 : index
    %c3_63 = arith.constant 3 : index
    %c0_64 = arith.constant 0 : index
    %c0_65 = arith.constant 0 : index
    %51 = vector.load %arg2[%c1_62, %c3_63, %c0_64, %c0_65] : memref<4x4x128x128xbf16, #tpu.memory_space<vmem>>, vector<1x1x128x128xbf16>
    %52 = vector.shape_cast %51 : vector<1x1x128x128xbf16> to vector<128x128xbf16>
    %cst_66 = arith.constant dense<0.000000e+00> : vector<16x128xf32>
    %53 = tpu.matmul %50, %52, %cst_66 {dimension_numbers = #tpu.dot_dimension_numbers<[1], [0], [0], [1], [0, 0, 1, 1], [], []>} : vector<16x128xbf16>, vector<128x128xbf16>, vector<16x128xf32> -> vector<16x128xf32>
    %54 = arith.addf %47, %53 : vector<16x128xf32>
    %c2_67 = arith.constant 2 : index
    %c0_68 = arith.constant 0 : index
    %c0_69 = arith.constant 0 : index
    %c0_70 = arith.constant 0 : index
    %55 = vector.load %arg1[%c2_67, %c0_68, %c0_69, %c0_70] : memref<4x4x16x128xf32, #tpu.memory_space<vmem>>, vector<1x1x16x128xf32>
    %56 = vector.shape_cast %55 : vector<1x1x16x128xf32> to vector<16x128xf32>
    %57 = arith.truncf %56 : vector<16x128xf32> to vector<16x128xbf16>
    %c2_71 = arith.constant 2 : index
    %c0_72 = arith.constant 0 : index
    %c0_73 = arith.constant 0 : index
    %c0_74 = arith.constant 0 : index
    %58 = vector.load %arg2[%c2_71, %c0_72, %c0_73, %c0_74] : memref<4x4x128x128xbf16, #tpu.memory_space<vmem>>, vector<1x1x128x128xbf16>
    %59 = vector.shape_cast %58 : vector<1x1x128x128xbf16> to vector<128x128xbf16>
    %cst_75 = arith.constant dense<0.000000e+00> : vector<16x128xf32>
    %60 = tpu.matmul %57, %59, %cst_75 {dimension_numbers = #tpu.dot_dimension_numbers<[1], [0], [0], [1], [0, 0, 1, 1], [], []>} : vector<16x128xbf16>, vector<128x128xbf16>, vector<16x128xf32> -> vector<16x128xf32>
    %61 = arith.addf %54, %60 : vector<16x128xf32>
    %c2_76 = arith.constant 2 : index
    %c1_77 = arith.constant 1 : index
    %c0_78 = arith.constant 0 : index
    %c0_79 = arith.constant 0 : index
    %62 = vector.load %arg1[%c2_76, %c1_77, %c0_78, %c0_79] : memref<4x4x16x128xf32, #tpu.memory_space<vmem>>, vector<1x1x16x128xf32>
    %63 = vector.shape_cast %62 : vector<1x1x16x128xf32> to vector<16x128xf32>
    %64 = arith.truncf %63 : vector<16x128xf32> to vector<16x128xbf16>
    %c2_80 = arith.constant 2 : index
    %c1_81 = arith.constant 1 : index
    %c0_82 = arith.constant 0 : index
    %c0_83 = arith.constant 0 : index
    %65 = vector.load %arg2[%c2_80, %c1_81, %c0_82, %c0_83] : memref<4x4x128x128xbf16, #tpu.memory_space<vmem>>, vector<1x1x128x128xbf16>
    %66 = vector.shape_cast %65 : vector<1x1x128x128xbf16> to vector<128x128xbf16>
    %cst_84 = arith.constant dense<0.000000e+00> : vector<16x128xf32>
    %67 = tpu.matmul %64, %66, %cst_84 {dimension_numbers = #tpu.dot_dimension_numbers<[1], [0], [0], [1], [0, 0, 1, 1], [], []>} : vector<16x128xbf16>, vector<128x128xbf16>, vector<16x128xf32> -> vector<16x128xf32>
    %68 = arith.addf %61, %67 : vector<16x128xf32>
    %c2_85 = arith.constant 2 : index
    %c2_86 = arith.constant 2 : index
    %c0_87 = arith.constant 0 : index
    %c0_88 = arith.constant 0 : index
    %69 = vector.load %arg1[%c2_85, %c2_86, %c0_87, %c0_88] : memref<4x4x16x128xf32, #tpu.memory_space<vmem>>, vector<1x1x16x128xf32>
    %70 = vector.shape_cast %69 : vector<1x1x16x128xf32> to vector<16x128xf32>
    %71 = arith.truncf %70 : vector<16x128xf32> to vector<16x128xbf16>
    %c2_89 = arith.constant 2 : index
    %c2_90 = arith.constant 2 : index
    %c0_91 = arith.constant 0 : index
    %c0_92 = arith.constant 0 : index
    %72 = vector.load %arg2[%c2_89, %c2_90, %c0_91, %c0_92] : memref<4x4x128x128xbf16, #tpu.memory_space<vmem>>, vector<1x1x128x128xbf16>
    %73 = vector.shape_cast %72 : vector<1x1x128x128xbf16> to vector<128x128xbf16>
    %cst_93 = arith.constant dense<0.000000e+00> : vector<16x128xf32>
    %74 = tpu.matmul %71, %73, %cst_93 {dimension_numbers = #tpu.dot_dimension_numbers<[1], [0], [0], [1], [0, 0, 1, 1], [], []>} : vector<16x128xbf16>, vector<128x128xbf16>, vector<16x128xf32> -> vector<16x128xf32>
    %75 = arith.addf %68, %74 : vector<16x128xf32>
    %c2_94 = arith.constant 2 : index
    %c3_95 = arith.constant 3 : index
    %c0_96 = arith.constant 0 : index
    %c0_97 = arith.constant 0 : index
    %76 = vector.load %arg1[%c2_94, %c3_95, %c0_96, %c0_97] : memref<4x4x16x128xf32, #tpu.memory_space<vmem>>, vector<1x1x16x128xf32>
    %77 = vector.shape_cast %76 : vector<1x1x16x128xf32> to vector<16x128xf32>
    %78 = arith.truncf %77 : vector<16x128xf32> to vector<16x128xbf16>
    %c2_98 = arith.constant 2 : index
    %c3_99 = arith.constant 3 : index
    %c0_100 = arith.constant 0 : index
    %c0_101 = arith.constant 0 : index
    %79 = vector.load %arg2[%c2_98, %c3_99, %c0_100, %c0_101] : memref<4x4x128x128xbf16, #tpu.memory_space<vmem>>, vector<1x1x128x128xbf16>
    %80 = vector.shape_cast %79 : vector<1x1x128x128xbf16> to vector<128x128xbf16>
    %cst_102 = arith.constant dense<0.000000e+00> : vector<16x128xf32>
    %81 = tpu.matmul %78, %80, %cst_102 {dimension_numbers = #tpu.dot_dimension_numbers<[1], [0], [0], [1], [0, 0, 1, 1], [], []>} : vector<16x128xbf16>, vector<128x128xbf16>, vector<16x128xf32> -> vector<16x128xf32>
    %82 = arith.addf %75, %81 : vector<16x128xf32>
    %c3_103 = arith.constant 3 : index
    %c0_104 = arith.constant 0 : index
    %c0_105 = arith.constant 0 : index
    %c0_106 = arith.constant 0 : index
    %83 = vector.load %arg1[%c3_103, %c0_104, %c0_105, %c0_106] : memref<4x4x16x128xf32, #tpu.memory_space<vmem>>, vector<1x1x16x128xf32>
    %84 = vector.shape_cast %83 : vector<1x1x16x128xf32> to vector<16x128xf32>
    %85 = arith.truncf %84 : vector<16x128xf32> to vector<16x128xbf16>
    %c3_107 = arith.constant 3 : index
    %c0_108 = arith.constant 0 : index
    %c0_109 = arith.constant 0 : index
    %c0_110 = arith.constant 0 : index
    %86 = vector.load %arg2[%c3_107, %c0_108, %c0_109, %c0_110] : memref<4x4x128x128xbf16, #tpu.memory_space<vmem>>, vector<1x1x128x128xbf16>
    %87 = vector.shape_cast %86 : vector<1x1x128x128xbf16> to vector<128x128xbf16>
    %cst_111 = arith.constant dense<0.000000e+00> : vector<16x128xf32>
    %88 = tpu.matmul %85, %87, %cst_111 {dimension_numbers = #tpu.dot_dimension_numbers<[1], [0], [0], [1], [0, 0, 1, 1], [], []>} : vector<16x128xbf16>, vector<128x128xbf16>, vector<16x128xf32> -> vector<16x128xf32>
    %89 = arith.addf %82, %88 : vector<16x128xf32>
    %c3_112 = arith.constant 3 : index
    %c1_113 = arith.constant 1 : index
    %c0_114 = arith.constant 0 : index
    %c0_115 = arith.constant 0 : index
    %90 = vector.load %arg1[%c3_112, %c1_113, %c0_114, %c0_115] : memref<4x4x16x128xf32, #tpu.memory_space<vmem>>, vector<1x1x16x128xf32>
    %91 = vector.shape_cast %90 : vector<1x1x16x128xf32> to vector<16x128xf32>
    %92 = arith.truncf %91 : vector<16x128xf32> to vector<16x128xbf16>
    %c3_116 = arith.constant 3 : index
    %c1_117 = arith.constant 1 : index
    %c0_118 = arith.constant 0 : index
    %c0_119 = arith.constant 0 : index
    %93 = vector.load %arg2[%c3_116, %c1_117, %c0_118, %c0_119] : memref<4x4x128x128xbf16, #tpu.memory_space<vmem>>, vector<1x1x128x128xbf16>
    %94 = vector.shape_cast %93 : vector<1x1x128x128xbf16> to vector<128x128xbf16>
    %cst_120 = arith.constant dense<0.000000e+00> : vector<16x128xf32>
    %95 = tpu.matmul %92, %94, %cst_120 {dimension_numbers = #tpu.dot_dimension_numbers<[1], [0], [0], [1], [0, 0, 1, 1], [], []>} : vector<16x128xbf16>, vector<128x128xbf16>, vector<16x128xf32> -> vector<16x128xf32>
    %96 = arith.addf %89, %95 : vector<16x128xf32>
    %c3_121 = arith.constant 3 : index
    %c2_122 = arith.constant 2 : index
    %c0_123 = arith.constant 0 : index
    %c0_124 = arith.constant 0 : index
    %97 = vector.load %arg1[%c3_121, %c2_122, %c0_123, %c0_124] : memref<4x4x16x128xf32, #tpu.memory_space<vmem>>, vector<1x1x16x128xf32>
    %98 = vector.shape_cast %97 : vector<1x1x16x128xf32> to vector<16x128xf32>
    %99 = arith.truncf %98 : vector<16x128xf32> to vector<16x128xbf16>
    %c3_125 = arith.constant 3 : index
    %c2_126 = arith.constant 2 : index
    %c0_127 = arith.constant 0 : index
    %c0_128 = arith.constant 0 : index
    %100 = vector.load %arg2[%c3_125, %c2_126, %c0_127, %c0_128] : memref<4x4x128x128xbf16, #tpu.memory_space<vmem>>, vector<1x1x128x128xbf16>
    %101 = vector.shape_cast %100 : vector<1x1x128x128xbf16> to vector<128x128xbf16>
    %cst_129 = arith.constant dense<0.000000e+00> : vector<16x128xf32>
    %102 = tpu.matmul %99, %101, %cst_129 {dimension_numbers = #tpu.dot_dimension_numbers<[1], [0], [0], [1], [0, 0, 1, 1], [], []>} : vector<16x128xbf16>, vector<128x128xbf16>, vector<16x128xf32> -> vector<16x128xf32>
    %103 = arith.addf %96, %102 : vector<16x128xf32>
    %c3_130 = arith.constant 3 : index
    %c3_131 = arith.constant 3 : index
    %c0_132 = arith.constant 0 : index
    %c0_133 = arith.constant 0 : index
    %104 = vector.load %arg1[%c3_130, %c3_131, %c0_132, %c0_133] : memref<4x4x16x128xf32, #tpu.memory_space<vmem>>, vector<1x1x16x128xf32>
    %105 = vector.shape_cast %104 : vector<1x1x16x128xf32> to vector<16x128xf32>
    %106 = arith.truncf %105 : vector<16x128xf32> to vector<16x128xbf16>
    %c3_134 = arith.constant 3 : index
    %c3_135 = arith.constant 3 : index
    %c0_136 = arith.constant 0 : index
    %c0_137 = arith.constant 0 : index
    %107 = vector.load %arg2[%c3_134, %c3_135, %c0_136, %c0_137] : memref<4x4x128x128xbf16, #tpu.memory_space<vmem>>, vector<1x1x128x128xbf16>
    %108 = vector.shape_cast %107 : vector<1x1x128x128xbf16> to vector<128x128xbf16>
    %cst_138 = arith.constant dense<0.000000e+00> : vector<16x128xf32>
    %109 = tpu.matmul %106, %108, %cst_138 {dimension_numbers = #tpu.dot_dimension_numbers<[1], [0], [0], [1], [0, 0, 1, 1], [], []>} : vector<16x128xbf16>, vector<128x128xbf16>, vector<16x128xf32> -> vector<16x128xf32>
    %110 = arith.addf %103, %109 : vector<16x128xf32>
    %c0_139 = arith.constant 0 : index
    %c0_140 = arith.constant 0 : index
    %111 = vector.load %arg3[%c0_139, %c0_140] : memref<1x128xf32, #tpu.memory_space<vmem>>, vector<1x128xf32>
    %112 = vector.broadcast %111 : vector<1x128xf32> to vector<16x128xf32>
    %113 = arith.addf %110, %112 : vector<16x128xf32>
    %c0_141 = arith.constant 0 : index
    %c0_142 = arith.constant 0 : index
    %114 = vector.load %arg4[%c0_141, %c0_142] : memref<16x128xf32, #tpu.memory_space<vmem>>, vector<16x128xf32>
    tpu.vector_store %arg4[%c0_141, %c0_142], %113 {strides = array<i32>} : memref<16x128xf32, #tpu.memory_space<vmem>>, vector<16x128xf32>,
    return
  }
  func.func @transform_0(%arg0: i32) -> (i32, i32, i32, i32) {
    %c0_i32 = arith.constant 0 : i32
    %c0_i32_0 = arith.constant 0 : i32
    %c0_i32_1 = arith.constant 0 : i32
    %c0_i32_2 = arith.constant 0 : i32
    return %c0_i32, %c0_i32_0, %arg0, %c0_i32_1 : i32, i32, i32, i32
  }
  func.func @transform_1(%arg0: i32) -> (i32, i32, i32, i32) {
    %c0_i32 = arith.constant 0 : i32
    %c0_i32_0 = arith.constant 0 : i32
    %c0_i32_1 = arith.constant 0 : i32
    %c0_i32_2 = arith.constant 0 : i32
    %c0_i32_3 = arith.constant 0 : i32
    return %c0_i32, %c0_i32_0, %c0_i32_1, %c0_i32_2 : i32, i32, i32, i32
  }
  func.func @transform_2(%arg0: i32) -> (i32, i32) {
    %c0_i32 = arith.constant 0 : i32
    %c0_i32_0 = arith.constant 0 : i32
    %c0_i32_1 = arith.constant 0 : i32
    return %c0_i32, %c0_i32_0 : i32, i32
  }
  func.func @transform_3(%arg0: i32) -> (i32, i32) {
    %c0_i32 = arith.constant 0 : i32
    %c0_i32_0 = arith.constant 0 : i32
    return %arg0, %c0_i32 : i32, i32
  }
}

</mosaic_0001>

<bundles_post_ra>
// kernel: cnncifar_forward.6
= control target key start
LH: loop header
LB: loop body
LE: loop exit
PB: predicated region body
PF: predicated region fallthrough
CT: control target
= control target key end

     0   :  { %s2785_s12 = smov 0   ;;  %s2787_s13 = smov 0   ;;  %s3080_s0 = inlined_call_operand.vmem [shape: bf16[6,6,16,128], index: 0, kind: input, shape index: {}]   ;;  %s3081_s1 = inlined_call_operand.vmem [shape: bf16[3,3,128,128], index: 1, kind: input, shape index: {}]   ;;  %s3082_s2 = inlined_call_operand.vmem [shape: f32[1,128], index: 2, kind: input, shape index: {}]   ;;  %s3083_s3 = inlined_call_operand.vmem [shape: f32[4,4,16,128], index: 3, kind: output, shape index: {}]  }
   0x1   :  { %s2789_s14 = smov 0  }
   0x2 LB: > { %s22_s15 = sadd.s32 1, %s2759_s13  ;;  %p1890_p0 = scmp.ge.s32.totalorder %s2763_s14, 1  ;;  %s2763_s14 = sphi %s2789_s14, %s13_s14   ;;  %s2759_s13 = sphi %s2787_s13, %s3085_s13   ;;  %s2755_s12 = sphi %s2785_s12, %s3084_s12  }
   0x3   : > { %p23_p1 = scmp.ge.s32.totalorder %s22_s15, 4  ;;  %p152_p2 = scmp.lt.s32.totalorder %s2763_s14, 5 }
   0x5   : > { %s3087_s15 = smov (%p23_p1, %s22_s15), 0  ;;  %p153_p3 = pnand %p1890_p0, %p152_p2 }
   0x6   : > { %v2633_v0 = vld [vmem:[%s3081_s1 + $0x40] sm:$0xff] (!%p153_p3)   ;;  %v2635_v2 = vld [vmem:[%s3081_s1 + $0x48] sm:$0xff] (!%p153_p3)   ;;  %v2637_v4 = vld [vmem:[%s3081_s1 + $0x50] sm:$0xff] (!%p153_p3)   ;;  %s2204_s5 = smul.u32 (!%p153_p3), 48, %s2755_s12  ;;  %p187_p4 = scmp.lt.s32.totalorder (!%p153_p3), %s2755_s12, 3 }
   0x7   : > { %156 = sbr.rel (%p153_p3) target bundleno = 390 (0x186), region = 32  ;;  %v2634_v1 = vld [vmem:[%s3081_s1 + $0x100] sm:$0xff] (!%p153_p3)   ;;  %2313 = vmatprep.subr.bf16.mxu1 (!%p153_p3), %v2633_v0  ;;  %v2636_v3 = vld [vmem:[%s3081_s1 + $0x108] sm:$0xff] (!%p153_p3)   ;;  %v2638_v5 = vld [vmem:[%s3081_s1 + $0x110] sm:$0xff] (!%p153_p3)  }
   0x8   : > { %2409 = vmatprep.subr.bf16.mxu0 (!%p153_p3), %v2634_v1  ;;  %2314 = vmatpush3.bf16.msra.mxu1 (!%p153_p3), %v2633_v0  ;;  %v2639_v6 = vld [vmem:[%s3081_s1 + $0x58] sm:$0xff] (!%p153_p3)   ;;  %v2641_v8 = vld [vmem:[%s3081_s1 + $0x60] sm:$0xff] (!%p153_p3)   ;;  %s2839_s16 = scalar_lea.vmem (!%p153_p3), %s3080_s0, %s2204_s5  ;;  %v2643_v10 = vld [vmem:[%s3081_s1 + $0x68] sm:$0xff] (!%p153_p3)  }
   0x9   : > { %2410 = vmatpush3.bf16.msra.mxu0 (!%p153_p3), %v2634_v1  ;;  %2315 = vmatprep.subr.bf16.mxu1 (!%p153_p3), %v2635_v2  ;;  %v2640_v7 = vld [vmem:[%s3081_s1 + $0x118] sm:$0xff] (!%p153_p3)   ;;  %v2642_v9 = vld [vmem:[%s3081_s1 + $0x120] sm:$0xff] (!%p153_p3)   ;;  %v2649_v11 = vld [vmem:[%s2839_s16 + $0x8] sm:$0xff] (!%p153_p3)  }
   0xa   : > { %2411 = vmatprep.subr.bf16.mxu0 (!%p153_p3), %v2636_v3  ;;  %v2644_v12 = vld [vmem:[%s3081_s1 + $0x128] sm:$0xff] (!%p153_p3)   ;;  %2329 = vmatprep.mubr.bf16.mxu1 (!%p153_p3), %v2649_v11  ;;  %v2651_v13 = vld [vmem:[%s2839_s16 + $0x38] sm:$0xff] (!%p153_p3)   ;;  %v2645_v14 = vld [vmem:[%s3081_s1 + $0x70] sm:$0xff] (!%p153_p3)  }
   0xb   : > { %v2646_v15 = vld [vmem:[%s3081_s1 + $0x130] sm:$0xff] (!%p153_p3)   ;;  %2425 = vmatprep.mubr.bf16.mxu0 (!%p153_p3), %v2651_v13  ;;  %v2647_v16 = vld [vmem:[%s3081_s1 + $0x78] sm:$0xff] (!%p153_p3)   ;;  %v2650_v18 = vld [vmem:[%s3081_s1] sm:$0xff] (!%p153_p3)  }
   0xc   : > { %2316 = vmatpush3.bf16.msra.mxu1 (!%p153_p3), %v2635_v2  ;;  %v2648_v17 = vld [vmem:[%s3081_s1 + $0x138] sm:$0xff] (!%p153_p3)   ;;  %v2652_v19 = vld [vmem:[%s3081_s1 + $0x140] sm:$0xff] (!%p153_p3)   ;;  %v2653_v20 = vld [vmem:[%s2839_s16 + $0x10] sm:$0xff] (!%p153_p3)  }
   0xd   : > { %2412 = vmatpush3.bf16.msra.mxu0 (!%p153_p3), %v2636_v3  ;;  %2317 = vmatprep.subr.bf16.mxu1 (!%p153_p3), %v2637_v4  ;;  %v2654_v21 = vld [vmem:[%s2839_s16 + $0x40] sm:$0xff] (!%p153_p3)   ;;  %v2655_v22 = vld [vmem:[%s3081_s1 + $0x8] sm:$0xff] (!%p153_p3)   ;;  %v2665_v24 = vld [vmem:[%s2839_s16 + $0x18] sm:$0xff] (!%p153_p3)  }
   0xe   : > { %2413 = vmatprep.subr.bf16.mxu0 %v2638_v5  ;;  %v2656_v23 = vld [vmem:[%s3081_s1 + $0x148] sm:$0xff]   ;;  %v2657_v26 = vld [vmem:[%s3081_s1 + $0x10] sm:$0xff]   ;;  %v2659_v28 = vld [vmem:[%s3081_s1 + $0x18] sm:$0xff]   ;;  %s3089_s12 = smov (!%p187_p4, %s2755_s12), 3 }
   0xf   : > { %v2667_v25 = vld [vmem:[%s2839_s16 + $0x48] sm:$0xff]   ;;  %v2658_v27 = vld [vmem:[%s3081_s1 + $0x150] sm:$0xff]   ;;  %v2669_v29 = vld [vmem:[%s2839_s16 + $0x20] sm:$0xff]   ;;  %s2203_s5 = sshll.u32 %s3089_s12, 6 }
  0x10   : > { %2318 = vmatpush3.bf16.msra.mxu1 %v2637_v4  ;;  %v2670_v30 = vld [vmem:[%s2839_s16 + $0x50] sm:$0xff]   ;;  %v2660_v31 = vld [vmem:[%s3081_s1 + $0x158] sm:$0xff]   ;;  %v2673_v32 = vld [vmem:[%s2839_s16] sm:$0xff]   ;;  %s194_s8 = scalar_lea.vmem %s3083_s3, %s2203_s5 }
  0x11   : > { %2414 = vmatpush3.bf16.msra.mxu0 %v2638_v5  ;;  %2319 = vmatprep.subr.bf16.mxu1 %v2639_v6  ;;  %v2675_v33 = vld [vmem:[%s2839_s16 + $0x40] sm:$0xff]   ;;  %v2663_v36 = vld [vmem:[%s3081_s1 + $0x28] sm:$0xff]   ;;  %v2666_v38 = vld [vmem:[%s3081_s1 + $0x30] sm:$0xff]  }
  0x12   : > { %2415 = vmatprep.subr.bf16.mxu0 %v2640_v7  ;;  %v2661_v34 = vld [vmem:[%s3081_s1 + $0x20] sm:$0xff]   ;;  %v2664_v37 = vld [vmem:[%s3081_s1 + $0x168] sm:$0xff]   ;;  %v2668_v39 = vld [vmem:[%s3081_s1 + $0x170] sm:$0xff]  }
  0x13   : > { %v2662_v35 = vld [vmem:[%s3081_s1 + $0x160] sm:$0xff]   ;;  %v2671_v40 = vld [vmem:[%s3081_s1 + $0x38] sm:$0xff]   ;;  %v2677_v44 = vld [vmem:[%s2839_s16 + $0x8] sm:$0xff]  }
  0x14   : > { %2320 = vmatpush3.bf16.msra.mxu1 %v2639_v6  ;;  %v2672_v41 = vld [vmem:[%s3081_s1 + $0x178] sm:$0xff]   ;;  %v2674_v42 = vld [vmem:[%s3081_s1 + $0x80] sm:$0xff]   ;;  %v2678_v45 = vld [vmem:[%s2839_s16 + $0x48] sm:$0xff]  }
  0x15   : > { %2416 = vmatpush3.bf16.msra.mxu0 %v2640_v7  ;;  %2321 = vmatprep.subr.bf16.mxu1 %v2641_v8  ;;  %v2676_v43 = vld [vmem:[%s3081_s1 + $0x180] sm:$0xff]   ;;  %v2679_v46 = vld [vmem:[%s3081_s1 + $0x88] sm:$0xff]   ;;  %v2689_v48 = vld [vmem:[%s2839_s16 + $0x10] sm:$0xff]  }
  0x16   : > { %2417 = vmatprep.subr.bf16.mxu0 %v2642_v9  ;;  %v2680_v47 = vld [vmem:[%s3081_s1 + $0x188] sm:$0xff]   ;;  %v2691_v49 = vld [vmem:[%s2839_s16 + $0x50] sm:$0xff]   ;;  %v2683_v52 = vld [vmem:[%s3081_s1 + $0x98] sm:$0xff]  }
  0x17   : > { %v2681_v50 = vld [vmem:[%s3081_s1 + $0x90] sm:$0xff]   ;;  %v2693_v53 = vld [vmem:[%s2839_s16 + $0x18] sm:$0xff]   ;;  %v2699_v57 = vld [vmem:[%s2839_s16 + $0x60] sm:$0xff]  }
  0x18   : > { %2322 = vmatpush3.bf16.msra.mxu1 %v2641_v8  ;;  %v2682_v51 = vld [vmem:[%s3081_s1 + $0x190] sm:$0xff]   ;;  %v2694_v54 = vld [vmem:[%s2839_s16 + $0x58] sm:$0xff]   ;;  %v2685_v58 = vld [vmem:[%s3081_s1 + $0xa0] sm:$0xff]  }
  0x19   : > { %2418 = vmatpush3.bf16.msra.mxu0 %v2642_v9  ;;  %2323 = vmatprep.subr.bf16.mxu1 %v2643_v10  ;;  %v2684_v55 = vld [vmem:[%s3081_s1 + $0x198] sm:$0xff]   ;;  %v2697_v56 = vld [vmem:[%s2839_s16 + $0x10] sm:$0xff]   ;;  %v2686_v59 = vld [vmem:[%s3081_s1 + $0x1a0] sm:$0xff]  }
  0x1a   : > { %2419 = vmatprep.subr.bf16.mxu0 %v2644_v12  ;;  %v2687_v60 = vld [vmem:[%s3081_s1 + $0xa8] sm:$0xff]   ;;  %v2690_v62 = vld [vmem:[%s3081_s1 + $0xb0] sm:$0xff]   ;;  %v2695_v0 = vld [vmem:[%s3081_s1 + $0xb8] sm:$0xff]  }
  0x1b   : > { %v2688_v61 = vld [vmem:[%s3081_s1 + $0x1a8] sm:$0xff]   ;;  %v2692_v63 = vld [vmem:[%s3081_s1 + $0x1b0] sm:$0xff]   ;;  %v2696_v1 = vld [vmem:[%s3081_s1 + $0x1b8] sm:$0xff]  }
  0x1c   : > { %2324 = vmatpush3.bf16.msra.mxu1 %v2643_v10  ;;  %v2698_v2 = vld [vmem:[%s3081_s1 + $0xc0] sm:$0xff]   ;;  %v2701_v4 = vld [vmem:[%s2839_s16 + $0x18] sm:$0xff]   ;;  %v2702_v5 = vld [vmem:[%s2839_s16 + $0x68] sm:$0xff]  }
  0x1d   : > { %2420 = vmatpush3.bf16.msra.mxu0 %v2644_v12  ;;  %2325 = vmatprep.subr.bf16.mxu1 %v2645_v14  ;;  %v2700_v3 = vld [vmem:[%s3081_s1 + $0x1c0] sm:$0xff]   ;;  %v2703_v6 = vld [vmem:[%s3081_s1 + $0xc8] sm:$0xff]   ;;  %v2714_v9 = vld [vmem:[%s2839_s16 + $0x70] sm:$0xff]  }
  0x1e   : > { %2421 = vmatprep.subr.bf16.mxu0 %v2646_v15  ;;  %v2704_v7 = vld [vmem:[%s3081_s1 + $0x1c8] sm:$0xff]   ;;  %v2713_v8 = vld [vmem:[%s2839_s16 + $0x20] sm:$0xff]   ;;  %v2705_v10 = vld [vmem:[%s3081_s1 + $0xd0] sm:$0xff]  }
  0x1f   : > { %v2706_v11 = vld [vmem:[%s3081_s1 + $0x1d0] sm:$0xff]   ;;  %v2707_v12 = vld [vmem:[%s3081_s1 + $0xd8] sm:$0xff]   ;;  %v2715_v13 = vld [vmem:[%s2839_s16 + $0x28] sm:$0xff]  }
  0x20   : > { %2326 = vmatpush3.bf16.msra.mxu1 %v2645_v14  ;;  %v2717_v14 = vld [vmem:[%s2839_s16 + $0x78] sm:$0xff]  }
  0x21   : > { %2422 = vmatpush3.bf16.msra.mxu0 %v2646_v15  ;;  %2327 = vmatprep.subr.bf16.mxu1 %v2647_v16  ;;  %v2708_v15 = vld [vmem:[%s3081_s1 + $0x1d8] sm:$0xff]  }
  0x22   : > { %2423 = vmatprep.subr.bf16.mxu0 %v2648_v17 }
  0x24   : > { %2328 = vmatpush3.bf16.msra.mxu1 %v2647_v16  ;;  %v2721_v16 = vld [vmem:[%s2839_s16 + $0x30] sm:$0xff]  }
  0x25   : > { %2424 = vmatpush3.bf16.msra.mxu0 %v2648_v17  ;;  %2337 = vmatprep.subr.bf16.mxu1 %v2650_v18  ;;  %v2722_v17 = vld [vmem:[%s2839_s16 + $0x68] sm:$0xff]  }
  0x26   : > { %2433 = vmatprep.subr.bf16.mxu0 %v2652_v19 }
  0x27   : > { %2330 = vmatmul.mubr.bf16.vlgmr.msra.gmra.mrb[0].mxu1 %v2653_v20  ;;  %v2711_v20 = vld [vmem:[%s3081_s1 + $0xe8] sm:$0xff]  }
  0x28   : > { %2338 = vmatpush3.bf16.msra.mxu1 %v2650_v18  ;;  %2426 = vmatmul.mubr.bf16.vlgmr.msra.gmra.mrb[0].mxu0 %v2654_v21  ;;  %v2709_v18 = vld [vmem:[%s3081_s1 + $0xe0] sm:$0xff]   ;;  %v2712_v21 = vld [vmem:[%s3081_s1 + $0x1e8] sm:$0xff]  }
  0x29   : > { %2434 = vmatpush3.bf16.msra.mxu0 %v2652_v19  ;;  %2339 = vmatprep.subr.bf16.mxu1 %v2655_v22  ;;  %v2710_v19 = vld [vmem:[%s3081_s1 + $0x1e0] sm:$0xff]  }
  0x2a   : > { %2435 = vmatprep.subr.bf16.mxu0 %v2656_v23  ;;  %2333 = vmatprep.mubr.bf16.mxu1 %v2665_v24  ;;  %v2719_v24 = vld [vmem:[%s3081_s1 + $0xf8] sm:$0xff]  }
  0x2b   : > { %2429 = vmatprep.mubr.bf16.mxu0 %v2667_v25  ;;  %v2720_v25 = vld [vmem:[%s3081_s1 + $0x1f8] sm:$0xff]  }
  0x2c   : > { %2340 = vmatpush3.bf16.msra.mxu1 %v2655_v22  ;;  %v2716_v22 = vld [vmem:[%s3081_s1 + $0xf0] sm:$0xff]  }
  0x2d   : > { %2436 = vmatpush3.bf16.msra.mxu0 %v2656_v23  ;;  %2341 = vmatprep.subr.bf16.mxu1 %v2657_v26  ;;  %v2718_v23 = vld [vmem:[%s3081_s1 + $0x1f0] sm:$0xff]  }
  0x2e   : > { %2437 = vmatprep.subr.bf16.mxu0 %v2658_v27 }
  0x2f   : > { %2334 = vmatmul.mubr.bf16.gmra.mrb[4].mxu1 %v2669_v29  ;;  %v2726_v29 = vld [vmem:[%s3081_s1 + $0x208] sm:$0xff]  }
  0x30   : > { %2342 = vmatpush3.bf16.msra.mxu1 %v2657_v26  ;;  %2430 = vmatmul.mubr.bf16.gmra.mrb[4].mxu0 %v2670_v30  ;;  %v2725_v26 = vld [vmem:[%s3081_s1 + $0x200] sm:$0xff]  }
  0x31   : > { %2438 = vmatpush3.bf16.msra.mxu0 %v2658_v27  ;;  %2343 = vmatprep.subr.bf16.mxu1 %v2659_v28  ;;  %v2723_v27 = vld [vmem:[%s2839_s16 + $0x38] sm:$0xff]   ;;  %v2727_v30 = vld [vmem:[%s2839_s16 + $0x40] sm:$0xff]  }
  0x32   : > { %2439 = vmatprep.subr.bf16.mxu0 %v2660_v31  ;;  %2353 = vmatprep.mubr.bf16.mxu1 %v2673_v32  ;;  %v2731_v32 = vld [vmem:[%s3081_s1 + $0x210] sm:$0xff]  }
  0x33   : > { %2449 = vmatprep.mubr.bf16.mxu0 %v2675_v33  ;;  %v2729_v33 = vld [vmem:[%s2839_s16 + $0x48] sm:$0xff]  }
  0x34   : > { %2344 = vmatpush3.bf16.msra.mxu1 %v2659_v28  ;;  %v2724_v28 = vld [vmem:[%s2839_s16 + $0x70] sm:$0xff]  }
  0x35   : > { %2440 = vmatpush3.bf16.msra.mxu0 %v2660_v31  ;;  %2345 = vmatprep.subr.bf16.mxu1 %v2661_v34  ;;  %v2728_v31 = vld [vmem:[%s2839_s16 + $0x78] sm:$0xff]  }
  0x36   : > { %2441 = vmatprep.subr.bf16.mxu0 %v2662_v35 }
  0x38   : > { %2346 = vmatpush3.bf16.msra.mxu1 %v2661_v34  ;;  %v2730_v34 = vld [vmem:[%s2839_s16 + $0x80] sm:$0xff]  }
  0x39   : > { %2442 = vmatpush3.bf16.msra.mxu0 %v2662_v35  ;;  %2347 = vmatprep.subr.bf16.mxu1 %v2663_v36  ;;  %v2732_v35 = vld [vmem:[%s3081_s1 + $0x218] sm:$0xff]  }
  0x3a   : > { %2443 = vmatprep.subr.bf16.mxu0 %v2664_v37 }
  0x3c   : > { %2348 = vmatpush3.bf16.msra.mxu1 %v2663_v36  ;;  %v2737_v36 = vld [vmem:[%s2839_s16 + $0x70] sm:$0xff]  }
  0x3d   : > { %2444 = vmatpush3.bf16.msra.mxu0 %v2664_v37  ;;  %2349 = vmatprep.subr.bf16.mxu1 %v2666_v38  ;;  %v2738_v37 = vld [vmem:[%s2839_s16 + $0x80] sm:$0xff]  }
  0x3e   : > { %2445 = vmatprep.subr.bf16.mxu0 %v2668_v39 }
  0x40   : > { %2350 = vmatpush3.bf16.msra.mxu1 %v2666_v38  ;;  %v2733_v38 = vld [vmem:[%s3081_s1 + $0x220] sm:$0xff]  }
  0x41   : > { %2446 = vmatpush3.bf16.msra.mxu0 %v2668_v39  ;;  %2351 = vmatprep.subr.bf16.mxu1 %v2671_v40  ;;  %v2734_v39 = vld [vmem:[%s3081_s1 + $0x228] sm:$0xff]  }
  0x42   : > { %2447 = vmatprep.subr.bf16.mxu0 %v2672_v41 }
  0x44   : > { %2352 = vmatpush3.bf16.msra.mxu1 %v2671_v40  ;;  %v2735_v40 = vld [vmem:[%s3081_s1 + $0x230] sm:$0xff]  }
  0x45   : > { %2448 = vmatpush3.bf16.msra.mxu0 %v2672_v41  ;;  %2361 = vmatprep.subr.bf16.mxu1 %v2674_v42  ;;  %v2736_v41 = vld [vmem:[%s3081_s1 + $0x238] sm:$0xff]  }
  0x46   : > { %2457 = vmatprep.subr.bf16.mxu0 %v2676_v43 }
  0x47   : > { %2354 = vmatmul.mubr.bf16.vlgmr.msra.gmra.mrb[0].mxu1 %v2677_v44 }
  0x48   : > { %2362 = vmatpush3.bf16.msra.mxu1 %v2674_v42  ;;  %2450 = vmatmul.mubr.bf16.vlgmr.msra.gmra.mrb[0].mxu0 %v2678_v45  ;;  %v2740_v42 = vld [vmem:[%s2839_s16 + $0x88] sm:$0xff]  }
  0x49   : > { %2458 = vmatpush3.bf16.msra.mxu0 %v2676_v43  ;;  %2363 = vmatprep.subr.bf16.mxu1 %v2679_v46  ;;  %v2739_v43 = vld [vmem:[%s2839_s16 + $0x78] sm:$0xff]  }
  0x4a   : > { %2459 = vmatprep.subr.bf16.mxu0 %v2680_v47  ;;  %2357 = vmatprep.mubr.bf16.mxu1 %v2689_v48 }
  0x4b   : > { %2453 = vmatprep.mubr.bf16.mxu0 %v2691_v49 }
  0x4c   : > { %2364 = vmatpush3.bf16.msra.mxu1 %v2679_v46 }
  0x4d   : > { %2460 = vmatpush3.bf16.msra.mxu0 %v2680_v47  ;;  %2365 = vmatprep.subr.bf16.mxu1 %v2681_v50 }
  0x4e   : > { %2461 = vmatprep.subr.bf16.mxu0 %v2682_v51 }
  0x4f   : > { %2358 = vmatmul.mubr.bf16.gmra.mrb[4].mxu1 %v2693_v53 }
  0x50   : > { %2366 = vmatpush3.bf16.msra.mxu1 %v2681_v50  ;;  %2454 = vmatmul.mubr.bf16.gmra.mrb[4].mxu0 %v2694_v54 }
  0x51   : > { %2462 = vmatpush3.bf16.msra.mxu0 %v2682_v51  ;;  %2367 = vmatprep.subr.bf16.mxu1 %v2683_v52 }
  0x52   : > { %2463 = vmatprep.subr.bf16.mxu0 %v2684_v55  ;;  %2377 = vmatprep.mubr.bf16.mxu1 %v2697_v56 }
  0x53   : > { %2473 = vmatprep.mubr.bf16.mxu0 %v2699_v57 }
  0x54   : > { %2368 = vmatpush3.bf16.msra.mxu1 %v2683_v52 }
  0x55   : > { %2464 = vmatpush3.bf16.msra.mxu0 %v2684_v55  ;;  %2369 = vmatprep.subr.bf16.mxu1 %v2685_v58 }
  0x56   : > { %2465 = vmatprep.subr.bf16.mxu0 %v2686_v59 }
  0x58   : > { %2370 = vmatpush3.bf16.msra.mxu1 %v2685_v58 }
  0x59   : > { %2466 = vmatpush3.bf16.msra.mxu0 %v2686_v59  ;;  %2371 = vmatprep.subr.bf16.mxu1 %v2687_v60 }
  0x5a   : > { %2467 = vmatprep.subr.bf16.mxu0 %v2688_v61 }
  0x5c   : > { %2372 = vmatpush3.bf16.msra.mxu1 %v2687_v60  ;;  %v2200_v60 = vld [vmem:[%s3082_s2] ss:$0 sm:$0xff] }
  0x5d   : > { %2468 = vmatpush3.bf16.msra.mxu0 %v2688_v61  ;;  %2373 = vmatprep.subr.bf16.mxu1 %v2690_v62 }
  0x5e   : > { %2469 = vmatprep.subr.bf16.mxu0 %v2692_v63 }
  0x60   : > { %2374 = vmatpush3.bf16.msra.mxu1 %v2690_v62 }
  0x61   : > { %2470 = vmatpush3.bf16.msra.mxu0 %v2692_v63  ;;  %2375 = vmatprep.subr.bf16.mxu1 %v2695_v0 }
  0x62   : > { %2471 = vmatprep.subr.bf16.mxu0 %v2696_v1 }
  0x64   : > { %2376 = vmatpush3.bf16.msra.mxu1 %v2695_v0 }
  0x65   : > { %2472 = vmatpush3.bf16.msra.mxu0 %v2696_v1  ;;  %2385 = vmatprep.subr.bf16.mxu1 %v2698_v2 }
  0x66   : > { %2481 = vmatprep.subr.bf16.mxu0 %v2700_v3 }
  0x67   : > { %2378 = vmatmul.mubr.bf16.vlgmr.msra.gmra.mrb[0].mxu1 %v2701_v4 }
  0x68   : > { %2386 = vmatpush3.bf16.msra.mxu1 %v2698_v2  ;;  %2474 = vmatmul.mubr.bf16.vlgmr.msra.gmra.mrb[0].mxu0 %v2702_v5 }
  0x69   : > { %2482 = vmatpush3.bf16.msra.mxu0 %v2700_v3  ;;  %2387 = vmatprep.subr.bf16.mxu1 %v2703_v6 }
  0x6a   : > { %2483 = vmatprep.subr.bf16.mxu0 %v2704_v7  ;;  %2381 = vmatprep.mubr.bf16.mxu1 %v2713_v8 }
  0x6b   : > { %2477 = vmatprep.mubr.bf16.mxu0 %v2714_v9 }
  0x6c   : > { %2388 = vmatpush3.bf16.msra.mxu1 %v2703_v6 }
  0x6d   : > { %2484 = vmatpush3.bf16.msra.mxu0 %v2704_v7  ;;  %2389 = vmatprep.subr.bf16.mxu1 %v2705_v10 }
  0x6e   : > { %2485 = vmatprep.subr.bf16.mxu0 %v2706_v11 }
  0x6f   : > { %2382 = vmatmul.mubr.bf16.gmra.mrb[4].mxu1 %v2715_v13 }
  0x70   : > { %2390 = vmatpush3.bf16.msra.mxu1 %v2705_v10  ;;  %2478 = vmatmul.mubr.bf16.gmra.mrb[4].mxu0 %v2717_v14 }
  0x71   : > { %2486 = vmatpush3.bf16.msra.mxu0 %v2706_v11  ;;  %2391 = vmatprep.subr.bf16.mxu1 %v2707_v12 }
  0x72   : > { %2487 = vmatprep.subr.bf16.mxu0 %v2708_v15  ;;  %2401 = vmatprep.mubr.bf16.mxu1 %v2721_v16 }
  0x73   : > { %2497 = vmatprep.mubr.bf16.mxu0 %v2722_v17 }
  0x74   : > { %2392 = vmatpush3.bf16.msra.mxu1 %v2707_v12 }
  0x75   : > { %2488 = vmatpush3.bf16.msra.mxu0 %v2708_v15  ;;  %2393 = vmatprep.subr.bf16.mxu1 %v2709_v18 }
  0x76   : > { %2489 = vmatprep.subr.bf16.mxu0 %v2710_v19 }
  0x78   : > { %2394 = vmatpush3.bf16.msra.mxu1 %v2709_v18 }
  0x79   : > { %2490 = vmatpush3.bf16.msra.mxu0 %v2710_v19  ;;  %2395 = vmatprep.subr.bf16.mxu1 %v2711_v20 }
  0x7a   : > { %2491 = vmatprep.subr.bf16.mxu0 %v2712_v21 }
  0x7c   : > { %2396 = vmatpush3.bf16.msra.mxu1 %v2711_v20 }
  0x7d   : > { %2492 = vmatpush3.bf16.msra.mxu0 %v2712_v21  ;;  %2397 = vmatprep.subr.bf16.mxu1 %v2716_v22 }
  0x7e   : > { %2493 = vmatprep.subr.bf16.mxu0 %v2718_v23 }
  0x80   : > { %2398 = vmatpush3.bf16.msra.mxu1 %v2716_v22 }
  0x81   : > { %2494 = vmatpush3.bf16.msra.mxu0 %v2718_v23  ;;  %2399 = vmatprep.subr.bf16.mxu1 %v2719_v24 }
  0x82   : > { %2495 = vmatprep.subr.bf16.mxu0 %v2720_v25 }
  0x84   : > { %2400 = vmatpush3.bf16.msra.mxu1 %v2719_v24 }
  0x85   : > { %2496 = vmatpush3.bf16.msra.mxu0 %v2720_v25  ;;  %2529 = vmatprep.subr.bf16.mxu1 %v2725_v26 }
  0x86   : > { %2505 = vmatprep.subr.bf16.mxu0 %v2725_v26 }
  0x87   : > { %2402 = vmatmul.mubr.bf16.vlgmr.msra.gmra.mrb[0].mxu1 %v2723_v27 }
  0x88   : > { %2498 = vmatmul.mubr.bf16.vlgmr.msra.gmra.mrb[0].mxu0 %v2724_v28  ;;  %2537 = vmatpush3.bf16.msra.mxu1 %v2725_v26 }
  0x89   : > { %2506 = vmatpush3.bf16.msra.mxu0 %v2725_v26  ;;  %2530 = vmatprep.subr.bf16.mxu1 %v2726_v29 }
  0x8a   : > { %2507 = vmatprep.subr.bf16.mxu0 %v2726_v29  ;;  %2405 = vmatprep.mubr.bf16.mxu1 %v2727_v30 }
  0x8b   : > { %2501 = vmatprep.mubr.bf16.mxu0 %v2728_v31 }
  0x8c   : > { %2538 = vmatpush3.bf16.msra.mxu1 %v2726_v29 }
  0x8d   : > { %2508 = vmatpush3.bf16.msra.mxu0 %v2726_v29  ;;  %2531 = vmatprep.subr.bf16.mxu1 %v2731_v32 }
  0x8e   : > { %2509 = vmatprep.subr.bf16.mxu0 %v2731_v32 }
  0x8f   : > { %2406 = vmatmul.mubr.bf16.gmra.mrb[4].mxu1 %v2729_v33 }
  0x90   : > { %2502 = vmatmul.mubr.bf16.gmra.mrb[4].mxu0 %v2730_v34  ;;  %2539 = vmatpush3.bf16.msra.mxu1 %v2731_v32 }
  0x91   : > { %2510 = vmatpush3.bf16.msra.mxu0 %v2731_v32  ;;  %2532 = vmatprep.subr.bf16.mxu1 %v2732_v35 }
  0x92   : > { %2511 = vmatprep.subr.bf16.mxu0 %v2732_v35  ;;  %2521 = vmatprep.mubr.bf16.mxu0 %v2737_v36 }
  0x93   : > { %2525 = vmatprep.mubr.bf16.mxu1 %v2738_v37 }
  0x94   : > { %2540 = vmatpush3.bf16.msra.mxu1 %v2732_v35 }
  0x95   : > { %2512 = vmatpush3.bf16.msra.mxu0 %v2732_v35  ;;  %2533 = vmatprep.subr.bf16.mxu1 %v2733_v38 }
  0x96   : > { %2513 = vmatprep.subr.bf16.mxu0 %v2733_v38 }
  0x98   : > { %2541 = vmatpush3.bf16.msra.mxu1 %v2733_v38 }
  0x99   : > { %2514 = vmatpush3.bf16.msra.mxu0 %v2733_v38  ;;  %2534 = vmatprep.subr.bf16.mxu1 %v2734_v39 }
  0x9a   : > { %2515 = vmatprep.subr.bf16.mxu0 %v2734_v39 }
  0x9c   : > { %2542 = vmatpush3.bf16.msra.mxu1 %v2734_v39 }
  0x9d   : > { %2516 = vmatpush3.bf16.msra.mxu0 %v2734_v39  ;;  %2535 = vmatprep.subr.bf16.mxu1 %v2735_v40 }
  0x9e   : > { %2517 = vmatprep.subr.bf16.mxu0 %v2735_v40 }
  0xa0   : > { %2543 = vmatpush3.bf16.msra.mxu1 %v2735_v40 }
  0xa1   : > { %2518 = vmatpush3.bf16.msra.mxu0 %v2735_v40  ;;  %2536 = vmatprep.subr.bf16.mxu1 %v2736_v41 }
  0xa2   : > { %2519 = vmatprep.subr.bf16.mxu0 %v2736_v41 }
  0xa4   : > { %2544 = vmatpush3.bf16.msra.mxu1 %v2736_v41 }
  0xa5   : > { %2520 = vmatpush3.bf16.msra.mxu0 %v2736_v41 }
  0xa7   : > { %2526 = vmatmul.mubr.bf16.vlgmr.msra.gmra.mrb[8].mxu1 %v2740_v42 }
  0xa8   : > { %2522 = vmatmul.mubr.bf16.vlgmr.msra.gmra.mrb[0].mxu0 %v2739_v43 }
 0x15a   : > { %v2403_v44 = vpop.f32.mrb[0].mxu1 }
 0x15b   : > { %v834_v45 = vpop.f32.mrb[1].mxu1 }
 0x15c   : > { %v2404_v46 = vpop.f32.mrb[2].mxu1 }
 0x15d   : > { %v837_v47 = vpop.f32.mrb[3].mxu1 }
 0x162   : > { %v2407_v48 = vpop.f32.mrb[4].mxu1 }
 0x163   : > { %v2503_v49 = vpop.f32.mrb[4].mxu0  ;;  %v850_v50 = vpop.f32.mrb[5].mxu1 }
 0x164   : > { %v2549_v51 = vadd.f32 %v2503_v49, %v2407_v48  ;;  %v1543_v52 = vpop.f32.mrb[5].mxu0  ;;  %v2408_v53 = vpop.f32.mrb[6].mxu1 }
 0x165   : > { %v2551_v54 = vadd.f32 %v1543_v52, %v850_v50  ;;  %v2504_v55 = vpop.f32.mrb[6].mxu0  ;;  %v853_v56 = vpop.f32.mrb[7].mxu1 }
 0x166   : > { %v2553_v57 = vadd.f32 %v2504_v55, %v2408_v53  ;;  %v1546_v58 = vpop.f32.mrb[7].mxu0 }
 0x167   : > { %v2555_v59 = vadd.f32 %v1546_v58, %v853_v56 }
 0x17a   : > { %v2527_v61 = vpop.f32.mrb[8].mxu1 }
 0x17b   : > { %v2523_v62 = vpop.f32.mrb[0].mxu0  ;;  %v2550_v63 = vadd.f32 %v2549_v51, %v2527_v61  ;;  %v1716_v0 = vpop.f32.mrb[9].mxu1 }
 0x17c   : > { %v2545_v1 = vadd.f32 %v2523_v62, %v2403_v44  ;;  %v1700_v2 = vpop.f32.mrb[1].mxu0  ;;  %v2552_v3 = vadd.f32 %v2551_v54, %v1716_v0  ;;  %v2528_v4 = vpop.f32.mrb[10].mxu1 }
 0x17d   : > { %v1752_v5 = vadd.f32 %v2550_v63, %v2200_v60  ;;  %v2546_v6 = vadd.f32 %v1700_v2, %v834_v45  ;;  %v2524_v7 = vpop.f32.mrb[2].mxu0  ;;  %v2554_v8 = vadd.f32 %v2553_v57, %v2528_v4  ;;  %v1719_v9 = vpop.f32.mrb[11].mxu1 }
 0x17e   : > { %v1748_v10 = vadd.f32 %v2545_v1, %v2200_v60  ;;  %v1750_v11 = vadd.f32 %v2552_v3, %v2200_v60  ;;  %v2547_v12 = vadd.f32 %v2524_v7, %v2404_v46  ;;  %v1703_v13 = vpop.f32.mrb[3].mxu0  ;;  %v2556_v14 = vadd.f32 %v2555_v59, %v1719_v9 }
 0x17f   : > { %v1760_v15 = vmax.f32 %v1752_v5, 0.0  ;;  %v1746_v16 = vadd.f32 %v2546_v6, %v2200_v60  ;;  %v1753_v17 = vadd.f32 %v2554_v8, %v2200_v60  ;;  %v2548_v18 = vadd.f32 %v1703_v13, %v837_v47 }
 0x180   : > { %v1756_v19 = vmax.f32 %v1748_v10, 0.0  ;;  %v1758_v20 = vmax.f32 %v1750_v11, 0.0  ;;  %v1749_v21 = vadd.f32 %v2547_v12, %v2200_v60  ;;  %v1751_v22 = vadd.f32 %v2556_v14, %v2200_v60 }
 0x181   : > { %1768 = vst [vmem:[%s194_s8 + $0x30] sm:$0xff] %v1760_v15  ;;  %v1754_v23 = vmax.f32 %v1746_v16, 0.0  ;;  %v1761_v24 = vmax.f32 %v1753_v17, 0.0  ;;  %v1747_v25 = vadd.f32 %v2548_v18, %v2200_v60 }
 0x182   : > { %1764 = vst [vmem:[%s194_s8 + $0x10] sm:$0xff] %v1756_v19  ;;  %1766 = vst [vmem:[%s194_s8 + $0x20] sm:$0xff] %v1758_v20  ;;  %v1757_v26 = vmax.f32 %v1749_v21, 0.0  ;;  %v1759_v27 = vmax.f32 %v1751_v22, 0.0 }
 0x183   : > { %1762 = vst [vmem:[%s194_s8] sm:$0xff] %v1754_v23  ;;  %1769 = vst [vmem:[%s194_s8 + $0x38] sm:$0xff] %v1761_v24  ;;  %v1755_v28 = vmax.f32 %v1747_v25, 0.0 }
 0x184   : > { %1765 = vst [vmem:[%s194_s8 + $0x18] sm:$0xff] %v1757_v26  ;;  %1767 = vst [vmem:[%s194_s8 + $0x28] sm:$0xff] %v1759_v27 }
 0x185   : > { %1763 = vst [vmem:[%s194_s8 + $0x8] sm:$0xff] %v1755_v28 }
 0x186 PF: > { %s13_s14 = sadd.s32 1, %s2763_s14   ;;  %s3084_s12 = smov %s2759_s13 }
 0x187   : > { %p10_p5 = scmp.ge.s32.totalorder %s13_s14, 6   ;;  %s3085_s13 = smov %s3087_s15 }
 0x189   :  { %12 = sbr.rel (!%p10_p5) target bundleno = 2 (0x2), region = 79 }

// kernel: cnncifar_forward.5
= control target key start
LH: loop header
LB: loop body
LE: loop exit
PB: predicated region body
PF: predicated region fallthrough
CT: control target
= control target key end

     0   :  { %s7361_s12 = smov 0   ;;  %s7363_s13 = smov 0   ;;  %s8038_s0 = inlined_call_operand.vmem [shape: bf16[15,15,16,128], index: 0, kind: input, shape index: {}]   ;;  %s8039_s1 = inlined_call_operand.vmem [shape: bf16[3,3,128,128], index: 1, kind: input, shape index: {}]   ;;  %s8040_s2 = inlined_call_operand.vmem [shape: f32[1,128], index: 2, kind: input, shape index: {}]   ;;  %s8041_s3 = inlined_call_operand.vmem [shape: bf16[6,6,16,128], index: 3, kind: output, shape index: {}]  }
   0x1   :  { %s7365_s14 = smov 0  }
   0x2 LB: > { %s22_s15 = sadd.s32 1, %s7335_s13  ;;  %p4898_p0 = scmp.ge.s32.totalorder %s7339_s14, 1  ;;  %s7339_s14 = sphi %s7365_s14, %s13_s14   ;;  %s7335_s13 = sphi %s7363_s13, %s8043_s13   ;;  %s7331_s12 = sphi %s7361_s12, %s8042_s12  }
   0x3   : > { %p23_p1 = scmp.ge.s32.totalorder %s22_s15, 6  ;;  %p152_p2 = scmp.lt.s32.totalorder %s7339_s14, 7 }
   0x5   : > { %s8045_s15 = smov (%p23_p1, %s22_s15), 0  ;;  %p153_p3 = pnand %p4898_p0, %p152_p2 }
   0x6   : > { %v7089_v0 = vld [vmem:[%s8039_s1 + $0x40] sm:$0xff] (!%p153_p3)   ;;  %v7090_v1 = vld [vmem:[%s8039_s1 + $0x48] sm:$0xff] (!%p153_p3)   ;;  %s5552_s20 = smul.u32 (!%p153_p3), 240, %s7331_s12  ;;  %v7091_v2 = vld [vmem:[%s8039_s1 + $0x50] sm:$0xff] (!%p153_p3)   ;;  %p187_p4 = scmp.lt.s32.totalorder (!%p153_p3), %s7331_s12, 5 }
   0x7   : > { %156 = sbr.rel (%p153_p3) target bundleno = 689 (0x2b1), region = 32  ;;  %5960 = vmatprep.subr.bf16.mxu0 (!%p153_p3), %v7089_v0  ;;  %6320 = vmatprep.subr.bf16.mxu1 (!%p153_p3), %v7089_v0  ;;  %v7092_v3 = vld [vmem:[%s8039_s1 + $0x58] sm:$0xff] (!%p153_p3)   ;;  %v7093_v6 = vld [vmem:[%s8039_s1 + $0x60] sm:$0xff] (!%p153_p3)   ;;  %v7094_v7 = vld [vmem:[%s8039_s1 + $0x68] sm:$0xff] (!%p153_p3)  }
   0x8   : > { %5961 = vmatpush3.bf16.msra.mxu0 (!%p153_p3), %v7089_v0  ;;  %6321 = vmatpush3.bf16.msra.mxu1 (!%p153_p3), %v7089_v0  ;;  %s7394_s25 = scalar_lea.vmem (!%p153_p3), %s8038_s0, %s5552_s20  ;;  %v7095_v8 = vld [vmem:[%s8039_s1 + $0x70] sm:$0xff] (!%p153_p3)   ;;  %v7096_v9 = vld [vmem:[%s8039_s1 + $0x78] sm:$0xff] (!%p153_p3)   ;;  %v7100_v10 = vld [vmem:[%s8039_s1] sm:$0xff] (!%p153_p3)  }
   0x9   : > { %5962 = vmatprep.subr.bf16.mxu0 (!%p153_p3), %v7090_v1  ;;  %6322 = vmatprep.subr.bf16.mxu1 (!%p153_p3), %v7090_v1  ;;  %v7097_v4 = vld [vmem:[%s7394_s25 + $0x8] sm:$0xff] (!%p153_p3)   ;;  %v7098_v5 = vld [vmem:[%s7394_s25 + $0x80] sm:$0xff] (!%p153_p3)   ;;  %v7099_v11 = vld [vmem:[%s7394_s25 + $0x10] sm:$0xff] (!%p153_p3)  }
   0xa   : > { %5976 = vmatprep.mubr.bf16.mxu0 (!%p153_p3), %v7097_v4  ;;  %6336 = vmatprep.mubr.bf16.mxu1 (!%p153_p3), %v7098_v5  ;;  %v7101_v12 = vld [vmem:[%s7394_s25 + $0x88] sm:$0xff] (!%p153_p3)   ;;  %v7103_v14 = vld [vmem:[%s7394_s25 + $0x18] sm:$0xff] (!%p153_p3)   ;;  %v7104_v15 = vld [vmem:[%s7394_s25 + $0x90] sm:$0xff] (!%p153_p3)  }
   0xb   : > { %v7102_v13 = vld [vmem:[%s8039_s1 + $0x8] sm:$0xff] (!%p153_p3)   ;;  %v7107_v16 = vld [vmem:[%s8039_s1 + $0x10] sm:$0xff] (!%p153_p3)   ;;  %v7105_v17 = vld [vmem:[%s7394_s25 + $0x20] sm:$0xff] (!%p153_p3)  }
   0xc   : > { %5963 = vmatpush3.bf16.msra.mxu0 (!%p153_p3), %v7090_v1  ;;  %6323 = vmatpush3.bf16.msra.mxu1 (!%p153_p3), %v7090_v1  ;;  %v7106_v18 = vld [vmem:[%s7394_s25 + $0x98] sm:$0xff] (!%p153_p3)   ;;  %v7108_v19 = vld [vmem:[%s7394_s25 + $0x28] sm:$0xff] (!%p153_p3)   ;;  %v7109_v20 = vld [vmem:[%s7394_s25 + $0xa0] sm:$0xff] (!%p153_p3)  }
   0xd   : > { %5964 = vmatprep.subr.bf16.mxu0 (!%p153_p3), %v7091_v2  ;;  %6324 = vmatprep.subr.bf16.mxu1 (!%p153_p3), %v7091_v2  ;;  %v7112_v21 = vld [vmem:[%s8039_s1 + $0x18] sm:$0xff] (!%p153_p3)   ;;  %v7110_v22 = vld [vmem:[%s7394_s25 + $0x30] sm:$0xff] (!%p153_p3)   ;;  %v7116_v23 = vld [vmem:[%s8039_s1 + $0x20] sm:$0xff] (!%p153_p3)  }
   0xe   : > { %v7111_v24 = vld [vmem:[%s7394_s25 + $0xa8] sm:$0xff]   ;;  %v7113_v25 = vld [vmem:[%s7394_s25 + $0x38] sm:$0xff]   ;;  %v7114_v26 = vld [vmem:[%s7394_s25 + $0xb0] sm:$0xff]   ;;  %s8047_s12 = smov (!%p187_p4, %s7331_s12), 5 }
   0xf   : > { %v7118_v27 = vld [vmem:[%s8039_s1 + $0x28] sm:$0xff]   ;;  %v7115_v28 = vld [vmem:[%s7394_s25 + $0x40] sm:$0xff]   ;;  %v7117_v29 = vld [vmem:[%s7394_s25 + $0xb8] sm:$0xff]  }
  0x10   : > { %5965 = vmatpush3.bf16.msra.mxu0 %v7091_v2  ;;  %6325 = vmatpush3.bf16.msra.mxu1 %v7091_v2  ;;  %v7123_v30 = vld [vmem:[%s8039_s1 + $0x30] sm:$0xff]   ;;  %v7119_v31 = vld [vmem:[%s7394_s25 + $0x48] sm:$0xff]   ;;  %v7120_v32 = vld [vmem:[%s7394_s25 + $0xc0] sm:$0xff]  }
  0x11   : > { %5966 = vmatprep.subr.bf16.mxu0 %v7092_v3  ;;  %6326 = vmatprep.subr.bf16.mxu1 %v7092_v3  ;;  %v7128_v33 = vld [vmem:[%s8039_s1 + $0x38] sm:$0xff]   ;;  %v7121_v34 = vld [vmem:[%s7394_s25 + $0x50] sm:$0xff]   ;;  %v7122_v35 = vld [vmem:[%s7394_s25 + $0xc8] sm:$0xff]  }
  0x12   : > { %v7132_v36 = vld [vmem:[%s8039_s1 + $0x80] sm:$0xff]   ;;  %v7124_v37 = vld [vmem:[%s7394_s25 + $0x58] sm:$0xff]   ;;  %v7125_v38 = vld [vmem:[%s7394_s25 + $0xd0] sm:$0xff]  }
  0x13   : > { %v7126_v39 = vld [vmem:[%s7394_s25 + $0x60] sm:$0xff]   ;;  %v7127_v40 = vld [vmem:[%s7394_s25 + $0xd8] sm:$0xff]   ;;  %v7131_v43 = vld [vmem:[%s7394_s25 + $0x8] sm:$0xff]  }
  0x14   : > { %5967 = vmatpush3.bf16.msra.mxu0 %v7092_v3  ;;  %6327 = vmatpush3.bf16.msra.mxu1 %v7092_v3  ;;  %v7129_v41 = vld [vmem:[%s7394_s25] sm:$0xff]   ;;  %v7464_v42 = vld [vmem:[%s7394_s25 + $0x78] sm:$0xff]   ;;  %v7134_v45 = vld [vmem:[%s8039_s1 + $0x88] sm:$0xff]  }
  0x15   : > { %5968 = vmatprep.subr.bf16.mxu0 %v7093_v6  ;;  %6328 = vmatprep.subr.bf16.mxu1 %v7093_v6  ;;  %v7469_v44 = vld [vmem:[%s7394_s25 + $0x80] sm:$0xff]   ;;  %v7135_v46 = vld [vmem:[%s7394_s25 + $0x10] sm:$0xff]   ;;  %v7476_v47 = vld [vmem:[%s7394_s25 + $0x88] sm:$0xff]  }
  0x16   : > { %v7139_v48 = vld [vmem:[%s8039_s1 + $0x90] sm:$0xff]   ;;  %v7137_v49 = vld [vmem:[%s7394_s25 + $0x18] sm:$0xff]   ;;  %v7140_v51 = vld [vmem:[%s7394_s25 + $0x20] sm:$0xff]  }
  0x17   : > { %v7485_v50 = vld [vmem:[%s7394_s25 + $0x90] sm:$0xff]   ;;  %v7489_v52 = vld [vmem:[%s7394_s25 + $0x98] sm:$0xff]   ;;  %v7142_v54 = vld [vmem:[%s7394_s25 + $0x28] sm:$0xff]  }
  0x18   : > { %5969 = vmatpush3.bf16.msra.mxu0 %v7093_v6  ;;  %6329 = vmatpush3.bf16.msra.mxu1 %v7093_v6  ;;  %v7144_v53 = vld [vmem:[%s8039_s1 + $0x98] sm:$0xff]   ;;  %v7148_v55 = vld [vmem:[%s8039_s1 + $0xa0] sm:$0xff]   ;;  %v7145_v57 = vld [vmem:[%s7394_s25 + $0x30] sm:$0xff]  }
  0x19   : > { %5970 = vmatprep.subr.bf16.mxu0 %v7094_v7  ;;  %6330 = vmatprep.subr.bf16.mxu1 %v7094_v7  ;;  %v7501_v56 = vld [vmem:[%s7394_s25 + $0xa0] sm:$0xff]   ;;  %v7505_v58 = vld [vmem:[%s7394_s25 + $0xa8] sm:$0xff]   ;;  %v7147_v60 = vld [vmem:[%s7394_s25 + $0x38] sm:$0xff]  }
  0x1a   : > { %v7150_v59 = vld [vmem:[%s8039_s1 + $0xa8] sm:$0xff]   ;;  %v7514_v61 = vld [vmem:[%s7394_s25 + $0xb0] sm:$0xff]   ;;  %v7151_v63 = vld [vmem:[%s7394_s25 + $0x40] sm:$0xff]  }
  0x1b   : > { %v7155_v62 = vld [vmem:[%s8039_s1 + $0xb0] sm:$0xff]   ;;  %v7521_v0 = vld [vmem:[%s7394_s25 + $0xb8] sm:$0xff]   ;;  %v7153_v2 = vld [vmem:[%s7394_s25 + $0x48] sm:$0xff]  }
  0x1c   : > { %5971 = vmatpush3.bf16.msra.mxu0 %v7094_v7  ;;  %6331 = vmatpush3.bf16.msra.mxu1 %v7094_v7  ;;  %v7160_v1 = vld [vmem:[%s8039_s1 + $0xb8] sm:$0xff]   ;;  %v7530_v3 = vld [vmem:[%s7394_s25 + $0xc0] sm:$0xff]   ;;  %v7156_v5 = vld [vmem:[%s7394_s25 + $0x50] sm:$0xff]  }
  0x1d   : > { %5972 = vmatprep.subr.bf16.mxu0 %v7095_v8  ;;  %6332 = vmatprep.subr.bf16.mxu1 %v7095_v8  ;;  %v7164_v4 = vld [vmem:[%s8039_s1 + $0xc0] sm:$0xff]   ;;  %v7537_v6 = vld [vmem:[%s7394_s25 + $0xc8] sm:$0xff]   ;;  %v7158_v7 = vld [vmem:[%s7394_s25 + $0x58] sm:$0xff]  }
  0x20   : > { %5973 = vmatpush3.bf16.msra.mxu0 %v7095_v8  ;;  %6333 = vmatpush3.bf16.msra.mxu1 %v7095_v8  ;;  %v7543_v8 = vld [vmem:[%s7394_s25 + $0xd0] sm:$0xff]  }
  0x21   : > { %5974 = vmatprep.subr.bf16.mxu0 %v7096_v9  ;;  %6334 = vmatprep.subr.bf16.mxu1 %v7096_v9 }
  0x24   : > { %5975 = vmatpush3.bf16.msra.mxu0 %v7096_v9  ;;  %6335 = vmatpush3.bf16.msra.mxu1 %v7096_v9  ;;  %v7161_v9 = vld [vmem:[%s7394_s25 + $0x10] sm:$0xff]  }
  0x25   : > { %6000 = vmatprep.subr.bf16.mxu0 %v7100_v10  ;;  %6360 = vmatprep.subr.bf16.mxu1 %v7100_v10 }
  0x27   : > { %5977 = vmatmul.mubr.bf16.vlgmr.msra.gmra.mrb[0].mxu0 %v7099_v11  ;;  %6337 = vmatmul.mubr.bf16.vlgmr.msra.gmra.mrb[0].mxu1 %v7101_v12  ;;  %v7163_v11 = vld [vmem:[%s7394_s25 + $0x18] sm:$0xff]   ;;  %v7553_v12 = vld [vmem:[%s7394_s25 + $0x90] sm:$0xff]  }
  0x28   : > { %6001 = vmatpush3.bf16.msra.mxu0 %v7100_v10  ;;  %6361 = vmatpush3.bf16.msra.mxu1 %v7100_v10  ;;  %v7547_v10 = vld [vmem:[%s7394_s25 + $0x88] sm:$0xff]  }
  0x29   : > { %6002 = vmatprep.subr.bf16.mxu0 %v7102_v13  ;;  %6362 = vmatprep.subr.bf16.mxu1 %v7102_v13 }
  0x2a   : > { %5980 = vmatprep.mubr.bf16.mxu0 %v7103_v14  ;;  %6340 = vmatprep.mubr.bf16.mxu1 %v7104_v15  ;;  %v7167_v14 = vld [vmem:[%s7394_s25 + $0x20] sm:$0xff]   ;;  %v7560_v15 = vld [vmem:[%s7394_s25 + $0x98] sm:$0xff]  }
  0x2c   : > { %6003 = vmatpush3.bf16.msra.mxu0 %v7102_v13  ;;  %6363 = vmatpush3.bf16.msra.mxu1 %v7102_v13  ;;  %v7166_v13 = vld [vmem:[%s8039_s1 + $0xc8] sm:$0xff]  }
  0x2d   : > { %6004 = vmatprep.subr.bf16.mxu0 %v7107_v16  ;;  %6364 = vmatprep.subr.bf16.mxu1 %v7107_v16 }
  0x2f   : > { %5981 = vmatmul.mubr.bf16.gmra.mrb[4].mxu0 %v7105_v17  ;;  %6341 = vmatmul.mubr.bf16.gmra.mrb[4].mxu1 %v7106_v18  ;;  %v7169_v17 = vld [vmem:[%s7394_s25 + $0x28] sm:$0xff]   ;;  %v7569_v18 = vld [vmem:[%s7394_s25 + $0xa0] sm:$0xff]  }
  0x30   : > { %6005 = vmatpush3.bf16.msra.mxu0 %v7107_v16  ;;  %6365 = vmatpush3.bf16.msra.mxu1 %v7107_v16  ;;  %v7171_v16 = vld [vmem:[%s8039_s1 + $0xd0] sm:$0xff]  }
  0x31   : > { %5984 = vmatprep.mubr.bf16.mxu0 %v7108_v19  ;;  %6344 = vmatprep.mubr.bf16.mxu1 %v7109_v20  ;;  %v7172_v19 = vld [vmem:[%s7394_s25 + $0x30] sm:$0xff]   ;;  %v7573_v20 = vld [vmem:[%s7394_s25 + $0xa8] sm:$0xff]  }
  0x32   : > { %6006 = vmatprep.subr.bf16.mxu0 %v7112_v21  ;;  %6366 = vmatprep.subr.bf16.mxu1 %v7112_v21 }
  0x34   : > { %6007 = vmatpush3.bf16.msra.mxu0 %v7112_v21  ;;  %6367 = vmatpush3.bf16.msra.mxu1 %v7112_v21  ;;  %v7176_v21 = vld [vmem:[%s8039_s1 + $0xd8] sm:$0xff]  }
  0x35   : > { %6008 = vmatprep.subr.bf16.mxu0 %v7116_v23  ;;  %6368 = vmatprep.subr.bf16.mxu1 %v7116_v23 }
  0x37   : > { %5985 = vmatmul.mubr.bf16.gmra.mrb[8].mxu0 %v7110_v22  ;;  %6345 = vmatmul.mubr.bf16.gmra.mrb[8].mxu1 %v7111_v24  ;;  %v7174_v22 = vld [vmem:[%s7394_s25 + $0x38] sm:$0xff]   ;;  %v7585_v24 = vld [vmem:[%s7394_s25 + $0xb0] sm:$0xff]  }
  0x38   : > { %5988 = vmatprep.mubr.bf16.mxu0 %v7113_v25  ;;  %6348 = vmatprep.mubr.bf16.mxu1 %v7114_v26  ;;  %v7177_v25 = vld [vmem:[%s7394_s25 + $0x40] sm:$0xff]   ;;  %v7589_v26 = vld [vmem:[%s7394_s25 + $0xb8] sm:$0xff]  }
  0x39   : > { %6009 = vmatpush3.bf16.msra.mxu0 %v7116_v23  ;;  %6369 = vmatpush3.bf16.msra.mxu1 %v7116_v23  ;;  %v7180_v23 = vld [vmem:[%s8039_s1 + $0xe0] sm:$0xff]  }
  0x3a   : > { %6010 = vmatprep.subr.bf16.mxu0 %v7118_v27  ;;  %6370 = vmatprep.subr.bf16.mxu1 %v7118_v27 }
  0x3d   : > { %6011 = vmatpush3.bf16.msra.mxu0 %v7118_v27  ;;  %6371 = vmatpush3.bf16.msra.mxu1 %v7118_v27  ;;  %v7182_v27 = vld [vmem:[%s8039_s1 + $0xe8] sm:$0xff]  }
  0x3e   : > { %6012 = vmatprep.subr.bf16.mxu0 %v7123_v30  ;;  %6372 = vmatprep.subr.bf16.mxu1 %v7123_v30 }
  0x3f   : > { %5989 = vmatmul.mubr.bf16.gmra.mrb[12].mxu0 %v7115_v28  ;;  %6349 = vmatmul.mubr.bf16.gmra.mrb[12].mxu1 %v7117_v29  ;;  %v7187_v28 = vld [vmem:[%s8039_s1 + $0xf0] sm:$0xff]   ;;  %v7179_v29 = vld [vmem:[%s7394_s25 + $0x48] sm:$0xff]  }
  0x40   : > { %5992 = vmatprep.mubr.bf16.mxu0 %v7119_v31  ;;  %6352 = vmatprep.mubr.bf16.mxu1 %v7120_v32  ;;  %v7183_v31 = vld [vmem:[%s7394_s25 + $0x50] sm:$0xff]   ;;  %v7605_v32 = vld [vmem:[%s7394_s25 + $0xc8] sm:$0xff]  }
  0x41   : > { %6013 = vmatpush3.bf16.msra.mxu0 %v7123_v30  ;;  %6373 = vmatpush3.bf16.msra.mxu1 %v7123_v30  ;;  %v7601_v30 = vld [vmem:[%s7394_s25 + $0xc0] sm:$0xff]  }
  0x42   : > { %6014 = vmatprep.subr.bf16.mxu0 %v7128_v33  ;;  %6374 = vmatprep.subr.bf16.mxu1 %v7128_v33 }
  0x45   : > { %6015 = vmatpush3.bf16.msra.mxu0 %v7128_v33  ;;  %6375 = vmatpush3.bf16.msra.mxu1 %v7128_v33  ;;  %v7192_v33 = vld [vmem:[%s8039_s1 + $0xf8] sm:$0xff]  }
  0x46   : > { %6040 = vmatprep.subr.bf16.mxu0 %v7132_v36  ;;  %6400 = vmatprep.subr.bf16.mxu1 %v7132_v36 }
  0x47   : > { %5993 = vmatmul.mubr.bf16.gmra.mrb[16].mxu0 %v7121_v34  ;;  %6353 = vmatmul.mubr.bf16.gmra.mrb[16].mxu1 %v7122_v35  ;;  %v7185_v34 = vld [vmem:[%s7394_s25 + $0x58] sm:$0xff]   ;;  %v7614_v35 = vld [vmem:[%s7394_s25 + $0xd0] sm:$0xff]  }
  0x48   : > { %5996 = vmatprep.mubr.bf16.mxu0 %v7124_v37  ;;  %6356 = vmatprep.mubr.bf16.mxu1 %v7125_v38  ;;  %v7188_v37 = vld [vmem:[%s7394_s25 + $0x60] sm:$0xff]   ;;  %v7621_v38 = vld [vmem:[%s7394_s25 + $0xd8] sm:$0xff]  }
  0x4f   : > { %5997 = vmatmul.mubr.bf16.gmra.mrb[20].mxu0 %v7126_v39  ;;  %6357 = vmatmul.mubr.bf16.gmra.mrb[20].mxu1 %v7127_v40  ;;  %v7190_v39 = vld [vmem:[%s7394_s25 + $0x68] sm:$0xff]   ;;  %v7627_v40 = vld [vmem:[%s7394_s25 + $0xe0] sm:$0xff]  }
  0x50   : > { %6016 = vmatprep.mubr.bf16.mxu0 %v7129_v41  ;;  %6376 = vmatprep.mubr.bf16.mxu1 %v7464_v42  ;;  %v7630_v41 = vld [vmem:[%s7394_s25 + $0xf0] sm:$0xff]  }
  0x57   : > { %6017 = vmatmul.mubr.bf16.vlgmr.msra.gmra.mrb[0].mxu0 %v7131_v43  ;;  %6377 = vmatmul.mubr.bf16.vlgmr.msra.gmra.mrb[0].mxu1 %v7469_v44  ;;  %v7636_v43 = vld [vmem:[%s7394_s25 + $0xf8] sm:$0xff]  }
  0x58   : > { %6041 = vmatpush3.bf16.msra.mxu0 %v7132_v36  ;;  %6401 = vmatpush3.bf16.msra.mxu1 %v7132_v36  ;;  %v7194_v36 = vld [vmem:[%s8039_s1 + $0x100] sm:$0xff]  }
  0x59   : > { %6042 = vmatprep.subr.bf16.mxu0 %v7134_v45  ;;  %6402 = vmatprep.subr.bf16.mxu1 %v7134_v45 }
  0x5a   : > { %6020 = vmatprep.mubr.bf16.mxu0 %v7135_v46  ;;  %6380 = vmatprep.mubr.bf16.mxu1 %v7476_v47  ;;  %v7642_v46 = vld [vmem:[%s7394_s25 + $0x100] sm:$0xff]  }
  0x5c   : > { %6043 = vmatpush3.bf16.msra.mxu0 %v7134_v45  ;;  %6403 = vmatpush3.bf16.msra.mxu1 %v7134_v45  ;;  %v7196_v45 = vld [vmem:[%s8039_s1 + $0x108] sm:$0xff]  }
  0x5d   : > { %6044 = vmatprep.subr.bf16.mxu0 %v7139_v48  ;;  %6404 = vmatprep.subr.bf16.mxu1 %v7139_v48 }
  0x5f   : > { %6021 = vmatmul.mubr.bf16.gmra.mrb[4].mxu0 %v7137_v49  ;;  %6381 = vmatmul.mubr.bf16.gmra.mrb[4].mxu1 %v7485_v50  ;;  %v7655_v49 = vld [vmem:[%s7394_s25 + $0x110] sm:$0xff]  }
  0x60   : > { %6045 = vmatpush3.bf16.msra.mxu0 %v7139_v48  ;;  %6405 = vmatpush3.bf16.msra.mxu1 %v7139_v48  ;;  %v7650_v48 = vld [vmem:[%s7394_s25 + $0x108] sm:$0xff]  }
  0x61   : > { %6024 = vmatprep.mubr.bf16.mxu0 %v7140_v51  ;;  %6384 = vmatprep.mubr.bf16.mxu1 %v7489_v52  ;;  %v7668_v51 = vld [vmem:[%s7394_s25 + $0x118] sm:$0xff]  }
  0x62   : > { %6046 = vmatprep.subr.bf16.mxu0 %v7144_v53  ;;  %6406 = vmatprep.subr.bf16.mxu1 %v7144_v53 }
  0x64   : > { %6047 = vmatpush3.bf16.msra.mxu0 %v7144_v53  ;;  %6407 = vmatpush3.bf16.msra.mxu1 %v7144_v53  ;;  %v7671_v53 = vld [vmem:[%s7394_s25 + $0x120] sm:$0xff]  }
  0x65   : > { %6048 = vmatprep.subr.bf16.mxu0 %v7148_v55  ;;  %6408 = vmatprep.subr.bf16.mxu1 %v7148_v55 }
  0x67   : > { %6025 = vmatmul.mubr.bf16.gmra.mrb[8].mxu0 %v7142_v54  ;;  %6385 = vmatmul.mubr.bf16.gmra.mrb[8].mxu1 %v7501_v56  ;;  %v7684_v54 = vld [vmem:[%s7394_s25 + $0x128] sm:$0xff]  }
  0x68   : > { %6028 = vmatprep.mubr.bf16.mxu0 %v7145_v57  ;;  %6388 = vmatprep.mubr.bf16.mxu1 %v7505_v58  ;;  %v7214_v57 = vld [vmem:[%s8039_s1 + $0x140] sm:$0xff]  }
  0x69   : > { %6049 = vmatpush3.bf16.msra.mxu0 %v7148_v55  ;;  %6409 = vmatpush3.bf16.msra.mxu1 %v7148_v55  ;;  %v7687_v55 = vld [vmem:[%s7394_s25 + $0x130] sm:$0xff]  }
  0x6a   : > { %6050 = vmatprep.subr.bf16.mxu0 %v7150_v59  ;;  %6410 = vmatprep.subr.bf16.mxu1 %v7150_v59 }
  0x6d   : > { %6051 = vmatpush3.bf16.msra.mxu0 %v7150_v59  ;;  %6411 = vmatpush3.bf16.msra.mxu1 %v7150_v59  ;;  %v7703_v59 = vld [vmem:[%s7394_s25 + $0x140] sm:$0xff]  }
  0x6e   : > { %6052 = vmatprep.subr.bf16.mxu0 %v7155_v62  ;;  %6412 = vmatprep.subr.bf16.mxu1 %v7155_v62 }
  0x6f   : > { %6029 = vmatmul.mubr.bf16.gmra.mrb[12].mxu0 %v7147_v60  ;;  %6389 = vmatmul.mubr.bf16.gmra.mrb[12].mxu1 %v7514_v61  ;;  %v7710_v60 = vld [vmem:[%s7394_s25 + $0x148] sm:$0xff]  }
  0x70   : > { %6032 = vmatprep.mubr.bf16.mxu0 %v7151_v63  ;;  %6392 = vmatprep.mubr.bf16.mxu1 %v7521_v0  ;;  %v7720_v63 = vld [vmem:[%s7394_s25 + $0x100] sm:$0xff]  }
  0x71   : > { %6053 = vmatpush3.bf16.msra.mxu0 %v7155_v62  ;;  %6413 = vmatpush3.bf16.msra.mxu1 %v7155_v62  ;;  %v7305_v62 = vld [vmem:[%s7394_s25 + $0x80] sm:$0xff]  }
  0x72   : > { %6054 = vmatprep.subr.bf16.mxu0 %v7160_v1  ;;  %6414 = vmatprep.subr.bf16.mxu1 %v7160_v1 }
  0x75   : > { %6055 = vmatpush3.bf16.msra.mxu0 %v7160_v1  ;;  %6415 = vmatpush3.bf16.msra.mxu1 %v7160_v1  ;;  %v7726_v1 = vld [vmem:[%s7394_s25 + $0x108] sm:$0xff]  }
  0x76   : > { %6080 = vmatprep.subr.bf16.mxu0 %v7164_v4  ;;  %6440 = vmatprep.subr.bf16.mxu1 %v7164_v4 }
  0x77   : > { %6033 = vmatmul.mubr.bf16.gmra.mrb[16].mxu0 %v7153_v2  ;;  %6393 = vmatmul.mubr.bf16.gmra.mrb[16].mxu1 %v7530_v3  ;;  %v7306_v2 = vld [vmem:[%s7394_s25 + $0x88] sm:$0xff]  }
  0x78   : > { %6036 = vmatprep.mubr.bf16.mxu0 %v7156_v5  ;;  %6396 = vmatprep.mubr.bf16.mxu1 %v7537_v6  ;;  %v7736_v5 = vld [vmem:[%s7394_s25 + $0x110] sm:$0xff]  }
  0x7f   : > { %6037 = vmatmul.mubr.bf16.gmra.mrb[20].mxu0 %v7158_v7  ;;  %6397 = vmatmul.mubr.bf16.gmra.mrb[20].mxu1 %v7543_v8  ;;  %v7222_v7 = vld [vmem:[%s8039_s1 + $0x158] sm:$0xff]  }
  0x80   : > { %6056 = vmatprep.mubr.bf16.mxu0 %v7161_v9  ;;  %6416 = vmatprep.mubr.bf16.mxu1 %v7547_v10  ;;  %v7309_v9 = vld [vmem:[%s7394_s25 + $0xa0] sm:$0xff]  }
  0x87   : > { %6057 = vmatmul.mubr.bf16.vlgmr.msra.gmra.mrb[0].mxu0 %v7163_v11  ;;  %6417 = vmatmul.mubr.bf16.vlgmr.msra.gmra.mrb[0].mxu1 %v7553_v12  ;;  %v7224_v11 = vld [vmem:[%s8039_s1 + $0x160] sm:$0xff]  }
  0x88   : > { %6081 = vmatpush3.bf16.msra.mxu0 %v7164_v4  ;;  %6441 = vmatpush3.bf16.msra.mxu1 %v7164_v4  ;;  %v7307_v4 = vld [vmem:[%s7394_s25 + $0x90] sm:$0xff]  }
  0x89   : > { %6082 = vmatprep.subr.bf16.mxu0 %v7166_v13  ;;  %6442 = vmatprep.subr.bf16.mxu1 %v7166_v13 }
  0x8a   : > { %6060 = vmatprep.mubr.bf16.mxu0 %v7167_v14  ;;  %6420 = vmatprep.mubr.bf16.mxu1 %v7560_v15  ;;  %v7755_v14 = vld [vmem:[%s7394_s25 + $0x128] sm:$0xff]  }
  0x8c   : > { %6083 = vmatpush3.bf16.msra.mxu0 %v7166_v13  ;;  %6443 = vmatpush3.bf16.msra.mxu1 %v7166_v13  ;;  %v7752_v13 = vld [vmem:[%s7394_s25 + $0x120] sm:$0xff]  }
  0x8d   : > { %6084 = vmatprep.subr.bf16.mxu0 %v7171_v16  ;;  %6444 = vmatprep.subr.bf16.mxu1 %v7171_v16 }
  0x8f   : > { %6061 = vmatmul.mubr.bf16.gmra.mrb[4].mxu0 %v7169_v17  ;;  %6421 = vmatmul.mubr.bf16.gmra.mrb[4].mxu1 %v7569_v18  ;;  %v7310_v17 = vld [vmem:[%s7394_s25 + $0xa8] sm:$0xff]  }
  0x90   : > { %6085 = vmatpush3.bf16.msra.mxu0 %v7171_v16  ;;  %6445 = vmatpush3.bf16.msra.mxu1 %v7171_v16  ;;  %v7226_v16 = vld [vmem:[%s8039_s1 + $0x168] sm:$0xff]  }
  0x91   : > { %6064 = vmatprep.mubr.bf16.mxu0 %v7172_v19  ;;  %6424 = vmatprep.mubr.bf16.mxu1 %v7573_v20  ;;  %v7311_v19 = vld [vmem:[%s7394_s25 + $0xb0] sm:$0xff]  }
  0x92   : > { %6086 = vmatprep.subr.bf16.mxu0 %v7176_v21  ;;  %6446 = vmatprep.subr.bf16.mxu1 %v7176_v21 }
  0x94   : > { %6087 = vmatpush3.bf16.msra.mxu0 %v7176_v21  ;;  %6447 = vmatpush3.bf16.msra.mxu1 %v7176_v21  ;;  %v7229_v21 = vld [vmem:[%s8039_s1 + $0x170] sm:$0xff]  }
  0x95   : > { %6088 = vmatprep.subr.bf16.mxu0 %v7180_v23  ;;  %6448 = vmatprep.subr.bf16.mxu1 %v7180_v23 }
  0x97   : > { %6065 = vmatmul.mubr.bf16.gmra.mrb[8].mxu0 %v7174_v22  ;;  %6425 = vmatmul.mubr.bf16.gmra.mrb[8].mxu1 %v7585_v24  ;;  %v7768_v22 = vld [vmem:[%s7394_s25 + $0x130] sm:$0xff]  }
  0x98   : > { %6068 = vmatprep.mubr.bf16.mxu0 %v7177_v25  ;;  %6428 = vmatprep.mubr.bf16.mxu1 %v7589_v26  ;;  %v7232_v25 = vld [vmem:[%s8039_s1 + $0x178] sm:$0xff]  }
  0x99   : > { %6089 = vmatpush3.bf16.msra.mxu0 %v7180_v23  ;;  %6449 = vmatpush3.bf16.msra.mxu1 %v7180_v23  ;;  %v7771_v23 = vld [vmem:[%s7394_s25 + $0x138] sm:$0xff]  }
  0x9a   : > { %6090 = vmatprep.subr.bf16.mxu0 %v7182_v27  ;;  %6450 = vmatprep.subr.bf16.mxu1 %v7182_v27 }
  0x9d   : > { %6091 = vmatpush3.bf16.msra.mxu0 %v7182_v27  ;;  %6451 = vmatpush3.bf16.msra.mxu1 %v7182_v27  ;;  %v7312_v27 = vld [vmem:[%s7394_s25 + $0xb8] sm:$0xff]  }
  0x9e   : > { %6092 = vmatprep.subr.bf16.mxu0 %v7187_v28  ;;  %6452 = vmatprep.subr.bf16.mxu1 %v7187_v28 }
  0x9f   : > { %6069 = vmatmul.mubr.bf16.gmra.mrb[12].mxu0 %v7179_v29  ;;  %6429 = vmatmul.mubr.bf16.gmra.mrb[12].mxu1 %v7601_v30  ;;  %v7234_v29 = vld [vmem:[%s8039_s1 + $0x180] sm:$0xff]  }
  0xa0   : > { %6072 = vmatprep.mubr.bf16.mxu0 %v7183_v31  ;;  %6432 = vmatprep.mubr.bf16.mxu1 %v7605_v32  ;;  %v7784_v31 = vld [vmem:[%s7394_s25 + $0x140] sm:$0xff]  }
  0xa1   : > { %6093 = vmatpush3.bf16.msra.mxu0 %v7187_v28  ;;  %6453 = vmatpush3.bf16.msra.mxu1 %v7187_v28  ;;  %v7313_v28 = vld [vmem:[%s7394_s25 + $0xc0] sm:$0xff]  }
  0xa2   : > { %6094 = vmatprep.subr.bf16.mxu0 %v7192_v33  ;;  %6454 = vmatprep.subr.bf16.mxu1 %v7192_v33 }
  0xa5   : > { %6095 = vmatpush3.bf16.msra.mxu0 %v7192_v33  ;;  %6455 = vmatpush3.bf16.msra.mxu1 %v7192_v33  ;;  %v7787_v33 = vld [vmem:[%s7394_s25 + $0x148] sm:$0xff]  }
  0xa6   : > { %6120 = vmatprep.subr.bf16.mxu0 %v7194_v36  ;;  %6480 = vmatprep.subr.bf16.mxu1 %v7194_v36 }
  0xa7   : > { %6073 = vmatmul.mubr.bf16.gmra.mrb[16].mxu0 %v7185_v34  ;;  %6433 = vmatmul.mubr.bf16.gmra.mrb[16].mxu1 %v7614_v35  ;;  %v7314_v34 = vld [vmem:[%s7394_s25 + $0xc8] sm:$0xff]  }
  0xa8   : > { %6076 = vmatprep.mubr.bf16.mxu0 %v7188_v37  ;;  %6436 = vmatprep.mubr.bf16.mxu1 %v7621_v38  ;;  %v7794_v37 = vld [vmem:[%s7394_s25 + $0x150] sm:$0xff]  }
  0xaf   : > { %6077 = vmatmul.mubr.bf16.gmra.mrb[20].mxu0 %v7190_v39  ;;  %6437 = vmatmul.mubr.bf16.gmra.mrb[20].mxu1 %v7627_v40  ;;  %v7797_v39 = vld [vmem:[%s7394_s25 + $0x100] sm:$0xff]  }
  0xb0   : > { %6096 = vmatprep.mubr.bf16.mxu0 %v7464_v42  ;;  %6456 = vmatprep.mubr.bf16.mxu1 %v7630_v41  ;;  %v7199_v42 = vld [vmem:[%s8039_s1 + $0x110] sm:$0xff]  }
  0xb7   : > { %6097 = vmatmul.mubr.bf16.vlgmr.msra.gmra.mrb[0].mxu0 %v7469_v44  ;;  %6457 = vmatmul.mubr.bf16.vlgmr.msra.gmra.mrb[0].mxu1 %v7636_v43  ;;  %v7202_v44 = vld [vmem:[%s8039_s1 + $0x118] sm:$0xff]  }
  0xb8   : > { %6121 = vmatpush3.bf16.msra.mxu0 %v7194_v36  ;;  %6481 = vmatpush3.bf16.msra.mxu1 %v7194_v36  ;;  %v7315_v36 = vld [vmem:[%s7394_s25 + $0xd0] sm:$0xff]  }
  0xb9   : > { %6122 = vmatprep.subr.bf16.mxu0 %v7196_v45  ;;  %6482 = vmatprep.subr.bf16.mxu1 %v7196_v45 }
  0xba   : > { %6100 = vmatprep.mubr.bf16.mxu0 %v7476_v47  ;;  %6460 = vmatprep.mubr.bf16.mxu1 %v7642_v46  ;;  %v7204_v47 = vld [vmem:[%s8039_s1 + $0x120] sm:$0xff]  }
  0xbc   : > { %6123 = vmatpush3.bf16.msra.mxu0 %v7196_v45  ;;  %6483 = vmatpush3.bf16.msra.mxu1 %v7196_v45  ;;  %v7316_v45 = vld [vmem:[%s7394_s25 + $0xd8] sm:$0xff]  }
  0xbd   : > { %6124 = vmatprep.subr.bf16.mxu0 %v7199_v42  ;;  %6484 = vmatprep.subr.bf16.mxu1 %v7199_v42 }
  0xbf   : > { %6101 = vmatmul.mubr.bf16.gmra.mrb[4].mxu0 %v7485_v50  ;;  %6461 = vmatmul.mubr.bf16.gmra.mrb[4].mxu1 %v7650_v48  ;;  %v7206_v50 = vld [vmem:[%s8039_s1 + $0x128] sm:$0xff]  }
  0xc0   : > { %6125 = vmatpush3.bf16.msra.mxu0 %v7199_v42  ;;  %6485 = vmatpush3.bf16.msra.mxu1 %v7199_v42  ;;  %v7804_v42 = vld [vmem:[%s7394_s25 + $0x108] sm:$0xff]  }
  0xc1   : > { %6104 = vmatprep.mubr.bf16.mxu0 %v7489_v52  ;;  %6464 = vmatprep.mubr.bf16.mxu1 %v7655_v49  ;;  %v7209_v52 = vld [vmem:[%s8039_s1 + $0x130] sm:$0xff]  }
  0xc2   : > { %6126 = vmatprep.subr.bf16.mxu0 %v7202_v44  ;;  %6486 = vmatprep.subr.bf16.mxu1 %v7202_v44 }
  0xc4   : > { %6127 = vmatpush3.bf16.msra.mxu0 %v7202_v44  ;;  %6487 = vmatpush3.bf16.msra.mxu1 %v7202_v44  ;;  %v7236_v44 = vld [vmem:[%s8039_s1 + $0x188] sm:$0xff]  }
  0xc5   : > { %6128 = vmatprep.subr.bf16.mxu0 %v7204_v47  ;;  %6488 = vmatprep.subr.bf16.mxu1 %v7204_v47 }
  0xc7   : > { %6105 = vmatmul.mubr.bf16.gmra.mrb[8].mxu0 %v7501_v56  ;;  %6465 = vmatmul.mubr.bf16.gmra.mrb[8].mxu1 %v7668_v51  ;;  %v7212_v56 = vld [vmem:[%s8039_s1 + $0x138] sm:$0xff]  }
  0xc8   : > { %6108 = vmatprep.mubr.bf16.mxu0 %v7505_v58  ;;  %6468 = vmatprep.mubr.bf16.mxu1 %v7671_v53  ;;  %v7700_v58 = vld [vmem:[%s7394_s25 + $0x138] sm:$0xff]  }
  0xc9   : > { %6129 = vmatpush3.bf16.msra.mxu0 %v7204_v47  ;;  %6489 = vmatpush3.bf16.msra.mxu1 %v7204_v47  ;;  %v7810_v47 = vld [vmem:[%s7394_s25 + $0x110] sm:$0xff]  }
  0xca   : > { %6130 = vmatprep.subr.bf16.mxu0 %v7206_v50  ;;  %6490 = vmatprep.subr.bf16.mxu1 %v7206_v50 }
  0xcd   : > { %6131 = vmatpush3.bf16.msra.mxu0 %v7206_v50  ;;  %6491 = vmatpush3.bf16.msra.mxu1 %v7206_v50  ;;  %v7820_v50 = vld [vmem:[%s7394_s25 + $0x118] sm:$0xff]  }
  0xce   : > { %6132 = vmatprep.subr.bf16.mxu0 %v7209_v52  ;;  %6492 = vmatprep.subr.bf16.mxu1 %v7209_v52 }
  0xcf   : > { %6109 = vmatmul.mubr.bf16.gmra.mrb[12].mxu0 %v7514_v61  ;;  %6469 = vmatmul.mubr.bf16.gmra.mrb[12].mxu1 %v7684_v54  ;;  %v7713_v61 = vld [vmem:[%s7394_s25 + $0xf8] sm:$0xff]  }
  0xd0   : > { %6112 = vmatprep.mubr.bf16.mxu0 %v7521_v0  ;;  %6472 = vmatprep.mubr.bf16.mxu1 %v7687_v55  ;;  %v7216_v0 = vld [vmem:[%s8039_s1 + $0x148] sm:$0xff]  }
  0xd1   : > { %6133 = vmatpush3.bf16.msra.mxu0 %v7209_v52  ;;  %6493 = vmatpush3.bf16.msra.mxu1 %v7209_v52  ;;  %v7242_v52 = vld [vmem:[%s8039_s1 + $0x198] sm:$0xff]  }
  0xd2   : > { %6134 = vmatprep.subr.bf16.mxu0 %v7212_v56  ;;  %6494 = vmatprep.subr.bf16.mxu1 %v7212_v56 }
  0xd5   : > { %6135 = vmatpush3.bf16.msra.mxu0 %v7212_v56  ;;  %6495 = vmatpush3.bf16.msra.mxu1 %v7212_v56  ;;  %v7836_v56 = vld [vmem:[%s7394_s25 + $0x128] sm:$0xff]  }
  0xd6   : > { %6160 = vmatprep.subr.bf16.mxu0 %v7214_v57  ;;  %6520 = vmatprep.subr.bf16.mxu1 %v7214_v57 }
  0xd7   : > { %6113 = vmatmul.mubr.bf16.gmra.mrb[16].mxu0 %v7530_v3  ;;  %6473 = vmatmul.mubr.bf16.gmra.mrb[16].mxu1 %v7700_v58  ;;  %v7219_v3 = vld [vmem:[%s8039_s1 + $0x150] sm:$0xff]  }
  0xd8   : > { %6116 = vmatprep.mubr.bf16.mxu0 %v7537_v6  ;;  %6476 = vmatprep.mubr.bf16.mxu1 %v7703_v59  ;;  %v7739_v6 = vld [vmem:[%s7394_s25 + $0x118] sm:$0xff]  }
  0xdf   : > { %6117 = vmatmul.mubr.bf16.gmra.mrb[20].mxu0 %v7543_v8  ;;  %6477 = vmatmul.mubr.bf16.gmra.mrb[20].mxu1 %v7710_v60  ;;  %v7308_v8 = vld [vmem:[%s7394_s25 + $0x98] sm:$0xff]  }
  0xe0   : > { %6136 = vmatprep.mubr.bf16.mxu0 %v7305_v62  ;;  %6496 = vmatprep.mubr.bf16.mxu1 %v7713_v61  ;;  %v7852_v62 = vld [vmem:[%s7394_s25 + $0x138] sm:$0xff]  }
  0xe7   : > { %6137 = vmatmul.mubr.bf16.vlgmr.msra.gmra.mrb[0].mxu0 %v7306_v2  ;;  %6497 = vmatmul.mubr.bf16.vlgmr.msra.gmra.mrb[0].mxu1 %v7720_v63  ;;  %v7868_v2 = vld [vmem:[%s7394_s25 + $0x148] sm:$0xff]  }
  0xe8   : > { %6161 = vmatpush3.bf16.msra.mxu0 %v7214_v57  ;;  %6521 = vmatpush3.bf16.msra.mxu1 %v7214_v57  ;;  %v7249_v57 = vld [vmem:[%s8039_s1 + $0x1b0] sm:$0xff]  }
  0xe9   : > { %6162 = vmatprep.subr.bf16.mxu0 %v7216_v0  ;;  %6522 = vmatprep.subr.bf16.mxu1 %v7216_v0 }
  0xea   : > { %6140 = vmatprep.mubr.bf16.mxu0 %v7307_v4  ;;  %6500 = vmatprep.mubr.bf16.mxu1 %v7726_v1  ;;  %v7255_v4 = vld [vmem:[%s7394_s25 + $0x170] sm:$0xff]  }
  0xec   : > { %6163 = vmatpush3.bf16.msra.mxu0 %v7216_v0  ;;  %6523 = vmatpush3.bf16.msra.mxu1 %v7216_v0  ;;  %v7855_v0 = vld [vmem:[%s7394_s25 + $0x140] sm:$0xff]  }
  0xed   : > { %6164 = vmatprep.subr.bf16.mxu0 %v7219_v3  ;;  %6524 = vmatprep.subr.bf16.mxu1 %v7219_v3 }
  0xef   : > { %6141 = vmatmul.mubr.bf16.gmra.mrb[4].mxu0 %v7308_v8  ;;  %6501 = vmatmul.mubr.bf16.gmra.mrb[4].mxu1 %v7736_v5  ;;  %v7261_v8 = vld [vmem:[%s7394_s25 + $0x190] sm:$0xff]  }
  0xf0   : > { %6165 = vmatpush3.bf16.msra.mxu0 %v7219_v3  ;;  %6525 = vmatpush3.bf16.msra.mxu1 %v7219_v3  ;;  %v7253_v3 = vld [vmem:[%s7394_s25 + $0x168] sm:$0xff]  }
  0xf1   : > { %6144 = vmatprep.mubr.bf16.mxu0 %v7309_v9  ;;  %6504 = vmatprep.mubr.bf16.mxu1 %v7739_v6  ;;  %v7263_v9 = vld [vmem:[%s7394_s25 + $0x198] sm:$0xff]  }
  0xf2   : > { %6166 = vmatprep.subr.bf16.mxu0 %v7222_v7  ;;  %6526 = vmatprep.subr.bf16.mxu1 %v7222_v7 }
  0xf4   : > { %6167 = vmatpush3.bf16.msra.mxu0 %v7222_v7  ;;  %6527 = vmatpush3.bf16.msra.mxu1 %v7222_v7  ;;  %v7262_v7 = vld [vmem:[%s8039_s1 + $0x1d8] sm:$0xff]  }
  0xf5   : > { %6168 = vmatprep.subr.bf16.mxu0 %v7224_v11  ;;  %6528 = vmatprep.subr.bf16.mxu1 %v7224_v11 }
  0xf7   : > { %6145 = vmatmul.mubr.bf16.gmra.mrb[8].mxu0 %v7310_v17  ;;  %6505 = vmatmul.mubr.bf16.gmra.mrb[8].mxu1 %v7752_v13  ;;  %v7268_v17 = vld [vmem:[%s7394_s25 + $0x1b0] sm:$0xff]  }
  0xf8   : > { %6148 = vmatprep.mubr.bf16.mxu0 %v7311_v19  ;;  %6508 = vmatprep.mubr.bf16.mxu1 %v7755_v14  ;;  %v7270_v19 = vld [vmem:[%s7394_s25 + $0x1b8] sm:$0xff]  }
  0xf9   : > { %6169 = vmatpush3.bf16.msra.mxu0 %v7224_v11  ;;  %6529 = vmatpush3.bf16.msra.mxu1 %v7224_v11  ;;  %v7265_v11 = vld [vmem:[%s7394_s25 + $0x1a0] sm:$0xff]  }
  0xfa   : > { %6170 = vmatprep.subr.bf16.mxu0 %v7226_v16  ;;  %6530 = vmatprep.subr.bf16.mxu1 %v7226_v16 }
  0xfd   : > { %6171 = vmatpush3.bf16.msra.mxu0 %v7226_v16  ;;  %6531 = vmatpush3.bf16.msra.mxu1 %v7226_v16  ;;  %v7267_v16 = vld [vmem:[%s7394_s25 + $0x1a8] sm:$0xff]  }
  0xfe   : > { %6172 = vmatprep.subr.bf16.mxu0 %v7229_v21  ;;  %6532 = vmatprep.subr.bf16.mxu1 %v7229_v21 }
  0xff   : > { %6149 = vmatmul.mubr.bf16.gmra.mrb[12].mxu0 %v7312_v27  ;;  %6509 = vmatmul.mubr.bf16.gmra.mrb[12].mxu1 %v7768_v22  ;;  %v7281_v27 = vld [vmem:[%s7394_s25 + $0x198] sm:$0xff]  }
 0x100   : > { %6152 = vmatprep.mubr.bf16.mxu0 %v7313_v28  ;;  %6512 = vmatprep.mubr.bf16.mxu1 %v7771_v23  ;;  %v7283_v28 = vld [vmem:[%s7394_s25 + $0x1a0] sm:$0xff]  }
 0x101   : > { %6173 = vmatpush3.bf16.msra.mxu0 %v7229_v21  ;;  %6533 = vmatpush3.bf16.msra.mxu1 %v7229_v21  ;;  %v7275_v21 = vld [vmem:[%s7394_s25 + $0x178] sm:$0xff]  }
 0x102   : > { %6174 = vmatprep.subr.bf16.mxu0 %v7232_v25  ;;  %6534 = vmatprep.subr.bf16.mxu1 %v7232_v25 }
 0x105   : > { %6175 = vmatpush3.bf16.msra.mxu0 %v7232_v25  ;;  %6535 = vmatpush3.bf16.msra.mxu1 %v7232_v25  ;;  %v7276_v25 = vld [vmem:[%s8039_s1 + $0x208] sm:$0xff]  }
 0x106   : > { %6200 = vmatprep.subr.bf16.mxu0 %v7234_v29  ;;  %6560 = vmatprep.subr.bf16.mxu1 %v7234_v29 }
 0x107   : > { %6153 = vmatmul.mubr.bf16.gmra.mrb[16].mxu0 %v7314_v34  ;;  %6513 = vmatmul.mubr.bf16.gmra.mrb[16].mxu1 %v7784_v31  ;;  %v7287_v34 = vld [vmem:[%s7394_s25 + $0x1b0] sm:$0xff]  }
 0x108   : > { %6156 = vmatprep.mubr.bf16.mxu0 %v7315_v36  ;;  %6516 = vmatprep.mubr.bf16.mxu1 %v7787_v33  ;;  %v7290_v36 = vld [vmem:[%s7394_s25 + $0x1c0] sm:$0xff]  }
 0x10f   : > { %6157 = vmatmul.mubr.bf16.gmra.mrb[20].mxu0 %v7316_v45  ;;  %6517 = vmatmul.mubr.bf16.gmra.mrb[20].mxu1 %v7794_v37  ;;  %v7294_v45 = vld [vmem:[%s7394_s25 + $0x180] sm:$0xff]  }
 0x110   : > { %6176 = vmatprep.mubr.bf16.mxu0 %v7547_v10  ;;  %6536 = vmatprep.mubr.bf16.mxu1 %v7797_v39  ;;  %v7239_v10 = vld [vmem:[%s8039_s1 + $0x190] sm:$0xff]  }
 0x117   : > { %6177 = vmatmul.mubr.bf16.vlgmr.msra.gmra.mrb[0].mxu0 %v7553_v12  ;;  %6537 = vmatmul.mubr.bf16.vlgmr.msra.gmra.mrb[0].mxu1 %v7804_v42  ;;  %v7823_v12 = vld [vmem:[%s7394_s25 + $0x120] sm:$0xff]  }
 0x118   : > { %6201 = vmatpush3.bf16.msra.mxu0 %v7234_v29  ;;  %6561 = vmatpush3.bf16.msra.mxu1 %v7234_v29  ;;  %v7285_v29 = vld [vmem:[%s7394_s25 + $0x1a8] sm:$0xff]  }
 0x119   : > { %6202 = vmatprep.subr.bf16.mxu0 %v7236_v44  ;;  %6562 = vmatprep.subr.bf16.mxu1 %v7236_v44 }
 0x11a   : > { %6180 = vmatprep.mubr.bf16.mxu0 %v7560_v15  ;;  %6540 = vmatprep.mubr.bf16.mxu1 %v7810_v47  ;;  %v7244_v15 = vld [vmem:[%s8039_s1 + $0x1a0] sm:$0xff]  }
 0x11c   : > { %6203 = vmatpush3.bf16.msra.mxu0 %v7236_v44  ;;  %6563 = vmatpush3.bf16.msra.mxu1 %v7236_v44  ;;  %v7295_v44 = vld [vmem:[%s7394_s25 + $0x188] sm:$0xff]  }
 0x11d   : > { %6204 = vmatprep.subr.bf16.mxu0 %v7239_v10  ;;  %6564 = vmatprep.subr.bf16.mxu1 %v7239_v10 }
 0x11f   : > { %6181 = vmatmul.mubr.bf16.gmra.mrb[4].mxu0 %v7569_v18  ;;  %6541 = vmatmul.mubr.bf16.gmra.mrb[4].mxu1 %v7820_v50  ;;  %v7839_v18 = vld [vmem:[%s7394_s25 + $0x130] sm:$0xff]  }
 0x120   : > { %6205 = vmatpush3.bf16.msra.mxu0 %v7239_v10  ;;  %6565 = vmatpush3.bf16.msra.mxu1 %v7239_v10  ;;  %v7302_v10 = vld [vmem:[%s7394_s25 + $0x1c0] sm:$0xff]  }
 0x121   : > { %6184 = vmatprep.mubr.bf16.mxu0 %v7573_v20  ;;  %6544 = vmatprep.mubr.bf16.mxu1 %v7823_v12  ;;  %v7246_v20 = vld [vmem:[%s8039_s1 + $0x1a8] sm:$0xff]  }
 0x122   : > { %6206 = vmatprep.subr.bf16.mxu0 %v7242_v52  ;;  %6566 = vmatprep.subr.bf16.mxu1 %v7242_v52 }
 0x124   : > { %6207 = vmatpush3.bf16.msra.mxu0 %v7242_v52  ;;  %6567 = vmatpush3.bf16.msra.mxu1 %v7242_v52 }
 0x125   : > { %6208 = vmatprep.subr.bf16.mxu0 %v7244_v15  ;;  %6568 = vmatprep.subr.bf16.mxu1 %v7244_v15 }
 0x127   : > { %6185 = vmatmul.mubr.bf16.gmra.mrb[8].mxu0 %v7585_v24  ;;  %6545 = vmatmul.mubr.bf16.gmra.mrb[8].mxu1 %v7836_v56  ;;  %v7252_v24 = vld [vmem:[%s8039_s1 + $0x1b8] sm:$0xff]  }
 0x128   : > { %6188 = vmatprep.mubr.bf16.mxu0 %v7589_v26  ;;  %6548 = vmatprep.mubr.bf16.mxu1 %v7839_v18  ;;  %v7254_v26 = vld [vmem:[%s8039_s1 + $0x1c0] sm:$0xff]  }
 0x129   : > { %6209 = vmatpush3.bf16.msra.mxu0 %v7244_v15  ;;  %6569 = vmatpush3.bf16.msra.mxu1 %v7244_v15 }
 0x12a   : > { %6210 = vmatprep.subr.bf16.mxu0 %v7246_v20  ;;  %6570 = vmatprep.subr.bf16.mxu1 %v7246_v20 }
 0x12d   : > { %6211 = vmatpush3.bf16.msra.mxu0 %v7246_v20  ;;  %6571 = vmatpush3.bf16.msra.mxu1 %v7246_v20 }
 0x12e   : > { %6212 = vmatprep.subr.bf16.mxu0 %v7249_v57  ;;  %6572 = vmatprep.subr.bf16.mxu1 %v7249_v57 }
 0x12f   : > { %6189 = vmatmul.mubr.bf16.gmra.mrb[12].mxu0 %v7601_v30  ;;  %6549 = vmatmul.mubr.bf16.gmra.mrb[12].mxu1 %v7852_v62  ;;  %v7871_v30 = vld [vmem:[%s7394_s25 + $0x150] sm:$0xff]  }
 0x130   : > { %6192 = vmatprep.mubr.bf16.mxu0 %v7605_v32  ;;  %6552 = vmatprep.mubr.bf16.mxu1 %v7855_v0  ;;  %v7878_v32 = vld [vmem:[%s7394_s25 + $0x158] sm:$0xff]  }
 0x131   : > { %6213 = vmatpush3.bf16.msra.mxu0 %v7249_v57  ;;  %6573 = vmatpush3.bf16.msra.mxu1 %v7249_v57 }
 0x132   : > { %6214 = vmatprep.subr.bf16.mxu0 %v7252_v24  ;;  %6574 = vmatprep.subr.bf16.mxu1 %v7252_v24 }
 0x135   : > { %6215 = vmatpush3.bf16.msra.mxu0 %v7252_v24  ;;  %6575 = vmatpush3.bf16.msra.mxu1 %v7252_v24  ;;  %v8003_v24 = vld [vmem:[%s8040_s2] ss:$0 sm:$0xff] }
 0x136   : > { %6240 = vmatprep.subr.bf16.mxu0 %v7254_v26  ;;  %6600 = vmatprep.subr.bf16.mxu1 %v7254_v26 }
 0x137   : > { %6193 = vmatmul.mubr.bf16.gmra.mrb[16].mxu0 %v7614_v35  ;;  %6553 = vmatmul.mubr.bf16.gmra.mrb[16].mxu1 %v7868_v2  ;;  %v7256_v35 = vld [vmem:[%s8039_s1 + $0x1c8] sm:$0xff]  }
 0x138   : > { %6196 = vmatprep.mubr.bf16.mxu0 %v7621_v38  ;;  %6556 = vmatprep.mubr.bf16.mxu1 %v7871_v30  ;;  %v7257_v38 = vld [vmem:[%s7394_s25 + $0x178] sm:$0xff]  }
 0x13f   : > { %6197 = vmatmul.mubr.bf16.gmra.mrb[20].mxu0 %v7627_v40  ;;  %6557 = vmatmul.mubr.bf16.gmra.mrb[20].mxu1 %v7878_v32  ;;  %v7259_v40 = vld [vmem:[%s8039_s1 + $0x1d0] sm:$0xff]  }
 0x140   : > { %6216 = vmatprep.mubr.bf16.mxu0 %v7630_v41  ;;  %6576 = vmatprep.mubr.bf16.mxu1 %v7253_v3  ;;  %v7258_v41 = vld [vmem:[%s7394_s25 + $0x180] sm:$0xff]  }
 0x147   : > { %6217 = vmatmul.mubr.bf16.vlgmr.msra.gmra.mrb[0].mxu0 %v7636_v43  ;;  %6577 = vmatmul.mubr.bf16.vlgmr.msra.gmra.mrb[0].mxu1 %v7255_v4  ;;  %v7260_v43 = vld [vmem:[%s7394_s25 + $0x188] sm:$0xff]  }
 0x148   : > { %6241 = vmatpush3.bf16.msra.mxu0 %v7254_v26  ;;  %6601 = vmatpush3.bf16.msra.mxu1 %v7254_v26 }
 0x149   : > { %6242 = vmatprep.subr.bf16.mxu0 %v7256_v35  ;;  %6602 = vmatprep.subr.bf16.mxu1 %v7256_v35 }
 0x14a   : > { %6220 = vmatprep.mubr.bf16.mxu0 %v7642_v46  ;;  %6580 = vmatprep.mubr.bf16.mxu1 %v7257_v38  ;;  %v7264_v46 = vld [vmem:[%s8039_s1 + $0x1e0] sm:$0xff]  }
 0x14c   : > { %6243 = vmatpush3.bf16.msra.mxu0 %v7256_v35  ;;  %6603 = vmatpush3.bf16.msra.mxu1 %v7256_v35 }
 0x14d   : > { %6244 = vmatprep.subr.bf16.mxu0 %v7259_v40  ;;  %6604 = vmatprep.subr.bf16.mxu1 %v7259_v40 }
 0x14f   : > { %6221 = vmatmul.mubr.bf16.gmra.mrb[4].mxu0 %v7650_v48  ;;  %6581 = vmatmul.mubr.bf16.gmra.mrb[4].mxu1 %v7258_v41  ;;  %v7266_v48 = vld [vmem:[%s8039_s1 + $0x1e8] sm:$0xff]  }
 0x150   : > { %6245 = vmatpush3.bf16.msra.mxu0 %v7259_v40  ;;  %6605 = vmatpush3.bf16.msra.mxu1 %v7259_v40 }
 0x151   : > { %6224 = vmatprep.mubr.bf16.mxu0 %v7655_v49  ;;  %6584 = vmatprep.mubr.bf16.mxu1 %v7260_v43  ;;  %v7269_v49 = vld [vmem:[%s8039_s1 + $0x1f0] sm:$0xff]  }
 0x152   : > { %6246 = vmatprep.subr.bf16.mxu0 %v7262_v7  ;;  %6606 = vmatprep.subr.bf16.mxu1 %v7262_v7 }
 0x154   : > { %6247 = vmatpush3.bf16.msra.mxu0 %v7262_v7  ;;  %6607 = vmatpush3.bf16.msra.mxu1 %v7262_v7 }
 0x155   : > { %6248 = vmatprep.subr.bf16.mxu0 %v7264_v46  ;;  %6608 = vmatprep.subr.bf16.mxu1 %v7264_v46 }
 0x157   : > { %6225 = vmatmul.mubr.bf16.gmra.mrb[8].mxu0 %v7668_v51  ;;  %6585 = vmatmul.mubr.bf16.gmra.mrb[8].mxu1 %v7261_v8  ;;  %v7272_v51 = vld [vmem:[%s8039_s1 + $0x1f8] sm:$0xff]  }
 0x158   : > { %6228 = vmatprep.mubr.bf16.mxu0 %v7671_v53  ;;  %6588 = vmatprep.mubr.bf16.mxu1 %v7263_v9  ;;  %v7274_v53 = vld [vmem:[%s8039_s1 + $0x200] sm:$0xff]  }
 0x159   : > { %6249 = vmatpush3.bf16.msra.mxu0 %v7264_v46  ;;  %6609 = vmatpush3.bf16.msra.mxu1 %v7264_v46 }
 0x15a   : > { %6250 = vmatprep.subr.bf16.mxu0 %v7266_v48  ;;  %6610 = vmatprep.subr.bf16.mxu1 %v7266_v48 }
 0x15d   : > { %6251 = vmatpush3.bf16.msra.mxu0 %v7266_v48  ;;  %6611 = vmatpush3.bf16.msra.mxu1 %v7266_v48 }
 0x15e   : > { %6252 = vmatprep.subr.bf16.mxu0 %v7269_v49  ;;  %6612 = vmatprep.subr.bf16.mxu1 %v7269_v49 }
 0x15f   : > { %6229 = vmatmul.mubr.bf16.gmra.mrb[12].mxu0 %v7684_v54  ;;  %6589 = vmatmul.mubr.bf16.gmra.mrb[12].mxu1 %v7265_v11  ;;  %v7271_v54 = vld [vmem:[%s7394_s25 + $0x1c0] sm:$0xff]  }
 0x160   : > { %6232 = vmatprep.mubr.bf16.mxu0 %v7687_v55  ;;  %6592 = vmatprep.mubr.bf16.mxu1 %v7267_v16  ;;  %v7273_v55 = vld [vmem:[%s7394_s25 + $0x170] sm:$0xff]  }
 0x161   : > { %6253 = vmatpush3.bf16.msra.mxu0 %v7269_v49  ;;  %6613 = vmatpush3.bf16.msra.mxu1 %v7269_v49 }
 0x162   : > { %6254 = vmatprep.subr.bf16.mxu0 %v7272_v51  ;;  %6614 = vmatprep.subr.bf16.mxu1 %v7272_v51 }
 0x165   : > { %6255 = vmatpush3.bf16.msra.mxu0 %v7272_v51  ;;  %6615 = vmatpush3.bf16.msra.mxu1 %v7272_v51 }
 0x166   : > { %6280 = vmatprep.subr.bf16.mxu0 %v7274_v53  ;;  %6640 = vmatprep.subr.bf16.mxu1 %v7274_v53 }
 0x167   : > { %6233 = vmatmul.mubr.bf16.gmra.mrb[16].mxu0 %v7700_v58  ;;  %6593 = vmatmul.mubr.bf16.gmra.mrb[16].mxu1 %v7268_v17  ;;  %v7277_v58 = vld [vmem:[%s7394_s25 + $0x180] sm:$0xff]  }
 0x168   : > { %6236 = vmatprep.mubr.bf16.mxu0 %v7703_v59  ;;  %6596 = vmatprep.mubr.bf16.mxu1 %v7270_v19  ;;  %v7279_v59 = vld [vmem:[%s8039_s1 + $0x210] sm:$0xff]  }
 0x16f   : > { %6237 = vmatmul.mubr.bf16.gmra.mrb[20].mxu0 %v7710_v60  ;;  %6597 = vmatmul.mubr.bf16.gmra.mrb[20].mxu1 %v7271_v54  ;;  %v7278_v60 = vld [vmem:[%s7394_s25 + $0x188] sm:$0xff]  }
 0x170   : > { %6256 = vmatprep.mubr.bf16.mxu0 %v7713_v61  ;;  %6616 = vmatprep.mubr.bf16.mxu1 %v7273_v55  ;;  %v7280_v61 = vld [vmem:[%s7394_s25 + $0x190] sm:$0xff]  }
 0x177   : > { %6257 = vmatmul.mubr.bf16.vlgmr.msra.gmra.mrb[0].mxu0 %v7720_v63  ;;  %6617 = vmatmul.mubr.bf16.vlgmr.msra.gmra.mrb[0].mxu1 %v7275_v21  ;;  %v7282_v63 = vld [vmem:[%s8039_s1 + $0x218] sm:$0xff]  }
 0x178   : > { %6281 = vmatpush3.bf16.msra.mxu0 %v7274_v53  ;;  %6641 = vmatpush3.bf16.msra.mxu1 %v7274_v53 }
 0x179   : > { %6282 = vmatprep.subr.bf16.mxu0 %v7276_v25  ;;  %6642 = vmatprep.subr.bf16.mxu1 %v7276_v25 }
 0x17a   : > { %6260 = vmatprep.mubr.bf16.mxu0 %v7726_v1  ;;  %6620 = vmatprep.mubr.bf16.mxu1 %v7277_v58  ;;  %v7284_v1 = vld [vmem:[%s8039_s1 + $0x220] sm:$0xff]  }
 0x17c   : > { %6283 = vmatpush3.bf16.msra.mxu0 %v7276_v25  ;;  %6643 = vmatpush3.bf16.msra.mxu1 %v7276_v25 }
 0x17d   : > { %6284 = vmatprep.subr.bf16.mxu0 %v7279_v59  ;;  %6644 = vmatprep.subr.bf16.mxu1 %v7279_v59 }
 0x17f   : > { %6261 = vmatmul.mubr.bf16.gmra.mrb[4].mxu0 %v7736_v5  ;;  %6621 = vmatmul.mubr.bf16.gmra.mrb[4].mxu1 %v7278_v60  ;;  %v7286_v5 = vld [vmem:[%s8039_s1 + $0x228] sm:$0xff]  }
 0x180   : > { %6285 = vmatpush3.bf16.msra.mxu0 %v7279_v59  ;;  %6645 = vmatpush3.bf16.msra.mxu1 %v7279_v59 }
 0x181   : > { %6264 = vmatprep.mubr.bf16.mxu0 %v7739_v6  ;;  %6624 = vmatprep.mubr.bf16.mxu1 %v7280_v61  ;;  %v7289_v6 = vld [vmem:[%s8039_s1 + $0x230] sm:$0xff]  }
 0x182   : > { %6286 = vmatprep.subr.bf16.mxu0 %v7282_v63  ;;  %6646 = vmatprep.subr.bf16.mxu1 %v7282_v63 }
 0x184   : > { %6287 = vmatpush3.bf16.msra.mxu0 %v7282_v63  ;;  %6647 = vmatpush3.bf16.msra.mxu1 %v7282_v63 }
 0x185   : > { %6288 = vmatprep.subr.bf16.mxu0 %v7284_v1  ;;  %6648 = vmatprep.subr.bf16.mxu1 %v7284_v1 }
 0x187   : > { %6265 = vmatmul.mubr.bf16.gmra.mrb[8].mxu0 %v7752_v13  ;;  %6625 = vmatmul.mubr.bf16.gmra.mrb[8].mxu1 %v7281_v27  ;;  %v7292_v13 = vld [vmem:[%s8039_s1 + $0x238] sm:$0xff]  }
 0x188   : > { %6268 = vmatprep.mubr.bf16.mxu0 %v7755_v14  ;;  %6628 = vmatprep.mubr.bf16.mxu1 %v7283_v28  ;;  %v7288_v14 = vld [vmem:[%s7394_s25 + $0x1b8] sm:$0xff]  }
 0x189   : > { %6289 = vmatpush3.bf16.msra.mxu0 %v7284_v1  ;;  %6649 = vmatpush3.bf16.msra.mxu1 %v7284_v1 }
 0x18a   : > { %6290 = vmatprep.subr.bf16.mxu0 %v7286_v5  ;;  %6650 = vmatprep.subr.bf16.mxu1 %v7286_v5 }
 0x18d   : > { %6291 = vmatpush3.bf16.msra.mxu0 %v7286_v5  ;;  %6651 = vmatpush3.bf16.msra.mxu1 %v7286_v5 }
 0x18e   : > { %6292 = vmatprep.subr.bf16.mxu0 %v7289_v6  ;;  %6652 = vmatprep.subr.bf16.mxu1 %v7289_v6 }
 0x18f   : > { %6269 = vmatmul.mubr.bf16.gmra.mrb[12].mxu0 %v7768_v22  ;;  %6629 = vmatmul.mubr.bf16.gmra.mrb[12].mxu1 %v7285_v29  ;;  %v7291_v22 = vld [vmem:[%s7394_s25 + $0x1c8] sm:$0xff]  }
 0x190   : > { %6272 = vmatprep.mubr.bf16.mxu0 %v7771_v23  ;;  %6632 = vmatprep.mubr.bf16.mxu1 %v7287_v34  ;;  %v7293_v23 = vld [vmem:[%s7394_s25 + $0x178] sm:$0xff]  }
 0x191   : > { %6293 = vmatpush3.bf16.msra.mxu0 %v7289_v6  ;;  %6653 = vmatpush3.bf16.msra.mxu1 %v7289_v6 }
 0x192   : > { %6294 = vmatprep.subr.bf16.mxu0 %v7292_v13  ;;  %6654 = vmatprep.subr.bf16.mxu1 %v7292_v13 }
 0x195   : > { %6295 = vmatpush3.bf16.msra.mxu0 %v7292_v13  ;;  %6655 = vmatpush3.bf16.msra.mxu1 %v7292_v13 }
 0x197   : > { %6273 = vmatmul.mubr.bf16.gmra.mrb[16].mxu0 %v7784_v31  ;;  %6633 = vmatmul.mubr.bf16.gmra.mrb[16].mxu1 %v7288_v14  ;;  %v7296_v31 = vld [vmem:[%s7394_s25 + $0x190] sm:$0xff]  }
 0x198   : > { %6276 = vmatprep.mubr.bf16.mxu0 %v7787_v33  ;;  %6636 = vmatprep.mubr.bf16.mxu1 %v7290_v36  ;;  %v7297_v33 = vld [vmem:[%s7394_s25 + $0x198] sm:$0xff]  }
 0x19f   : > { %6277 = vmatmul.mubr.bf16.gmra.mrb[20].mxu0 %v7794_v37  ;;  %6637 = vmatmul.mubr.bf16.gmra.mrb[20].mxu1 %v7291_v22  ;;  %v7298_v37 = vld [vmem:[%s7394_s25 + $0x1a0] sm:$0xff]  }
 0x1a0   : > { %6296 = vmatprep.mubr.bf16.mxu0 %v7797_v39  ;;  %6656 = vmatprep.mubr.bf16.mxu1 %v7293_v23  ;;  %v7299_v39 = vld [vmem:[%s7394_s25 + $0x1a8] sm:$0xff]  }
 0x1a7   : > { %6297 = vmatmul.mubr.bf16.vlgmr.msra.gmra.mrb[0].mxu0 %v7804_v42  ;;  %6657 = vmatmul.mubr.bf16.vlgmr.msra.gmra.mrb[0].mxu1 %v7294_v45  ;;  %v7300_v42 = vld [vmem:[%s7394_s25 + $0x1b0] sm:$0xff]  }
 0x1a8   : > { %6300 = vmatprep.mubr.bf16.mxu0 %v7810_v47  ;;  %6660 = vmatprep.mubr.bf16.mxu1 %v7295_v44  ;;  %v7301_v47 = vld [vmem:[%s7394_s25 + $0x1b8] sm:$0xff]  }
 0x1af   : > { %6301 = vmatmul.mubr.bf16.gmra.mrb[4].mxu0 %v7820_v50  ;;  %6661 = vmatmul.mubr.bf16.gmra.mrb[4].mxu1 %v7296_v31  ;;  %v7303_v50 = vld [vmem:[%s7394_s25 + $0x1c8] sm:$0xff]  }
 0x1b0   : > { %6304 = vmatprep.mubr.bf16.mxu0 %v7823_v12  ;;  %6664 = vmatprep.mubr.bf16.mxu1 %v7297_v33  ;;  %v7304_v12 = vld [vmem:[%s7394_s25 + $0x1d0] sm:$0xff]   ;;  %s7064_s25 = smul.u32 48, %s8047_s12 }
 0x1b2   : > { %s8011_s9 = scalar_lea.vmem %s8041_s3, %s7064_s25 }
 0x1b7   : > { %6305 = vmatmul.mubr.bf16.gmra.mrb[8].mxu0 %v7836_v56  ;;  %6665 = vmatmul.mubr.bf16.gmra.mrb[8].mxu1 %v7298_v37 }
 0x1b8   : > { %6308 = vmatprep.mubr.bf16.mxu0 %v7839_v18  ;;  %6668 = vmatprep.mubr.bf16.mxu1 %v7299_v39 }
 0x1bf   : > { %6309 = vmatmul.mubr.bf16.gmra.mrb[12].mxu0 %v7852_v62  ;;  %6669 = vmatmul.mubr.bf16.gmra.mrb[12].mxu1 %v7300_v42 }
 0x1c0   : > { %6312 = vmatprep.mubr.bf16.mxu0 %v7855_v0  ;;  %6672 = vmatprep.mubr.bf16.mxu1 %v7301_v47 }
 0x1c7   : > { %6313 = vmatmul.mubr.bf16.gmra.mrb[16].mxu0 %v7868_v2  ;;  %6673 = vmatmul.mubr.bf16.gmra.mrb[16].mxu1 %v7302_v10 }
 0x1c8   : > { %6316 = vmatprep.mubr.bf16.mxu0 %v7871_v30  ;;  %6676 = vmatprep.mubr.bf16.mxu1 %v7303_v50 }
 0x1cf   : > { %6317 = vmatmul.mubr.bf16.gmra.mrb[20].mxu0 %v7878_v32  ;;  %6677 = vmatmul.mubr.bf16.gmra.mrb[20].mxu1 %v7304_v12 }
 0x27a   : > { %v6298_v52 = vpop.f32.mrb[0].mxu0  ;;  %v6658_v15 = vpop.f32.mrb[0].mxu1 }
 0x27b   : > { %v4633_v56 = vmax.f32 %v6298_v52, %v6658_v15  ;;  %v2885_v18 = vpop.f32.mrb[1].mxu0  ;;  %v4512_v20 = vpop.f32.mrb[1].mxu1 }
 0x27c   : > { %v4631_v57 = vmax.f32 %v2885_v18, %v4512_v20  ;;  %v6299_v62 = vpop.f32.mrb[2].mxu0  ;;  %v6659_v0 = vpop.f32.mrb[2].mxu1 }
 0x27d   : > { %v4634_v26 = vmax.f32 %v6299_v62, %v6659_v0  ;;  %v2888_v2 = vpop.f32.mrb[3].mxu0  ;;  %v4515_v30 = vpop.f32.mrb[3].mxu1 }
 0x27e   : > { %v4655_v32 = vmax.f32 %v4631_v57, %v4633_v56  ;;  %v4632_v3 = vmax.f32 %v2888_v2, %v4515_v30 }
 0x280   : > { %v4674_v4 = vadd.f32 %v8003_v24, %v4655_v32  ;;  %v4656_v35 = vmax.f32 %v4632_v3, %v4634_v26 }
 0x282   : > { %v4675_v38 = vadd.f32 %v8003_v24, %v4656_v35  ;;  %v6302_v40 = vpop.f32.mrb[4].mxu0  ;;  %v6662_v41 = vpop.f32.mrb[4].mxu1  ;;  %v4686_v8 = vmax.f32 %v4674_v4, 0.0 }
 0x283   : > { %v4637_v43 = vmax.f32 %v6302_v40, %v6662_v41  ;;  %v2901_v7 = vpop.f32.mrb[5].mxu0  ;;  %v4528_v46 = vpop.f32.mrb[5].mxu1 }
 0x284   : > { %v4687_v9 = vmax.f32 %v4675_v38, 0.0  ;;  %v4635_v48 = vmax.f32 %v2901_v7, %v4528_v46  ;;  %v6303_v49 = vpop.f32.mrb[6].mxu0  ;;  %v6663_v11 = vpop.f32.mrb[6].mxu1 }
 0x285   : > { %v4638_v16 = vmax.f32 %v6303_v49, %v6663_v11  ;;  %v2904_v51 = vpop.f32.mrb[7].mxu0  ;;  %v4531_v53 = vpop.f32.mrb[7].mxu1 }
 0x286   : > { %v5568_v17 = vpack.c.bf16 %v4687_v9, %v4686_v8  ;;  %v4657_v19 = vmax.f32 %v4635_v48, %v4637_v43  ;;  %v4636_v54 = vmax.f32 %v2904_v51, %v4531_v53 }
 0x288   : > { %5569 = vst [vmem:[%s8011_s9] sm:$0xff] %v5568_v17   ;;  %v4676_v55 = vadd.f32 %v8003_v24, %v4657_v19  ;;  %v4658_v21 = vmax.f32 %v4636_v54, %v4638_v16 }
 0x28a   : > { %v4677_v25 = vadd.f32 %v8003_v24, %v4658_v21  ;;  %v6306_v58 = vpop.f32.mrb[8].mxu0  ;;  %v6666_v59 = vpop.f32.mrb[8].mxu1  ;;  %v4688_v1 = vmax.f32 %v4676_v55, 0.0 }
 0x28b   : > { %v4641_v60 = vmax.f32 %v6306_v58, %v6666_v59  ;;  %v2917_v61 = vpop.f32.mrb[9].mxu0  ;;  %v4544_v63 = vpop.f32.mrb[9].mxu1 }
 0x28c   : > { %v4689_v27 = vmax.f32 %v4677_v25, 0.0  ;;  %v4639_v28 = vmax.f32 %v2917_v61, %v4544_v63  ;;  %v6307_v5 = vpop.f32.mrb[10].mxu0  ;;  %v6667_v6 = vpop.f32.mrb[10].mxu1 }
 0x28d   : > { %v4642_v29 = vmax.f32 %v6307_v5, %v6667_v6  ;;  %v2920_v34 = vpop.f32.mrb[11].mxu0  ;;  %v4547_v13 = vpop.f32.mrb[11].mxu1 }
 0x28e   : > { %v5573_v14 = vpack.c.bf16 %v4689_v27, %v4688_v1  ;;  %v4659_v36 = vmax.f32 %v4639_v28, %v4641_v60  ;;  %v4640_v22 = vmax.f32 %v2920_v34, %v4547_v13 }
 0x290   : > { %5595 = vst [vmem:[%s8011_s9 + $0x8] sm:$0xff] %v5573_v14   ;;  %v4678_v23 = vadd.f32 %v8003_v24, %v4659_v36  ;;  %v4660_v45 = vmax.f32 %v4640_v22, %v4642_v29 }
 0x292   : > { %v4679_v44 = vadd.f32 %v8003_v24, %v4660_v45  ;;  %v6310_v31 = vpop.f32.mrb[12].mxu0  ;;  %v6670_v33 = vpop.f32.mrb[12].mxu1  ;;  %v4690_v47 = vmax.f32 %v4678_v23, 0.0 }
 0x293   : > { %v4645_v37 = vmax.f32 %v6310_v31, %v6670_v33  ;;  %v2933_v39 = vpop.f32.mrb[13].mxu0  ;;  %v4560_v42 = vpop.f32.mrb[13].mxu1 }
 0x294   : > { %v4691_v10 = vmax.f32 %v4679_v44, 0.0  ;;  %v4643_v50 = vmax.f32 %v2933_v39, %v4560_v42  ;;  %v6311_v12 = vpop.f32.mrb[14].mxu0  ;;  %v6671_v52 = vpop.f32.mrb[14].mxu1 }
 0x295   : > { %v4646_v15 = vmax.f32 %v6311_v12, %v6671_v52  ;;  %v2936_v56 = vpop.f32.mrb[15].mxu0  ;;  %v4563_v18 = vpop.f32.mrb[15].mxu1 }
 0x296   : > { %v5578_v20 = vpack.c.bf16 %v4691_v10, %v4690_v47  ;;  %v4661_v57 = vmax.f32 %v4643_v50, %v4645_v37  ;;  %v4644_v62 = vmax.f32 %v2936_v56, %v4563_v18 }
 0x298   : > { %5596 = vst [vmem:[%s8011_s9 + $0x10] sm:$0xff] %v5578_v20   ;;  %v4680_v0 = vadd.f32 %v8003_v24, %v4661_v57  ;;  %v4662_v26 = vmax.f32 %v4644_v62, %v4646_v15 }
 0x29a   : > { %v4681_v2 = vadd.f32 %v8003_v24, %v4662_v26  ;;  %v6314_v30 = vpop.f32.mrb[16].mxu0  ;;  %v6674_v32 = vpop.f32.mrb[16].mxu1  ;;  %v4692_v38 = vmax.f32 %v4680_v0, 0.0 }
 0x29b   : > { %v4649_v3 = vmax.f32 %v6314_v30, %v6674_v32  ;;  %v2949_v4 = vpop.f32.mrb[17].mxu0  ;;  %v4576_v35 = vpop.f32.mrb[17].mxu1 }
 0x29c   : > { %v4693_v40 = vmax.f32 %v4681_v2, 0.0  ;;  %v4647_v41 = vmax.f32 %v2949_v4, %v4576_v35  ;;  %v6315_v43 = vpop.f32.mrb[18].mxu0  ;;  %v6675_v7 = vpop.f32.mrb[18].mxu1 }
 0x29d   : > { %v4650_v46 = vmax.f32 %v6315_v43, %v6675_v7  ;;  %v2952_v8 = vpop.f32.mrb[19].mxu0  ;;  %v4579_v9 = vpop.f32.mrb[19].mxu1 }
 0x29e   : > { %v5583_v48 = vpack.c.bf16 %v4693_v40, %v4692_v38  ;;  %v4663_v49 = vmax.f32 %v4647_v41, %v4649_v3  ;;  %v4648_v11 = vmax.f32 %v2952_v8, %v4579_v9 }
 0x2a0   : > { %5597 = vst [vmem:[%s8011_s9 + $0x18] sm:$0xff] %v5583_v48   ;;  %v4682_v16 = vadd.f32 %v8003_v24, %v4663_v49  ;;  %v4664_v51 = vmax.f32 %v4648_v11, %v4650_v46 }
 0x2a2   : > { %v4683_v53 = vadd.f32 %v8003_v24, %v4664_v51  ;;  %v6318_v17 = vpop.f32.mrb[20].mxu0  ;;  %v6678_v19 = vpop.f32.mrb[20].mxu1  ;;  %v4694_v25 = vmax.f32 %v4682_v16, 0.0 }
 0x2a3   : > { %v4653_v54 = vmax.f32 %v6318_v17, %v6678_v19  ;;  %v2965_v55 = vpop.f32.mrb[21].mxu0  ;;  %v4592_v21 = vpop.f32.mrb[21].mxu1 }
 0x2a4   : > { %v4695_v58 = vmax.f32 %v4683_v53, 0.0  ;;  %v4651_v59 = vmax.f32 %v2965_v55, %v4592_v21  ;;  %v6319_v60 = vpop.f32.mrb[22].mxu0  ;;  %v6679_v61 = vpop.f32.mrb[22].mxu1 }
 0x2a5   : > { %v4654_v63 = vmax.f32 %v6319_v60, %v6679_v61  ;;  %v2968_v1 = vpop.f32.mrb[23].mxu0  ;;  %v4595_v27 = vpop.f32.mrb[23].mxu1 }
 0x2a6   : > { %v5588_v28 = vpack.c.bf16 %v4695_v58, %v4694_v25  ;;  %v4665_v5 = vmax.f32 %v4651_v59, %v4653_v54  ;;  %v4652_v6 = vmax.f32 %v2968_v1, %v4595_v27 }
 0x2a8   : > { %5598 = vst [vmem:[%s8011_s9 + $0x20] sm:$0xff] %v5588_v28   ;;  %v4684_v29 = vadd.f32 %v8003_v24, %v4665_v5  ;;  %v4666_v34 = vmax.f32 %v4652_v6, %v4654_v63 }
 0x2aa   : > { %v4685_v13 = vadd.f32 %v8003_v24, %v4666_v34  ;;  %v4696_v14 = vmax.f32 %v4684_v29, 0.0 }
 0x2ac   : > { %v4697_v36 = vmax.f32 %v4685_v13, 0.0 }
 0x2ae   : > { %v5593_v22 = vpack.c.bf16 %v4697_v36, %v4696_v14 }
 0x2b0   : > { %5599 = vst [vmem:[%s8011_s9 + $0x28] sm:$0xff] %v5593_v22  }
 0x2b1 PF: > { %s13_s14 = sadd.s32 1, %s7339_s14   ;;  %s8042_s12 = smov %s7335_s13 }
 0x2b2   : > { %p10_p5 = scmp.ge.s32.totalorder %s13_s14, 8   ;;  %s8043_s13 = smov %s8045_s15 }
 0x2b4   :  { %12 = sbr.rel (!%p10_p5) target bundleno = 2 (0x2), region = 82 }

// kernel: cnncifar_forward.4
= control target key start
LH: loop header
LB: loop body
LE: loop exit
PB: predicated region body
PF: predicated region fallthrough
CT: control target
= control target key end

     0   :  { %s14978_s12 = smov 0   ;;  %s14980_s13 = smov 0   ;;  %s16608_s0 = inlined_call_operand.vmem [shape: bf16[32,32,16,3], index: 0, kind: input, shape index: {}]   ;;  %s16609_s1 = inlined_call_operand.vmem [shape: bf16[3,3,3,128], index: 1, kind: input, shape index: {}]   ;;  %s16610_s2 = inlined_call_operand.vmem [shape: f32[1,128], index: 2, kind: input, shape index: {}]   ;;  %s16611_s3 = inlined_call_operand.vmem [shape: bf16[15,15,16,128], index: 3, kind: output, shape index: {}]  }
   0x1   :  { %s14982_s14 = smov 0  }
   0x2 LB: > { %s22_s15 = sadd.s32 1, %s14951_s13  ;;  %p10087_p0 = scmp.ge.s32.totalorder %s14955_s14, 1  ;;  %s14955_s14 = sphi %s14982_s14, %s13_s14   ;;  %s14951_s13 = sphi %s14980_s13, %s16715_s13   ;;  %s14947_s12 = sphi %s14978_s12, %s16714_s12  }
   0x3   : > { %p23_p1 = scmp.ge.s32.totalorder %s22_s15, 15  ;;  %p152_p2 = scmp.lt.s32.totalorder %s14955_s14, 16 }
   0x5   : > { %s16717_s15 = smov (%p23_p1, %s22_s15), 0  ;;  %p153_p3 = pnand %p10087_p0, %p152_p2 }
   0x7   : > { %156 = sbr.rel (%p153_p3) target bundleno = 1321 (0x529), region = 32 }
   0xe   : > { %v10154_v0 = vld [vmem:[%s16609_s1 + $0x2] sm:$0x3]  ;;  %vm568_vm0 = vcmask 1040384   ;;  %vm569_vm1 = vcmask 1041408   ;;  %s11722_s18 = sshll.u32 %s14947_s12, 9  ;;  %v14957_v1 = vmov 65535  }
   0xf   : > { %v570_v2 = vsel %vm568_vm0, 4294967295, %v14957_v1  ;;  %s15005_s21 = scalar_lea.vmem %s16608_s0, %s11722_s18  ;;  %vm477_vm2 = vcmask 23552   ;;  %v261_v3 = vld [vmem:[%s16609_s1] sm:$0x3]  ;;  %v10337_v9 = vld [vmem:[%s16609_s1 + $0x4] sm:$0x3] }
  0x10   : > { %v15010_v4 = vsel %vm569_vm1, %v570_v2, 0  ;;  %v14519_v5 = vld [vmem:[%s15005_s21 + $0x8] sm:$0xff]   ;;  %v14521_v10 = vld [vmem:[%s15005_s21 + $0x10] sm:$0xff]   ;;  %v14523_v12 = vld [vmem:[%s15005_s21 + $0x18] sm:$0xff]   ;;  %p187_p4 = scmp.lt.s32.totalorder %s14947_s12, 14 }
  0x11   : > { %v573_v6 = vand.u32 %v10154_v0, %v15010_v4  ;;  %v14520_v7 = vld [vmem:[%s15005_s21 + $0x108] sm:$0xff]   ;;  %v1089_v8 = vand.u32 %v15010_v4, %v261_v3  ;;  %12419 = vmatprep.mubr.msk.bf16.mxu0 %vm477_vm2, %v14519_v5  ;;  %v14522_v11 = vld [vmem:[%s15005_s21 + $0x110] sm:$0xff]   ;;  %v14524_v13 = vld [vmem:[%s15005_s21 + $0x118] sm:$0xff]   ;;  %v15026_v14 = vand.u32 %v10337_v9, %v15010_v4 }
  0x12   : > { %12977 = vmatprep.mubr.msk.bf16.mxu1 %vm477_vm2, %v14520_v7  ;;  %v14525_v15 = vld [vmem:[%s15005_s21 + $0x20] sm:$0xff]   ;;  %v14527_v17 = vld [vmem:[%s15005_s21 + $0x28] sm:$0xff]   ;;  %v14529_v19 = vld [vmem:[%s15005_s21 + $0x30] sm:$0xff]   ;;  %s16719_s12 = smov (!%p187_p4, %s14947_s12), 14 }
  0x13   : > { %12417 = vmatprep.subr.bf16.mxu0 %v573_v6  ;;  %12975 = vmatprep.subr.bf16.mxu1 %v573_v6  ;;  %v14526_v16 = vld [vmem:[%s15005_s21 + $0x120] sm:$0xff]   ;;  %v14528_v18 = vld [vmem:[%s15005_s21 + $0x128] sm:$0xff]   ;;  %v14530_v20 = vld [vmem:[%s15005_s21 + $0x130] sm:$0xff]   ;;  %s14493_s17 = smul.u32 120, %s16719_s12 }
  0x14   : > { %12418 = vmatpush3.bf16.msra.mxu0 %v573_v6  ;;  %12976 = vmatpush3.bf16.msra.mxu1 %v573_v6  ;;  %v14531_v21 = vld [vmem:[%s15005_s21 + $0x38] sm:$0xff]   ;;  %v14533_v23 = vld [vmem:[%s15005_s21 + $0x40] sm:$0xff]   ;;  %v14535_v25 = vld [vmem:[%s15005_s21 + $0x48] sm:$0xff]  }
  0x15   : > { %12479 = vmatprep.subr.bf16.mxu0 %v1089_v8  ;;  %13037 = vmatprep.subr.bf16.mxu1 %v1089_v8  ;;  %v14532_v22 = vld [vmem:[%s15005_s21 + $0x138] sm:$0xff]   ;;  %v14534_v24 = vld [vmem:[%s15005_s21 + $0x140] sm:$0xff]   ;;  %v14536_v26 = vld [vmem:[%s15005_s21 + $0x148] sm:$0xff]   ;;  %s16554_s20 = scalar_lea.vmem %s16611_s3, %s14493_s17 }
  0x16   : > { %v14537_v27 = vld [vmem:[%s15005_s21 + $0x50] sm:$0xff]   ;;  %v14539_v29 = vld [vmem:[%s15005_s21 + $0x58] sm:$0xff]   ;;  %v14541_v31 = vld [vmem:[%s15005_s21 + $0x60] sm:$0xff]  }
  0x17   : > { %12420 = vmatmul.mubr.msk.bf16.vlgmr.msra.gmra.mrb[0].mxu0 %vm477_vm2, %v14521_v10  ;;  %12978 = vmatmul.mubr.msk.bf16.vlgmr.msra.gmra.mrb[0].mxu1 %vm477_vm2, %v14522_v11  ;;  %v14538_v28 = vld [vmem:[%s15005_s21 + $0x150] sm:$0xff]   ;;  %v14540_v30 = vld [vmem:[%s15005_s21 + $0x158] sm:$0xff]   ;;  %v14542_v32 = vld [vmem:[%s15005_s21 + $0x160] sm:$0xff]  }
  0x18   : > { %12480 = vmatpush3.bf16.msra.mxu0 %v1089_v8  ;;  %13038 = vmatpush3.bf16.msra.mxu1 %v1089_v8  ;;  %v14543_v33 = vld [vmem:[%s15005_s21 + $0x68] sm:$0xff]   ;;  %v14545_v35 = vld [vmem:[%s15005_s21 + $0x70] sm:$0xff]   ;;  %v14547_v37 = vld [vmem:[%s15005_s21 + $0x78] sm:$0xff]  }
  0x19   : > { %12423 = vmatprep.mubr.msk.bf16.mxu0 %vm477_vm2, %v14523_v12  ;;  %12981 = vmatprep.mubr.msk.bf16.mxu1 %vm477_vm2, %v14524_v13  ;;  %v14544_v34 = vld [vmem:[%s15005_s21 + $0x168] sm:$0xff]   ;;  %v14546_v36 = vld [vmem:[%s15005_s21 + $0x170] sm:$0xff]   ;;  %v14548_v38 = vld [vmem:[%s15005_s21 + $0x178] sm:$0xff]  }
  0x1a   : > { %12541 = vmatprep.subr.bf16.mxu0 %v15026_v14  ;;  %13099 = vmatprep.subr.bf16.mxu1 %v15026_v14  ;;  %v14549_v39 = vld [vmem:[%s15005_s21 + $0x80] sm:$0xff]   ;;  %v14551_v41 = vld [vmem:[%s15005_s21 + $0x88] sm:$0xff]   ;;  %v14553_v43 = vld [vmem:[%s15005_s21 + $0x90] sm:$0xff]  }
  0x1b   : > { %v14550_v40 = vld [vmem:[%s15005_s21 + $0x180] sm:$0xff]   ;;  %v14552_v42 = vld [vmem:[%s15005_s21 + $0x188] sm:$0xff]   ;;  %v14554_v44 = vld [vmem:[%s15005_s21 + $0x190] sm:$0xff]  }
  0x1c   : > { %v14555_v45 = vld [vmem:[%s15005_s21 + $0x98] sm:$0xff]   ;;  %v14557_v47 = vld [vmem:[%s15005_s21 + $0xa0] sm:$0xff]   ;;  %v14559_v49 = vld [vmem:[%s15005_s21 + $0xa8] sm:$0xff]  }
  0x1d   : > { %v14556_v46 = vld [vmem:[%s15005_s21 + $0x198] sm:$0xff]   ;;  %v14558_v48 = vld [vmem:[%s15005_s21 + $0x1a0] sm:$0xff]   ;;  %v14560_v50 = vld [vmem:[%s15005_s21 + $0x1a8] sm:$0xff]  }
  0x1e   : > { %v14561_v51 = vld [vmem:[%s15005_s21 + $0xb0] sm:$0xff]   ;;  %v14563_v53 = vld [vmem:[%s15005_s21 + $0xb8] sm:$0xff]   ;;  %v14565_v55 = vld [vmem:[%s15005_s21 + $0xc0] sm:$0xff]  }
  0x1f   : > { %12424 = vmatmul.mubr.msk.bf16.gmra.mrb[4].mxu0 %vm477_vm2, %v14525_v15  ;;  %12982 = vmatmul.mubr.msk.bf16.gmra.mrb[4].mxu1 %vm477_vm2, %v14526_v16  ;;  %v14562_v52 = vld [vmem:[%s15005_s21 + $0x1b0] sm:$0xff]   ;;  %v14564_v54 = vld [vmem:[%s15005_s21 + $0x1b8] sm:$0xff]   ;;  %v14566_v56 = vld [vmem:[%s15005_s21 + $0x1c0] sm:$0xff]  }
  0x20   : > { %12427 = vmatprep.mubr.msk.bf16.mxu0 %vm477_vm2, %v14527_v17  ;;  %12985 = vmatprep.mubr.msk.bf16.mxu1 %vm477_vm2, %v14528_v18  ;;  %v14567_v57 = vld [vmem:[%s15005_s21 + $0xc8] sm:$0xff]   ;;  %v14569_v59 = vld [vmem:[%s15005_s21 + $0xd0] sm:$0xff]   ;;  %v14571_v61 = vld [vmem:[%s15005_s21 + $0xd8] sm:$0xff]  }
  0x21   : > { %v14568_v58 = vld [vmem:[%s15005_s21 + $0x1c8] sm:$0xff]   ;;  %v14570_v60 = vld [vmem:[%s15005_s21 + $0x1d0] sm:$0xff]   ;;  %v14572_v62 = vld [vmem:[%s15005_s21 + $0x1d8] sm:$0xff]  }
  0x22   : > { %v14573_v63 = vld [vmem:[%s15005_s21 + $0xe0] sm:$0xff]   ;;  %v14575_v1 = vld [vmem:[%s15005_s21 + $0xe8] sm:$0xff]   ;;  %v14577_v3 = vld [vmem:[%s15005_s21 + $0xf0] sm:$0xff]  }
  0x23   : > { %v14574_v0 = vld [vmem:[%s15005_s21 + $0x1e0] sm:$0xff]   ;;  %v14576_v2 = vld [vmem:[%s15005_s21 + $0x1e8] sm:$0xff]   ;;  %v14578_v5 = vld [vmem:[%s15005_s21 + $0x1f0] sm:$0xff]  }
  0x24   : > { %v14579_v6 = vld [vmem:[%s15005_s21] sm:$0xff]   ;;  %v14581_v8 = vld [vmem:[%s15005_s21 + $0x8] sm:$0xff]   ;;  %v14583_v11 = vld [vmem:[%s15005_s21 + $0x10] sm:$0xff]  }
  0x25   : > { %v14580_v7 = vld [vmem:[%s15005_s21 + $0x100] sm:$0xff]   ;;  %v14582_v9 = vld [vmem:[%s15005_s21 + $0x108] sm:$0xff]   ;;  %v14584_v12 = vld [vmem:[%s15005_s21 + $0x110] sm:$0xff]  }
  0x26   : > { %v10460_v10 = vld [vmem:[%s16609_s1 + $0x6] sm:$0x3]  ;;  %v14585_v15 = vld [vmem:[%s15005_s21 + $0x18] sm:$0xff]  }
  0x27   : > { %12428 = vmatmul.mubr.msk.bf16.gmra.mrb[8].mxu0 %vm477_vm2, %v14529_v19  ;;  %12986 = vmatmul.mubr.msk.bf16.gmra.mrb[8].mxu1 %vm477_vm2, %v14530_v20  ;;  %v15154_v13 = vand.u32 %v10460_v10, %v15010_v4  ;;  %v14586_v16 = vld [vmem:[%s15005_s21 + $0x118] sm:$0xff]   ;;  %v14587_v17 = vld [vmem:[%s15005_s21 + $0x20] sm:$0xff]   ;;  %v14590_v19 = vld [vmem:[%s15005_s21 + $0x128] sm:$0xff]  }
  0x28   : > { %12431 = vmatprep.mubr.msk.bf16.mxu0 %vm477_vm2, %v14531_v21  ;;  %12989 = vmatprep.mubr.msk.bf16.mxu1 %vm477_vm2, %v14532_v22  ;;  %v14588_v18 = vld [vmem:[%s15005_s21 + $0x120] sm:$0xff]   ;;  %v14591_v20 = vld [vmem:[%s15005_s21 + $0x30] sm:$0xff]   ;;  %v14593_v22 = vld [vmem:[%s15005_s21 + $0x38] sm:$0xff]  }
  0x29   : > { %v14592_v21 = vld [vmem:[%s15005_s21 + $0x130] sm:$0xff]   ;;  %v14643_v10 = vld [vmem:[%s15005_s21 + $0x20] sm:$0xff]  }
  0x2f   : > { %12432 = vmatmul.mubr.msk.bf16.gmra.mrb[12].mxu0 %vm477_vm2, %v14533_v23  ;;  %12990 = vmatmul.mubr.msk.bf16.gmra.mrb[12].mxu1 %vm477_vm2, %v14534_v24  ;;  %v14594_v23 = vld [vmem:[%s15005_s21 + $0x138] sm:$0xff]   ;;  %v14595_v24 = vld [vmem:[%s15005_s21 + $0x40] sm:$0xff]  }
  0x30   : > { %12435 = vmatprep.mubr.msk.bf16.mxu0 %vm477_vm2, %v14535_v25  ;;  %12993 = vmatprep.mubr.msk.bf16.mxu1 %vm477_vm2, %v14536_v26  ;;  %v14596_v25 = vld [vmem:[%s15005_s21 + $0x140] sm:$0xff]   ;;  %v14597_v26 = vld [vmem:[%s15005_s21 + $0x48] sm:$0xff]  }
  0x37   : > { %12436 = vmatmul.mubr.msk.bf16.gmra.mrb[16].mxu0 %vm477_vm2, %v14537_v27  ;;  %12994 = vmatmul.mubr.msk.bf16.gmra.mrb[16].mxu1 %vm477_vm2, %v14538_v28  ;;  %v14598_v27 = vld [vmem:[%s15005_s21 + $0x148] sm:$0xff]   ;;  %v14599_v28 = vld [vmem:[%s15005_s21 + $0x50] sm:$0xff]  }
  0x38   : > { %12439 = vmatprep.mubr.msk.bf16.mxu0 %vm477_vm2, %v14539_v29  ;;  %12997 = vmatprep.mubr.msk.bf16.mxu1 %vm477_vm2, %v14540_v30  ;;  %v14600_v29 = vld [vmem:[%s15005_s21 + $0x150] sm:$0xff]   ;;  %v14601_v30 = vld [vmem:[%s15005_s21 + $0x58] sm:$0xff]  }
  0x3f   : > { %12440 = vmatmul.mubr.msk.bf16.gmra.mrb[20].mxu0 %vm477_vm2, %v14541_v31  ;;  %12998 = vmatmul.mubr.msk.bf16.gmra.mrb[20].mxu1 %vm477_vm2, %v14542_v32  ;;  %v14602_v31 = vld [vmem:[%s15005_s21 + $0x158] sm:$0xff]   ;;  %v14603_v32 = vld [vmem:[%s15005_s21 + $0x60] sm:$0xff]  }
  0x40   : > { %12443 = vmatprep.mubr.msk.bf16.mxu0 %vm477_vm2, %v14543_v33  ;;  %13001 = vmatprep.mubr.msk.bf16.mxu1 %vm477_vm2, %v14544_v34  ;;  %v14604_v33 = vld [vmem:[%s15005_s21 + $0x160] sm:$0xff]   ;;  %v14605_v34 = vld [vmem:[%s15005_s21 + $0x68] sm:$0xff]  }
  0x47   : > { %12444 = vmatmul.mubr.msk.bf16.gmra.mrb[24].mxu0 %vm477_vm2, %v14545_v35  ;;  %13002 = vmatmul.mubr.msk.bf16.gmra.mrb[24].mxu1 %vm477_vm2, %v14546_v36  ;;  %v14606_v35 = vld [vmem:[%s15005_s21 + $0x168] sm:$0xff]   ;;  %v14607_v36 = vld [vmem:[%s15005_s21 + $0x70] sm:$0xff]  }
  0x48   : > { %12447 = vmatprep.mubr.msk.bf16.mxu0 %vm477_vm2, %v14547_v37  ;;  %13005 = vmatprep.mubr.msk.bf16.mxu1 %vm477_vm2, %v14548_v38  ;;  %v14608_v37 = vld [vmem:[%s15005_s21 + $0x170] sm:$0xff]   ;;  %v14609_v38 = vld [vmem:[%s15005_s21 + $0x78] sm:$0xff]  }
  0x4f   : > { %12448 = vmatmul.mubr.msk.bf16.gmra.mrb[28].mxu0 %vm477_vm2, %v14549_v39  ;;  %13006 = vmatmul.mubr.msk.bf16.gmra.mrb[28].mxu1 %vm477_vm2, %v14550_v40  ;;  %v14610_v39 = vld [vmem:[%s15005_s21 + $0x178] sm:$0xff]   ;;  %v14611_v40 = vld [vmem:[%s15005_s21 + $0x80] sm:$0xff]  }
  0x50   : > { %12451 = vmatprep.mubr.msk.bf16.mxu0 %vm477_vm2, %v14551_v41  ;;  %13009 = vmatprep.mubr.msk.bf16.mxu1 %vm477_vm2, %v14552_v42  ;;  %v14612_v41 = vld [vmem:[%s15005_s21 + $0x180] sm:$0xff]   ;;  %v14613_v42 = vld [vmem:[%s15005_s21 + $0x88] sm:$0xff]  }
  0x57   : > { %12452 = vmatmul.mubr.msk.bf16.gmra.mrb[32].mxu0 %vm477_vm2, %v14553_v43  ;;  %13010 = vmatmul.mubr.msk.bf16.gmra.mrb[32].mxu1 %vm477_vm2, %v14554_v44  ;;  %v14614_v43 = vld [vmem:[%s15005_s21 + $0x188] sm:$0xff]   ;;  %v14615_v44 = vld [vmem:[%s15005_s21 + $0x90] sm:$0xff]  }
  0x58   : > { %12455 = vmatprep.mubr.msk.bf16.mxu0 %vm477_vm2, %v14555_v45  ;;  %13013 = vmatprep.mubr.msk.bf16.mxu1 %vm477_vm2, %v14556_v46  ;;  %v14616_v45 = vld [vmem:[%s15005_s21 + $0x190] sm:$0xff]   ;;  %v14617_v46 = vld [vmem:[%s15005_s21 + $0x98] sm:$0xff]  }
  0x5f   : > { %12456 = vmatmul.mubr.msk.bf16.gmra.mrb[36].mxu0 %vm477_vm2, %v14557_v47  ;;  %13014 = vmatmul.mubr.msk.bf16.gmra.mrb[36].mxu1 %vm477_vm2, %v14558_v48  ;;  %v14618_v47 = vld [vmem:[%s15005_s21 + $0x198] sm:$0xff]   ;;  %v14619_v48 = vld [vmem:[%s15005_s21 + $0xa0] sm:$0xff]  }
  0x60   : > { %12459 = vmatprep.mubr.msk.bf16.mxu0 %vm477_vm2, %v14559_v49  ;;  %13017 = vmatprep.mubr.msk.bf16.mxu1 %vm477_vm2, %v14560_v50  ;;  %v14620_v49 = vld [vmem:[%s15005_s21 + $0x1a0] sm:$0xff]   ;;  %v14621_v50 = vld [vmem:[%s15005_s21 + $0xa8] sm:$0xff]  }
  0x67   : > { %12460 = vmatmul.mubr.msk.bf16.gmra.mrb[40].mxu0 %vm477_vm2, %v14561_v51  ;;  %13018 = vmatmul.mubr.msk.bf16.gmra.mrb[40].mxu1 %vm477_vm2, %v14562_v52  ;;  %v14622_v51 = vld [vmem:[%s15005_s21 + $0x1a8] sm:$0xff]   ;;  %v14623_v52 = vld [vmem:[%s15005_s21 + $0xb0] sm:$0xff]  }
  0x68   : > { %12463 = vmatprep.mubr.msk.bf16.mxu0 %vm477_vm2, %v14563_v53  ;;  %13021 = vmatprep.mubr.msk.bf16.mxu1 %vm477_vm2, %v14564_v54  ;;  %v14624_v53 = vld [vmem:[%s15005_s21 + $0x1b0] sm:$0xff]   ;;  %v14625_v54 = vld [vmem:[%s15005_s21 + $0xb8] sm:$0xff]  }
  0x6f   : > { %12464 = vmatmul.mubr.msk.bf16.gmra.mrb[44].mxu0 %vm477_vm2, %v14565_v55  ;;  %13022 = vmatmul.mubr.msk.bf16.gmra.mrb[44].mxu1 %vm477_vm2, %v14566_v56  ;;  %v15246_v55 = vld [vmem:[%s15005_s21 + $0x1b8] sm:$0xff]   ;;  %v14627_v56 = vld [vmem:[%s15005_s21 + $0xc0] sm:$0xff]  }
  0x70   : > { %12467 = vmatprep.mubr.msk.bf16.mxu0 %vm477_vm2, %v14567_v57  ;;  %13025 = vmatprep.mubr.msk.bf16.mxu1 %vm477_vm2, %v14568_v58  ;;  %v15250_v57 = vld [vmem:[%s15005_s21 + $0x1c0] sm:$0xff]   ;;  %v14629_v58 = vld [vmem:[%s15005_s21 + $0xc8] sm:$0xff]  }
  0x77   : > { %12468 = vmatmul.mubr.msk.bf16.gmra.mrb[48].mxu0 %vm477_vm2, %v14569_v59  ;;  %13026 = vmatmul.mubr.msk.bf16.gmra.mrb[48].mxu1 %vm477_vm2, %v14570_v60  ;;  %v15260_v59 = vld [vmem:[%s15005_s21 + $0x1c8] sm:$0xff]   ;;  %v14631_v60 = vld [vmem:[%s15005_s21 + $0xd0] sm:$0xff]  }
  0x78   : > { %12471 = vmatprep.mubr.msk.bf16.mxu0 %vm477_vm2, %v14571_v61  ;;  %13029 = vmatprep.mubr.msk.bf16.mxu1 %vm477_vm2, %v14572_v62  ;;  %v15264_v61 = vld [vmem:[%s15005_s21 + $0x1d0] sm:$0xff]   ;;  %v14633_v62 = vld [vmem:[%s15005_s21 + $0xd8] sm:$0xff]  }
  0x7f   : > { %12472 = vmatmul.mubr.msk.bf16.gmra.mrb[52].mxu0 %vm477_vm2, %v14573_v63  ;;  %13030 = vmatmul.mubr.msk.bf16.gmra.mrb[52].mxu1 %vm477_vm2, %v14574_v0  ;;  %v15274_v63 = vld [vmem:[%s15005_s21 + $0x1d8] sm:$0xff]   ;;  %v14635_v0 = vld [vmem:[%s15005_s21 + $0xe0] sm:$0xff]  }
  0x80   : > { %12475 = vmatprep.mubr.msk.bf16.mxu0 %vm477_vm2, %v14575_v1  ;;  %13033 = vmatprep.mubr.msk.bf16.mxu1 %vm477_vm2, %v14576_v2  ;;  %v15278_v1 = vld [vmem:[%s15005_s21 + $0x1e0] sm:$0xff]   ;;  %v14637_v2 = vld [vmem:[%s15005_s21 + $0xe8] sm:$0xff]  }
  0x87   : > { %12476 = vmatmul.mubr.msk.bf16.gmra.mrb[56].mxu0 %vm477_vm2, %v14577_v3  ;;  %13034 = vmatmul.mubr.msk.bf16.gmra.mrb[56].mxu1 %vm477_vm2, %v14578_v5  ;;  %v15288_v3 = vld [vmem:[%s15005_s21 + $0x1e8] sm:$0xff]   ;;  %v14639_v5 = vld [vmem:[%s15005_s21 + $0x10] sm:$0xff]  }
  0x88   : > { %12481 = vmatprep.mubr.msk.bf16.mxu0 %vm477_vm2, %v14579_v6  ;;  %13039 = vmatprep.mubr.msk.bf16.mxu1 %vm477_vm2, %v14580_v7  ;;  %v14640_v6 = vld [vmem:[%s15005_s21 + $0x110] sm:$0xff]   ;;  %v14641_v7 = vld [vmem:[%s15005_s21 + $0x18] sm:$0xff]  }
  0x8f   : > { %12482 = vmatmul.mubr.msk.bf16.vlgmr.msra.gmra.mrb[0].mxu0 %vm477_vm2, %v14581_v8  ;;  %13040 = vmatmul.mubr.msk.bf16.vlgmr.msra.gmra.mrb[0].mxu1 %vm477_vm2, %v14582_v9  ;;  %v15299_v8 = vld [vmem:[%s15005_s21 + $0x118] sm:$0xff]   ;;  %v10584_v9 = vld [vmem:[%s16609_s1 + $0x8] sm:$0x3] }
  0x90   : > { %12542 = vmatpush3.bf16.msra.mxu0 %v15026_v14  ;;  %13100 = vmatpush3.bf16.msra.mxu1 %v15026_v14  ;;  %v14589_v14 = vld [vmem:[%s15005_s21 + $0x28] sm:$0xff]  }
  0x91   : > { %12485 = vmatprep.mubr.msk.bf16.mxu0 %vm477_vm2, %v14583_v11  ;;  %13043 = vmatprep.mubr.msk.bf16.mxu1 %vm477_vm2, %v14584_v12  ;;  %v15306_v11 = vld [vmem:[%s15005_s21 + $0x120] sm:$0xff]   ;;  %v15309_v12 = vand.u32 %v10584_v9, %v15010_v4  ;;  %v15495_v9 = vld [vmem:[%s15005_s21 + $0x1f0] sm:$0xff]  }
  0x92   : > { %12603 = vmatprep.subr.bf16.mxu0 %v15154_v13  ;;  %13161 = vmatprep.subr.bf16.mxu1 %v15154_v13 }
  0x97   : > { %12486 = vmatmul.mubr.msk.bf16.gmra.mrb[4].mxu0 %vm477_vm2, %v14585_v15  ;;  %13044 = vmatmul.mubr.msk.bf16.gmra.mrb[4].mxu1 %vm477_vm2, %v14586_v16  ;;  %v14645_v15 = vld [vmem:[%s15005_s21 + $0x28] sm:$0xff]  }
  0x98   : > { %12489 = vmatprep.mubr.msk.bf16.mxu0 %vm477_vm2, %v14587_v17  ;;  %13047 = vmatprep.mubr.msk.bf16.mxu1 %vm477_vm2, %v14588_v18  ;;  %v15321_v16 = vld [vmem:[%s15005_s21 + $0x128] sm:$0xff]   ;;  %v14647_v17 = vld [vmem:[%s15005_s21 + $0x30] sm:$0xff]  }
  0x99   : > { %v15325_v18 = vld [vmem:[%s15005_s21 + $0x130] sm:$0xff]  }
  0x9f   : > { %12490 = vmatmul.mubr.msk.bf16.gmra.mrb[8].mxu0 %vm477_vm2, %v14589_v14  ;;  %13048 = vmatmul.mubr.msk.bf16.gmra.mrb[8].mxu1 %vm477_vm2, %v14590_v19  ;;  %v15337_v14 = vld [vmem:[%s15005_s21 + $0x138] sm:$0xff]   ;;  %v14651_v19 = vld [vmem:[%s15005_s21 + $0x40] sm:$0xff]  }
  0xa0   : > { %12493 = vmatprep.mubr.msk.bf16.mxu0 %vm477_vm2, %v14591_v20  ;;  %13051 = vmatprep.mubr.msk.bf16.mxu1 %vm477_vm2, %v14592_v21  ;;  %v15341_v20 = vld [vmem:[%s15005_s21 + $0x140] sm:$0xff]   ;;  %v14653_v21 = vld [vmem:[%s15005_s21 + $0x48] sm:$0xff]  }
  0xa7   : > { %12494 = vmatmul.mubr.msk.bf16.gmra.mrb[12].mxu0 %vm477_vm2, %v14593_v22  ;;  %13052 = vmatmul.mubr.msk.bf16.gmra.mrb[12].mxu1 %vm477_vm2, %v14594_v23  ;;  %v15351_v22 = vld [vmem:[%s15005_s21 + $0x148] sm:$0xff]   ;;  %v14655_v23 = vld [vmem:[%s15005_s21 + $0x50] sm:$0xff]  }
  0xa8   : > { %12497 = vmatprep.mubr.msk.bf16.mxu0 %vm477_vm2, %v14595_v24  ;;  %13055 = vmatprep.mubr.msk.bf16.mxu1 %vm477_vm2, %v14596_v25  ;;  %v15355_v24 = vld [vmem:[%s15005_s21 + $0x150] sm:$0xff]   ;;  %v14657_v25 = vld [vmem:[%s15005_s21 + $0x58] sm:$0xff]  }
  0xaf   : > { %12498 = vmatmul.mubr.msk.bf16.gmra.mrb[16].mxu0 %vm477_vm2, %v14597_v26  ;;  %13056 = vmatmul.mubr.msk.bf16.gmra.mrb[16].mxu1 %vm477_vm2, %v14598_v27  ;;  %v15365_v26 = vld [vmem:[%s15005_s21 + $0x158] sm:$0xff]   ;;  %v14659_v27 = vld [vmem:[%s15005_s21 + $0x60] sm:$0xff]  }
  0xb0   : > { %12501 = vmatprep.mubr.msk.bf16.mxu0 %vm477_vm2, %v14599_v28  ;;  %13059 = vmatprep.mubr.msk.bf16.mxu1 %vm477_vm2, %v14600_v29  ;;  %v15369_v28 = vld [vmem:[%s15005_s21 + $0x160] sm:$0xff]   ;;  %v14661_v29 = vld [vmem:[%s15005_s21 + $0x68] sm:$0xff]  }
  0xb7   : > { %12502 = vmatmul.mubr.msk.bf16.gmra.mrb[20].mxu0 %vm477_vm2, %v14601_v30  ;;  %13060 = vmatmul.mubr.msk.bf16.gmra.mrb[20].mxu1 %vm477_vm2, %v14602_v31  ;;  %v15379_v30 = vld [vmem:[%s15005_s21 + $0x168] sm:$0xff]   ;;  %v14663_v31 = vld [vmem:[%s15005_s21 + $0x70] sm:$0xff]  }
  0xb8   : > { %12505 = vmatprep.mubr.msk.bf16.mxu0 %vm477_vm2, %v14603_v32  ;;  %13063 = vmatprep.mubr.msk.bf16.mxu1 %vm477_vm2, %v14604_v33  ;;  %v15383_v32 = vld [vmem:[%s15005_s21 + $0x170] sm:$0xff]   ;;  %v14665_v33 = vld [vmem:[%s15005_s21 + $0x78] sm:$0xff]  }
  0xbf   : > { %12506 = vmatmul.mubr.msk.bf16.gmra.mrb[24].mxu0 %vm477_vm2, %v14605_v34  ;;  %13064 = vmatmul.mubr.msk.bf16.gmra.mrb[24].mxu1 %vm477_vm2, %v14606_v35  ;;  %v15393_v34 = vld [vmem:[%s15005_s21 + $0x178] sm:$0xff]   ;;  %v14667_v35 = vld [vmem:[%s15005_s21 + $0x80] sm:$0xff]  }
  0xc0   : > { %12509 = vmatprep.mubr.msk.bf16.mxu0 %vm477_vm2, %v14607_v36  ;;  %13067 = vmatprep.mubr.msk.bf16.mxu1 %vm477_vm2, %v14608_v37  ;;  %v15397_v36 = vld [vmem:[%s15005_s21 + $0x180] sm:$0xff]   ;;  %v14669_v37 = vld [vmem:[%s15005_s21 + $0x88] sm:$0xff]  }
  0xc7   : > { %12510 = vmatmul.mubr.msk.bf16.gmra.mrb[28].mxu0 %vm477_vm2, %v14609_v38  ;;  %13068 = vmatmul.mubr.msk.bf16.gmra.mrb[28].mxu1 %vm477_vm2, %v14610_v39  ;;  %v15407_v38 = vld [vmem:[%s15005_s21 + $0x188] sm:$0xff]   ;;  %v14671_v39 = vld [vmem:[%s15005_s21 + $0x90] sm:$0xff]  }
  0xc8   : > { %12513 = vmatprep.mubr.msk.bf16.mxu0 %vm477_vm2, %v14611_v40  ;;  %13071 = vmatprep.mubr.msk.bf16.mxu1 %vm477_vm2, %v14612_v41  ;;  %v15411_v40 = vld [vmem:[%s15005_s21 + $0x190] sm:$0xff]   ;;  %v14673_v41 = vld [vmem:[%s15005_s21 + $0x98] sm:$0xff]  }
  0xcf   : > { %12514 = vmatmul.mubr.msk.bf16.gmra.mrb[32].mxu0 %vm477_vm2, %v14613_v42  ;;  %13072 = vmatmul.mubr.msk.bf16.gmra.mrb[32].mxu1 %vm477_vm2, %v14614_v43  ;;  %v15421_v42 = vld [vmem:[%s15005_s21 + $0x198] sm:$0xff]   ;;  %v14675_v43 = vld [vmem:[%s15005_s21 + $0xa0] sm:$0xff]  }
  0xd0   : > { %12517 = vmatprep.mubr.msk.bf16.mxu0 %vm477_vm2, %v14615_v44  ;;  %13075 = vmatprep.mubr.msk.bf16.mxu1 %vm477_vm2, %v14616_v45  ;;  %v15425_v44 = vld [vmem:[%s15005_s21 + $0x1a0] sm:$0xff]   ;;  %v14677_v45 = vld [vmem:[%s15005_s21 + $0xa8] sm:$0xff]  }
  0xd7   : > { %12518 = vmatmul.mubr.msk.bf16.gmra.mrb[36].mxu0 %vm477_vm2, %v14617_v46  ;;  %13076 = vmatmul.mubr.msk.bf16.gmra.mrb[36].mxu1 %vm477_vm2, %v14618_v47  ;;  %v15435_v46 = vld [vmem:[%s15005_s21 + $0x1a8] sm:$0xff]   ;;  %v14679_v47 = vld [vmem:[%s15005_s21 + $0xb0] sm:$0xff]  }
  0xd8   : > { %12521 = vmatprep.mubr.msk.bf16.mxu0 %vm477_vm2, %v14619_v48  ;;  %13079 = vmatprep.mubr.msk.bf16.mxu1 %vm477_vm2, %v14620_v49  ;;  %v15439_v48 = vld [vmem:[%s15005_s21 + $0x1b0] sm:$0xff]   ;;  %v14681_v49 = vld [vmem:[%s15005_s21 + $0xb8] sm:$0xff]  }
  0xdf   : > { %12522 = vmatmul.mubr.msk.bf16.gmra.mrb[40].mxu0 %vm477_vm2, %v14621_v50  ;;  %13080 = vmatmul.mubr.msk.bf16.gmra.mrb[40].mxu1 %vm477_vm2, %v14622_v51  ;;  %v15449_v50 = vld [vmem:[%s15005_s21 + $0x1b8] sm:$0xff]   ;;  %v14683_v51 = vld [vmem:[%s15005_s21 + $0xc0] sm:$0xff]  }
  0xe0   : > { %12525 = vmatprep.mubr.msk.bf16.mxu0 %vm477_vm2, %v14623_v52  ;;  %13083 = vmatprep.mubr.msk.bf16.mxu1 %vm477_vm2, %v14624_v53  ;;  %v15453_v52 = vld [vmem:[%s15005_s21 + $0x1c0] sm:$0xff]   ;;  %v14685_v53 = vld [vmem:[%s15005_s21 + $0xc8] sm:$0xff]  }
  0xe7   : > { %12526 = vmatmul.mubr.msk.bf16.gmra.mrb[44].mxu0 %vm477_vm2, %v14625_v54  ;;  %13084 = vmatmul.mubr.msk.bf16.gmra.mrb[44].mxu1 %vm477_vm2, %v15246_v55  ;;  %v15463_v54 = vld [vmem:[%s15005_s21 + $0x1c8] sm:$0xff]  }
  0xe8   : > { %12529 = vmatprep.mubr.msk.bf16.mxu0 %vm477_vm2, %v14627_v56  ;;  %13087 = vmatprep.mubr.msk.bf16.mxu1 %vm477_vm2, %v15250_v57  ;;  %v14687_v56 = vld [vmem:[%s15005_s21 + $0xd0] sm:$0xff]  }
  0xef   : > { %12530 = vmatmul.mubr.msk.bf16.gmra.mrb[48].mxu0 %vm477_vm2, %v14629_v58  ;;  %13088 = vmatmul.mubr.msk.bf16.gmra.mrb[48].mxu1 %vm477_vm2, %v15260_v59  ;;  %v15467_v58 = vld [vmem:[%s15005_s21 + $0x1d0] sm:$0xff]  }
  0xf0   : > { %12533 = vmatprep.mubr.msk.bf16.mxu0 %vm477_vm2, %v14631_v60  ;;  %13091 = vmatprep.mubr.msk.bf16.mxu1 %vm477_vm2, %v15264_v61  ;;  %v14689_v60 = vld [vmem:[%s15005_s21 + $0xd8] sm:$0xff]  }
  0xf7   : > { %12534 = vmatmul.mubr.msk.bf16.gmra.mrb[52].mxu0 %vm477_vm2, %v14633_v62  ;;  %13092 = vmatmul.mubr.msk.bf16.gmra.mrb[52].mxu1 %vm477_vm2, %v15274_v63  ;;  %v15477_v62 = vld [vmem:[%s15005_s21 + $0x1d8] sm:$0xff]  }
  0xf8   : > { %12537 = vmatprep.mubr.msk.bf16.mxu0 %vm477_vm2, %v14635_v0  ;;  %13095 = vmatprep.mubr.msk.bf16.mxu1 %vm477_vm2, %v15278_v1  ;;  %v14691_v0 = vld [vmem:[%s15005_s21 + $0xe0] sm:$0xff]  }
  0xff   : > { %12538 = vmatmul.mubr.msk.bf16.gmra.mrb[56].mxu0 %vm477_vm2, %v14637_v2  ;;  %13096 = vmatmul.mubr.msk.bf16.gmra.mrb[56].mxu1 %vm477_vm2, %v15288_v3  ;;  %v15481_v2 = vld [vmem:[%s15005_s21 + $0x1e0] sm:$0xff]  }
 0x100   : > { %12543 = vmatprep.mubr.msk.bf16.mxu0 %vm477_vm2, %v14639_v5  ;;  %13101 = vmatprep.mubr.msk.bf16.mxu1 %vm477_vm2, %v14640_v6  ;;  %v14693_v5 = vld [vmem:[%s15005_s21 + $0xe8] sm:$0xff]  }
 0x101   : > { %v15491_v6 = vld [vmem:[%s15005_s21 + $0x1e8] sm:$0xff]  }
 0x107   : > { %12544 = vmatmul.mubr.msk.bf16.vlgmr.msra.gmra.mrb[0].mxu0 %vm477_vm2, %v14641_v7  ;;  %13102 = vmatmul.mubr.msk.bf16.vlgmr.msra.gmra.mrb[0].mxu1 %vm477_vm2, %v15299_v8  ;;  %v14695_v7 = vld [vmem:[%s15005_s21 + $0xf0] sm:$0xff]  }
 0x108   : > { %12604 = vmatpush3.bf16.msra.mxu0 %v15154_v13  ;;  %13162 = vmatpush3.bf16.msra.mxu1 %v15154_v13  ;;  %v14649_v13 = vld [vmem:[%s15005_s21 + $0x38] sm:$0xff]  }
 0x109   : > { %12547 = vmatprep.mubr.msk.bf16.mxu0 %vm477_vm2, %v14643_v10  ;;  %13105 = vmatprep.mubr.msk.bf16.mxu1 %vm477_vm2, %v15306_v11  ;;  %v14697_v10 = vld [vmem:[%s15005_s21 + $0xf8] sm:$0xff]  }
 0x10a   : > { %12665 = vmatprep.subr.bf16.mxu0 %v15309_v12  ;;  %13223 = vmatprep.subr.bf16.mxu1 %v15309_v12 }
 0x10f   : > { %12548 = vmatmul.mubr.msk.bf16.gmra.mrb[4].mxu0 %vm477_vm2, %v14645_v15  ;;  %13106 = vmatmul.mubr.msk.bf16.gmra.mrb[4].mxu1 %vm477_vm2, %v15321_v16  ;;  %v15505_v15 = vld [vmem:[%s15005_s21 + $0x1f8] sm:$0xff]  }
 0x110   : > { %12551 = vmatprep.mubr.msk.bf16.mxu0 %vm477_vm2, %v14647_v17  ;;  %13109 = vmatprep.mubr.msk.bf16.mxu1 %vm477_vm2, %v15325_v18  ;;  %v15508_v17 = vld [vmem:[%s15005_s21 + $0x200] sm:$0xff]  }
 0x117   : > { %12552 = vmatmul.mubr.msk.bf16.gmra.mrb[8].mxu0 %vm477_vm2, %v14649_v13  ;;  %13110 = vmatmul.mubr.msk.bf16.gmra.mrb[8].mxu1 %vm477_vm2, %v15337_v14  ;;  %v14879_v13 = vld [vmem:[%s15005_s21 + $0x100] sm:$0xff]  }
 0x118   : > { %12555 = vmatprep.mubr.msk.bf16.mxu0 %vm477_vm2, %v14651_v19  ;;  %13113 = vmatprep.mubr.msk.bf16.mxu1 %vm477_vm2, %v15341_v20  ;;  %v15518_v19 = vld [vmem:[%s15005_s21 + $0x208] sm:$0xff]  }
 0x11f   : > { %12556 = vmatmul.mubr.msk.bf16.gmra.mrb[12].mxu0 %vm477_vm2, %v14653_v21  ;;  %13114 = vmatmul.mubr.msk.bf16.gmra.mrb[12].mxu1 %vm477_vm2, %v15351_v22  ;;  %v10708_v21 = vld [vmem:[%s16609_s1 + $0xa] sm:$0x3] }
 0x120   : > { %12559 = vmatprep.mubr.msk.bf16.mxu0 %vm477_vm2, %v14655_v23  ;;  %13117 = vmatprep.mubr.msk.bf16.mxu1 %vm477_vm2, %v15355_v24  ;;  %v15524_v23 = vld [vmem:[%s15005_s21 + $0x210] sm:$0xff]  }
 0x127   : > { %12560 = vmatmul.mubr.msk.bf16.gmra.mrb[16].mxu0 %vm477_vm2, %v14657_v25  ;;  %13118 = vmatmul.mubr.msk.bf16.gmra.mrb[16].mxu1 %vm477_vm2, %v15365_v26  ;;  %v15527_v25 = vand.u32 %v10708_v21, %v15010_v4  ;;  %v15612_v21 = vld [vmem:[%s15005_s21 + $0x268] sm:$0xff]  }
 0x128   : > { %12563 = vmatprep.mubr.msk.bf16.mxu0 %vm477_vm2, %v14659_v27  ;;  %13121 = vmatprep.mubr.msk.bf16.mxu1 %vm477_vm2, %v15369_v28  ;;  %v14880_v27 = vld [vmem:[%s15005_s21 + $0x108] sm:$0xff]  }
 0x12f   : > { %12564 = vmatmul.mubr.msk.bf16.gmra.mrb[20].mxu0 %vm477_vm2, %v14661_v29  ;;  %13122 = vmatmul.mubr.msk.bf16.gmra.mrb[20].mxu1 %vm477_vm2, %v15379_v30  ;;  %v14881_v29 = vld [vmem:[%s15005_s21 + $0x110] sm:$0xff]  }
 0x130   : > { %12567 = vmatprep.mubr.msk.bf16.mxu0 %vm477_vm2, %v14663_v31  ;;  %13125 = vmatprep.mubr.msk.bf16.mxu1 %vm477_vm2, %v15383_v32  ;;  %v15542_v31 = vld [vmem:[%s15005_s21 + $0x218] sm:$0xff]  }
 0x137   : > { %12568 = vmatmul.mubr.msk.bf16.gmra.mrb[24].mxu0 %vm477_vm2, %v14665_v33  ;;  %13126 = vmatmul.mubr.msk.bf16.gmra.mrb[24].mxu1 %vm477_vm2, %v15393_v34  ;;  %v15545_v33 = vld [vmem:[%s15005_s21 + $0x220] sm:$0xff]  }
 0x138   : > { %12571 = vmatprep.mubr.msk.bf16.mxu0 %vm477_vm2, %v14667_v35  ;;  %13129 = vmatprep.mubr.msk.bf16.mxu1 %vm477_vm2, %v15397_v36  ;;  %v14882_v35 = vld [vmem:[%s15005_s21 + $0x118] sm:$0xff]  }
 0x13f   : > { %12572 = vmatmul.mubr.msk.bf16.gmra.mrb[28].mxu0 %vm477_vm2, %v14669_v37  ;;  %13130 = vmatmul.mubr.msk.bf16.gmra.mrb[28].mxu1 %vm477_vm2, %v15407_v38  ;;  %v15556_v37 = vld [vmem:[%s15005_s21 + $0x228] sm:$0xff]  }
 0x140   : > { %12575 = vmatprep.mubr.msk.bf16.mxu0 %vm477_vm2, %v14671_v39  ;;  %13133 = vmatprep.mubr.msk.bf16.mxu1 %vm477_vm2, %v15411_v40  ;;  %v15559_v39 = vld [vmem:[%s15005_s21 + $0x230] sm:$0xff]  }
 0x147   : > { %12576 = vmatmul.mubr.msk.bf16.gmra.mrb[32].mxu0 %vm477_vm2, %v14673_v41  ;;  %13134 = vmatmul.mubr.msk.bf16.gmra.mrb[32].mxu1 %vm477_vm2, %v15421_v42  ;;  %v14884_v41 = vld [vmem:[%s15005_s21 + $0x128] sm:$0xff]  }
 0x148   : > { %12579 = vmatprep.mubr.msk.bf16.mxu0 %vm477_vm2, %v14675_v43  ;;  %13137 = vmatprep.mubr.msk.bf16.mxu1 %vm477_vm2, %v15425_v44  ;;  %v14885_v43 = vld [vmem:[%s15005_s21 + $0x130] sm:$0xff]  }
 0x14f   : > { %12580 = vmatmul.mubr.msk.bf16.gmra.mrb[36].mxu0 %vm477_vm2, %v14677_v45  ;;  %13138 = vmatmul.mubr.msk.bf16.gmra.mrb[36].mxu1 %vm477_vm2, %v15435_v46  ;;  %v15570_v45 = vld [vmem:[%s15005_s21 + $0x238] sm:$0xff]  }
 0x150   : > { %12583 = vmatprep.mubr.msk.bf16.mxu0 %vm477_vm2, %v14679_v47  ;;  %13141 = vmatprep.mubr.msk.bf16.mxu1 %vm477_vm2, %v15439_v48  ;;  %v15573_v47 = vld [vmem:[%s15005_s21 + $0x240] sm:$0xff]  }
 0x157   : > { %12584 = vmatmul.mubr.msk.bf16.gmra.mrb[40].mxu0 %vm477_vm2, %v14681_v49  ;;  %13142 = vmatmul.mubr.msk.bf16.gmra.mrb[40].mxu1 %vm477_vm2, %v15449_v50  ;;  %v14886_v49 = vld [vmem:[%s15005_s21 + $0x138] sm:$0xff]  }
 0x158   : > { %12587 = vmatprep.mubr.msk.bf16.mxu0 %vm477_vm2, %v14683_v51  ;;  %13145 = vmatprep.mubr.msk.bf16.mxu1 %vm477_vm2, %v15453_v52  ;;  %v14887_v51 = vld [vmem:[%s15005_s21 + $0x140] sm:$0xff]  }
 0x15f   : > { %12588 = vmatmul.mubr.msk.bf16.gmra.mrb[44].mxu0 %vm477_vm2, %v14685_v53  ;;  %13146 = vmatmul.mubr.msk.bf16.gmra.mrb[44].mxu1 %vm477_vm2, %v15463_v54  ;;  %v15584_v53 = vld [vmem:[%s15005_s21 + $0x248] sm:$0xff]  }
 0x160   : > { %12591 = vmatprep.mubr.msk.bf16.mxu0 %vm477_vm2, %v14687_v56  ;;  %13149 = vmatprep.mubr.msk.bf16.mxu1 %vm477_vm2, %v15467_v58  ;;  %v15587_v56 = vld [vmem:[%s15005_s21 + $0x250] sm:$0xff]  }
 0x167   : > { %12592 = vmatmul.mubr.msk.bf16.gmra.mrb[48].mxu0 %vm477_vm2, %v14689_v60  ;;  %13150 = vmatmul.mubr.msk.bf16.gmra.mrb[48].mxu1 %vm477_vm2, %v15477_v62  ;;  %v14888_v60 = vld [vmem:[%s15005_s21 + $0x148] sm:$0xff]  }
 0x168   : > { %12595 = vmatprep.mubr.msk.bf16.mxu0 %vm477_vm2, %v14691_v0  ;;  %13153 = vmatprep.mubr.msk.bf16.mxu1 %vm477_vm2, %v15481_v2  ;;  %v14889_v0 = vld [vmem:[%s15005_s21 + $0x150] sm:$0xff]  }
 0x16f   : > { %12596 = vmatmul.mubr.msk.bf16.gmra.mrb[52].mxu0 %vm477_vm2, %v14693_v5  ;;  %13154 = vmatmul.mubr.msk.bf16.gmra.mrb[52].mxu1 %vm477_vm2, %v15491_v6  ;;  %v15598_v5 = vld [vmem:[%s15005_s21 + $0x258] sm:$0xff]  }
 0x170   : > { %12599 = vmatprep.mubr.msk.bf16.mxu0 %vm477_vm2, %v14695_v7  ;;  %13157 = vmatprep.mubr.msk.bf16.mxu1 %vm477_vm2, %v15495_v9  ;;  %v15601_v7 = vld [vmem:[%s15005_s21 + $0x260] sm:$0xff]  }
 0x177   : > { %12600 = vmatmul.mubr.msk.bf16.gmra.mrb[56].mxu0 %vm477_vm2, %v14697_v10  ;;  %13158 = vmatmul.mubr.msk.bf16.gmra.mrb[56].mxu1 %vm477_vm2, %v15505_v15  ;;  %v14890_v10 = vld [vmem:[%s15005_s21 + $0x158] sm:$0xff]  }
 0x178   : > { %12605 = vmatprep.mubr.msk.bf16.mxu0 %vm477_vm2, %v14879_v13  ;;  %13163 = vmatprep.mubr.msk.bf16.mxu1 %vm477_vm2, %v15508_v17  ;;  %v14891_v13 = vld [vmem:[%s15005_s21 + $0x160] sm:$0xff]  }
 0x17f   : > { %12606 = vmatmul.mubr.msk.bf16.vlgmr.msra.gmra.mrb[0].mxu0 %vm477_vm2, %v14880_v27  ;;  %13164 = vmatmul.mubr.msk.bf16.vlgmr.msra.gmra.mrb[0].mxu1 %vm477_vm2, %v15518_v19  ;;  %v15615_v27 = vld [vmem:[%s15005_s21 + $0x270] sm:$0xff]  }
 0x180   : > { %12666 = vmatpush3.bf16.msra.mxu0 %v15309_v12  ;;  %13224 = vmatpush3.bf16.msra.mxu1 %v15309_v12  ;;  %v14883_v12 = vld [vmem:[%s15005_s21 + $0x120] sm:$0xff]  }
 0x181   : > { %12609 = vmatprep.mubr.msk.bf16.mxu0 %vm477_vm2, %v14881_v29  ;;  %13167 = vmatprep.mubr.msk.bf16.mxu1 %vm477_vm2, %v15524_v23  ;;  %v14892_v29 = vld [vmem:[%s15005_s21 + $0x168] sm:$0xff]  }
 0x182   : > { %12727 = vmatprep.subr.bf16.mxu0 %v15527_v25  ;;  %13285 = vmatprep.subr.bf16.mxu1 %v15527_v25 }
 0x187   : > { %12610 = vmatmul.mubr.msk.bf16.gmra.mrb[4].mxu0 %vm477_vm2, %v14882_v35  ;;  %13168 = vmatmul.mubr.msk.bf16.gmra.mrb[4].mxu1 %vm477_vm2, %v15542_v31  ;;  %v14893_v35 = vld [vmem:[%s15005_s21 + $0x170] sm:$0xff]  }
 0x188   : > { %12613 = vmatprep.mubr.msk.bf16.mxu0 %vm477_vm2, %v14883_v12  ;;  %13171 = vmatprep.mubr.msk.bf16.mxu1 %vm477_vm2, %v15545_v33  ;;  %v15626_v12 = vld [vmem:[%s15005_s21 + $0x278] sm:$0xff]  }
 0x18f   : > { %12614 = vmatmul.mubr.msk.bf16.gmra.mrb[8].mxu0 %vm477_vm2, %v14884_v41  ;;  %13172 = vmatmul.mubr.msk.bf16.gmra.mrb[8].mxu1 %vm477_vm2, %v15556_v37  ;;  %v15629_v41 = vld [vmem:[%s15005_s21 + $0x280] sm:$0xff]  }
 0x190   : > { %12617 = vmatprep.mubr.msk.bf16.mxu0 %vm477_vm2, %v14885_v43  ;;  %13175 = vmatprep.mubr.msk.bf16.mxu1 %vm477_vm2, %v15559_v39  ;;  %v14894_v43 = vld [vmem:[%s15005_s21 + $0x178] sm:$0xff]  }
 0x197   : > { %12618 = vmatmul.mubr.msk.bf16.gmra.mrb[12].mxu0 %vm477_vm2, %v14886_v49  ;;  %13176 = vmatmul.mubr.msk.bf16.gmra.mrb[12].mxu1 %vm477_vm2, %v15570_v45  ;;  %v14895_v49 = vld [vmem:[%s15005_s21 + $0x180] sm:$0xff]  }
 0x198   : > { %12621 = vmatprep.mubr.msk.bf16.mxu0 %vm477_vm2, %v14887_v51  ;;  %13179 = vmatprep.mubr.msk.bf16.mxu1 %vm477_vm2, %v15573_v47  ;;  %v15640_v51 = vld [vmem:[%s15005_s21 + $0x288] sm:$0xff]  }
 0x19f   : > { %12622 = vmatmul.mubr.msk.bf16.gmra.mrb[16].mxu0 %vm477_vm2, %v14888_v60  ;;  %13180 = vmatmul.mubr.msk.bf16.gmra.mrb[16].mxu1 %vm477_vm2, %v15584_v53  ;;  %v15643_v60 = vld [vmem:[%s15005_s21 + $0x290] sm:$0xff]  }
 0x1a0   : > { %12625 = vmatprep.mubr.msk.bf16.mxu0 %vm477_vm2, %v14889_v0  ;;  %13183 = vmatprep.mubr.msk.bf16.mxu1 %vm477_vm2, %v15587_v56  ;;  %v14896_v0 = vld [vmem:[%s15005_s21 + $0x188] sm:$0xff]  }
 0x1a7   : > { %12626 = vmatmul.mubr.msk.bf16.gmra.mrb[20].mxu0 %vm477_vm2, %v14890_v10  ;;  %13184 = vmatmul.mubr.msk.bf16.gmra.mrb[20].mxu1 %vm477_vm2, %v15598_v5  ;;  %v14897_v10 = vld [vmem:[%s15005_s21 + $0x190] sm:$0xff]  }
 0x1a8   : > { %12629 = vmatprep.mubr.msk.bf16.mxu0 %vm477_vm2, %v14891_v13  ;;  %13187 = vmatprep.mubr.msk.bf16.mxu1 %vm477_vm2, %v15601_v7  ;;  %v15654_v13 = vld [vmem:[%s15005_s21 + $0x298] sm:$0xff]  }
 0x1af   : > { %12630 = vmatmul.mubr.msk.bf16.gmra.mrb[24].mxu0 %vm477_vm2, %v14892_v29  ;;  %13188 = vmatmul.mubr.msk.bf16.gmra.mrb[24].mxu1 %vm477_vm2, %v15612_v21  ;;  %v15657_v29 = vld [vmem:[%s15005_s21 + $0x2a0] sm:$0xff]  }
 0x1b0   : > { %12633 = vmatprep.mubr.msk.bf16.mxu0 %vm477_vm2, %v14893_v35  ;;  %13191 = vmatprep.mubr.msk.bf16.mxu1 %vm477_vm2, %v15615_v27  ;;  %16646 = vst [vmem:[#allocation2_spill] sm:$0xff] %v15657_v29  ;;  %v14898_v35 = vld [vmem:[%s15005_s21 + $0x198] sm:$0xff]  }
 0x1b7   : > { %12634 = vmatmul.mubr.msk.bf16.gmra.mrb[28].mxu0 %vm477_vm2, %v14894_v43  ;;  %13192 = vmatmul.mubr.msk.bf16.gmra.mrb[28].mxu1 %vm477_vm2, %v15626_v12  ;;  %v14899_v43 = vld [vmem:[%s15005_s21 + $0x1a0] sm:$0xff]  }
 0x1b8   : > { %12637 = vmatprep.mubr.msk.bf16.mxu0 %vm477_vm2, %v14895_v49  ;;  %13195 = vmatprep.mubr.msk.bf16.mxu1 %vm477_vm2, %v15629_v41  ;;  %v15668_v49 = vld [vmem:[%s15005_s21 + $0x2a8] sm:$0xff]  }
 0x1bf   : > { %12638 = vmatmul.mubr.msk.bf16.gmra.mrb[32].mxu0 %vm477_vm2, %v14896_v0  ;;  %13196 = vmatmul.mubr.msk.bf16.gmra.mrb[32].mxu1 %vm477_vm2, %v15640_v51  ;;  %v15671_v0 = vld [vmem:[%s15005_s21 + $0x2b0] sm:$0xff]  }
 0x1c0   : > { %12641 = vmatprep.mubr.msk.bf16.mxu0 %vm477_vm2, %v14897_v10  ;;  %13199 = vmatprep.mubr.msk.bf16.mxu1 %vm477_vm2, %v15643_v60  ;;  %v14900_v10 = vld [vmem:[%s15005_s21 + $0x1a8] sm:$0xff]  }
 0x1c7   : > { %12642 = vmatmul.mubr.msk.bf16.gmra.mrb[36].mxu0 %vm477_vm2, %v14898_v35  ;;  %13200 = vmatmul.mubr.msk.bf16.gmra.mrb[36].mxu1 %vm477_vm2, %v15654_v13  ;;  %v14901_v35 = vld [vmem:[%s15005_s21 + $0x1b0] sm:$0xff]  }
 0x1c8   : > { %12645 = vmatprep.mubr.msk.bf16.mxu0 %vm477_vm2, %v14899_v43  ;;  %13203 = vmatprep.mubr.msk.bf16.mxu1 %vm477_vm2, %v15657_v29  ;;  %v15682_v43 = vld [vmem:[%s15005_s21 + $0x2b8] sm:$0xff]   ;;  %v15685_v29 = vld [vmem:[%s15005_s21 + $0x2c0] sm:$0xff]  }
 0x1cf   : > { %12646 = vmatmul.mubr.msk.bf16.gmra.mrb[40].mxu0 %vm477_vm2, %v14900_v10  ;;  %13204 = vmatmul.mubr.msk.bf16.gmra.mrb[40].mxu1 %vm477_vm2, %v15668_v49  ;;  %v15696_v10 = vld [vmem:[%s15005_s21 + $0x2c8] sm:$0xff]  }
 0x1d0   : > { %12649 = vmatprep.mubr.msk.bf16.mxu0 %vm477_vm2, %v14901_v35  ;;  %13207 = vmatprep.mubr.msk.bf16.mxu1 %vm477_vm2, %v15671_v0  ;;  %v15699_v35 = vld [vmem:[%s15005_s21 + $0x2d0] sm:$0xff]  }
 0x1d7   : > { %12650 = vmatmul.mubr.msk.bf16.gmra.mrb[44].mxu0 %vm477_vm2, %v15246_v55  ;;  %13208 = vmatmul.mubr.msk.bf16.gmra.mrb[44].mxu1 %vm477_vm2, %v15682_v43  ;;  %v15710_v55 = vld [vmem:[%s15005_s21 + $0x2d8] sm:$0xff]  }
 0x1d8   : > { %12653 = vmatprep.mubr.msk.bf16.mxu0 %vm477_vm2, %v15250_v57  ;;  %13211 = vmatprep.mubr.msk.bf16.mxu1 %vm477_vm2, %v15685_v29  ;;  %16647 = vst [vmem:[#allocation3_spill] sm:$0xff] %v15710_v55  ;;  %v15713_v57 = vld [vmem:[%s15005_s21 + $0x2e0] sm:$0xff]  }
 0x1d9   : > { %16648 = vst [vmem:[#allocation4_spill] sm:$0xff] %v15713_v57 }
 0x1df   : > { %12654 = vmatmul.mubr.msk.bf16.gmra.mrb[48].mxu0 %vm477_vm2, %v15260_v59  ;;  %13212 = vmatmul.mubr.msk.bf16.gmra.mrb[48].mxu1 %vm477_vm2, %v15696_v10  ;;  %v15724_v59 = vld [vmem:[%s15005_s21 + $0x2e8] sm:$0xff]  }
 0x1e0   : > { %12657 = vmatprep.mubr.msk.bf16.mxu0 %vm477_vm2, %v15264_v61  ;;  %13215 = vmatprep.mubr.msk.bf16.mxu1 %vm477_vm2, %v15699_v35  ;;  %16649 = vst [vmem:[#allocation5_spill] sm:$0xff] %v15724_v59  ;;  %v15727_v61 = vld [vmem:[%s15005_s21 + $0x208] sm:$0xff]  }
 0x1e1   : > { %16650 = vst [vmem:[#allocation6_spill] sm:$0xff] %v15727_v61 }
 0x1e7   : > { %12658 = vmatmul.mubr.msk.bf16.gmra.mrb[52].mxu0 %vm477_vm2, %v15274_v63  ;;  %13216 = vmatmul.mubr.msk.bf16.gmra.mrb[52].mxu1 %vm477_vm2, %v15710_v55  ;;  %v14902_v63 = vld [vmem:[%s15005_s21 + $0x108] sm:$0xff]   ;;  %v15744_v55 = vld [vmem:[%s15005_s21 + $0x218] sm:$0xff]  }
 0x1e8   : > { %12661 = vmatprep.mubr.msk.bf16.mxu0 %vm477_vm2, %v15278_v1  ;;  %13219 = vmatprep.mubr.msk.bf16.mxu1 %vm477_vm2, %v15713_v57  ;;  %v15738_v1 = vld [vmem:[%s15005_s21 + $0x210] sm:$0xff]   ;;  %v10831_v57 = vld [vmem:[%s16609_s1 + $0xc] sm:$0x3]  ;;  %16652 = vst [vmem:[#allocation8_spill] sm:$0xff] %v15744_v55 }
 0x1e9   : > { %16651 = vst [vmem:[#allocation7_spill] sm:$0xff] %v15738_v1 }
 0x1ef   : > { %12662 = vmatmul.mubr.msk.bf16.gmra.mrb[56].mxu0 %vm477_vm2, %v15288_v3  ;;  %13220 = vmatmul.mubr.msk.bf16.gmra.mrb[56].mxu1 %vm477_vm2, %v15724_v59  ;;  %v15747_v3 = vand.u32 %v10831_v57, %v15010_v4  ;;  %v14903_v59 = vld [vmem:[%s15005_s21 + $0x110] sm:$0xff]   ;;  %v15762_v57 = vld [vmem:[%s15005_s21 + $0x220] sm:$0xff]  }
 0x1f0   : > { %12667 = vmatprep.mubr.msk.bf16.mxu0 %vm477_vm2, %v14902_v63  ;;  %13225 = vmatprep.mubr.msk.bf16.mxu1 %vm477_vm2, %v15727_v61  ;;  %v14904_v63 = vld [vmem:[%s15005_s21 + $0x118] sm:$0xff]   ;;  %16653 = vst [vmem:[#allocation9_spill] sm:$0xff] %v15762_v57  ;;  %v14907_v61 = vld [vmem:[%s15005_s21 + $0x130] sm:$0xff]  }
 0x1f7   : > { %12668 = vmatmul.mubr.msk.bf16.vlgmr.msra.gmra.mrb[0].mxu0 %vm477_vm2, %v14903_v59  ;;  %13226 = vmatmul.mubr.msk.bf16.vlgmr.msra.gmra.mrb[0].mxu1 %vm477_vm2, %v15738_v1  ;;  %v15765_v59 = vld [vmem:[%s15005_s21 + $0x228] sm:$0xff]   ;;  %v14905_v1 = vld [vmem:[%s15005_s21 + $0x120] sm:$0xff]  }
 0x1f8   : > { %12728 = vmatpush3.bf16.msra.mxu0 %v15527_v25  ;;  %13286 = vmatpush3.bf16.msra.mxu1 %v15527_v25  ;;  %16654 = vst [vmem:[#allocation10_spill] sm:$0xff] %v15765_v59  ;;  %v14906_v25 = vld [vmem:[%s15005_s21 + $0x128] sm:$0xff]  }
 0x1f9   : > { %12671 = vmatprep.mubr.msk.bf16.mxu0 %vm477_vm2, %v14904_v63  ;;  %13229 = vmatprep.mubr.msk.bf16.mxu1 %vm477_vm2, %v15744_v55  ;;  %v15776_v63 = vld [vmem:[%s15005_s21 + $0x230] sm:$0xff]   ;;  %v15779_v55 = vld [vmem:[%s15005_s21 + $0x238] sm:$0xff]  }
 0x1fa   : > { %12789 = vmatprep.subr.bf16.mxu0 %v15747_v3  ;;  %13347 = vmatprep.subr.bf16.mxu1 %v15747_v3  ;;  %16655 = vst [vmem:[#allocation11_spill] sm:$0xff] %v15776_v63  ;;  %16656 = vst [vmem:[#allocation12_spill] sm:$0xff] %v15779_v55 }
 0x1ff   : > { %12672 = vmatmul.mubr.msk.bf16.gmra.mrb[4].mxu0 %vm477_vm2, %v14905_v1  ;;  %13230 = vmatmul.mubr.msk.bf16.gmra.mrb[4].mxu1 %vm477_vm2, %v15762_v57  ;;  %v14908_v1 = vld [vmem:[%s15005_s21 + $0x138] sm:$0xff]   ;;  %v14909_v57 = vld [vmem:[%s15005_s21 + $0x140] sm:$0xff]  }
 0x200   : > { %12675 = vmatprep.mubr.msk.bf16.mxu0 %vm477_vm2, %v14906_v25  ;;  %13233 = vmatprep.mubr.msk.bf16.mxu1 %vm477_vm2, %v15765_v59  ;;  %v15790_v25 = vld [vmem:[%s15005_s21 + $0x240] sm:$0xff]   ;;  %v15793_v59 = vld [vmem:[%s15005_s21 + $0x248] sm:$0xff]  }
 0x201   : > { %16657 = vst [vmem:[#allocation13_spill] sm:$0xff] %v15790_v25  ;;  %16658 = vst [vmem:[#allocation14_spill] sm:$0xff] %v15793_v59 }
 0x207   : > { %12676 = vmatmul.mubr.msk.bf16.gmra.mrb[8].mxu0 %vm477_vm2, %v14907_v61  ;;  %13234 = vmatmul.mubr.msk.bf16.gmra.mrb[8].mxu1 %vm477_vm2, %v15776_v63  ;;  %v14910_v61 = vld [vmem:[%s15005_s21 + $0x148] sm:$0xff]   ;;  %v14911_v63 = vld [vmem:[%s15005_s21 + $0x150] sm:$0xff]  }
 0x208   : > { %12679 = vmatprep.mubr.msk.bf16.mxu0 %vm477_vm2, %v14908_v1  ;;  %13237 = vmatprep.mubr.msk.bf16.mxu1 %vm477_vm2, %v15779_v55  ;;  %v15804_v1 = vld [vmem:[%s15005_s21 + $0x250] sm:$0xff]   ;;  %v15807_v55 = vld [vmem:[%s15005_s21 + $0x258] sm:$0xff]  }
 0x209   : > { %16659 = vst [vmem:[#allocation15_spill] sm:$0xff] %v15804_v1  ;;  %16660 = vst [vmem:[#allocation16_spill] sm:$0xff] %v15807_v55 }
 0x20f   : > { %12680 = vmatmul.mubr.msk.bf16.gmra.mrb[12].mxu0 %vm477_vm2, %v14909_v57  ;;  %13238 = vmatmul.mubr.msk.bf16.gmra.mrb[12].mxu1 %vm477_vm2, %v15790_v25  ;;  %v14912_v57 = vld [vmem:[%s15005_s21 + $0x158] sm:$0xff]   ;;  %v14913_v25 = vld [vmem:[%s15005_s21 + $0x160] sm:$0xff]  }
 0x210   : > { %12683 = vmatprep.mubr.msk.bf16.mxu0 %vm477_vm2, %v14910_v61  ;;  %13241 = vmatprep.mubr.msk.bf16.mxu1 %vm477_vm2, %v15793_v59  ;;  %v15818_v61 = vld [vmem:[%s15005_s21 + $0x260] sm:$0xff]   ;;  %v15821_v59 = vld [vmem:[%s15005_s21 + $0x268] sm:$0xff]  }
 0x211   : > { %16661 = vst [vmem:[#allocation17_spill] sm:$0xff] %v15818_v61  ;;  %16662 = vst [vmem:[#allocation18_spill] sm:$0xff] %v15821_v59 }
 0x217   : > { %12684 = vmatmul.mubr.msk.bf16.gmra.mrb[16].mxu0 %vm477_vm2, %v14911_v63  ;;  %13242 = vmatmul.mubr.msk.bf16.gmra.mrb[16].mxu1 %vm477_vm2, %v15804_v1  ;;  %v14914_v63 = vld [vmem:[%s15005_s21 + $0x168] sm:$0xff]   ;;  %v14915_v1 = vld [vmem:[%s15005_s21 + $0x170] sm:$0xff]  }
 0x218   : > { %12687 = vmatprep.mubr.msk.bf16.mxu0 %vm477_vm2, %v14912_v57  ;;  %13245 = vmatprep.mubr.msk.bf16.mxu1 %vm477_vm2, %v15807_v55  ;;  %v15832_v57 = vld [vmem:[%s15005_s21 + $0x270] sm:$0xff]   ;;  %v15835_v55 = vld [vmem:[%s15005_s21 + $0x278] sm:$0xff]  }
 0x219   : > { %16663 = vst [vmem:[#allocation19_spill] sm:$0xff] %v15832_v57  ;;  %16664 = vst [vmem:[#allocation20_spill] sm:$0xff] %v15835_v55 }
 0x21f   : > { %12688 = vmatmul.mubr.msk.bf16.gmra.mrb[20].mxu0 %vm477_vm2, %v14913_v25  ;;  %13246 = vmatmul.mubr.msk.bf16.gmra.mrb[20].mxu1 %vm477_vm2, %v15818_v61  ;;  %v14916_v25 = vld [vmem:[%s15005_s21 + $0x178] sm:$0xff]   ;;  %v14917_v61 = vld [vmem:[%s15005_s21 + $0x180] sm:$0xff]  }
 0x220   : > { %12691 = vmatprep.mubr.msk.bf16.mxu0 %vm477_vm2, %v14914_v63  ;;  %13249 = vmatprep.mubr.msk.bf16.mxu1 %vm477_vm2, %v15821_v59  ;;  %v15846_v63 = vld [vmem:[%s15005_s21 + $0x280] sm:$0xff]   ;;  %v15849_v59 = vld [vmem:[%s15005_s21 + $0x288] sm:$0xff]  }
 0x221   : > { %16665 = vst [vmem:[#allocation21_spill] sm:$0xff] %v15846_v63  ;;  %16666 = vst [vmem:[#allocation22_spill] sm:$0xff] %v15849_v59 }
 0x227   : > { %12692 = vmatmul.mubr.msk.bf16.gmra.mrb[24].mxu0 %vm477_vm2, %v14915_v1  ;;  %13250 = vmatmul.mubr.msk.bf16.gmra.mrb[24].mxu1 %vm477_vm2, %v15832_v57  ;;  %v14918_v1 = vld [vmem:[%s15005_s21 + $0x188] sm:$0xff]   ;;  %v14919_v57 = vld [vmem:[%s15005_s21 + $0x190] sm:$0xff]  }
 0x228   : > { %12695 = vmatprep.mubr.msk.bf16.mxu0 %vm477_vm2, %v14916_v25  ;;  %13253 = vmatprep.mubr.msk.bf16.mxu1 %vm477_vm2, %v15835_v55  ;;  %v15860_v25 = vld [vmem:[%s15005_s21 + $0x290] sm:$0xff]   ;;  %v15863_v55 = vld [vmem:[%s15005_s21 + $0x298] sm:$0xff]  }
 0x229   : > { %16667 = vst [vmem:[#allocation23_spill] sm:$0xff] %v15860_v25  ;;  %16668 = vst [vmem:[#allocation24_spill] sm:$0xff] %v15863_v55 }
 0x22f   : > { %12696 = vmatmul.mubr.msk.bf16.gmra.mrb[28].mxu0 %vm477_vm2, %v14917_v61  ;;  %13254 = vmatmul.mubr.msk.bf16.gmra.mrb[28].mxu1 %vm477_vm2, %v15846_v63  ;;  %v14920_v61 = vld [vmem:[%s15005_s21 + $0x198] sm:$0xff]   ;;  %v14921_v63 = vld [vmem:[%s15005_s21 + $0x1a0] sm:$0xff]  }
 0x230   : > { %12699 = vmatprep.mubr.msk.bf16.mxu0 %vm477_vm2, %v14918_v1  ;;  %13257 = vmatprep.mubr.msk.bf16.mxu1 %vm477_vm2, %v15849_v59  ;;  %v15874_v1 = vld [vmem:[%s15005_s21 + $0x2a0] sm:$0xff]   ;;  %v15877_v59 = vld [vmem:[%s15005_s21 + $0x2a8] sm:$0xff]  }
 0x231   : > { %16669 = vst [vmem:[#allocation25_spill] sm:$0xff] %v15874_v1  ;;  %16670 = vst [vmem:[#allocation26_spill] sm:$0xff] %v15877_v59 }
 0x237   : > { %12700 = vmatmul.mubr.msk.bf16.gmra.mrb[32].mxu0 %vm477_vm2, %v14919_v57  ;;  %13258 = vmatmul.mubr.msk.bf16.gmra.mrb[32].mxu1 %vm477_vm2, %v15860_v25  ;;  %v14922_v57 = vld [vmem:[%s15005_s21 + $0x1a8] sm:$0xff]   ;;  %v14923_v25 = vld [vmem:[%s15005_s21 + $0x1b0] sm:$0xff]  }
 0x238   : > { %12703 = vmatprep.mubr.msk.bf16.mxu0 %vm477_vm2, %v14920_v61  ;;  %13261 = vmatprep.mubr.msk.bf16.mxu1 %vm477_vm2, %v15863_v55  ;;  %v15888_v61 = vld [vmem:[%s15005_s21 + $0x2b0] sm:$0xff]   ;;  %v15891_v55 = vld [vmem:[%s15005_s21 + $0x2b8] sm:$0xff]  }
 0x239   : > { %16671 = vst [vmem:[#allocation27_spill] sm:$0xff] %v15888_v61  ;;  %16672 = vst [vmem:[#allocation28_spill] sm:$0xff] %v15891_v55 }
 0x23f   : > { %12704 = vmatmul.mubr.msk.bf16.gmra.mrb[36].mxu0 %vm477_vm2, %v14921_v63  ;;  %13262 = vmatmul.mubr.msk.bf16.gmra.mrb[36].mxu1 %vm477_vm2, %v15874_v1  ;;  %v14924_v63 = vld [vmem:[%s15005_s21 + $0x1b8] sm:$0xff]   ;;  %v14925_v1 = vld [vmem:[%s15005_s21 + $0x1c0] sm:$0xff]  }
 0x240   : > { %12707 = vmatprep.mubr.msk.bf16.mxu0 %vm477_vm2, %v14922_v57  ;;  %13265 = vmatprep.mubr.msk.bf16.mxu1 %vm477_vm2, %v15877_v59  ;;  %v15902_v57 = vld [vmem:[%s15005_s21 + $0x2c0] sm:$0xff]   ;;  %v15905_v59 = vld [vmem:[%s15005_s21 + $0x2c8] sm:$0xff]  }
 0x241   : > { %16673 = vst [vmem:[#allocation29_spill] sm:$0xff] %v15902_v57  ;;  %16674 = vst [vmem:[#allocation30_spill] sm:$0xff] %v15905_v59 }
 0x247   : > { %12708 = vmatmul.mubr.msk.bf16.gmra.mrb[40].mxu0 %vm477_vm2, %v14923_v25  ;;  %13266 = vmatmul.mubr.msk.bf16.gmra.mrb[40].mxu1 %vm477_vm2, %v15888_v61  ;;  %v14926_v25 = vld [vmem:[%s15005_s21 + $0x1c8] sm:$0xff]   ;;  %v14927_v61 = vld [vmem:[%s15005_s21 + $0x1d0] sm:$0xff]  }
 0x248   : > { %12711 = vmatprep.mubr.msk.bf16.mxu0 %vm477_vm2, %v14924_v63  ;;  %13269 = vmatprep.mubr.msk.bf16.mxu1 %vm477_vm2, %v15891_v55  ;;  %v15916_v63 = vld [vmem:[%s15005_s21 + $0x2d0] sm:$0xff]   ;;  %v15919_v55 = vld [vmem:[%s15005_s21 + $0x2d8] sm:$0xff]  }
 0x249   : > { %16675 = vst [vmem:[#allocation31_spill] sm:$0xff] %v15916_v63  ;;  %16676 = vst [vmem:[#allocation32_spill] sm:$0xff] %v15919_v55 }
 0x24f   : > { %12712 = vmatmul.mubr.msk.bf16.gmra.mrb[44].mxu0 %vm477_vm2, %v14925_v1  ;;  %13270 = vmatmul.mubr.msk.bf16.gmra.mrb[44].mxu1 %vm477_vm2, %v15902_v57  ;;  %v14928_v1 = vld [vmem:[%s15005_s21 + $0x1d8] sm:$0xff]   ;;  %v14929_v57 = vld [vmem:[%s15005_s21 + $0x1e0] sm:$0xff]  }
 0x250   : > { %12715 = vmatprep.mubr.msk.bf16.mxu0 %vm477_vm2, %v14926_v25  ;;  %13273 = vmatprep.mubr.msk.bf16.mxu1 %vm477_vm2, %v15905_v59  ;;  %v15930_v25 = vld [vmem:[%s15005_s21 + $0x2e0] sm:$0xff]   ;;  %v15933_v59 = vld [vmem:[%s15005_s21 + $0x2e8] sm:$0xff]  }
 0x251   : > { %16677 = vst [vmem:[#allocation33_spill] sm:$0xff] %v15930_v25  ;;  %16678 = vst [vmem:[#allocation34_spill] sm:$0xff] %v15933_v59 }
 0x257   : > { %12716 = vmatmul.mubr.msk.bf16.gmra.mrb[48].mxu0 %vm477_vm2, %v14927_v61  ;;  %13274 = vmatmul.mubr.msk.bf16.gmra.mrb[48].mxu1 %vm477_vm2, %v15916_v63  ;;  %v14930_v61 = vld [vmem:[%s15005_s21 + $0x1e8] sm:$0xff]   ;;  %v14931_v63 = vld [vmem:[%s15005_s21 + $0x1f0] sm:$0xff]  }
 0x258   : > { %12719 = vmatprep.mubr.msk.bf16.mxu0 %vm477_vm2, %v14928_v1  ;;  %13277 = vmatprep.mubr.msk.bf16.mxu1 %vm477_vm2, %v15919_v55  ;;  %v15944_v1 = vld [vmem:[%s15005_s21 + $0x2f0] sm:$0xff]  }
 0x259   : > { %v15947_v55 = vld [vmem:[%s15005_s21 + $0x210] sm:$0xff]  }
 0x25f   : > { %12720 = vmatmul.mubr.msk.bf16.gmra.mrb[52].mxu0 %vm477_vm2, %v14929_v57  ;;  %13278 = vmatmul.mubr.msk.bf16.gmra.mrb[52].mxu1 %vm477_vm2, %v15930_v25  ;;  %v14932_v57 = vld [vmem:[%s15005_s21 + $0x110] sm:$0xff]   ;;  %v15964_v25 = vld [vmem:[%s15005_s21 + $0x220] sm:$0xff]  }
 0x260   : > { %12723 = vmatprep.mubr.msk.bf16.mxu0 %vm477_vm2, %v14930_v61  ;;  %13281 = vmatprep.mubr.msk.bf16.mxu1 %vm477_vm2, %v15933_v59  ;;  %v15958_v61 = vld [vmem:[%s15005_s21 + $0x218] sm:$0xff]   ;;  %v10955_v59 = vld [vmem:[%s16609_s1 + $0xe] sm:$0x3] }
 0x267   : > { %12724 = vmatmul.mubr.msk.bf16.gmra.mrb[56].mxu0 %vm477_vm2, %v14931_v63  ;;  %13282 = vmatmul.mubr.msk.bf16.gmra.mrb[56].mxu1 %vm477_vm2, %v15944_v1  ;;  %v15967_v63 = vand.u32 %v10955_v59, %v15010_v4  ;;  %v15985_v59 = vld [vmem:[%s15005_s21 + $0x230] sm:$0xff]  }
 0x268   : > { %12729 = vmatprep.mubr.msk.bf16.mxu0 %vm477_vm2, %v14932_v57  ;;  %13287 = vmatprep.mubr.msk.bf16.mxu1 %vm477_vm2, %v15947_v55  ;;  %v14791_v57 = vld [vmem:[%s15005_s21 + $0x310] sm:$0xff]  }
 0x26f   : > { %12730 = vmatmul.mubr.msk.bf16.vlgmr.msra.gmra.mrb[0].mxu0 %vm477_vm2, %v15299_v8  ;;  %13288 = vmatmul.mubr.msk.bf16.vlgmr.msra.gmra.mrb[0].mxu1 %vm477_vm2, %v15958_v61  ;;  %v15982_v8 = vld [vmem:[%s15005_s21 + $0x228] sm:$0xff]  }
 0x270   : > { %12790 = vmatpush3.bf16.msra.mxu0 %v15747_v3  ;;  %13348 = vmatpush3.bf16.msra.mxu1 %v15747_v3  ;;  %v15999_v3 = vld [vmem:[%s15005_s21 + $0x240] sm:$0xff]  }
 0x271   : > { %12733 = vmatprep.mubr.msk.bf16.mxu0 %vm477_vm2, %v15306_v11  ;;  %13291 = vmatprep.mubr.msk.bf16.mxu1 %vm477_vm2, %v15964_v25  ;;  %v15996_v11 = vld [vmem:[%s15005_s21 + $0x238] sm:$0xff]  }
 0x272   : > { %12851 = vmatprep.subr.bf16.mxu0 %v15967_v63  ;;  %13409 = vmatprep.subr.bf16.mxu1 %v15967_v63 }
 0x277   : > { %12734 = vmatmul.mubr.msk.bf16.gmra.mrb[4].mxu0 %vm477_vm2, %v15321_v16  ;;  %13292 = vmatmul.mubr.msk.bf16.gmra.mrb[4].mxu1 %vm477_vm2, %v15982_v8  ;;  %v16010_v16 = vld [vmem:[%s15005_s21 + $0x248] sm:$0xff]  }
 0x278   : > { %12737 = vmatprep.mubr.msk.bf16.mxu0 %vm477_vm2, %v15325_v18  ;;  %13295 = vmatprep.mubr.msk.bf16.mxu1 %vm477_vm2, %v15985_v59  ;;  %v16013_v18 = vld [vmem:[%s15005_s21 + $0x250] sm:$0xff]  }
 0x27f   : > { %12738 = vmatmul.mubr.msk.bf16.gmra.mrb[8].mxu0 %vm477_vm2, %v15337_v14  ;;  %13296 = vmatmul.mubr.msk.bf16.gmra.mrb[8].mxu1 %vm477_vm2, %v15996_v11  ;;  %v16024_v14 = vld [vmem:[%s15005_s21 + $0x258] sm:$0xff]  }
 0x280   : > { %12741 = vmatprep.mubr.msk.bf16.mxu0 %vm477_vm2, %v15341_v20  ;;  %13299 = vmatprep.mubr.msk.bf16.mxu1 %vm477_vm2, %v15999_v3  ;;  %v16027_v20 = vld [vmem:[%s15005_s21 + $0x260] sm:$0xff]  }
 0x287   : > { %12742 = vmatmul.mubr.msk.bf16.gmra.mrb[12].mxu0 %vm477_vm2, %v15351_v22  ;;  %13300 = vmatmul.mubr.msk.bf16.gmra.mrb[12].mxu1 %vm477_vm2, %v16010_v16  ;;  %v16038_v22 = vld [vmem:[%s15005_s21 + $0x268] sm:$0xff]  }
 0x288   : > { %12745 = vmatprep.mubr.msk.bf16.mxu0 %vm477_vm2, %v15355_v24  ;;  %13303 = vmatprep.mubr.msk.bf16.mxu1 %vm477_vm2, %v16013_v18  ;;  %v16041_v24 = vld [vmem:[%s15005_s21 + $0x270] sm:$0xff]  }
 0x28f   : > { %12746 = vmatmul.mubr.msk.bf16.gmra.mrb[16].mxu0 %vm477_vm2, %v15365_v26  ;;  %13304 = vmatmul.mubr.msk.bf16.gmra.mrb[16].mxu1 %vm477_vm2, %v16024_v14  ;;  %v16052_v26 = vld [vmem:[%s15005_s21 + $0x278] sm:$0xff]  }
 0x290   : > { %12749 = vmatprep.mubr.msk.bf16.mxu0 %vm477_vm2, %v15369_v28  ;;  %13307 = vmatprep.mubr.msk.bf16.mxu1 %vm477_vm2, %v16027_v20  ;;  %v16055_v28 = vld [vmem:[%s15005_s21 + $0x280] sm:$0xff]  }
 0x297   : > { %12750 = vmatmul.mubr.msk.bf16.gmra.mrb[20].mxu0 %vm477_vm2, %v15379_v30  ;;  %13308 = vmatmul.mubr.msk.bf16.gmra.mrb[20].mxu1 %vm477_vm2, %v16038_v22  ;;  %v16066_v30 = vld [vmem:[%s15005_s21 + $0x288] sm:$0xff]  }
 0x298   : > { %12753 = vmatprep.mubr.msk.bf16.mxu0 %vm477_vm2, %v15383_v32  ;;  %13311 = vmatprep.mubr.msk.bf16.mxu1 %vm477_vm2, %v16041_v24  ;;  %v16069_v32 = vld [vmem:[%s15005_s21 + $0x290] sm:$0xff]  }
 0x29f   : > { %12754 = vmatmul.mubr.msk.bf16.gmra.mrb[24].mxu0 %vm477_vm2, %v15393_v34  ;;  %13312 = vmatmul.mubr.msk.bf16.gmra.mrb[24].mxu1 %vm477_vm2, %v16052_v26  ;;  %v16080_v34 = vld [vmem:[%s15005_s21 + $0x298] sm:$0xff]  }
 0x2a0   : > { %12757 = vmatprep.mubr.msk.bf16.mxu0 %vm477_vm2, %v15397_v36  ;;  %13315 = vmatprep.mubr.msk.bf16.mxu1 %vm477_vm2, %v16055_v28  ;;  %v16083_v36 = vld [vmem:[%s15005_s21 + $0x2a0] sm:$0xff]  }
 0x2a7   : > { %12758 = vmatmul.mubr.msk.bf16.gmra.mrb[28].mxu0 %vm477_vm2, %v15407_v38  ;;  %13316 = vmatmul.mubr.msk.bf16.gmra.mrb[28].mxu1 %vm477_vm2, %v16066_v30  ;;  %v16094_v38 = vld [vmem:[%s15005_s21 + $0x2a8] sm:$0xff]  }
 0x2a8   : > { %12761 = vmatprep.mubr.msk.bf16.mxu0 %vm477_vm2, %v15411_v40  ;;  %13319 = vmatprep.mubr.msk.bf16.mxu1 %vm477_vm2, %v16069_v32  ;;  %v16097_v40 = vld [vmem:[%s15005_s21 + $0x2b0] sm:$0xff]  }
 0x2af   : > { %12762 = vmatmul.mubr.msk.bf16.gmra.mrb[32].mxu0 %vm477_vm2, %v15421_v42  ;;  %13320 = vmatmul.mubr.msk.bf16.gmra.mrb[32].mxu1 %vm477_vm2, %v16080_v34  ;;  %v16108_v42 = vld [vmem:[%s15005_s21 + $0x2b8] sm:$0xff]  }
 0x2b0   : > { %12765 = vmatprep.mubr.msk.bf16.mxu0 %vm477_vm2, %v15425_v44  ;;  %13323 = vmatprep.mubr.msk.bf16.mxu1 %vm477_vm2, %v16083_v36  ;;  %v16111_v44 = vld [vmem:[%s15005_s21 + $0x2c0] sm:$0xff]  }
 0x2b7   : > { %12766 = vmatmul.mubr.msk.bf16.gmra.mrb[36].mxu0 %vm477_vm2, %v15435_v46  ;;  %13324 = vmatmul.mubr.msk.bf16.gmra.mrb[36].mxu1 %vm477_vm2, %v16094_v38  ;;  %v16122_v46 = vld [vmem:[%s15005_s21 + $0x2c8] sm:$0xff]  }
 0x2b8   : > { %12769 = vmatprep.mubr.msk.bf16.mxu0 %vm477_vm2, %v15439_v48  ;;  %13327 = vmatprep.mubr.msk.bf16.mxu1 %vm477_vm2, %v16097_v40  ;;  %v16125_v48 = vld [vmem:[%s15005_s21 + $0x2d0] sm:$0xff]  }
 0x2bf   : > { %12770 = vmatmul.mubr.msk.bf16.gmra.mrb[40].mxu0 %vm477_vm2, %v15449_v50  ;;  %13328 = vmatmul.mubr.msk.bf16.gmra.mrb[40].mxu1 %vm477_vm2, %v16108_v42  ;;  %v16136_v50 = vld [vmem:[%s15005_s21 + $0x2d8] sm:$0xff]  }
 0x2c0   : > { %12773 = vmatprep.mubr.msk.bf16.mxu0 %vm477_vm2, %v15453_v52  ;;  %13331 = vmatprep.mubr.msk.bf16.mxu1 %vm477_vm2, %v16111_v44  ;;  %v16139_v52 = vld [vmem:[%s15005_s21 + $0x2e0] sm:$0xff]  }
 0x2c7   : > { %12774 = vmatmul.mubr.msk.bf16.gmra.mrb[44].mxu0 %vm477_vm2, %v15463_v54  ;;  %13332 = vmatmul.mubr.msk.bf16.gmra.mrb[44].mxu1 %vm477_vm2, %v16122_v46  ;;  %v16150_v54 = vld [vmem:[%s15005_s21 + $0x2e8] sm:$0xff]  }
 0x2c8   : > { %12777 = vmatprep.mubr.msk.bf16.mxu0 %vm477_vm2, %v15467_v58  ;;  %13335 = vmatprep.mubr.msk.bf16.mxu1 %vm477_vm2, %v16125_v48  ;;  %v16153_v58 = vld [vmem:[%s15005_s21 + $0x2f0] sm:$0xff]  }
 0x2c9   : > { %16679 = vst [vmem:[#allocation35_spill] sm:$0xff] %v16153_v58 }
 0x2cf   : > { %12778 = vmatmul.mubr.msk.bf16.gmra.mrb[48].mxu0 %vm477_vm2, %v15477_v62  ;;  %13336 = vmatmul.mubr.msk.bf16.gmra.mrb[48].mxu1 %vm477_vm2, %v16136_v50  ;;  %v16164_v62 = vld [vmem:[%s15005_s21 + $0x2f8] sm:$0xff]  }
 0x2d0   : > { %12781 = vmatprep.mubr.msk.bf16.mxu0 %vm477_vm2, %v15481_v2  ;;  %13339 = vmatprep.mubr.msk.bf16.mxu1 %vm477_vm2, %v16139_v52  ;;  %v14789_v2 = vld [vmem:[%s15005_s21 + $0x300] sm:$0xff]  }
 0x2d7   : > { %12782 = vmatmul.mubr.msk.bf16.gmra.mrb[52].mxu0 %vm477_vm2, %v15491_v6  ;;  %13340 = vmatmul.mubr.msk.bf16.gmra.mrb[52].mxu1 %vm477_vm2, %v16150_v54  ;;  %v14790_v6 = vld [vmem:[%s15005_s21 + $0x308] sm:$0xff]  }
 0x2d8   : > { %12785 = vmatprep.mubr.msk.bf16.mxu0 %vm477_vm2, %v15495_v9  ;;  %13343 = vmatprep.mubr.msk.bf16.mxu1 %vm477_vm2, %v16153_v58  ;;  %v11079_v9 = vld [vmem:[%s16609_s1 + $0x10] sm:$0x3] }
 0x2d9   : > { %v16180_v58 = vand.u32 %v11079_v9, %v15010_v4  ;;  %v14792_v4 = vld [vmem:[%s15005_s21 + $0x318] sm:$0xff]   ;;  %v14819_v9 = vld [vmem:[%s15005_s21 + $0x308] sm:$0xff]  }
 0x2df   : > { %12786 = vmatmul.mubr.msk.bf16.gmra.mrb[56].mxu0 %vm477_vm2, %v15505_v15  ;;  %13344 = vmatmul.mubr.msk.bf16.gmra.mrb[56].mxu1 %vm477_vm2, %v16164_v62  ;;  %v14793_v15 = vld [vmem:[%s15005_s21 + $0x320] sm:$0xff]  }
 0x2e0   : > { %12791 = vmatprep.mubr.msk.bf16.mxu0 %vm477_vm2, %v15508_v17  ;;  %13349 = vmatprep.mubr.msk.bf16.mxu1 %vm477_vm2, %v14789_v2  ;;  %v14794_v17 = vld [vmem:[%s15005_s21 + $0x328] sm:$0xff]   ;;  %v14815_v2 = vld [vmem:[%s15005_s21 + $0x3d0] sm:$0xff]  }
 0x2e7   : > { %12792 = vmatmul.mubr.msk.bf16.vlgmr.msra.gmra.mrb[0].mxu0 %vm477_vm2, %v15518_v19  ;;  %13350 = vmatmul.mubr.msk.bf16.vlgmr.msra.gmra.mrb[0].mxu1 %vm477_vm2, %v14790_v6  ;;  %v14795_v19 = vld [vmem:[%s15005_s21 + $0x330] sm:$0xff]   ;;  %v16681_v6 = vld [vmem:[#allocation3_spill] sm:$0xff] }
 0x2e8   : > { %12852 = vmatpush3.bf16.msra.mxu0 %v15967_v63  ;;  %13410 = vmatpush3.bf16.msra.mxu1 %v15967_v63  ;;  %v14811_v63 = vld [vmem:[%s15005_s21 + $0x3b0] sm:$0xff]  }
 0x2e9   : > { %12795 = vmatprep.mubr.msk.bf16.mxu0 %vm477_vm2, %v15524_v23  ;;  %13353 = vmatprep.mubr.msk.bf16.mxu1 %vm477_vm2, %v14791_v57  ;;  %v14796_v23 = vld [vmem:[%s15005_s21 + $0x338] sm:$0xff]  }
 0x2ea   : > { %12913 = vmatprep.subr.bf16.mxu0 %v16180_v58  ;;  %13471 = vmatprep.subr.bf16.mxu1 %v16180_v58  ;;  %v16683_v57 = vld [vmem:[#allocation5_spill] sm:$0xff] }
 0x2ef   : > { %12796 = vmatmul.mubr.msk.bf16.gmra.mrb[4].mxu0 %vm477_vm2, %v15542_v31  ;;  %13354 = vmatmul.mubr.msk.bf16.gmra.mrb[4].mxu1 %vm477_vm2, %v14792_v4  ;;  %v14797_v31 = vld [vmem:[%s15005_s21 + $0x340] sm:$0xff]   ;;  %v14820_v4 = vld [vmem:[%s15005_s21 + $0x310] sm:$0xff]  }
 0x2f0   : > { %12799 = vmatprep.mubr.msk.bf16.mxu0 %vm477_vm2, %v15545_v33  ;;  %13357 = vmatprep.mubr.msk.bf16.mxu1 %vm477_vm2, %v14793_v15  ;;  %v14798_v33 = vld [vmem:[%s15005_s21 + $0x348] sm:$0xff]   ;;  %v14821_v15 = vld [vmem:[%s15005_s21 + $0x318] sm:$0xff]  }
 0x2f7   : > { %12800 = vmatmul.mubr.msk.bf16.gmra.mrb[8].mxu0 %vm477_vm2, %v15556_v37  ;;  %13358 = vmatmul.mubr.msk.bf16.gmra.mrb[8].mxu1 %vm477_vm2, %v14794_v17  ;;  %v14799_v37 = vld [vmem:[%s15005_s21 + $0x350] sm:$0xff]   ;;  %v16685_v17 = vld [vmem:[#allocation7_spill] sm:$0xff] }
 0x2f8   : > { %12803 = vmatprep.mubr.msk.bf16.mxu0 %vm477_vm2, %v15559_v39  ;;  %13361 = vmatprep.mubr.msk.bf16.mxu1 %vm477_vm2, %v14795_v19  ;;  %v14800_v39 = vld [vmem:[%s15005_s21 + $0x358] sm:$0xff]   ;;  %v16686_v19 = vld [vmem:[#allocation8_spill] sm:$0xff] }
 0x2ff   : > { %12804 = vmatmul.mubr.msk.bf16.gmra.mrb[12].mxu0 %vm477_vm2, %v15570_v45  ;;  %13362 = vmatmul.mubr.msk.bf16.gmra.mrb[12].mxu1 %vm477_vm2, %v14796_v23  ;;  %v14801_v45 = vld [vmem:[%s15005_s21 + $0x360] sm:$0xff]  }
 0x300   : > { %12807 = vmatprep.mubr.msk.bf16.mxu0 %vm477_vm2, %v15573_v47  ;;  %13365 = vmatprep.mubr.msk.bf16.mxu1 %vm477_vm2, %v14797_v31  ;;  %v14802_v47 = vld [vmem:[%s15005_s21 + $0x368] sm:$0xff]   ;;  %v14822_v23 = vld [vmem:[%s15005_s21 + $0x320] sm:$0xff]  }
 0x301   : > { %v14823_v31 = vld [vmem:[%s15005_s21 + $0x328] sm:$0xff]  }
 0x307   : > { %12808 = vmatmul.mubr.msk.bf16.gmra.mrb[16].mxu0 %vm477_vm2, %v15584_v53  ;;  %13366 = vmatmul.mubr.msk.bf16.gmra.mrb[16].mxu1 %vm477_vm2, %v14798_v33  ;;  %v14803_v53 = vld [vmem:[%s15005_s21 + $0x370] sm:$0xff]   ;;  %v16687_v33 = vld [vmem:[#allocation9_spill] sm:$0xff] }
 0x308   : > { %12811 = vmatprep.mubr.msk.bf16.mxu0 %vm477_vm2, %v15587_v56  ;;  %13369 = vmatprep.mubr.msk.bf16.mxu1 %vm477_vm2, %v14799_v37  ;;  %v14804_v56 = vld [vmem:[%s15005_s21 + $0x378] sm:$0xff]   ;;  %v16688_v37 = vld [vmem:[#allocation10_spill] sm:$0xff] }
 0x30f   : > { %12812 = vmatmul.mubr.msk.bf16.gmra.mrb[20].mxu0 %vm477_vm2, %v15598_v5  ;;  %13370 = vmatmul.mubr.msk.bf16.gmra.mrb[20].mxu1 %vm477_vm2, %v14800_v39  ;;  %v14805_v5 = vld [vmem:[%s15005_s21 + $0x380] sm:$0xff]   ;;  %v14825_v39 = vld [vmem:[%s15005_s21 + $0x338] sm:$0xff]  }
 0x310   : > { %12815 = vmatprep.mubr.msk.bf16.mxu0 %vm477_vm2, %v15601_v7  ;;  %13373 = vmatprep.mubr.msk.bf16.mxu1 %vm477_vm2, %v14801_v45  ;;  %v14806_v7 = vld [vmem:[%s15005_s21 + $0x388] sm:$0xff]  }
 0x311   : > { %v16689_v45 = vld [vmem:[#allocation11_spill] sm:$0xff] }
 0x317   : > { %12816 = vmatmul.mubr.msk.bf16.gmra.mrb[24].mxu0 %vm477_vm2, %v15612_v21  ;;  %13374 = vmatmul.mubr.msk.bf16.gmra.mrb[24].mxu1 %vm477_vm2, %v14802_v47  ;;  %v14807_v21 = vld [vmem:[%s15005_s21 + $0x390] sm:$0xff]  }
 0x318   : > { %12819 = vmatprep.mubr.msk.bf16.mxu0 %vm477_vm2, %v15615_v27  ;;  %13377 = vmatprep.mubr.msk.bf16.mxu1 %vm477_vm2, %v14803_v53  ;;  %v14808_v27 = vld [vmem:[%s15005_s21 + $0x398] sm:$0xff]   ;;  %v16690_v47 = vld [vmem:[#allocation12_spill] sm:$0xff]  ;;  %v14826_v53 = vld [vmem:[%s15005_s21 + $0x340] sm:$0xff]  }
 0x31f   : > { %12820 = vmatmul.mubr.msk.bf16.gmra.mrb[28].mxu0 %vm477_vm2, %v15626_v12  ;;  %13378 = vmatmul.mubr.msk.bf16.gmra.mrb[28].mxu1 %vm477_vm2, %v14804_v56  ;;  %v14809_v12 = vld [vmem:[%s15005_s21 + $0x3a0] sm:$0xff]   ;;  %v14827_v56 = vld [vmem:[%s15005_s21 + $0x348] sm:$0xff]  }
 0x320   : > { %12823 = vmatprep.mubr.msk.bf16.mxu0 %vm477_vm2, %v15629_v41  ;;  %13381 = vmatprep.mubr.msk.bf16.mxu1 %vm477_vm2, %v14805_v5  ;;  %v16680_v41 = vld [vmem:[#allocation2_spill] sm:$0xff]  ;;  %v16691_v5 = vld [vmem:[#allocation13_spill] sm:$0xff] }
 0x327   : > { %12824 = vmatmul.mubr.msk.bf16.gmra.mrb[32].mxu0 %vm477_vm2, %v15640_v51  ;;  %13382 = vmatmul.mubr.msk.bf16.gmra.mrb[32].mxu1 %vm477_vm2, %v14806_v7  ;;  %v14810_v51 = vld [vmem:[%s15005_s21 + $0x3a8] sm:$0xff]   ;;  %v16692_v7 = vld [vmem:[#allocation14_spill] sm:$0xff] }
 0x328   : > { %12827 = vmatprep.mubr.msk.bf16.mxu0 %vm477_vm2, %v15643_v60  ;;  %13385 = vmatprep.mubr.msk.bf16.mxu1 %vm477_vm2, %v14807_v21  ;;  %v14812_v60 = vld [vmem:[%s15005_s21 + $0x3b8] sm:$0xff]   ;;  %v14828_v21 = vld [vmem:[%s15005_s21 + $0x350] sm:$0xff]  }
 0x32f   : > { %12828 = vmatmul.mubr.msk.bf16.gmra.mrb[36].mxu0 %vm477_vm2, %v15654_v13  ;;  %13386 = vmatmul.mubr.msk.bf16.gmra.mrb[36].mxu1 %vm477_vm2, %v14808_v27  ;;  %v14813_v13 = vld [vmem:[%s15005_s21 + $0x3c0] sm:$0xff]   ;;  %v14829_v27 = vld [vmem:[%s15005_s21 + $0x358] sm:$0xff]  }
 0x330   : > { %12831 = vmatprep.mubr.msk.bf16.mxu0 %vm477_vm2, %v16680_v41  ;;  %13389 = vmatprep.mubr.msk.bf16.mxu1 %vm477_vm2, %v14809_v12  ;;  %v16693_v12 = vld [vmem:[#allocation15_spill] sm:$0xff]  ;;  %v16694_v41 = vld [vmem:[#allocation16_spill] sm:$0xff] }
 0x337   : > { %12832 = vmatmul.mubr.msk.bf16.gmra.mrb[40].mxu0 %vm477_vm2, %v15668_v49  ;;  %13390 = vmatmul.mubr.msk.bf16.gmra.mrb[40].mxu1 %vm477_vm2, %v14810_v51  ;;  %v14814_v49 = vld [vmem:[%s15005_s21 + $0x3c8] sm:$0xff]   ;;  %v14830_v51 = vld [vmem:[%s15005_s21 + $0x360] sm:$0xff]  }
 0x338   : > { %12835 = vmatprep.mubr.msk.bf16.mxu0 %vm477_vm2, %v15671_v0  ;;  %13393 = vmatprep.mubr.msk.bf16.mxu1 %vm477_vm2, %v14811_v63  ;;  %v14816_v0 = vld [vmem:[%s15005_s21 + $0x3d8] sm:$0xff]   ;;  %v14831_v63 = vld [vmem:[%s15005_s21 + $0x368] sm:$0xff]  }
 0x33f   : > { %12836 = vmatmul.mubr.msk.bf16.gmra.mrb[44].mxu0 %vm477_vm2, %v15682_v43  ;;  %13394 = vmatmul.mubr.msk.bf16.gmra.mrb[44].mxu1 %vm477_vm2, %v14812_v60  ;;  %v14817_v43 = vld [vmem:[%s15005_s21 + $0x3e0] sm:$0xff]   ;;  %v16695_v60 = vld [vmem:[#allocation17_spill] sm:$0xff] }
 0x340   : > { %12839 = vmatprep.mubr.msk.bf16.mxu0 %vm477_vm2, %v15685_v29  ;;  %13397 = vmatprep.mubr.msk.bf16.mxu1 %vm477_vm2, %v14813_v13  ;;  %v16682_v29 = vld [vmem:[#allocation4_spill] sm:$0xff]  ;;  %v16696_v13 = vld [vmem:[#allocation18_spill] sm:$0xff] }
 0x347   : > { %12840 = vmatmul.mubr.msk.bf16.gmra.mrb[48].mxu0 %vm477_vm2, %v15696_v10  ;;  %13398 = vmatmul.mubr.msk.bf16.gmra.mrb[48].mxu1 %vm477_vm2, %v14814_v49  ;;  %v14818_v10 = vld [vmem:[%s15005_s21 + $0x3e8] sm:$0xff]   ;;  %v14832_v49 = vld [vmem:[%s15005_s21 + $0x370] sm:$0xff]  }
 0x348   : > { %12843 = vmatprep.mubr.msk.bf16.mxu0 %vm477_vm2, %v15699_v35  ;;  %13401 = vmatprep.mubr.msk.bf16.mxu1 %vm477_vm2, %v14815_v2  ;;  %v16684_v35 = vld [vmem:[#allocation6_spill] sm:$0xff]  ;;  %v14833_v2 = vld [vmem:[%s15005_s21 + $0x378] sm:$0xff]  }
 0x34f   : > { %12844 = vmatmul.mubr.msk.bf16.gmra.mrb[52].mxu0 %vm477_vm2, %v16681_v6  ;;  %13402 = vmatmul.mubr.msk.bf16.gmra.mrb[52].mxu1 %vm477_vm2, %v14816_v0  ;;  %v16697_v0 = vld [vmem:[#allocation19_spill] sm:$0xff]  ;;  %v14834_v6 = vld [vmem:[%s15005_s21 + $0x380] sm:$0xff]  }
 0x350   : > { %12847 = vmatprep.mubr.msk.bf16.mxu0 %vm477_vm2, %v16682_v29  ;;  %13405 = vmatprep.mubr.msk.bf16.mxu1 %vm477_vm2, %v14817_v43  ;;  %v16698_v43 = vld [vmem:[#allocation20_spill] sm:$0xff]  ;;  %v14835_v29 = vld [vmem:[%s15005_s21 + $0x388] sm:$0xff]  }
 0x357   : > { %12848 = vmatmul.mubr.msk.bf16.gmra.mrb[56].mxu0 %vm477_vm2, %v16683_v57  ;;  %13406 = vmatmul.mubr.msk.bf16.gmra.mrb[56].mxu1 %vm477_vm2, %v14818_v10  ;;  %v16699_v10 = vld [vmem:[#allocation21_spill] sm:$0xff]  ;;  %v14836_v57 = vld [vmem:[%s15005_s21 + $0x390] sm:$0xff]  }
 0x358   : > { %12853 = vmatprep.mubr.msk.bf16.mxu0 %vm477_vm2, %v16684_v35  ;;  %13411 = vmatprep.mubr.msk.bf16.mxu1 %vm477_vm2, %v14819_v9  ;;  %v16700_v9 = vld [vmem:[#allocation22_spill] sm:$0xff]  ;;  %v14837_v35 = vld [vmem:[%s15005_s21 + $0x398] sm:$0xff]  }
 0x35f   : > { %12854 = vmatmul.mubr.msk.bf16.vlgmr.msra.gmra.mrb[0].mxu0 %vm477_vm2, %v16685_v17  ;;  %13412 = vmatmul.mubr.msk.bf16.vlgmr.msra.gmra.mrb[0].mxu1 %vm477_vm2, %v14820_v4  ;;  %v16701_v4 = vld [vmem:[#allocation23_spill] sm:$0xff]  ;;  %v14838_v17 = vld [vmem:[%s15005_s21 + $0x3a0] sm:$0xff]  }
 0x360   : > { %12914 = vmatpush3.bf16.msra.mxu0 %v16180_v58  ;;  %13472 = vmatpush3.bf16.msra.mxu1 %v16180_v58  ;;  %v14824_v58 = vld [vmem:[%s15005_s21 + $0x330] sm:$0xff]  }
 0x361   : > { %12857 = vmatprep.mubr.msk.bf16.mxu0 %vm477_vm2, %v16686_v19  ;;  %13415 = vmatprep.mubr.msk.bf16.mxu1 %vm477_vm2, %v14821_v15  ;;  %v16702_v15 = vld [vmem:[#allocation24_spill] sm:$0xff]  ;;  %v14839_v19 = vld [vmem:[%s15005_s21 + $0x3a8] sm:$0xff]  }
 0x367   : > { %12858 = vmatmul.mubr.msk.bf16.gmra.mrb[4].mxu0 %vm477_vm2, %v16687_v33  ;;  %13416 = vmatmul.mubr.msk.bf16.gmra.mrb[4].mxu1 %vm477_vm2, %v14822_v23  ;;  %v16703_v23 = vld [vmem:[#allocation25_spill] sm:$0xff]  ;;  %v14840_v33 = vld [vmem:[%s15005_s21 + $0x3b0] sm:$0xff]  }
 0x368   : > { %12861 = vmatprep.mubr.msk.bf16.mxu0 %vm477_vm2, %v16688_v37  ;;  %13419 = vmatprep.mubr.msk.bf16.mxu1 %vm477_vm2, %v14823_v31  ;;  %v16704_v31 = vld [vmem:[#allocation26_spill] sm:$0xff]  ;;  %v14841_v37 = vld [vmem:[%s15005_s21 + $0x3b8] sm:$0xff]  }
 0x36f   : > { %12862 = vmatmul.mubr.msk.bf16.gmra.mrb[8].mxu0 %vm477_vm2, %v16689_v45  ;;  %13420 = vmatmul.mubr.msk.bf16.gmra.mrb[8].mxu1 %vm477_vm2, %v14824_v58  ;;  %v16705_v58 = vld [vmem:[#allocation27_spill] sm:$0xff]  ;;  %v14842_v45 = vld [vmem:[%s15005_s21 + $0x3c0] sm:$0xff]  }
 0x370   : > { %12865 = vmatprep.mubr.msk.bf16.mxu0 %vm477_vm2, %v16690_v47  ;;  %13423 = vmatprep.mubr.msk.bf16.mxu1 %vm477_vm2, %v14825_v39  ;;  %v16706_v39 = vld [vmem:[#allocation28_spill] sm:$0xff]  ;;  %v14843_v47 = vld [vmem:[%s15005_s21 + $0x3c8] sm:$0xff]  }
 0x377   : > { %12866 = vmatmul.mubr.msk.bf16.gmra.mrb[12].mxu0 %vm477_vm2, %v16691_v5  ;;  %13424 = vmatmul.mubr.msk.bf16.gmra.mrb[12].mxu1 %vm477_vm2, %v14826_v53  ;;  %v16707_v53 = vld [vmem:[#allocation29_spill] sm:$0xff]  ;;  %v14844_v5 = vld [vmem:[%s15005_s21 + $0x3d0] sm:$0xff]  }
 0x378   : > { %12869 = vmatprep.mubr.msk.bf16.mxu0 %vm477_vm2, %v16692_v7  ;;  %13427 = vmatprep.mubr.msk.bf16.mxu1 %vm477_vm2, %v14827_v56  ;;  %v16708_v56 = vld [vmem:[#allocation30_spill] sm:$0xff]  ;;  %v14845_v7 = vld [vmem:[%s15005_s21 + $0x3d8] sm:$0xff]  }
 0x37f   : > { %12870 = vmatmul.mubr.msk.bf16.gmra.mrb[16].mxu0 %vm477_vm2, %v16693_v12  ;;  %13428 = vmatmul.mubr.msk.bf16.gmra.mrb[16].mxu1 %vm477_vm2, %v14828_v21  ;;  %v16709_v21 = vld [vmem:[#allocation31_spill] sm:$0xff]  ;;  %v14846_v12 = vld [vmem:[%s15005_s21 + $0x3e0] sm:$0xff]  }
 0x380   : > { %12873 = vmatprep.mubr.msk.bf16.mxu0 %vm477_vm2, %v16694_v41  ;;  %13431 = vmatprep.mubr.msk.bf16.mxu1 %vm477_vm2, %v14829_v27  ;;  %v16710_v27 = vld [vmem:[#allocation32_spill] sm:$0xff]  ;;  %v14847_v41 = vld [vmem:[%s15005_s21 + $0x3e8] sm:$0xff]  }
 0x387   : > { %12874 = vmatmul.mubr.msk.bf16.gmra.mrb[20].mxu0 %vm477_vm2, %v16695_v60  ;;  %13432 = vmatmul.mubr.msk.bf16.gmra.mrb[20].mxu1 %vm477_vm2, %v14830_v51  ;;  %v16711_v51 = vld [vmem:[#allocation33_spill] sm:$0xff]  ;;  %v14848_v60 = vld [vmem:[%s15005_s21 + $0x3f0] sm:$0xff]  }
 0x388   : > { %12877 = vmatprep.mubr.msk.bf16.mxu0 %vm477_vm2, %v16696_v13  ;;  %13435 = vmatprep.mubr.msk.bf16.mxu1 %vm477_vm2, %v14831_v63  ;;  %v16712_v63 = vld [vmem:[#allocation34_spill] sm:$0xff]  ;;  %v14849_v13 = vld [vmem:[%s15005_s21 + $0x310] sm:$0xff]  }
 0x38f   : > { %12878 = vmatmul.mubr.msk.bf16.gmra.mrb[24].mxu0 %vm477_vm2, %v16697_v0  ;;  %13436 = vmatmul.mubr.msk.bf16.gmra.mrb[24].mxu1 %vm477_vm2, %v14832_v49  ;;  %v14850_v49 = vld [vmem:[%s15005_s21 + $0x318] sm:$0xff]   ;;  %v14853_v0 = vld [vmem:[%s15005_s21 + $0x330] sm:$0xff]  }
 0x390   : > { %12881 = vmatprep.mubr.msk.bf16.mxu0 %vm477_vm2, %v16698_v43  ;;  %13439 = vmatprep.mubr.msk.bf16.mxu1 %vm477_vm2, %v14833_v2  ;;  %v14851_v2 = vld [vmem:[%s15005_s21 + $0x320] sm:$0xff]  }
 0x397   : > { %12882 = vmatmul.mubr.msk.bf16.gmra.mrb[28].mxu0 %vm477_vm2, %v16699_v10  ;;  %13440 = vmatmul.mubr.msk.bf16.gmra.mrb[28].mxu1 %vm477_vm2, %v14834_v6 }
 0x398   : > { %12885 = vmatprep.mubr.msk.bf16.mxu0 %vm477_vm2, %v16700_v9  ;;  %13443 = vmatprep.mubr.msk.bf16.mxu1 %vm477_vm2, %v14835_v29 }
 0x39f   : > { %12886 = vmatmul.mubr.msk.bf16.gmra.mrb[32].mxu0 %vm477_vm2, %v16701_v4  ;;  %13444 = vmatmul.mubr.msk.bf16.gmra.mrb[32].mxu1 %vm477_vm2, %v14836_v57 }
 0x3a0   : > { %12889 = vmatprep.mubr.msk.bf16.mxu0 %vm477_vm2, %v16702_v15  ;;  %13447 = vmatprep.mubr.msk.bf16.mxu1 %vm477_vm2, %v14837_v35  ;;  %v16546_v35 = vld [vmem:[%s16610_s2] ss:$0 sm:$0xff] }
 0x3a7   : > { %12890 = vmatmul.mubr.msk.bf16.gmra.mrb[36].mxu0 %vm477_vm2, %v16703_v23  ;;  %13448 = vmatmul.mubr.msk.bf16.gmra.mrb[36].mxu1 %vm477_vm2, %v14838_v17 }
 0x3a8   : > { %12893 = vmatprep.mubr.msk.bf16.mxu0 %vm477_vm2, %v16704_v31  ;;  %13451 = vmatprep.mubr.msk.bf16.mxu1 %vm477_vm2, %v14839_v19 }
 0x3af   : > { %12894 = vmatmul.mubr.msk.bf16.gmra.mrb[40].mxu0 %vm477_vm2, %v16705_v58  ;;  %13452 = vmatmul.mubr.msk.bf16.gmra.mrb[40].mxu1 %vm477_vm2, %v14840_v33 }
 0x3b0   : > { %12897 = vmatprep.mubr.msk.bf16.mxu0 %vm477_vm2, %v16706_v39  ;;  %13455 = vmatprep.mubr.msk.bf16.mxu1 %vm477_vm2, %v14841_v37 }
 0x3b7   : > { %12898 = vmatmul.mubr.msk.bf16.gmra.mrb[44].mxu0 %vm477_vm2, %v16707_v53  ;;  %13456 = vmatmul.mubr.msk.bf16.gmra.mrb[44].mxu1 %vm477_vm2, %v14842_v45 }
 0x3b8   : > { %12901 = vmatprep.mubr.msk.bf16.mxu0 %vm477_vm2, %v16708_v56  ;;  %13459 = vmatprep.mubr.msk.bf16.mxu1 %vm477_vm2, %v14843_v47 }
 0x3bf   : > { %12902 = vmatmul.mubr.msk.bf16.gmra.mrb[48].mxu0 %vm477_vm2, %v16709_v21  ;;  %13460 = vmatmul.mubr.msk.bf16.gmra.mrb[48].mxu1 %vm477_vm2, %v14844_v5 }
 0x3c0   : > { %12905 = vmatprep.mubr.msk.bf16.mxu0 %vm477_vm2, %v16710_v27  ;;  %13463 = vmatprep.mubr.msk.bf16.mxu1 %vm477_vm2, %v14845_v7 }
 0x3c7   : > { %12906 = vmatmul.mubr.msk.bf16.gmra.mrb[52].mxu0 %vm477_vm2, %v16711_v51  ;;  %13464 = vmatmul.mubr.msk.bf16.gmra.mrb[52].mxu1 %vm477_vm2, %v14846_v12 }
 0x3c8   : > { %12909 = vmatprep.mubr.msk.bf16.mxu0 %vm477_vm2, %v16712_v63  ;;  %13467 = vmatprep.mubr.msk.bf16.mxu1 %vm477_vm2, %v14847_v41 }
 0x3cf   : > { %12910 = vmatmul.mubr.msk.bf16.gmra.mrb[56].mxu0 %vm477_vm2, %v15944_v1  ;;  %13468 = vmatmul.mubr.msk.bf16.gmra.mrb[56].mxu1 %vm477_vm2, %v14848_v60  ;;  %v14852_v1 = vld [vmem:[%s15005_s21 + $0x328] sm:$0xff]  }
 0x3d0   : > { %12915 = vmatprep.mubr.msk.bf16.mxu0 %vm477_vm2, %v15947_v55  ;;  %13473 = vmatprep.mubr.msk.bf16.mxu1 %vm477_vm2, %v14849_v13  ;;  %v14854_v55 = vld [vmem:[%s15005_s21 + $0x338] sm:$0xff]  }
 0x3d7   : > { %12916 = vmatmul.mubr.msk.bf16.vlgmr.msra.gmra.mrb[0].mxu0 %vm477_vm2, %v15958_v61  ;;  %13474 = vmatmul.mubr.msk.bf16.vlgmr.msra.gmra.mrb[0].mxu1 %vm477_vm2, %v14850_v49  ;;  %v14855_v61 = vld [vmem:[%s15005_s21 + $0x340] sm:$0xff]  }
 0x3d8   : > { %12919 = vmatprep.mubr.msk.bf16.mxu0 %vm477_vm2, %v15964_v25  ;;  %13477 = vmatprep.mubr.msk.bf16.mxu1 %vm477_vm2, %v14851_v2  ;;  %v14856_v25 = vld [vmem:[%s15005_s21 + $0x348] sm:$0xff]  }
 0x3df   : > { %12920 = vmatmul.mubr.msk.bf16.gmra.mrb[4].mxu0 %vm477_vm2, %v15982_v8  ;;  %13478 = vmatmul.mubr.msk.bf16.gmra.mrb[4].mxu1 %vm477_vm2, %v14852_v1  ;;  %v14857_v8 = vld [vmem:[%s15005_s21 + $0x350] sm:$0xff]  }
 0x3e0   : > { %12923 = vmatprep.mubr.msk.bf16.mxu0 %vm477_vm2, %v15985_v59  ;;  %13481 = vmatprep.mubr.msk.bf16.mxu1 %vm477_vm2, %v14853_v0  ;;  %v14858_v59 = vld [vmem:[%s15005_s21 + $0x358] sm:$0xff]  }
 0x3e7   : > { %12924 = vmatmul.mubr.msk.bf16.gmra.mrb[8].mxu0 %vm477_vm2, %v15996_v11  ;;  %13482 = vmatmul.mubr.msk.bf16.gmra.mrb[8].mxu1 %vm477_vm2, %v14854_v55  ;;  %v14859_v11 = vld [vmem:[%s15005_s21 + $0x360] sm:$0xff]  }
 0x3e8   : > { %12927 = vmatprep.mubr.msk.bf16.mxu0 %vm477_vm2, %v15999_v3  ;;  %13485 = vmatprep.mubr.msk.bf16.mxu1 %vm477_vm2, %v14855_v61  ;;  %v14860_v3 = vld [vmem:[%s15005_s21 + $0x368] sm:$0xff]  }
 0x3ef   : > { %12928 = vmatmul.mubr.msk.bf16.gmra.mrb[12].mxu0 %vm477_vm2, %v16010_v16  ;;  %13486 = vmatmul.mubr.msk.bf16.gmra.mrb[12].mxu1 %vm477_vm2, %v14856_v25  ;;  %v14861_v16 = vld [vmem:[%s15005_s21 + $0x370] sm:$0xff]  }
 0x3f0   : > { %12931 = vmatprep.mubr.msk.bf16.mxu0 %vm477_vm2, %v16013_v18  ;;  %13489 = vmatprep.mubr.msk.bf16.mxu1 %vm477_vm2, %v14857_v8  ;;  %v14862_v18 = vld [vmem:[%s15005_s21 + $0x378] sm:$0xff]  }
 0x3f7   : > { %12932 = vmatmul.mubr.msk.bf16.gmra.mrb[16].mxu0 %vm477_vm2, %v16024_v14  ;;  %13490 = vmatmul.mubr.msk.bf16.gmra.mrb[16].mxu1 %vm477_vm2, %v14858_v59  ;;  %v14863_v14 = vld [vmem:[%s15005_s21 + $0x380] sm:$0xff]  }
 0x3f8   : > { %12935 = vmatprep.mubr.msk.bf16.mxu0 %vm477_vm2, %v16027_v20  ;;  %13493 = vmatprep.mubr.msk.bf16.mxu1 %vm477_vm2, %v14859_v11  ;;  %v14864_v20 = vld [vmem:[%s15005_s21 + $0x388] sm:$0xff]  }
 0x3ff   : > { %12936 = vmatmul.mubr.msk.bf16.gmra.mrb[20].mxu0 %vm477_vm2, %v16038_v22  ;;  %13494 = vmatmul.mubr.msk.bf16.gmra.mrb[20].mxu1 %vm477_vm2, %v14860_v3  ;;  %v14865_v22 = vld [vmem:[%s15005_s21 + $0x390] sm:$0xff]  }
 0x400   : > { %12939 = vmatprep.mubr.msk.bf16.mxu0 %vm477_vm2, %v16041_v24  ;;  %13497 = vmatprep.mubr.msk.bf16.mxu1 %vm477_vm2, %v14861_v16  ;;  %v14866_v24 = vld [vmem:[%s15005_s21 + $0x398] sm:$0xff]  }
 0x407   : > { %12940 = vmatmul.mubr.msk.bf16.gmra.mrb[24].mxu0 %vm477_vm2, %v16052_v26  ;;  %13498 = vmatmul.mubr.msk.bf16.gmra.mrb[24].mxu1 %vm477_vm2, %v14862_v18  ;;  %v14867_v26 = vld [vmem:[%s15005_s21 + $0x3a0] sm:$0xff]  }
 0x408   : > { %12943 = vmatprep.mubr.msk.bf16.mxu0 %vm477_vm2, %v16055_v28  ;;  %13501 = vmatprep.mubr.msk.bf16.mxu1 %vm477_vm2, %v14863_v14  ;;  %v14868_v28 = vld [vmem:[%s15005_s21 + $0x3a8] sm:$0xff]  }
 0x40f   : > { %12944 = vmatmul.mubr.msk.bf16.gmra.mrb[28].mxu0 %vm477_vm2, %v16066_v30  ;;  %13502 = vmatmul.mubr.msk.bf16.gmra.mrb[28].mxu1 %vm477_vm2, %v14864_v20  ;;  %v14869_v30 = vld [vmem:[%s15005_s21 + $0x3b0] sm:$0xff]  }
 0x410   : > { %12947 = vmatprep.mubr.msk.bf16.mxu0 %vm477_vm2, %v16069_v32  ;;  %13505 = vmatprep.mubr.msk.bf16.mxu1 %vm477_vm2, %v14865_v22  ;;  %v14870_v32 = vld [vmem:[%s15005_s21 + $0x3b8] sm:$0xff]  }
 0x417   : > { %12948 = vmatmul.mubr.msk.bf16.gmra.mrb[32].mxu0 %vm477_vm2, %v16080_v34  ;;  %13506 = vmatmul.mubr.msk.bf16.gmra.mrb[32].mxu1 %vm477_vm2, %v14866_v24  ;;  %v14871_v34 = vld [vmem:[%s15005_s21 + $0x3c0] sm:$0xff]  }
 0x418   : > { %12951 = vmatprep.mubr.msk.bf16.mxu0 %vm477_vm2, %v16083_v36  ;;  %13509 = vmatprep.mubr.msk.bf16.mxu1 %vm477_vm2, %v14867_v26  ;;  %v14872_v36 = vld [vmem:[%s15005_s21 + $0x3c8] sm:$0xff]  }
 0x41f   : > { %12952 = vmatmul.mubr.msk.bf16.gmra.mrb[36].mxu0 %vm477_vm2, %v16094_v38  ;;  %13510 = vmatmul.mubr.msk.bf16.gmra.mrb[36].mxu1 %vm477_vm2, %v14868_v28  ;;  %v14873_v38 = vld [vmem:[%s15005_s21 + $0x3d0] sm:$0xff]  }
 0x420   : > { %12955 = vmatprep.mubr.msk.bf16.mxu0 %vm477_vm2, %v16097_v40  ;;  %13513 = vmatprep.mubr.msk.bf16.mxu1 %vm477_vm2, %v14869_v30  ;;  %v14874_v40 = vld [vmem:[%s15005_s21 + $0x3d8] sm:$0xff]  }
 0x427   : > { %12956 = vmatmul.mubr.msk.bf16.gmra.mrb[40].mxu0 %vm477_vm2, %v16108_v42  ;;  %13514 = vmatmul.mubr.msk.bf16.gmra.mrb[40].mxu1 %vm477_vm2, %v14870_v32  ;;  %v14875_v42 = vld [vmem:[%s15005_s21 + $0x3e0] sm:$0xff]  }
 0x428   : > { %12959 = vmatprep.mubr.msk.bf16.mxu0 %vm477_vm2, %v16111_v44  ;;  %13517 = vmatprep.mubr.msk.bf16.mxu1 %vm477_vm2, %v14871_v34  ;;  %v14876_v44 = vld [vmem:[%s15005_s21 + $0x3e8] sm:$0xff]  }
 0x42f   : > { %12960 = vmatmul.mubr.msk.bf16.gmra.mrb[44].mxu0 %vm477_vm2, %v16122_v46  ;;  %13518 = vmatmul.mubr.msk.bf16.gmra.mrb[44].mxu1 %vm477_vm2, %v14872_v36  ;;  %v14877_v46 = vld [vmem:[%s15005_s21 + $0x3f0] sm:$0xff]  }
 0x430   : > { %12963 = vmatprep.mubr.msk.bf16.mxu0 %vm477_vm2, %v16125_v48  ;;  %13521 = vmatprep.mubr.msk.bf16.mxu1 %vm477_vm2, %v14873_v38  ;;  %v16713_v48 = vld [vmem:[#allocation35_spill] sm:$0xff] }
 0x437   : > { %12964 = vmatmul.mubr.msk.bf16.gmra.mrb[48].mxu0 %vm477_vm2, %v16136_v50  ;;  %13522 = vmatmul.mubr.msk.bf16.gmra.mrb[48].mxu1 %vm477_vm2, %v14874_v40  ;;  %v14878_v50 = vld [vmem:[%s15005_s21 + $0x3f8] sm:$0xff]  }
 0x438   : > { %12967 = vmatprep.mubr.msk.bf16.mxu0 %vm477_vm2, %v16139_v52  ;;  %13525 = vmatprep.mubr.msk.bf16.mxu1 %vm477_vm2, %v14875_v42 }
 0x43f   : > { %12968 = vmatmul.mubr.msk.bf16.gmra.mrb[52].mxu0 %vm477_vm2, %v16150_v54  ;;  %13526 = vmatmul.mubr.msk.bf16.gmra.mrb[52].mxu1 %vm477_vm2, %v14876_v44 }
 0x440   : > { %12971 = vmatprep.mubr.msk.bf16.mxu0 %vm477_vm2, %v16713_v48  ;;  %13529 = vmatprep.mubr.msk.bf16.mxu1 %vm477_vm2, %v14877_v46 }
 0x447   : > { %12972 = vmatmul.mubr.msk.bf16.gmra.mrb[56].mxu0 %vm477_vm2, %v16164_v62  ;;  %13530 = vmatmul.mubr.msk.bf16.gmra.mrb[56].mxu1 %vm477_vm2, %v14878_v50 }
 0x4aa   : > { %v12917_v52 = vpop.f32.mrb[0].mxu0  ;;  %v13475_v43 = vpop.f32.mrb[0].mxu1 }
 0x4ab   : > { %v9642_v6 = vmax.f32 %v12917_v52, %v13475_v43  ;;  %v5554_v29 = vpop.f32.mrb[1].mxu0  ;;  %v9341_v54 = vpop.f32.mrb[1].mxu1 }
 0x4ac   : > { %v9640_v10 = vmax.f32 %v5554_v29, %v9341_v54  ;;  %v12918_v9 = vpop.f32.mrb[2].mxu0  ;;  %v13476_v57 = vpop.f32.mrb[2].mxu1 }
 0x4ad   : > { %v9643_v4 = vmax.f32 %v12918_v9, %v13476_v57  ;;  %v5557_v15 = vpop.f32.mrb[3].mxu0  ;;  %v9344_v62 = vpop.f32.mrb[3].mxu1 }
 0x4ae   : > { %v9700_v17 = vmax.f32 %v9640_v10, %v9642_v6  ;;  %v9641_v19 = vmax.f32 %v5557_v15, %v9344_v62 }
 0x4b0   : > { %v9737_v23 = vadd.f32 %v16546_v35, %v9700_v17  ;;  %v9701_v31 = vmax.f32 %v9641_v19, %v9643_v4 }
 0x4b2   : > { %v9738_v33 = vadd.f32 %v16546_v35, %v9701_v31  ;;  %v12921_v37 = vpop.f32.mrb[4].mxu0  ;;  %v13479_v58 = vpop.f32.mrb[4].mxu1  ;;  %v9767_v53 = vmax.f32 %v9737_v23, 0.0 }
 0x4b3   : > { %v9646_v39 = vmax.f32 %v12921_v37, %v13479_v58  ;;  %v5570_v45 = vpop.f32.mrb[5].mxu0  ;;  %v9357_v47 = vpop.f32.mrb[5].mxu1 }
 0x4b4   : > { %v9768_v56 = vmax.f32 %v9738_v33, 0.0  ;;  %v9644_v5 = vmax.f32 %v5570_v45, %v9357_v47  ;;  %v12922_v7 = vpop.f32.mrb[6].mxu0  ;;  %v13480_v21 = vpop.f32.mrb[6].mxu1 }
 0x4b5   : > { %v9647_v27 = vmax.f32 %v12922_v7, %v13480_v21  ;;  %v5573_v12 = vpop.f32.mrb[7].mxu0  ;;  %v9360_v41 = vpop.f32.mrb[7].mxu1 }
 0x4b6   : > { %v11773_v51 = vpack.c.bf16 %v9768_v56, %v9767_v53  ;;  %v9702_v63 = vmax.f32 %v9644_v5, %v9646_v39  ;;  %v9645_v60 = vmax.f32 %v5573_v12, %v9360_v41 }
 0x4b8   : > { %11774 = vst [vmem:[%s16554_s20] sm:$0xff] %v11773_v51   ;;  %v9739_v13 = vadd.f32 %v16546_v35, %v9702_v63  ;;  %v9703_v49 = vmax.f32 %v9645_v60, %v9647_v27 }
 0x4ba   : > { %v9740_v2 = vadd.f32 %v16546_v35, %v9703_v49  ;;  %v12925_v1 = vpop.f32.mrb[8].mxu0  ;;  %v13483_v0 = vpop.f32.mrb[8].mxu1  ;;  %v9769_v8 = vmax.f32 %v9739_v13, 0.0 }
 0x4bb   : > { %v9650_v55 = vmax.f32 %v12925_v1, %v13483_v0  ;;  %v5586_v61 = vpop.f32.mrb[9].mxu0  ;;  %v9373_v25 = vpop.f32.mrb[9].mxu1 }
 0x4bc   : > { %v9770_v59 = vmax.f32 %v9740_v2, 0.0  ;;  %v9648_v11 = vmax.f32 %v5586_v61, %v9373_v25  ;;  %v12926_v3 = vpop.f32.mrb[10].mxu0  ;;  %v13484_v16 = vpop.f32.mrb[10].mxu1 }
 0x4bd   : > { %v9651_v18 = vmax.f32 %v12926_v3, %v13484_v16  ;;  %v5589_v14 = vpop.f32.mrb[11].mxu0  ;;  %v9376_v20 = vpop.f32.mrb[11].mxu1 }
 0x4be   : > { %v11778_v22 = vpack.c.bf16 %v9770_v59, %v9769_v8  ;;  %v9704_v24 = vmax.f32 %v9648_v11, %v9650_v55  ;;  %v9649_v26 = vmax.f32 %v5589_v14, %v9376_v20 }
 0x4c0   : > { %11845 = vst [vmem:[%s16554_s20 + $0x8] sm:$0xff] %v11778_v22   ;;  %v9741_v28 = vadd.f32 %v16546_v35, %v9704_v24  ;;  %v9705_v30 = vmax.f32 %v9649_v26, %v9651_v18 }
 0x4c2   : > { %v9742_v32 = vadd.f32 %v16546_v35, %v9705_v30  ;;  %v12929_v34 = vpop.f32.mrb[12].mxu0  ;;  %v13487_v36 = vpop.f32.mrb[12].mxu1  ;;  %v9771_v44 = vmax.f32 %v9741_v28, 0.0 }
 0x4c3   : > { %v9654_v38 = vmax.f32 %v12929_v34, %v13487_v36  ;;  %v5602_v40 = vpop.f32.mrb[13].mxu0  ;;  %v9389_v42 = vpop.f32.mrb[13].mxu1 }
 0x4c4   : > { %v9772_v46 = vmax.f32 %v9742_v32, 0.0  ;;  %v9652_v48 = vmax.f32 %v5602_v40, %v9389_v42  ;;  %v12930_v50 = vpop.f32.mrb[14].mxu0  ;;  %v13488_v52 = vpop.f32.mrb[14].mxu1 }
 0x4c5   : > { %v9655_v43 = vmax.f32 %v12930_v50, %v13488_v52  ;;  %v5605_v6 = vpop.f32.mrb[15].mxu0  ;;  %v9392_v29 = vpop.f32.mrb[15].mxu1 }
 0x4c6   : > { %v11783_v54 = vpack.c.bf16 %v9772_v46, %v9771_v44  ;;  %v9706_v10 = vmax.f32 %v9652_v48, %v9654_v38  ;;  %v9653_v9 = vmax.f32 %v5605_v6, %v9392_v29 }
 0x4c8   : > { %11846 = vst [vmem:[%s16554_s20 + $0x10] sm:$0xff] %v11783_v54   ;;  %v9743_v57 = vadd.f32 %v16546_v35, %v9706_v10  ;;  %v9707_v4 = vmax.f32 %v9653_v9, %v9655_v43 }
 0x4ca   : > { %v9744_v15 = vadd.f32 %v16546_v35, %v9707_v4  ;;  %v12933_v62 = vpop.f32.mrb[16].mxu0  ;;  %v13491_v17 = vpop.f32.mrb[16].mxu1  ;;  %v9773_v33 = vmax.f32 %v9743_v57, 0.0 }
 0x4cb   : > { %v9658_v19 = vmax.f32 %v12933_v62, %v13491_v17  ;;  %v5618_v23 = vpop.f32.mrb[17].mxu0  ;;  %v9405_v31 = vpop.f32.mrb[17].mxu1 }
 0x4cc   : > { %v9774_v37 = vmax.f32 %v9744_v15, 0.0  ;;  %v9656_v58 = vmax.f32 %v5618_v23, %v9405_v31  ;;  %v12934_v39 = vpop.f32.mrb[18].mxu0  ;;  %v13492_v45 = vpop.f32.mrb[18].mxu1 }
 0x4cd   : > { %v9659_v47 = vmax.f32 %v12934_v39, %v13492_v45  ;;  %v5621_v53 = vpop.f32.mrb[19].mxu0  ;;  %v9408_v56 = vpop.f32.mrb[19].mxu1 }
 0x4ce   : > { %v11788_v5 = vpack.c.bf16 %v9774_v37, %v9773_v33  ;;  %v9708_v7 = vmax.f32 %v9656_v58, %v9658_v19  ;;  %v9657_v21 = vmax.f32 %v5621_v53, %v9408_v56 }
 0x4d0   : > { %11847 = vst [vmem:[%s16554_s20 + $0x18] sm:$0xff] %v11788_v5   ;;  %v9745_v27 = vadd.f32 %v16546_v35, %v9708_v7  ;;  %v9709_v12 = vmax.f32 %v9657_v21, %v9659_v47 }
 0x4d2   : > { %v9746_v41 = vadd.f32 %v16546_v35, %v9709_v12  ;;  %v12937_v51 = vpop.f32.mrb[20].mxu0  ;;  %v13495_v63 = vpop.f32.mrb[20].mxu1  ;;  %v9775_v2 = vmax.f32 %v9745_v27, 0.0 }
 0x4d3   : > { %v9662_v60 = vmax.f32 %v12937_v51, %v13495_v63  ;;  %v5634_v13 = vpop.f32.mrb[21].mxu0  ;;  %v9421_v49 = vpop.f32.mrb[21].mxu1 }
 0x4d4   : > { %v9776_v1 = vmax.f32 %v9746_v41, 0.0  ;;  %v9660_v0 = vmax.f32 %v5634_v13, %v9421_v49  ;;  %v12938_v55 = vpop.f32.mrb[22].mxu0  ;;  %v13496_v61 = vpop.f32.mrb[22].mxu1 }
 0x4d5   : > { %v9663_v25 = vmax.f32 %v12938_v55, %v13496_v61  ;;  %v5637_v8 = vpop.f32.mrb[23].mxu0  ;;  %v9424_v59 = vpop.f32.mrb[23].mxu1 }
 0x4d6   : > { %v11793_v11 = vpack.c.bf16 %v9776_v1, %v9775_v2  ;;  %v9710_v3 = vmax.f32 %v9660_v0, %v9662_v60  ;;  %v9661_v16 = vmax.f32 %v5637_v8, %v9424_v59 }
 0x4d8   : > { %11848 = vst [vmem:[%s16554_s20 + $0x20] sm:$0xff] %v11793_v11   ;;  %v9747_v18 = vadd.f32 %v16546_v35, %v9710_v3  ;;  %v9711_v14 = vmax.f32 %v9661_v16, %v9663_v25 }
 0x4da   : > { %v9748_v20 = vadd.f32 %v16546_v35, %v9711_v14  ;;  %v12941_v22 = vpop.f32.mrb[24].mxu0  ;;  %v13499_v24 = vpop.f32.mrb[24].mxu1  ;;  %v9777_v32 = vmax.f32 %v9747_v18, 0.0 }
 0x4db   : > { %v9666_v26 = vmax.f32 %v12941_v22, %v13499_v24  ;;  %v5650_v28 = vpop.f32.mrb[25].mxu0  ;;  %v9437_v30 = vpop.f32.mrb[25].mxu1 }
 0x4dc   : > { %v9778_v34 = vmax.f32 %v9748_v20, 0.0  ;;  %v9664_v36 = vmax.f32 %v5650_v28, %v9437_v30  ;;  %v12942_v38 = vpop.f32.mrb[26].mxu0  ;;  %v13500_v40 = vpop.f32.mrb[26].mxu1 }
 0x4dd   : > { %v9667_v42 = vmax.f32 %v12942_v38, %v13500_v40  ;;  %v5653_v44 = vpop.f32.mrb[27].mxu0  ;;  %v9440_v46 = vpop.f32.mrb[27].mxu1 }
 0x4de   : > { %v11798_v48 = vpack.c.bf16 %v9778_v34, %v9777_v32  ;;  %v9712_v50 = vmax.f32 %v9664_v36, %v9666_v26  ;;  %v9665_v52 = vmax.f32 %v5653_v44, %v9440_v46 }
 0x4e0   : > { %11849 = vst [vmem:[%s16554_s20 + $0x28] sm:$0xff] %v11798_v48   ;;  %v9749_v43 = vadd.f32 %v16546_v35, %v9712_v50  ;;  %v9713_v6 = vmax.f32 %v9665_v52, %v9667_v42 }
 0x4e2   : > { %v9750_v29 = vadd.f32 %v16546_v35, %v9713_v6  ;;  %v12945_v54 = vpop.f32.mrb[28].mxu0  ;;  %v13503_v10 = vpop.f32.mrb[28].mxu1  ;;  %v9779_v15 = vmax.f32 %v9749_v43, 0.0 }
 0x4e3   : > { %v9670_v9 = vmax.f32 %v12945_v54, %v13503_v10  ;;  %v5666_v57 = vpop.f32.mrb[29].mxu0  ;;  %v9453_v4 = vpop.f32.mrb[29].mxu1 }
 0x4e4   : > { %v9780_v62 = vmax.f32 %v9750_v29, 0.0  ;;  %v9668_v17 = vmax.f32 %v5666_v57, %v9453_v4  ;;  %v12946_v19 = vpop.f32.mrb[30].mxu0  ;;  %v13504_v23 = vpop.f32.mrb[30].mxu1 }
 0x4e5   : > { %v9671_v31 = vmax.f32 %v12946_v19, %v13504_v23  ;;  %v5669_v33 = vpop.f32.mrb[31].mxu0  ;;  %v9456_v37 = vpop.f32.mrb[31].mxu1 }
 0x4e6   : > { %v11803_v58 = vpack.c.bf16 %v9780_v62, %v9779_v15  ;;  %v9714_v39 = vmax.f32 %v9668_v17, %v9670_v9  ;;  %v9669_v45 = vmax.f32 %v5669_v33, %v9456_v37 }
 0x4e8   : > { %11850 = vst [vmem:[%s16554_s20 + $0x30] sm:$0xff] %v11803_v58   ;;  %v9751_v47 = vadd.f32 %v16546_v35, %v9714_v39  ;;  %v9715_v53 = vmax.f32 %v9669_v45, %v9671_v31 }
 0x4ea   : > { %v9752_v56 = vadd.f32 %v16546_v35, %v9715_v53  ;;  %v12949_v5 = vpop.f32.mrb[32].mxu0  ;;  %v13507_v7 = vpop.f32.mrb[32].mxu1  ;;  %v9781_v41 = vmax.f32 %v9751_v47, 0.0 }
 0x4eb   : > { %v9674_v21 = vmax.f32 %v12949_v5, %v13507_v7  ;;  %v5682_v27 = vpop.f32.mrb[33].mxu0  ;;  %v9469_v12 = vpop.f32.mrb[33].mxu1 }
 0x4ec   : > { %v9782_v51 = vmax.f32 %v9752_v56, 0.0  ;;  %v9672_v63 = vmax.f32 %v5682_v27, %v9469_v12  ;;  %v12950_v60 = vpop.f32.mrb[34].mxu0  ;;  %v13508_v13 = vpop.f32.mrb[34].mxu1 }
 0x4ed   : > { %v9675_v49 = vmax.f32 %v12950_v60, %v13508_v13  ;;  %v5685_v2 = vpop.f32.mrb[35].mxu0  ;;  %v9472_v1 = vpop.f32.mrb[35].mxu1 }
 0x4ee   : > { %v11808_v0 = vpack.c.bf16 %v9782_v51, %v9781_v41  ;;  %v9716_v55 = vmax.f32 %v9672_v63, %v9674_v21  ;;  %v9673_v61 = vmax.f32 %v5685_v2, %v9472_v1 }
 0x4f0   : > { %11851 = vst [vmem:[%s16554_s20 + $0x38] sm:$0xff] %v11808_v0   ;;  %v9753_v25 = vadd.f32 %v16546_v35, %v9716_v55  ;;  %v9717_v8 = vmax.f32 %v9673_v61, %v9675_v49 }
 0x4f2   : > { %v9754_v59 = vadd.f32 %v16546_v35, %v9717_v8  ;;  %v12953_v11 = vpop.f32.mrb[36].mxu0  ;;  %v13511_v3 = vpop.f32.mrb[36].mxu1  ;;  %v9783_v20 = vmax.f32 %v9753_v25, 0.0 }
 0x4f3   : > { %v9678_v16 = vmax.f32 %v12953_v11, %v13511_v3  ;;  %v5698_v18 = vpop.f32.mrb[37].mxu0  ;;  %v9485_v14 = vpop.f32.mrb[37].mxu1 }
 0x4f4   : > { %v9784_v22 = vmax.f32 %v9754_v59, 0.0  ;;  %v9676_v24 = vmax.f32 %v5698_v18, %v9485_v14  ;;  %v12954_v26 = vpop.f32.mrb[38].mxu0  ;;  %v13512_v28 = vpop.f32.mrb[38].mxu1 }
 0x4f5   : > { %v9679_v30 = vmax.f32 %v12954_v26, %v13512_v28  ;;  %v5701_v32 = vpop.f32.mrb[39].mxu0  ;;  %v9488_v34 = vpop.f32.mrb[39].mxu1 }
 0x4f6   : > { %v11813_v36 = vpack.c.bf16 %v9784_v22, %v9783_v20  ;;  %v9718_v38 = vmax.f32 %v9676_v24, %v9678_v16  ;;  %v9677_v40 = vmax.f32 %v5701_v32, %v9488_v34 }
 0x4f8   : > { %11852 = vst [vmem:[%s16554_s20 + $0x40] sm:$0xff] %v11813_v36   ;;  %v9755_v42 = vadd.f32 %v16546_v35, %v9718_v38  ;;  %v9719_v44 = vmax.f32 %v9677_v40, %v9679_v30 }
 0x4fa   : > { %v9756_v46 = vadd.f32 %v16546_v35, %v9719_v44  ;;  %v12957_v48 = vpop.f32.mrb[40].mxu0  ;;  %v13515_v50 = vpop.f32.mrb[40].mxu1  ;;  %v9785_v29 = vmax.f32 %v9755_v42, 0.0 }
 0x4fb   : > { %v9682_v52 = vmax.f32 %v12957_v48, %v13515_v50  ;;  %v5714_v43 = vpop.f32.mrb[41].mxu0  ;;  %v9501_v6 = vpop.f32.mrb[41].mxu1 }
 0x4fc   : > { %v9786_v54 = vmax.f32 %v9756_v46, 0.0  ;;  %v9680_v10 = vmax.f32 %v5714_v43, %v9501_v6  ;;  %v12958_v9 = vpop.f32.mrb[42].mxu0  ;;  %v13516_v57 = vpop.f32.mrb[42].mxu1 }
 0x4fd   : > { %v9683_v4 = vmax.f32 %v12958_v9, %v13516_v57  ;;  %v5717_v15 = vpop.f32.mrb[43].mxu0  ;;  %v9504_v62 = vpop.f32.mrb[43].mxu1 }
 0x4fe   : > { %v11818_v17 = vpack.c.bf16 %v9786_v54, %v9785_v29  ;;  %v9720_v19 = vmax.f32 %v9680_v10, %v9682_v52  ;;  %v9681_v23 = vmax.f32 %v5717_v15, %v9504_v62 }
 0x500   : > { %11853 = vst [vmem:[%s16554_s20 + $0x48] sm:$0xff] %v11818_v17   ;;  %v9757_v31 = vadd.f32 %v16546_v35, %v9720_v19  ;;  %v9721_v33 = vmax.f32 %v9681_v23, %v9683_v4 }
 0x502   : > { %v9758_v37 = vadd.f32 %v16546_v35, %v9721_v33  ;;  %v12961_v58 = vpop.f32.mrb[44].mxu0  ;;  %v13519_v39 = vpop.f32.mrb[44].mxu1  ;;  %v9787_v56 = vmax.f32 %v9757_v31, 0.0 }
 0x503   : > { %v9686_v45 = vmax.f32 %v12961_v58, %v13519_v39  ;;  %v5730_v47 = vpop.f32.mrb[45].mxu0  ;;  %v9517_v53 = vpop.f32.mrb[45].mxu1 }
 0x504   : > { %v9788_v5 = vmax.f32 %v9758_v37, 0.0  ;;  %v9684_v7 = vmax.f32 %v5730_v47, %v9517_v53  ;;  %v12962_v21 = vpop.f32.mrb[46].mxu0  ;;  %v13520_v27 = vpop.f32.mrb[46].mxu1 }
 0x505   : > { %v9687_v12 = vmax.f32 %v12962_v21, %v13520_v27  ;;  %v5733_v41 = vpop.f32.mrb[47].mxu0  ;;  %v9520_v51 = vpop.f32.mrb[47].mxu1 }
 0x506   : > { %v11823_v63 = vpack.c.bf16 %v9788_v5, %v9787_v56  ;;  %v9722_v60 = vmax.f32 %v9684_v7, %v9686_v45  ;;  %v9685_v13 = vmax.f32 %v5733_v41, %v9520_v51 }
 0x508   : > { %11854 = vst [vmem:[%s16554_s20 + $0x50] sm:$0xff] %v11823_v63   ;;  %v9759_v49 = vadd.f32 %v16546_v35, %v9722_v60  ;;  %v9723_v2 = vmax.f32 %v9685_v13, %v9687_v12 }
 0x50a   : > { %v9760_v1 = vadd.f32 %v16546_v35, %v9723_v2  ;;  %v12965_v0 = vpop.f32.mrb[48].mxu0  ;;  %v13523_v55 = vpop.f32.mrb[48].mxu1  ;;  %v9789_v59 = vmax.f32 %v9759_v49, 0.0 }
 0x50b   : > { %v9690_v61 = vmax.f32 %v12965_v0, %v13523_v55  ;;  %v5746_v25 = vpop.f32.mrb[49].mxu0  ;;  %v9533_v8 = vpop.f32.mrb[49].mxu1 }
 0x50c   : > { %v9790_v11 = vmax.f32 %v9760_v1, 0.0  ;;  %v9688_v3 = vmax.f32 %v5746_v25, %v9533_v8  ;;  %v12966_v16 = vpop.f32.mrb[50].mxu0  ;;  %v13524_v18 = vpop.f32.mrb[50].mxu1 }
 0x50d   : > { %v9691_v14 = vmax.f32 %v12966_v16, %v13524_v18  ;;  %v5749_v20 = vpop.f32.mrb[51].mxu0  ;;  %v9536_v22 = vpop.f32.mrb[51].mxu1 }
 0x50e   : > { %v11828_v24 = vpack.c.bf16 %v9790_v11, %v9789_v59  ;;  %v9724_v26 = vmax.f32 %v9688_v3, %v9690_v61  ;;  %v9689_v28 = vmax.f32 %v5749_v20, %v9536_v22 }
 0x510   : > { %11855 = vst [vmem:[%s16554_s20 + $0x58] sm:$0xff] %v11828_v24   ;;  %v9761_v30 = vadd.f32 %v16546_v35, %v9724_v26  ;;  %v9725_v32 = vmax.f32 %v9689_v28, %v9691_v14 }
 0x512   : > { %v9762_v34 = vadd.f32 %v16546_v35, %v9725_v32  ;;  %v12969_v36 = vpop.f32.mrb[52].mxu0  ;;  %v13527_v38 = vpop.f32.mrb[52].mxu1  ;;  %v9791_v46 = vmax.f32 %v9761_v30, 0.0 }
 0x513   : > { %v9694_v40 = vmax.f32 %v12969_v36, %v13527_v38  ;;  %v5762_v42 = vpop.f32.mrb[53].mxu0  ;;  %v9549_v44 = vpop.f32.mrb[53].mxu1 }
 0x514   : > { %v9792_v48 = vmax.f32 %v9762_v34, 0.0  ;;  %v9692_v50 = vmax.f32 %v5762_v42, %v9549_v44  ;;  %v12970_v52 = vpop.f32.mrb[54].mxu0  ;;  %v13528_v43 = vpop.f32.mrb[54].mxu1 }
 0x515   : > { %v9695_v6 = vmax.f32 %v12970_v52, %v13528_v43  ;;  %v5765_v29 = vpop.f32.mrb[55].mxu0  ;;  %v9552_v54 = vpop.f32.mrb[55].mxu1 }
 0x516   : > { %v11833_v10 = vpack.c.bf16 %v9792_v48, %v9791_v46  ;;  %v9726_v9 = vmax.f32 %v9692_v50, %v9694_v40  ;;  %v9693_v57 = vmax.f32 %v5765_v29, %v9552_v54 }
 0x518   : > { %11856 = vst [vmem:[%s16554_s20 + $0x60] sm:$0xff] %v11833_v10   ;;  %v9763_v4 = vadd.f32 %v16546_v35, %v9726_v9  ;;  %v9727_v15 = vmax.f32 %v9693_v57, %v9695_v6 }
 0x51a   : > { %v9764_v62 = vadd.f32 %v16546_v35, %v9727_v15  ;;  %v12973_v17 = vpop.f32.mrb[56].mxu0  ;;  %v13531_v19 = vpop.f32.mrb[56].mxu1  ;;  %v9793_v37 = vmax.f32 %v9763_v4, 0.0 }
 0x51b   : > { %v9698_v23 = vmax.f32 %v12973_v17, %v13531_v19  ;;  %v5778_v31 = vpop.f32.mrb[57].mxu0  ;;  %v9565_v33 = vpop.f32.mrb[57].mxu1 }
 0x51c   : > { %v9794_v58 = vmax.f32 %v9764_v62, 0.0  ;;  %v9696_v39 = vmax.f32 %v5778_v31, %v9565_v33  ;;  %v12974_v45 = vpop.f32.mrb[58].mxu0  ;;  %v13532_v47 = vpop.f32.mrb[58].mxu1 }
 0x51d   : > { %v9699_v53 = vmax.f32 %v12974_v45, %v13532_v47  ;;  %v5781_v56 = vpop.f32.mrb[59].mxu0  ;;  %v9568_v5 = vpop.f32.mrb[59].mxu1 }
 0x51e   : > { %v11838_v7 = vpack.c.bf16 %v9794_v58, %v9793_v37  ;;  %v9728_v21 = vmax.f32 %v9696_v39, %v9698_v23  ;;  %v9697_v27 = vmax.f32 %v5781_v56, %v9568_v5 }
 0x520   : > { %11857 = vst [vmem:[%s16554_s20 + $0x68] sm:$0xff] %v11838_v7   ;;  %v9765_v12 = vadd.f32 %v16546_v35, %v9728_v21  ;;  %v9729_v41 = vmax.f32 %v9697_v27, %v9699_v53 }
 0x522   : > { %v9766_v51 = vadd.f32 %v16546_v35, %v9729_v41  ;;  %v9795_v63 = vmax.f32 %v9765_v12, 0.0 }
 0x524   : > { %v9796_v60 = vmax.f32 %v9766_v51, 0.0 }
 0x526   : > { %v11843_v13 = vpack.c.bf16 %v9796_v60, %v9795_v63 }
 0x528   : > { %11858 = vst [vmem:[%s16554_s20 + $0x70] sm:$0xff] %v11843_v13  }
 0x529 PF: > { %s13_s14 = sadd.s32 1, %s14955_s14   ;;  %s16714_s12 = smov %s14951_s13 }
 0x52a   : > { %p10_p5 = scmp.ge.s32.totalorder %s13_s14, 17   ;;  %s16715_s13 = smov %s16717_s15 }
 0x52c   :  { %12 = sbr.rel (!%p10_p5) target bundleno = 2 (0x2), region = 82 }

// kernel: cnncifar_forward.7
= control target key start
LH: loop header
LB: loop body
LE: loop exit
PB: predicated region body
PF: predicated region fallthrough
CT: control target
= control target key end

     0   :  { %v2809_v0 = vmov 0.0   ;;  %vm2810_vm0 = vmmov 0   ;;  %s3480_s1 = inlined_call_operand.vmem [shape: bf16[4,4,128,128], index: 1, kind: input, shape index: {}]   ;;  %s3481_s0 = inlined_call_operand.vmem [shape: f32[4,4,16,128], index: 0, kind: input, shape index: {}]   ;;  %s3482_s2 = inlined_call_operand.vmem [shape: f32[1,128], index: 2, kind: input, shape index: {}]   ;;  %s3483_s3 = inlined_call_operand.vmem [shape: f32[16,128], index: 3, kind: output, shape index: {}]  }
   0x1   :  { %2359 = vmatprep.subr.bf16.mxu0 %v2809_v0  ;;  %2379 = vmatprep.subr.bf16.mxu1 %v2809_v0  ;;  %v2681_v1 = vld [vmem:[%s3480_s1 + $0x40] sm:$0xff]   ;;  %v2683_v3 = vld [vmem:[%s3480_s1 + $0x48] sm:$0xff]   ;;  %v2685_v5 = vld [vmem:[%s3480_s1 + $0x50] sm:$0xff]  }
   0x2   :  { %v2682_v2 = vld [vmem:[%s3480_s1] sm:$0xff]   ;;  %2375 = vmatprep.mubr.msk.bf16.mxu0 %vm2810_vm0, %v2809_v0  ;;  %2395 = vmatprep.mubr.msk.bf16.mxu1 %vm2810_vm0, %v2809_v0  ;;  %v2684_v4 = vld [vmem:[%s3480_s1 + $0x8] sm:$0xff]   ;;  %v2686_v6 = vld [vmem:[%s3480_s1 + $0x10] sm:$0xff]  }
   0x3   :  { %2360 = vmatpush3.bf16.msra.mxu0 %v2681_v1  ;;  %2380 = vmatpush3.bf16.msra.mxu1 %v2682_v2  ;;  %v2687_v7 = vld [vmem:[%s3480_s1 + $0x58] sm:$0xff]   ;;  %v2689_v9 = vld [vmem:[%s3480_s1 + $0x60] sm:$0xff]   ;;  %v2691_v11 = vld [vmem:[%s3480_s1 + $0x68] sm:$0xff]  }
   0x4   :  { %2361 = vmatprep.subr.bf16.mxu0 %v2809_v0  ;;  %2381 = vmatprep.subr.bf16.mxu1 %v2809_v0  ;;  %v2688_v8 = vld [vmem:[%s3480_s1 + $0x18] sm:$0xff]   ;;  %v2690_v10 = vld [vmem:[%s3480_s1 + $0x20] sm:$0xff]   ;;  %v2692_v12 = vld [vmem:[%s3480_s1 + $0x28] sm:$0xff]  }
   0x5   :  { %v2693_v13 = vld [vmem:[%s3480_s1 + $0x70] sm:$0xff]   ;;  %v2695_v15 = vld [vmem:[%s3480_s1 + $0x78] sm:$0xff]   ;;  %v15_v19 = vld [vmem:[%s3481_s0] sm:$0xff] }
   0x6   :  { %v2694_v14 = vld [vmem:[%s3480_s1 + $0x30] sm:$0xff]   ;;  %v2696_v17 = vld [vmem:[%s3480_s1 + $0x38] sm:$0xff]   ;;  %v16_v20 = vld [vmem:[%s3481_s0 + $0x8] sm:$0xff] }
   0x7   :  { %2362 = vmatpush3.bf16.msra.mxu0 %v2683_v3  ;;  %2382 = vmatpush3.bf16.msra.mxu1 %v2684_v4  ;;  %v1816_v16 = vld [vmem:[%s3481_s0 + $0x10] sm:$0xff]  ;;  %v1817_v18 = vld [vmem:[%s3481_s0 + $0x18] sm:$0xff]  ;;  %v17_v22 = vpack.c.bf16 %v16_v20, %v15_v19  ;;  %v2697_v23 = vld [vmem:[%s3480_s1 + $0x80] sm:$0xff]  }
   0x8   :  { %2363 = vmatprep.subr.bf16.mxu0 %v2809_v0  ;;  %2383 = vmatprep.subr.bf16.mxu1 %v2809_v0  ;;  %v37_v21 = vpack.c.bf16 %v1817_v18, %v1816_v16  ;;  %v2698_v24 = vld [vmem:[%s3480_s1 + $0xc0] sm:$0xff]   ;;  %v2699_v25 = vld [vmem:[%s3480_s1 + $0x88] sm:$0xff]   ;;  %v2701_v27 = vld [vmem:[%s3480_s1 + $0x90] sm:$0xff]  }
   0x9   :  { %v2700_v26 = vld [vmem:[%s3480_s1 + $0xc8] sm:$0xff]   ;;  %v2702_v28 = vld [vmem:[%s3480_s1 + $0xd0] sm:$0xff]   ;;  %v2703_v29 = vld [vmem:[%s3480_s1 + $0x98] sm:$0xff]  }
   0xa   :  { %v2704_v30 = vld [vmem:[%s3480_s1 + $0xd8] sm:$0xff]   ;;  %v2705_v31 = vld [vmem:[%s3480_s1 + $0xa0] sm:$0xff]   ;;  %v2707_v33 = vld [vmem:[%s3480_s1 + $0xa8] sm:$0xff]  }
   0xb   :  { %2364 = vmatpush3.bf16.msra.mxu0 %v2685_v5  ;;  %2384 = vmatpush3.bf16.msra.mxu1 %v2686_v6  ;;  %v2706_v32 = vld [vmem:[%s3480_s1 + $0xe0] sm:$0xff]   ;;  %v2708_v34 = vld [vmem:[%s3480_s1 + $0xe8] sm:$0xff]   ;;  %v2709_v35 = vld [vmem:[%s3480_s1 + $0xb0] sm:$0xff]  }
   0xc   :  { %2365 = vmatprep.subr.bf16.mxu0 %v2809_v0  ;;  %2385 = vmatprep.subr.bf16.mxu1 %v2809_v0  ;;  %v2710_v36 = vld [vmem:[%s3480_s1 + $0xf0] sm:$0xff]   ;;  %v2711_v37 = vld [vmem:[%s3480_s1 + $0xb8] sm:$0xff]   ;;  %v1850_v38 = vld [vmem:[%s3481_s0 + $0x20] sm:$0xff] }
   0xd   :  { %v2712_v39 = vld [vmem:[%s3480_s1 + $0xf8] sm:$0xff]   ;;  %v1851_v40 = vld [vmem:[%s3481_s0 + $0x28] sm:$0xff]  ;;  %v1876_v41 = vld [vmem:[%s3481_s0 + $0x30] sm:$0xff] }
   0xe   :  { %v1877_v42 = vld [vmem:[%s3481_s0 + $0x38] sm:$0xff]  ;;  %v236_v43 = vpack.c.bf16 %v1851_v40, %v1850_v38  ;;  %v2713_v45 = vld [vmem:[%s3480_s1 + $0x100] sm:$0xff]   ;;  %v2715_v47 = vld [vmem:[%s3480_s1 + $0x108] sm:$0xff]  }
   0xf   :  { %2366 = vmatpush3.bf16.msra.mxu0 %v2687_v7  ;;  %2386 = vmatpush3.bf16.msra.mxu1 %v2688_v8  ;;  %v348_v44 = vpack.c.bf16 %v1877_v42, %v1876_v41  ;;  %v2714_v46 = vld [vmem:[%s3480_s1 + $0x140] sm:$0xff]   ;;  %v2716_v48 = vld [vmem:[%s3480_s1 + $0x148] sm:$0xff]   ;;  %v2717_v49 = vld [vmem:[%s3480_s1 + $0x110] sm:$0xff]  }
  0x10   :  { %2367 = vmatprep.subr.bf16.mxu0 %v2809_v0  ;;  %2387 = vmatprep.subr.bf16.mxu1 %v2809_v0  ;;  %v2718_v50 = vld [vmem:[%s3480_s1 + $0x150] sm:$0xff]   ;;  %v2719_v51 = vld [vmem:[%s3480_s1 + $0x118] sm:$0xff]   ;;  %v2721_v53 = vld [vmem:[%s3480_s1 + $0x120] sm:$0xff]  }
  0x11   :  { %v2720_v52 = vld [vmem:[%s3480_s1 + $0x158] sm:$0xff]   ;;  %v2722_v54 = vld [vmem:[%s3480_s1 + $0x160] sm:$0xff]   ;;  %v2723_v55 = vld [vmem:[%s3480_s1 + $0x128] sm:$0xff]  }
  0x12   :  { %v2724_v56 = vld [vmem:[%s3480_s1 + $0x168] sm:$0xff]   ;;  %v2725_v57 = vld [vmem:[%s3480_s1 + $0x130] sm:$0xff]   ;;  %v2727_v59 = vld [vmem:[%s3480_s1 + $0x138] sm:$0xff]  }
  0x13   :  { %2368 = vmatpush3.bf16.msra.mxu0 %v2689_v9  ;;  %2388 = vmatpush3.bf16.msra.mxu1 %v2690_v10  ;;  %v2726_v58 = vld [vmem:[%s3480_s1 + $0x170] sm:$0xff]   ;;  %v1902_v60 = vld [vmem:[%s3481_s0 + $0x40] sm:$0xff]  ;;  %v2728_v61 = vld [vmem:[%s3480_s1 + $0x178] sm:$0xff]  }
  0x14   :  { %2369 = vmatprep.subr.bf16.mxu0 %v2809_v0  ;;  %2389 = vmatprep.subr.bf16.mxu1 %v2809_v0  ;;  %v1903_v62 = vld [vmem:[%s3481_s0 + $0x48] sm:$0xff]  ;;  %v1928_v63 = vld [vmem:[%s3481_s0 + $0x50] sm:$0xff]  ;;  %v1929_v1 = vld [vmem:[%s3481_s0 + $0x58] sm:$0xff] }
  0x15   :  { %v460_v2 = vpack.c.bf16 %v1903_v62, %v1902_v60  ;;  %v572_v3 = vpack.c.bf16 %v1929_v1, %v1928_v63  ;;  %v2729_v4 = vld [vmem:[%s3480_s1 + $0x180] sm:$0xff]   ;;  %v2731_v6 = vld [vmem:[%s3480_s1 + $0x188] sm:$0xff]   ;;  %v2733_v8 = vld [vmem:[%s3480_s1 + $0x190] sm:$0xff]  }
  0x16   :  { %v2730_v5 = vld [vmem:[%s3480_s1 + $0x1c0] sm:$0xff]   ;;  %v2732_v7 = vld [vmem:[%s3480_s1 + $0x1c8] sm:$0xff]   ;;  %v2734_v9 = vld [vmem:[%s3480_s1 + $0x1d0] sm:$0xff]  }
  0x17   :  { %2370 = vmatpush3.bf16.msra.mxu0 %v2691_v11  ;;  %2390 = vmatpush3.bf16.msra.mxu1 %v2692_v12  ;;  %v2735_v10 = vld [vmem:[%s3480_s1 + $0x198] sm:$0xff]   ;;  %v2737_v12 = vld [vmem:[%s3480_s1 + $0x1a0] sm:$0xff]   ;;  %v2741_v16 = vld [vmem:[%s3480_s1 + $0x1b0] sm:$0xff]  }
  0x18   :  { %2371 = vmatprep.subr.bf16.mxu0 %v2809_v0  ;;  %2391 = vmatprep.subr.bf16.mxu1 %v2809_v0  ;;  %v2736_v11 = vld [vmem:[%s3480_s1 + $0x1d8] sm:$0xff]   ;;  %v1954_v19 = vld [vmem:[%s3481_s0 + $0x60] sm:$0xff]  ;;  %v2757_v38 = vld [vmem:[%s3480_s1 + $0x230] sm:$0xff]  }
  0x19   :  { %v2743_v18 = vld [vmem:[%s3480_s1 + $0x1b8] sm:$0xff]   ;;  %v2006_v41 = vld [vmem:[%s3481_s0 + $0x80] sm:$0xff]  ;;  %v2007_v42 = vld [vmem:[%s3481_s0 + $0x88] sm:$0xff] }
  0x1a   :  { %v2744_v20 = vld [vmem:[%s3480_s1 + $0x1f8] sm:$0xff]   ;;  %v2773_v60 = vld [vmem:[%s3480_s1 + $0x2b0] sm:$0xff]   ;;  %v2058_v63 = vld [vmem:[%s3481_s0 + $0xa0] sm:$0xff] }
  0x1b   :  { %2372 = vmatpush3.bf16.msra.mxu0 %v2693_v13  ;;  %2392 = vmatpush3.bf16.msra.mxu1 %v2694_v14  ;;  %v2738_v13 = vld [vmem:[%s3480_s1 + $0x1e0] sm:$0xff]   ;;  %v2739_v14 = vld [vmem:[%s3480_s1 + $0x1a8] sm:$0xff]   ;;  %v2759_v40 = vld [vmem:[%s3480_s1 + $0x238] sm:$0xff]  }
  0x1c   :  { %2373 = vmatprep.subr.bf16.mxu0 %v2809_v0  ;;  %2393 = vmatprep.subr.bf16.mxu1 %v2809_v0  ;;  %v2775_v62 = vld [vmem:[%s3480_s1 + $0x2b8] sm:$0xff]   ;;  %v2059_v1 = vld [vmem:[%s3481_s0 + $0xa8] sm:$0xff] }
  0x1f   :  { %2374 = vmatpush3.bf16.msra.mxu0 %v2695_v15  ;;  %2394 = vmatpush3.bf16.msra.mxu1 %v2696_v17  ;;  %v2740_v15 = vld [vmem:[%s3480_s1 + $0x1e8] sm:$0xff]   ;;  %v2742_v17 = vld [vmem:[%s3480_s1 + $0x1f0] sm:$0xff]  }
  0x20   :  { %2399 = vmatprep.subr.bf16.mxu0 %v2809_v0  ;;  %2419 = vmatprep.subr.bf16.mxu1 %v2809_v0 }
  0x22   :  { %2376 = vmatmul.mubr.bf16.vlgmr.msra.gmra.mrb[0].mxu0 %v37_v21  ;;  %2396 = vmatmul.mubr.bf16.vlgmr.msra.gmra.mrb[0].mxu1 %v17_v22  ;;  %v1955_v21 = vld [vmem:[%s3481_s0 + $0x68] sm:$0xff]  ;;  %v1980_v22 = vld [vmem:[%s3481_s0 + $0x70] sm:$0xff] }
  0x23   :  { %2400 = vmatpush3.bf16.msra.mxu0 %v2697_v23  ;;  %2420 = vmatpush3.bf16.msra.mxu1 %v2698_v24  ;;  %v1981_v23 = vld [vmem:[%s3481_s0 + $0x78] sm:$0xff]  ;;  %v684_v24 = vpack.c.bf16 %v1955_v21, %v1954_v19  ;;  %v2789_v19 = vld [vmem:[%s3480_s1 + $0x330] sm:$0xff]  }
  0x24   :  { %2401 = vmatprep.subr.bf16.mxu0 %v2809_v0  ;;  %2421 = vmatprep.subr.bf16.mxu1 %v2809_v0  ;;  %v2791_v21 = vld [vmem:[%s3480_s1 + $0x338] sm:$0xff]  }
  0x25   :  { %2415 = vmatprep.mubr.msk.bf16.mxu0 %vm2810_vm0, %v2809_v0  ;;  %2435 = vmatprep.mubr.msk.bf16.mxu1 %vm2810_vm0, %v2809_v0 }
  0x27   :  { %2402 = vmatpush3.bf16.msra.mxu0 %v2699_v25  ;;  %2422 = vmatpush3.bf16.msra.mxu1 %v2700_v26  ;;  %v796_v25 = vpack.c.bf16 %v1981_v23, %v1980_v22  ;;  %v2745_v26 = vld [vmem:[%s3480_s1 + $0x200] sm:$0xff]   ;;  %v2111_v23 = vld [vmem:[%s3481_s0 + $0xc8] sm:$0xff] }
  0x28   :  { %2403 = vmatprep.subr.bf16.mxu0 %v2809_v0  ;;  %2423 = vmatprep.subr.bf16.mxu1 %v2809_v0  ;;  %v2110_v22 = vld [vmem:[%s3481_s0 + $0xc0] sm:$0xff] }
  0x2b   :  { %2404 = vmatpush3.bf16.msra.mxu0 %v2701_v27  ;;  %2424 = vmatpush3.bf16.msra.mxu1 %v2702_v28  ;;  %v2746_v27 = vld [vmem:[%s3480_s1 + $0x240] sm:$0xff]   ;;  %v2747_v28 = vld [vmem:[%s3480_s1 + $0x208] sm:$0xff]  }
  0x2c   :  { %2405 = vmatprep.subr.bf16.mxu0 %v2809_v0  ;;  %2425 = vmatprep.subr.bf16.mxu1 %v2809_v0 }
  0x2f   :  { %2406 = vmatpush3.bf16.msra.mxu0 %v2703_v29  ;;  %2426 = vmatpush3.bf16.msra.mxu1 %v2704_v30  ;;  %v2748_v29 = vld [vmem:[%s3480_s1 + $0x248] sm:$0xff]   ;;  %v2749_v30 = vld [vmem:[%s3480_s1 + $0x210] sm:$0xff]  }
  0x30   :  { %2407 = vmatprep.subr.bf16.mxu0 %v2809_v0  ;;  %2427 = vmatprep.subr.bf16.mxu1 %v2809_v0 }
  0x33   :  { %2408 = vmatpush3.bf16.msra.mxu0 %v2705_v31  ;;  %2428 = vmatpush3.bf16.msra.mxu1 %v2706_v32  ;;  %v2750_v31 = vld [vmem:[%s3480_s1 + $0x250] sm:$0xff]   ;;  %v2751_v32 = vld [vmem:[%s3480_s1 + $0x218] sm:$0xff]  }
  0x34   :  { %2409 = vmatprep.subr.bf16.mxu0 %v2809_v0  ;;  %2429 = vmatprep.subr.bf16.mxu1 %v2809_v0 }
  0x37   :  { %2410 = vmatpush3.bf16.msra.mxu0 %v2707_v33  ;;  %2430 = vmatpush3.bf16.msra.mxu1 %v2708_v34  ;;  %v2752_v33 = vld [vmem:[%s3480_s1 + $0x258] sm:$0xff]   ;;  %v2753_v34 = vld [vmem:[%s3480_s1 + $0x220] sm:$0xff]  }
  0x38   :  { %2411 = vmatprep.subr.bf16.mxu0 %v2809_v0  ;;  %2431 = vmatprep.subr.bf16.mxu1 %v2809_v0 }
  0x3b   :  { %2412 = vmatpush3.bf16.msra.mxu0 %v2709_v35  ;;  %2432 = vmatpush3.bf16.msra.mxu1 %v2710_v36  ;;  %v2754_v35 = vld [vmem:[%s3480_s1 + $0x260] sm:$0xff]   ;;  %v2755_v36 = vld [vmem:[%s3480_s1 + $0x228] sm:$0xff]  }
  0x3c   :  { %2413 = vmatprep.subr.bf16.mxu0 %v2809_v0  ;;  %2433 = vmatprep.subr.bf16.mxu1 %v2809_v0 }
  0x3f   :  { %2414 = vmatpush3.bf16.msra.mxu0 %v2711_v37  ;;  %2434 = vmatpush3.bf16.msra.mxu1 %v2712_v39  ;;  %v2756_v37 = vld [vmem:[%s3480_s1 + $0x268] sm:$0xff]   ;;  %v2758_v39 = vld [vmem:[%s3480_s1 + $0x270] sm:$0xff]  }
  0x40   :  { %2439 = vmatprep.subr.bf16.mxu0 %v2809_v0  ;;  %2459 = vmatprep.subr.bf16.mxu1 %v2809_v0 }
  0x42   :  { %2416 = vmatmul.mubr.bf16.vlgmr.msra.gmra.mrb[4].mxu0 %v236_v43  ;;  %2436 = vmatmul.mubr.bf16.vlgmr.msra.gmra.mrb[4].mxu1 %v348_v44  ;;  %v2760_v43 = vld [vmem:[%s3480_s1 + $0x278] sm:$0xff]   ;;  %v2032_v44 = vld [vmem:[%s3481_s0 + $0x90] sm:$0xff] }
  0x43   :  { %2440 = vmatpush3.bf16.msra.mxu0 %v2713_v45  ;;  %2460 = vmatpush3.bf16.msra.mxu1 %v2714_v46  ;;  %v2033_v45 = vld [vmem:[%s3481_s0 + $0x98] sm:$0xff]  ;;  %v908_v46 = vpack.c.bf16 %v2007_v42, %v2006_v41 }
  0x44   :  { %2441 = vmatprep.subr.bf16.mxu0 %v2809_v0  ;;  %2461 = vmatprep.subr.bf16.mxu1 %v2809_v0 }
  0x45   :  { %2455 = vmatprep.mubr.msk.bf16.mxu0 %vm2810_vm0, %v2809_v0  ;;  %2475 = vmatprep.mubr.msk.bf16.mxu1 %vm2810_vm0, %v2809_v0 }
  0x47   :  { %2442 = vmatpush3.bf16.msra.mxu0 %v2715_v47  ;;  %2462 = vmatpush3.bf16.msra.mxu1 %v2716_v48  ;;  %v1020_v47 = vpack.c.bf16 %v2033_v45, %v2032_v44  ;;  %v2761_v48 = vld [vmem:[%s3480_s1 + $0x280] sm:$0xff]  }
  0x48   :  { %2443 = vmatprep.subr.bf16.mxu0 %v2809_v0  ;;  %2463 = vmatprep.subr.bf16.mxu1 %v2809_v0 }
  0x4b   :  { %2444 = vmatpush3.bf16.msra.mxu0 %v2717_v49  ;;  %2464 = vmatpush3.bf16.msra.mxu1 %v2718_v50  ;;  %v2762_v49 = vld [vmem:[%s3480_s1 + $0x2c0] sm:$0xff]   ;;  %v2763_v50 = vld [vmem:[%s3480_s1 + $0x288] sm:$0xff]  }
  0x4c   :  { %2445 = vmatprep.subr.bf16.mxu0 %v2809_v0  ;;  %2465 = vmatprep.subr.bf16.mxu1 %v2809_v0 }
  0x4f   :  { %2446 = vmatpush3.bf16.msra.mxu0 %v2719_v51  ;;  %2466 = vmatpush3.bf16.msra.mxu1 %v2720_v52  ;;  %v2764_v51 = vld [vmem:[%s3480_s1 + $0x2c8] sm:$0xff]   ;;  %v2765_v52 = vld [vmem:[%s3480_s1 + $0x290] sm:$0xff]  }
  0x50   :  { %2447 = vmatprep.subr.bf16.mxu0 %v2809_v0  ;;  %2467 = vmatprep.subr.bf16.mxu1 %v2809_v0 }
  0x53   :  { %2448 = vmatpush3.bf16.msra.mxu0 %v2721_v53  ;;  %2468 = vmatpush3.bf16.msra.mxu1 %v2722_v54  ;;  %v2766_v53 = vld [vmem:[%s3480_s1 + $0x2d0] sm:$0xff]   ;;  %v2767_v54 = vld [vmem:[%s3480_s1 + $0x298] sm:$0xff]  }
  0x54   :  { %2449 = vmatprep.subr.bf16.mxu0 %v2809_v0  ;;  %2469 = vmatprep.subr.bf16.mxu1 %v2809_v0 }
  0x57   :  { %2450 = vmatpush3.bf16.msra.mxu0 %v2723_v55  ;;  %2470 = vmatpush3.bf16.msra.mxu1 %v2724_v56  ;;  %v2768_v55 = vld [vmem:[%s3480_s1 + $0x2d8] sm:$0xff]   ;;  %v2769_v56 = vld [vmem:[%s3480_s1 + $0x2a0] sm:$0xff]  }
  0x58   :  { %2451 = vmatprep.subr.bf16.mxu0 %v2809_v0  ;;  %2471 = vmatprep.subr.bf16.mxu1 %v2809_v0 }
  0x5b   :  { %2452 = vmatpush3.bf16.msra.mxu0 %v2725_v57  ;;  %2472 = vmatpush3.bf16.msra.mxu1 %v2726_v58  ;;  %v2770_v57 = vld [vmem:[%s3480_s1 + $0x2e0] sm:$0xff]   ;;  %v2771_v58 = vld [vmem:[%s3480_s1 + $0x2a8] sm:$0xff]  }
  0x5c   :  { %2453 = vmatprep.subr.bf16.mxu0 %v2809_v0  ;;  %2473 = vmatprep.subr.bf16.mxu1 %v2809_v0 }
  0x5f   :  { %2454 = vmatpush3.bf16.msra.mxu0 %v2727_v59  ;;  %2474 = vmatpush3.bf16.msra.mxu1 %v2728_v61  ;;  %v2772_v59 = vld [vmem:[%s3480_s1 + $0x2e8] sm:$0xff]   ;;  %v2774_v61 = vld [vmem:[%s3480_s1 + $0x2f0] sm:$0xff]  }
  0x60   :  { %2479 = vmatprep.subr.bf16.mxu0 %v2809_v0  ;;  %2499 = vmatprep.subr.bf16.mxu1 %v2809_v0 }
  0x62   :  { %2456 = vmatmul.mubr.bf16.vlgmr.msra.gmra.mrb[8].mxu0 %v460_v2  ;;  %2476 = vmatmul.mubr.bf16.vlgmr.msra.gmra.mrb[8].mxu1 %v572_v3  ;;  %v2776_v2 = vld [vmem:[%s3480_s1 + $0x2f8] sm:$0xff]   ;;  %v2084_v3 = vld [vmem:[%s3481_s0 + $0xb0] sm:$0xff] }
  0x63   :  { %2480 = vmatpush3.bf16.msra.mxu0 %v2729_v4  ;;  %2500 = vmatpush3.bf16.msra.mxu1 %v2730_v5  ;;  %v2085_v4 = vld [vmem:[%s3481_s0 + $0xb8] sm:$0xff]  ;;  %v1132_v5 = vpack.c.bf16 %v2059_v1, %v2058_v63 }
  0x64   :  { %2481 = vmatprep.subr.bf16.mxu0 %v2809_v0  ;;  %2501 = vmatprep.subr.bf16.mxu1 %v2809_v0 }
  0x65   :  { %2495 = vmatprep.mubr.msk.bf16.mxu0 %vm2810_vm0, %v2809_v0  ;;  %2515 = vmatprep.mubr.msk.bf16.mxu1 %vm2810_vm0, %v2809_v0 }
  0x67   :  { %2482 = vmatpush3.bf16.msra.mxu0 %v2731_v6  ;;  %2502 = vmatpush3.bf16.msra.mxu1 %v2732_v7  ;;  %v1244_v6 = vpack.c.bf16 %v2085_v4, %v2084_v3  ;;  %v2777_v7 = vld [vmem:[%s3480_s1 + $0x300] sm:$0xff]  }
  0x68   :  { %2483 = vmatprep.subr.bf16.mxu0 %v2809_v0  ;;  %2503 = vmatprep.subr.bf16.mxu1 %v2809_v0 }
  0x6b   :  { %2484 = vmatpush3.bf16.msra.mxu0 %v2733_v8  ;;  %2504 = vmatpush3.bf16.msra.mxu1 %v2734_v9  ;;  %v2778_v8 = vld [vmem:[%s3480_s1 + $0x340] sm:$0xff]   ;;  %v2779_v9 = vld [vmem:[%s3480_s1 + $0x308] sm:$0xff]  }
  0x6c   :  { %2485 = vmatprep.subr.bf16.mxu0 %v2809_v0  ;;  %2505 = vmatprep.subr.bf16.mxu1 %v2809_v0 }
  0x6f   :  { %2486 = vmatpush3.bf16.msra.mxu0 %v2735_v10  ;;  %2506 = vmatpush3.bf16.msra.mxu1 %v2736_v11  ;;  %v2780_v10 = vld [vmem:[%s3480_s1 + $0x348] sm:$0xff]   ;;  %v2781_v11 = vld [vmem:[%s3480_s1 + $0x310] sm:$0xff]  }
  0x70   :  { %2487 = vmatprep.subr.bf16.mxu0 %v2809_v0  ;;  %2507 = vmatprep.subr.bf16.mxu1 %v2809_v0 }
  0x73   :  { %2488 = vmatpush3.bf16.msra.mxu0 %v2737_v12  ;;  %2508 = vmatpush3.bf16.msra.mxu1 %v2738_v13  ;;  %v2782_v12 = vld [vmem:[%s3480_s1 + $0x350] sm:$0xff]   ;;  %v2783_v13 = vld [vmem:[%s3480_s1 + $0x318] sm:$0xff]  }
  0x74   :  { %2489 = vmatprep.subr.bf16.mxu0 %v2809_v0  ;;  %2509 = vmatprep.subr.bf16.mxu1 %v2809_v0 }
  0x77   :  { %2490 = vmatpush3.bf16.msra.mxu0 %v2739_v14  ;;  %2510 = vmatpush3.bf16.msra.mxu1 %v2740_v15  ;;  %v2784_v14 = vld [vmem:[%s3480_s1 + $0x358] sm:$0xff]   ;;  %v2785_v15 = vld [vmem:[%s3480_s1 + $0x320] sm:$0xff]  }
  0x78   :  { %2491 = vmatprep.subr.bf16.mxu0 %v2809_v0  ;;  %2511 = vmatprep.subr.bf16.mxu1 %v2809_v0 }
  0x7b   :  { %2492 = vmatpush3.bf16.msra.mxu0 %v2741_v16  ;;  %2512 = vmatpush3.bf16.msra.mxu1 %v2742_v17  ;;  %v2786_v16 = vld [vmem:[%s3480_s1 + $0x360] sm:$0xff]   ;;  %v2787_v17 = vld [vmem:[%s3480_s1 + $0x328] sm:$0xff]  }
  0x7c   :  { %2493 = vmatprep.subr.bf16.mxu0 %v2809_v0  ;;  %2513 = vmatprep.subr.bf16.mxu1 %v2809_v0 }
  0x7f   :  { %2494 = vmatpush3.bf16.msra.mxu0 %v2743_v18  ;;  %2514 = vmatpush3.bf16.msra.mxu1 %v2744_v20  ;;  %v2788_v18 = vld [vmem:[%s3480_s1 + $0x368] sm:$0xff]   ;;  %v2790_v20 = vld [vmem:[%s3480_s1 + $0x370] sm:$0xff]  }
  0x80   :  { %2519 = vmatprep.subr.bf16.mxu0 %v2809_v0  ;;  %2539 = vmatprep.subr.bf16.mxu1 %v2809_v0 }
  0x82   :  { %2496 = vmatmul.mubr.bf16.vlgmr.msra.gmra.mrb[12].mxu0 %v684_v24  ;;  %2516 = vmatmul.mubr.bf16.vlgmr.msra.gmra.mrb[12].mxu1 %v796_v25  ;;  %v2792_v24 = vld [vmem:[%s3480_s1 + $0x378] sm:$0xff]   ;;  %v2136_v25 = vld [vmem:[%s3481_s0 + $0xd0] sm:$0xff] }
  0x83   :  { %2520 = vmatpush3.bf16.msra.mxu0 %v2745_v26  ;;  %2540 = vmatpush3.bf16.msra.mxu1 %v2746_v27  ;;  %v2137_v26 = vld [vmem:[%s3481_s0 + $0xd8] sm:$0xff]  ;;  %v1356_v27 = vpack.c.bf16 %v2111_v23, %v2110_v22 }
  0x84   :  { %2521 = vmatprep.subr.bf16.mxu0 %v2809_v0  ;;  %2541 = vmatprep.subr.bf16.mxu1 %v2809_v0 }
  0x85   :  { %2535 = vmatprep.mubr.msk.bf16.mxu0 %vm2810_vm0, %v2809_v0  ;;  %2555 = vmatprep.mubr.msk.bf16.mxu1 %vm2810_vm0, %v2809_v0 }
  0x87   :  { %2522 = vmatpush3.bf16.msra.mxu0 %v2747_v28  ;;  %2542 = vmatpush3.bf16.msra.mxu1 %v2748_v29  ;;  %v1468_v28 = vpack.c.bf16 %v2137_v26, %v2136_v25  ;;  %v2793_v29 = vld [vmem:[%s3480_s1 + $0x380] sm:$0xff]  }
  0x88   :  { %2523 = vmatprep.subr.bf16.mxu0 %v2809_v0  ;;  %2543 = vmatprep.subr.bf16.mxu1 %v2809_v0 }
  0x8b   :  { %2524 = vmatpush3.bf16.msra.mxu0 %v2749_v30  ;;  %2544 = vmatpush3.bf16.msra.mxu1 %v2750_v31  ;;  %v2794_v30 = vld [vmem:[%s3480_s1 + $0x3c0] sm:$0xff]   ;;  %v2795_v31 = vld [vmem:[%s3480_s1 + $0x388] sm:$0xff]  }
  0x8c   :  { %2525 = vmatprep.subr.bf16.mxu0 %v2809_v0  ;;  %2545 = vmatprep.subr.bf16.mxu1 %v2809_v0 }
  0x8f   :  { %2526 = vmatpush3.bf16.msra.mxu0 %v2751_v32  ;;  %2546 = vmatpush3.bf16.msra.mxu1 %v2752_v33  ;;  %v2796_v32 = vld [vmem:[%s3480_s1 + $0x3c8] sm:$0xff]   ;;  %v2797_v33 = vld [vmem:[%s3480_s1 + $0x390] sm:$0xff]  }
  0x90   :  { %2527 = vmatprep.subr.bf16.mxu0 %v2809_v0  ;;  %2547 = vmatprep.subr.bf16.mxu1 %v2809_v0 }
  0x93   :  { %2528 = vmatpush3.bf16.msra.mxu0 %v2753_v34  ;;  %2548 = vmatpush3.bf16.msra.mxu1 %v2754_v35  ;;  %v2798_v34 = vld [vmem:[%s3480_s1 + $0x3d0] sm:$0xff]   ;;  %v2799_v35 = vld [vmem:[%s3480_s1 + $0x398] sm:$0xff]  }
  0x94   :  { %2529 = vmatprep.subr.bf16.mxu0 %v2809_v0  ;;  %2549 = vmatprep.subr.bf16.mxu1 %v2809_v0 }
  0x97   :  { %2530 = vmatpush3.bf16.msra.mxu0 %v2755_v36  ;;  %2550 = vmatpush3.bf16.msra.mxu1 %v2756_v37  ;;  %v2800_v36 = vld [vmem:[%s3480_s1 + $0x3d8] sm:$0xff]   ;;  %v2801_v37 = vld [vmem:[%s3480_s1 + $0x3a0] sm:$0xff]  }
  0x98   :  { %2531 = vmatprep.subr.bf16.mxu0 %v2809_v0  ;;  %2551 = vmatprep.subr.bf16.mxu1 %v2809_v0 }
  0x9b   :  { %2532 = vmatpush3.bf16.msra.mxu0 %v2757_v38  ;;  %2552 = vmatpush3.bf16.msra.mxu1 %v2758_v39  ;;  %v2802_v38 = vld [vmem:[%s3480_s1 + $0x3e0] sm:$0xff]   ;;  %v2803_v39 = vld [vmem:[%s3480_s1 + $0x3a8] sm:$0xff]  }
  0x9c   :  { %2533 = vmatprep.subr.bf16.mxu0 %v2809_v0  ;;  %2553 = vmatprep.subr.bf16.mxu1 %v2809_v0 }
  0x9f   :  { %2534 = vmatpush3.bf16.msra.mxu0 %v2759_v40  ;;  %2554 = vmatpush3.bf16.msra.mxu1 %v2760_v43  ;;  %v2804_v40 = vld [vmem:[%s3480_s1 + $0x3e8] sm:$0xff]  }
  0xa0   :  { %2559 = vmatprep.subr.bf16.mxu0 %v2809_v0  ;;  %2579 = vmatprep.subr.bf16.mxu1 %v2809_v0 }
  0xa2   :  { %2536 = vmatmul.mubr.bf16.vlgmr.msra.gmra.mrb[16].mxu0 %v908_v46  ;;  %2556 = vmatmul.mubr.bf16.vlgmr.msra.gmra.mrb[16].mxu1 %v1020_v47  ;;  %v2805_v47 = vld [vmem:[%s3480_s1 + $0x3b0] sm:$0xff]  }
  0xa3   :  { %2560 = vmatpush3.bf16.msra.mxu0 %v2761_v48  ;;  %2580 = vmatpush3.bf16.msra.mxu1 %v2762_v49 }
  0xa4   :  { %2561 = vmatprep.subr.bf16.mxu0 %v2809_v0  ;;  %2581 = vmatprep.subr.bf16.mxu1 %v2809_v0 }
  0xa5   :  { %2575 = vmatprep.mubr.msk.bf16.mxu0 %vm2810_vm0, %v2809_v0  ;;  %2595 = vmatprep.mubr.msk.bf16.mxu1 %vm2810_vm0, %v2809_v0 }
  0xa7   :  { %2562 = vmatpush3.bf16.msra.mxu0 %v2763_v50  ;;  %2582 = vmatpush3.bf16.msra.mxu1 %v2764_v51  ;;  %v2806_v50 = vld [vmem:[%s3480_s1 + $0x3f0] sm:$0xff]  }
  0xa8   :  { %2563 = vmatprep.subr.bf16.mxu0 %v2809_v0  ;;  %2583 = vmatprep.subr.bf16.mxu1 %v2809_v0 }
  0xab   :  { %2564 = vmatpush3.bf16.msra.mxu0 %v2765_v52  ;;  %2584 = vmatpush3.bf16.msra.mxu1 %v2766_v53  ;;  %v2807_v53 = vld [vmem:[%s3480_s1 + $0x3b8] sm:$0xff]  }
  0xac   :  { %2565 = vmatprep.subr.bf16.mxu0 %v2809_v0  ;;  %2585 = vmatprep.subr.bf16.mxu1 %v2809_v0 }
  0xaf   :  { %2566 = vmatpush3.bf16.msra.mxu0 %v2767_v54  ;;  %2586 = vmatpush3.bf16.msra.mxu1 %v2768_v55  ;;  %v2162_v54 = vld [vmem:[%s3481_s0 + $0xe0] sm:$0xff]  ;;  %v2163_v55 = vld [vmem:[%s3481_s0 + $0xe8] sm:$0xff] }
  0xb0   :  { %2567 = vmatprep.subr.bf16.mxu0 %v2809_v0  ;;  %2587 = vmatprep.subr.bf16.mxu1 %v2809_v0 }
  0xb3   :  { %2568 = vmatpush3.bf16.msra.mxu0 %v2769_v56  ;;  %2588 = vmatpush3.bf16.msra.mxu1 %v2770_v57  ;;  %v2808_v56 = vld [vmem:[%s3480_s1 + $0x3f8] sm:$0xff]   ;;  %v2188_v57 = vld [vmem:[%s3481_s0 + $0xf0] sm:$0xff] }
  0xb4   :  { %2569 = vmatprep.subr.bf16.mxu0 %v2809_v0  ;;  %2589 = vmatprep.subr.bf16.mxu1 %v2809_v0 }
  0xb7   :  { %2570 = vmatpush3.bf16.msra.mxu0 %v2771_v58  ;;  %2590 = vmatpush3.bf16.msra.mxu1 %v2772_v59  ;;  %v2189_v58 = vld [vmem:[%s3481_s0 + $0xf8] sm:$0xff]  ;;  %v1580_v59 = vpack.c.bf16 %v2163_v55, %v2162_v54 }
  0xb8   :  { %2571 = vmatprep.subr.bf16.mxu0 %v2809_v0  ;;  %2591 = vmatprep.subr.bf16.mxu1 %v2809_v0 }
  0xbb   :  { %2572 = vmatpush3.bf16.msra.mxu0 %v2773_v60  ;;  %2592 = vmatpush3.bf16.msra.mxu1 %v2774_v61  ;;  %v1692_v60 = vpack.c.bf16 %v2189_v58, %v2188_v57 }
  0xbc   :  { %2573 = vmatprep.subr.bf16.mxu0 %v2809_v0  ;;  %2593 = vmatprep.subr.bf16.mxu1 %v2809_v0 }
  0xbf   :  { %2574 = vmatpush3.bf16.msra.mxu0 %v2775_v62  ;;  %2594 = vmatpush3.bf16.msra.mxu1 %v2776_v2 }
  0xc0   :  { %2599 = vmatprep.subr.bf16.mxu0 %v2809_v0  ;;  %2619 = vmatprep.subr.bf16.mxu1 %v2809_v0 }
  0xc2   :  { %2576 = vmatmul.mubr.bf16.vlgmr.msra.gmra.mrb[20].mxu0 %v1132_v5  ;;  %2596 = vmatmul.mubr.bf16.vlgmr.msra.gmra.mrb[20].mxu1 %v1244_v6 }
  0xc3   :  { %2600 = vmatpush3.bf16.msra.mxu0 %v2777_v7  ;;  %2620 = vmatpush3.bf16.msra.mxu1 %v2778_v8 }
  0xc4   :  { %2601 = vmatprep.subr.bf16.mxu0 %v2809_v0  ;;  %2621 = vmatprep.subr.bf16.mxu1 %v2809_v0 }
  0xc5   :  { %2615 = vmatprep.mubr.msk.bf16.mxu0 %vm2810_vm0, %v2809_v0  ;;  %2635 = vmatprep.mubr.msk.bf16.mxu1 %vm2810_vm0, %v2809_v0 }
  0xc7   :  { %2602 = vmatpush3.bf16.msra.mxu0 %v2779_v9  ;;  %2622 = vmatpush3.bf16.msra.mxu1 %v2780_v10 }
  0xc8   :  { %2603 = vmatprep.subr.bf16.mxu0 %v2809_v0  ;;  %2623 = vmatprep.subr.bf16.mxu1 %v2809_v0 }
  0xcb   :  { %2604 = vmatpush3.bf16.msra.mxu0 %v2781_v11  ;;  %2624 = vmatpush3.bf16.msra.mxu1 %v2782_v12 }
  0xcc   :  { %2605 = vmatprep.subr.bf16.mxu0 %v2809_v0  ;;  %2625 = vmatprep.subr.bf16.mxu1 %v2809_v0 }
  0xcf   :  { %2606 = vmatpush3.bf16.msra.mxu0 %v2783_v13  ;;  %2626 = vmatpush3.bf16.msra.mxu1 %v2784_v14 }
  0xd0   :  { %2607 = vmatprep.subr.bf16.mxu0 %v2809_v0  ;;  %2627 = vmatprep.subr.bf16.mxu1 %v2809_v0 }
  0xd3   :  { %2608 = vmatpush3.bf16.msra.mxu0 %v2785_v15  ;;  %2628 = vmatpush3.bf16.msra.mxu1 %v2786_v16 }
  0xd4   :  { %2609 = vmatprep.subr.bf16.mxu0 %v2809_v0  ;;  %2629 = vmatprep.subr.bf16.mxu1 %v2809_v0 }
  0xd7   :  { %2610 = vmatpush3.bf16.msra.mxu0 %v2787_v17  ;;  %2630 = vmatpush3.bf16.msra.mxu1 %v2788_v18 }
  0xd8   :  { %2611 = vmatprep.subr.bf16.mxu0 %v2809_v0  ;;  %2631 = vmatprep.subr.bf16.mxu1 %v2809_v0 }
  0xdb   :  { %2612 = vmatpush3.bf16.msra.mxu0 %v2789_v19  ;;  %2632 = vmatpush3.bf16.msra.mxu1 %v2790_v20 }
  0xdc   :  { %2613 = vmatprep.subr.bf16.mxu0 %v2809_v0  ;;  %2633 = vmatprep.subr.bf16.mxu1 %v2809_v0 }
  0xdf   :  { %2614 = vmatpush3.bf16.msra.mxu0 %v2791_v21  ;;  %2634 = vmatpush3.bf16.msra.mxu1 %v2792_v24 }
  0xe0   :  { %2639 = vmatprep.subr.bf16.mxu0 %v2809_v0  ;;  %2659 = vmatprep.subr.bf16.mxu1 %v2809_v0 }
  0xe2   :  { %2616 = vmatmul.mubr.bf16.vlgmr.msra.gmra.mrb[24].mxu0 %v1356_v27  ;;  %2636 = vmatmul.mubr.bf16.vlgmr.msra.gmra.mrb[24].mxu1 %v1468_v28 }
  0xe3   :  { %2640 = vmatpush3.bf16.msra.mxu0 %v2793_v29  ;;  %2660 = vmatpush3.bf16.msra.mxu1 %v2794_v30 }
  0xe4   :  { %2641 = vmatprep.subr.bf16.mxu0 %v2809_v0  ;;  %2661 = vmatprep.subr.bf16.mxu1 %v2809_v0 }
  0xe5   :  { %2655 = vmatprep.mubr.msk.bf16.mxu0 %vm2810_vm0, %v2809_v0  ;;  %2675 = vmatprep.mubr.msk.bf16.mxu1 %vm2810_vm0, %v2809_v0 }
  0xe7   :  { %2642 = vmatpush3.bf16.msra.mxu0 %v2795_v31  ;;  %2662 = vmatpush3.bf16.msra.mxu1 %v2796_v32 }
  0xe8   :  { %2643 = vmatprep.subr.bf16.mxu0 %v2809_v0  ;;  %2663 = vmatprep.subr.bf16.mxu1 %v2809_v0 }
  0xeb   :  { %2644 = vmatpush3.bf16.msra.mxu0 %v2797_v33  ;;  %2664 = vmatpush3.bf16.msra.mxu1 %v2798_v34 }
  0xec   :  { %2645 = vmatprep.subr.bf16.mxu0 %v2809_v0  ;;  %2665 = vmatprep.subr.bf16.mxu1 %v2809_v0 }
  0xef   :  { %2646 = vmatpush3.bf16.msra.mxu0 %v2799_v35  ;;  %2666 = vmatpush3.bf16.msra.mxu1 %v2800_v36 }
  0xf0   :  { %2647 = vmatprep.subr.bf16.mxu0 %v2809_v0  ;;  %2667 = vmatprep.subr.bf16.mxu1 %v2809_v0 }
  0xf3   :  { %2648 = vmatpush3.bf16.msra.mxu0 %v2801_v37  ;;  %2668 = vmatpush3.bf16.msra.mxu1 %v2802_v38 }
  0xf4   :  { %2649 = vmatprep.subr.bf16.mxu0 %v2809_v0  ;;  %2669 = vmatprep.subr.bf16.mxu1 %v2809_v0 }
  0xf5   :  { %v137_v41 = vpop.f32.mrb[0].mxu0  ;;  %v226_v42 = vpop.f32.mrb[0].mxu1 }
  0xf6   :  { %v2377_v43 = vpop.f32.mrb[1].mxu0  ;;  %v227_v44 = vadd.f32 %v226_v42, %v137_v41  ;;  %v2397_v45 = vpop.f32.mrb[1].mxu1 }
  0xf7   :  { %v140_v46 = vpop.f32.mrb[2].mxu0  ;;  %2650 = vmatpush3.bf16.msra.mxu0 %v2803_v39  ;;  %v229_v48 = vpop.f32.mrb[2].mxu1  ;;  %2670 = vmatpush3.bf16.msra.mxu1 %v2804_v40 }
  0xf8   :  { %v2378_v49 = vpop.f32.mrb[3].mxu0  ;;  %2651 = vmatprep.subr.bf16.mxu0 %v2809_v0  ;;  %v230_v51 = vadd.f32 %v229_v48, %v140_v46  ;;  %v2398_v52 = vpop.f32.mrb[3].mxu1  ;;  %2671 = vmatprep.subr.bf16.mxu1 %v2809_v0 }
  0xfb   :  { %2652 = vmatpush3.bf16.msra.mxu0 %v2805_v47  ;;  %2672 = vmatpush3.bf16.msra.mxu1 %v2806_v50 }
  0xfc   :  { %2653 = vmatprep.subr.bf16.mxu0 %v2809_v0  ;;  %2673 = vmatprep.subr.bf16.mxu1 %v2809_v0 }
  0xff   :  { %2654 = vmatpush3.bf16.msra.mxu0 %v2807_v53  ;;  %2674 = vmatpush3.bf16.msra.mxu1 %v2808_v56 }
 0x102   :  { %2656 = vmatmul.mubr.bf16.vlgmr.msra.gmra.mrb[28].mxu0 %v1580_v59  ;;  %2676 = vmatmul.mubr.bf16.vlgmr.msra.gmra.mrb[28].mxu1 %v1692_v60 }
 0x115   :  { %v336_v61 = vpop.f32.mrb[4].mxu0  ;;  %v448_v63 = vpop.f32.mrb[4].mxu1 }
 0x116   :  { %v343_v62 = vadd.f32 %v336_v61, %v227_v44  ;;  %v2417_v1 = vpop.f32.mrb[5].mxu0  ;;  %v2437_v2 = vpop.f32.mrb[5].mxu1 }
 0x117   :  { %v339_v3 = vpop.f32.mrb[6].mxu0  ;;  %v451_v6 = vpop.f32.mrb[6].mxu1 }
 0x118   :  { %v455_v4 = vadd.f32 %v448_v63, %v343_v62  ;;  %v344_v5 = vadd.f32 %v339_v3, %v230_v51  ;;  %v2418_v7 = vpop.f32.mrb[7].mxu0  ;;  %v2438_v8 = vpop.f32.mrb[7].mxu1 }
 0x11a   :  { %v456_v9 = vadd.f32 %v451_v6, %v344_v5 }
 0x135   :  { %v560_v10 = vpop.f32.mrb[8].mxu0  ;;  %v672_v11 = vpop.f32.mrb[8].mxu1 }
 0x136   :  { %v567_v0 = vadd.f32 %v560_v10, %v455_v4  ;;  %v2457_v12 = vpop.f32.mrb[9].mxu0  ;;  %v2477_v13 = vpop.f32.mrb[9].mxu1  ;;  %v2214_v10 = vld [vmem:[%s3482_s2] ss:$0 sm:$0xff] }
 0x137   :  { %v563_v14 = vpop.f32.mrb[10].mxu0  ;;  %v675_v17 = vpop.f32.mrb[10].mxu1 }
 0x138   :  { %v679_v15 = vadd.f32 %v672_v11, %v567_v0  ;;  %v568_v16 = vadd.f32 %v563_v14, %v456_v9  ;;  %v2458_v18 = vpop.f32.mrb[11].mxu0  ;;  %v2478_v19 = vpop.f32.mrb[11].mxu1 }
 0x13a   :  { %v680_v20 = vadd.f32 %v675_v17, %v568_v16 }
 0x155   :  { %v784_v21 = vpop.f32.mrb[12].mxu0  ;;  %v896_v23 = vpop.f32.mrb[12].mxu1 }
 0x156   :  { %v791_v22 = vadd.f32 %v784_v21, %v679_v15  ;;  %v2497_v24 = vpop.f32.mrb[13].mxu0  ;;  %v2517_v25 = vpop.f32.mrb[13].mxu1 }
 0x157   :  { %v787_v26 = vpop.f32.mrb[14].mxu0  ;;  %v899_v29 = vpop.f32.mrb[14].mxu1 }
 0x158   :  { %v903_v27 = vadd.f32 %v896_v23, %v791_v22  ;;  %v792_v28 = vadd.f32 %v787_v26, %v680_v20  ;;  %v2498_v30 = vpop.f32.mrb[15].mxu0  ;;  %v2518_v31 = vpop.f32.mrb[15].mxu1 }
 0x15a   :  { %v904_v32 = vadd.f32 %v899_v29, %v792_v28 }
 0x175   :  { %v1008_v33 = vpop.f32.mrb[16].mxu0  ;;  %v1120_v35 = vpop.f32.mrb[16].mxu1 }
 0x176   :  { %v1015_v34 = vadd.f32 %v1008_v33, %v903_v27  ;;  %v2537_v36 = vpop.f32.mrb[17].mxu0  ;;  %v2557_v37 = vpop.f32.mrb[17].mxu1 }
 0x177   :  { %v1011_v38 = vpop.f32.mrb[18].mxu0  ;;  %v1123_v41 = vpop.f32.mrb[18].mxu1 }
 0x178   :  { %v1127_v39 = vadd.f32 %v1120_v35, %v1015_v34  ;;  %v1016_v40 = vadd.f32 %v1011_v38, %v904_v32  ;;  %v2538_v42 = vpop.f32.mrb[19].mxu0  ;;  %v2558_v43 = vpop.f32.mrb[19].mxu1 }
 0x17a   :  { %v1128_v44 = vadd.f32 %v1123_v41, %v1016_v40 }
 0x195   :  { %v1232_v45 = vpop.f32.mrb[20].mxu0  ;;  %v1344_v47 = vpop.f32.mrb[20].mxu1 }
 0x196   :  { %v1239_v46 = vadd.f32 %v1232_v45, %v1127_v39  ;;  %v2577_v48 = vpop.f32.mrb[21].mxu0  ;;  %v2597_v49 = vpop.f32.mrb[21].mxu1 }
 0x197   :  { %v1235_v50 = vpop.f32.mrb[22].mxu0  ;;  %v1347_v53 = vpop.f32.mrb[22].mxu1 }
 0x198   :  { %v1351_v51 = vadd.f32 %v1344_v47, %v1239_v46  ;;  %v1240_v52 = vadd.f32 %v1235_v50, %v1128_v44  ;;  %v2578_v54 = vpop.f32.mrb[23].mxu0  ;;  %v2598_v55 = vpop.f32.mrb[23].mxu1 }
 0x19a   :  { %v1352_v56 = vadd.f32 %v1347_v53, %v1240_v52 }
 0x1b5   :  { %v1456_v57 = vpop.f32.mrb[24].mxu0  ;;  %v1568_v59 = vpop.f32.mrb[24].mxu1 }
 0x1b6   :  { %v1463_v58 = vadd.f32 %v1456_v57, %v1351_v51  ;;  %v2617_v60 = vpop.f32.mrb[25].mxu0  ;;  %v2637_v61 = vpop.f32.mrb[25].mxu1 }
 0x1b7   :  { %v1459_v62 = vpop.f32.mrb[26].mxu0  ;;  %v1571_v2 = vpop.f32.mrb[26].mxu1 }
 0x1b8   :  { %v1575_v63 = vadd.f32 %v1568_v59, %v1463_v58  ;;  %v1464_v1 = vadd.f32 %v1459_v62, %v1352_v56  ;;  %v2618_v3 = vpop.f32.mrb[27].mxu0  ;;  %v2638_v4 = vpop.f32.mrb[27].mxu1 }
 0x1ba   :  { %v1576_v5 = vadd.f32 %v1571_v2, %v1464_v1 }
 0x1d5   :  { %v1680_v6 = vpop.f32.mrb[28].mxu0  ;;  %v1792_v8 = vpop.f32.mrb[28].mxu1 }
 0x1d6   :  { %v1687_v7 = vadd.f32 %v1680_v6, %v1575_v63  ;;  %v2657_v9 = vpop.f32.mrb[29].mxu0  ;;  %v2677_v0 = vpop.f32.mrb[29].mxu1 }
 0x1d7   :  { %v1683_v11 = vpop.f32.mrb[30].mxu0  ;;  %v1795_v14 = vpop.f32.mrb[30].mxu1 }
 0x1d8   :  { %v1799_v12 = vadd.f32 %v1792_v8, %v1687_v7  ;;  %v1688_v13 = vadd.f32 %v1683_v11, %v1576_v5  ;;  %v2658_v15 = vpop.f32.mrb[31].mxu0  ;;  %v2678_v16 = vpop.f32.mrb[31].mxu1 }
 0x1da   :  { %v1808_v17 = vadd.f32 %v2214_v10, %v1799_v12  ;;  %v1800_v18 = vadd.f32 %v1795_v14, %v1688_v13 }
 0x1dc   :  { %1810 = vst [vmem:[%s3483_s3] sm:$0xff] %v1808_v17  ;;  %v1809_v19 = vadd.f32 %v2214_v10, %v1800_v18 }
 0x1de   :  { %1811 = vst [vmem:[%s3483_s3 + $0x8] sm:$0xff] %v1809_v19 }

</bundles_post_ra>
